<compile_context>
chip_gen: v7x
topology: tpu7x:2x2x1
jax: 0.10.0
libtpu: 0.0.40
codegen_flags: <defaults>
</compile_context>

<pallas_src>
import jax
import jax.numpy as jnp
from jax import lax
from jax.experimental import pallas as pl
from jax.experimental.pallas import tpu as pltpu

# ---- synthetic "hp" hyperparameters -----------------------------------------
D_MODEL_D = 32          # hp.d_model_d  (decoder hidden)
D_MODEL_E = 48          # hp.d_model_e  (encoder hidden)
VOCAB = 40              # hp.vocab_size
N_LAYERS = 2            # hp.n_model_d  (LSTM layers)
DECODER_SWISH = True    # hp.decoder_swish
USE_LM_LOSS = True      # hp.use_lm_loss
LANE = 128              # padded vocab width for lane-dense stores


# ---- fused Pallas kernel ------------------------------------------------------
def _make_fused_kernel(*, B, T, U1, D, L, swish, use_lm):
    def kernel(*refs):
        if use_lm:
            (ids_ref, embed_ref, wih_ref, whh_ref, blstm_ref, henc_ref,
             wenc_ref, wdec_ref, w2_ref, b2_ref, wlm_ref, blm_ref,
             out_ref, lm_ref) = refs
        else:
            (ids_ref, embed_ref, wih_ref, whh_ref, blstm_ref, henc_ref,
             wenc_ref, wdec_ref, w2_ref, b2_ref, out_ref) = refs
            wlm_ref = blm_ref = lm_ref = None

        f32 = jnp.float32
        N = U1 * B
        E = henc_ref.shape[-1]
        VP = w2_ref.shape[1]

        # Small LSTM weights loaded once as values; static per-gate slicing of a
        # value costs nothing inside the recurrence (no ref-indexing relayouts).
        wih = wih_ref[...]          # (L, 4, D, D):  x @ wih[l, g] == x @ W_ih_g.T
        whh = whh_ref[...]          # (L, 4, D, D):  h @ whh[l, g] == h @ W_hh_g.T
        bls = blstm_ref[...]        # (L, 4, 1, D):  b_ih + b_hh per gate

        # ---- embedding: row gather driven by SMEM scalar-prefetch ids ---------
        # ids are time-major (row n = t*B + b); embed row 0 is zero (padding_idx).
        rows = [embed_ref[ids_ref[n]] for n in range(N)]       # each (1, D)
        x_flat = jnp.concatenate(rows, axis=0)                 # (N, D)

        # ---- layer-0 input->gate matmuls hoisted out of the recurrence --------
        # one (N,D)@(D,D) per gate; every gate result is lane-aligned at 0.
        gx0 = [jnp.dot(x_flat, wih[0, g], preferred_element_type=f32) + bls[0, g]
               for g in range(4)]                              # 4 x (N, D)

        def cell(g_in, h_prev, c_prev, whh_l):
            # PyTorch gate order: i, f, g, o
            i_g = jax.nn.sigmoid(g_in[0] + jnp.dot(h_prev, whh_l[0],
                                                   preferred_element_type=f32))
            f_g = jax.nn.sigmoid(g_in[1] + jnp.dot(h_prev, whh_l[1],
                                                   preferred_element_type=f32))
            g_g = jnp.tanh(g_in[2] + jnp.dot(h_prev, whh_l[2],
                                             preferred_element_type=f32))
            o_g = jax.nn.sigmoid(g_in[3] + jnp.dot(h_prev, whh_l[3],
                                                   preferred_element_type=f32))
            c_new = f_g * c_prev + i_g * g_g
            h_new = o_g * jnp.tanh(c_new)
            return h_new, c_new

        # ---- wavefront-pipelined multi-layer LSTM (values only, no scratch) ---
        # At wavefront step s, layer l advances time t = s - l.  Every layer
        # update within a step reads pre-step state, so the L recurrence chains
        # are independent within a step and their MXU/EUP latencies overlap.
        zero = jnp.zeros((B, D), f32)
        h = [zero] * L
        c = [zero] * L
        dec_rows = []                                          # last-layer h, time order
        for s in range(U1 + L - 1):
            upd = []
            for l in range(L):
                t = s - l
                if not (0 <= t < U1):
                    continue
                if l == 0:
                    g_in = [gx0[g][t * B:(t + 1) * B, :] for g in range(4)]
                else:
                    x_in = h[l - 1]          # pre-step value = layer l-1 output @ t
                    g_in = [jnp.dot(x_in, wih[l, g], preferred_element_type=f32)
                            + bls[l, g] for g in range(4)]
                nh, nc = cell(g_in, h[l], c[l], whh[l])
                upd.append((l, nh, nc))
                if l == L - 1:
                    dec_rows.append(nh)
            for l, nh, nc in upd:            # commit after all chains issued
                h[l], c[l] = nh, nc

        dec_bm = jnp.stack(dec_rows, axis=1)                   # (B, U1, D) batch-major
        dec_flat = dec_bm.reshape(B * U1, D)

        # ---- joint network + LM head, batched over B: ONE matmul per weight ---
        fenc = jnp.dot(henc_ref[...].reshape(B * T, E), wenc_ref[...],
                       preferred_element_type=f32)             # (B*T, D)
        gdec = jnp.dot(dec_flat, wdec_ref[...],
                       preferred_element_type=f32)             # (B*U1, D)
        s4 = fenc.reshape(B, T, 1, D) + gdec.reshape(B, 1, U1, D)   # (B,T,U1,D)
        if swish:
            a4 = s4 * jax.nn.sigmoid(s4)                       # F.silu
        else:
            a4 = jnp.maximum(s4, 0.0)                          # relu
        a2 = a4.reshape(B * T * U1, D)                         # single logits slab
        logits = (jnp.dot(a2, w2_ref[...], preferred_element_type=f32)
                  + b2_ref[...])                               # (B*T*U1, VP)
        # lane/sublane-dense store: T*U1 is a multiple of 8 (T == 8)
        out_ref[...] = logits.reshape(B, T * U1, VP)

        if use_lm:
            lm = (jnp.dot(dec_flat, wlm_ref[...], preferred_element_type=f32)
                  + blm_ref[...])                              # (B*U1, VP) single slab
            lm_ref[...] = lm

    return kernel


# ---- pallas_call wrapper ------------------------------------------------------
def run_fused(ids, kp, hbatch, *, swish, use_lm):
    V_emb, _, D = kp["embed"].shape
    B, T, E = hbatch.shape
    N = ids.shape[0]
    U1 = N // B
    L = kp["w_ih"].shape[0]
    VP = kp["w2"].shape[1]

    kernel = _make_fused_kernel(B=B, T=T, U1=U1, D=D, L=L,
                                swish=swish, use_lm=use_lm)

    # full-array resident blocks; index_maps take (grid_idx, ids_smem_ref)
    def full(shape):
        nd = len(shape)
        return pl.BlockSpec(tuple(shape), lambda i, ids_ref, nd=nd: (0,) * nd)

    in_arrays = [kp["embed"], kp["w_ih"], kp["w_hh"], kp["b_lstm"],
                 hbatch, kp["wenc"], kp["wdec"], kp["w2"], kp["b2"]]
    if use_lm:
        in_arrays += [kp["wlm"], kp["blm"]]
    in_specs = [full(a.shape) for a in in_arrays]

    out_shapes = [jax.ShapeDtypeStruct((B, T * U1, VP), jnp.float32)]
    out_specs = [full((B, T * U1, VP))]
    if use_lm:
        out_shapes.append(jax.ShapeDtypeStruct((B * U1, VP), jnp.float32))
        out_specs.append(full((B * U1, VP)))

    grid_spec = pltpu.PrefetchScalarGridSpec(
        num_scalar_prefetch=1,          # ids -> SMEM, not a padded VMEM tile
        grid=(1,),
        in_specs=in_specs,
        out_specs=tuple(out_specs),
    )

    return pl.pallas_call(
        kernel,
        out_shape=tuple(out_shapes),
        grid_spec=grid_spec,
        compiler_params=pltpu.CompilerParams(
            dimension_semantics=("arbitrary",)),
    )(ids, *in_arrays)


# ---- model glue ---------------------------------------------------------------
def transducer_decoder_forward(kparams, targets, hbatch):
    """kparams: kernel-layout params from pack_params()."""
    B, U = targets.shape
    T = hbatch.shape[1]
    U1 = U + 1
    # ids in time-major order (t*B + b); t=0 is the prepended blank (=0) column.
    ids_tm = jnp.concatenate(
        [jnp.zeros((1, B), jnp.int32), targets.astype(jnp.int32).T], axis=0)
    ids = ids_tm.reshape(U1 * B)

    res = run_fused(ids, kparams, hbatch, swish=DECODER_SWISH, use_lm=USE_LM_LOSS)
    out = res[0].reshape(B, T, U1, -1)[..., :VOCAB]      # slice off lane padding
    if USE_LM_LOSS:
        lm = res[1].reshape(B, U1, -1)[..., :VOCAB]
        return out, lm
    return out


# ---- one-time parameter packing (pre-transpose / pad; outside the hot path) ---
def pack_params(params):
    V = params["fc2_w"].shape[0]
    D = D_MODEL_D
    L = params["w_ih"].shape[0]
    VP = ((V + LANE - 1) // LANE) * LANE

    def pad_cols(x):
        return jnp.pad(x, ((0, 0), (0, VP - V)))

    # (L, 4D, D_in) -> (L, 4, D_in, D): per-gate slabs, pre-transposed so that
    # x @ w[l, g] == x @ W_g.T (gate results land lane-aligned at offset 0).
    def per_gate(w):
        Lc, _, d_in = w.shape
        return jnp.transpose(w.reshape(Lc, 4, D, d_in), (0, 1, 3, 2))

    packed = dict(
        embed=params["embed"][:, None, :],                        # (V, 1, D) row table
        w_ih=per_gate(params["w_ih"]),                            # (L, 4, D, D)
        w_hh=per_gate(params["w_hh"]),                            # (L, 4, D, D)
        b_lstm=(params["b_ih"] + params["b_hh"]).reshape(L, 4, 1, D),
        wenc=params["fc1_enc"].T,                                 # (E, D)  no bias
        wdec=params["fc1_dec"].T,                                 # (D, D)  no bias
        w2=pad_cols(params["fc2_w"].T),                           # (D, VP)
        b2=pad_cols(params["fc2_b"][None, :]),                    # (1, VP)
    )
    if USE_LM_LOSS:
        packed["wlm"] = pad_cols(params["fc_lm_w"].T)             # (D, VP)
        packed["blm"] = pad_cols(params["fc_lm_b"][None, :])      # (1, VP)
    return packed


# ---- pure-JAX reference (original PyTorch layout, for correctness check) ------
def reference_forward(params, targets, hbatch):
    B, U = targets.shape
    D = D_MODEL_D
    ids = jnp.concatenate([jnp.zeros((B, 1), jnp.int32), targets], axis=1)
    seq = jnp.take(params["embed"], ids, axis=0)                   # (B, U1, D)
    for l in range(N_LAYERS):
        wih, whh = params["w_ih"][l], params["w_hh"][l]
        bias = params["b_ih"][l] + params["b_hh"][l]

        def step(carry, x_t, wih=wih, whh=whh, bias=bias):
            h, c = carry
            gates = x_t @ wih.T + h @ whh.T + bias
            i_g = jax.nn.sigmoid(gates[:, :D])
            f_g = jax.nn.sigmoid(gates[:, D:2 * D])
            g_g = jnp.tanh(gates[:, 2 * D:3 * D])
            o_g = jax.nn.sigmoid(gates[:, 3 * D:])
            c = f_g * c + i_g * g_g
            h = o_g * jnp.tanh(c)
            return (h, c), h

        init = (jnp.zeros((B, D), jnp.float32), jnp.zeros((B, D), jnp.float32))
        _, ys = lax.scan(step, init, jnp.transpose(seq, (1, 0, 2)))
        seq = jnp.transpose(ys, (1, 0, 2))
    dec_out = seq
    f = hbatch[:, :, None, :] @ params["fc1_enc"].T                # (B,T,1,D)
    g = dec_out[:, None, :, :] @ params["fc1_dec"].T               # (B,1,U1,D)
    s = f + g
    a = s * jax.nn.sigmoid(s) if DECODER_SWISH else jnp.maximum(s, 0.0)
    out = a @ params["fc2_w"].T + params["fc2_b"]
    if USE_LM_LOSS:
        lm = dec_out @ params["fc_lm_w"].T + params["fc_lm_b"]
        return out, lm
    return out


# ---- deterministic parameter init (PyTorch layout) -----------------------------
def init_params(key):
    D, E, V, L = D_MODEL_D, D_MODEL_E, VOCAB, N_LAYERS
    ks = jax.random.split(key, 11)
    rnd = lambda k, shape, s: jax.random.normal(k, shape, jnp.float32) * s
    embed = rnd(ks[0], (V, D), 0.1).at[0].set(0.0)   # padding_idx = blank = 0
    return dict(
        embed=embed,
        w_ih=rnd(ks[1], (L, 4 * D, D), 0.1),
        w_hh=rnd(ks[2], (L, 4 * D, D), 0.1),
        b_ih=rnd(ks[3], (L, 4 * D), 0.05),
        b_hh=rnd(ks[4], (L, 4 * D), 0.05),
        fc1_enc=rnd(ks[5], (D, E), 0.1),      # WeightDropLinear, no bias
        fc1_dec=rnd(ks[6], (D, D), 0.1),      # WeightDropLinear, no bias
        fc2_w=rnd(ks[7], (V, D), 0.1),
        fc2_b=rnd(ks[8], (V,), 0.05),
        fc_lm_w=rnd(ks[9], (V, D), 0.1),
        fc_lm_b=rnd(ks[10], (V,), 0.05),
    )


if __name__ == "__main__":
    B, T, U = 2, 8, 8
    root = jax.random.PRNGKey(0)
    kp_key, kt, kh = jax.random.split(root, 3)
    params = init_params(kp_key)
    kparams = pack_params(params)          # one-time transposes / padding
    targets = jax.random.randint(kt, (B, U), 1, VOCAB, dtype=jnp.int32)
    hbatch = jax.random.normal(kh, (B, T, D_MODEL_E), jnp.float32)

    fwd = jax.jit(transducer_decoder_forward)
    out, lm_out = fwd(kparams, targets, hbatch)
    out = jax.block_until_ready(out)
    lm_out = jax.block_until_ready(lm_out)

    ref_out, ref_lm = reference_forward(params, targets, hbatch)
    assert out.shape == (B, T, U + 1, VOCAB)
    assert lm_out.shape == (B, U + 1, VOCAB)
    # f32 everywhere; tolerance allows for MXU pass-ordering differences only.
    assert jnp.allclose(out, ref_out, atol=2e-3, rtol=2e-3)
    assert jnp.allclose(lm_out, ref_lm, atol=2e-3, rtol=2e-3)
    print("KERNEL_OK")
</pallas_src>

<mosaic_0001>
module attributes {stable_mosaic.version = 11 : i64} {
  func.func @kernel(%arg0: i32, %arg1: memref<18xi32, #tpu.memory_space<smem>>, %arg2: memref<40x1x32xf32, #tpu.memory_space<vmem>>, %arg3: memref<2x4x32x32xf32, #tpu.memory_space<vmem>>, %arg4: memref<2x4x32x32xf32, #tpu.memory_space<vmem>>, %arg5: memref<2x4x1x32xf32, #tpu.memory_space<vmem>>, %arg6: memref<2x8x48xf32, #tpu.memory_space<vmem>>, %arg7: memref<48x32xf32, #tpu.memory_space<vmem>>, %arg8: memref<32x32xf32, #tpu.memory_space<vmem>>, %arg9: memref<32x128xf32, #tpu.memory_space<vmem>>, %arg10: memref<1x128xf32, #tpu.memory_space<vmem>>, %arg11: memref<32x128xf32, #tpu.memory_space<vmem>>, %arg12: memref<1x128xf32, #tpu.memory_space<vmem>>, %arg13: memref<2x72x128xf32, #tpu.memory_space<vmem>>, %arg14: memref<18x128xf32, #tpu.memory_space<vmem>>) attributes {dimension_semantics = [#tpu.dimension_semantics<arbitrary>], iteration_bounds = array<i64: 1>, scalar_prefetch = 1 : i64, scratch_operands = 0 : i64, tpu.core_type = #tpu.core_type<tc>, window_params = [{pipeline_mode = #tpu.pipeline_mode<synchronous>, transform_indices = @transform_0, window_bounds = array<i64: 40, 1, 32>}, {pipeline_mode = #tpu.pipeline_mode<synchronous>, transform_indices = @transform_1, window_bounds = array<i64: 2, 4, 32, 32>}, {pipeline_mode = #tpu.pipeline_mode<synchronous>, transform_indices = @transform_2, window_bounds = array<i64: 2, 4, 32, 32>}, {pipeline_mode = #tpu.pipeline_mode<synchronous>, transform_indices = @transform_3, window_bounds = array<i64: 2, 4, 1, 32>}, {pipeline_mode = #tpu.pipeline_mode<synchronous>, transform_indices = @transform_4, window_bounds = array<i64: 2, 8, 48>}, {pipeline_mode = #tpu.pipeline_mode<synchronous>, transform_indices = @transform_5, window_bounds = array<i64: 48, 32>}, {pipeline_mode = #tpu.pipeline_mode<synchronous>, transform_indices = @transform_6, window_bounds = array<i64: 32, 32>}, {pipeline_mode = #tpu.pipeline_mode<synchronous>, transform_indices = @transform_7, window_bounds = array<i64: 32, 128>}, {pipeline_mode = #tpu.pipeline_mode<synchronous>, transform_indices = @transform_8, window_bounds = array<i64: 1, 128>}, {pipeline_mode = #tpu.pipeline_mode<synchronous>, transform_indices = @transform_9, window_bounds = array<i64: 32, 128>}, {pipeline_mode = #tpu.pipeline_mode<synchronous>, transform_indices = @transform_10, window_bounds = array<i64: 1, 128>}, {pipeline_mode = #tpu.pipeline_mode<synchronous>, transform_indices = @transform_11, window_bounds = array<i64: 2, 72, 128>}, {pipeline_mode = #tpu.pipeline_mode<synchronous>, transform_indices = @transform_12, window_bounds = array<i64: 18, 128>}]} {
    %c0 = arith.constant 0 : index
    %c0_0 = arith.constant 0 : index
    %c0_1 = arith.constant 0 : index
    %c0_2 = arith.constant 0 : index
    %0 = vector.load %arg3[%c0, %c0_0, %c0_1, %c0_2] : memref<2x4x32x32xf32, #tpu.memory_space<vmem>>, vector<2x4x32x32xf32>
    %c0_3 = arith.constant 0 : index
    %c0_4 = arith.constant 0 : index
    %c0_5 = arith.constant 0 : index
    %c0_6 = arith.constant 0 : index
    %1 = vector.load %arg4[%c0_3, %c0_4, %c0_5, %c0_6] : memref<2x4x32x32xf32, #tpu.memory_space<vmem>>, vector<2x4x32x32xf32>
    %c0_7 = arith.constant 0 : index
    %c0_8 = arith.constant 0 : index
    %c0_9 = arith.constant 0 : index
    %c0_10 = arith.constant 0 : index
    %2 = vector.load %arg5[%c0_7, %c0_8, %c0_9, %c0_10] : memref<2x4x1x32xf32, #tpu.memory_space<vmem>>, vector<2x4x1x32xf32>
    %c0_11 = arith.constant 0 : index
    %3 = memref.load %arg1[%c0_11] : memref<18xi32, #tpu.memory_space<smem>>
    %4 = arith.index_cast %3 : i32 to index
    %c0_12 = arith.constant 0 : index
    %c0_13 = arith.constant 0 : index
    %5 = vector.load %arg2[%4, %c0_12, %c0_13] : memref<40x1x32xf32, #tpu.memory_space<vmem>>, vector<1x1x32xf32>
    %6 = vector.shape_cast %5 : vector<1x1x32xf32> to vector<1x32xf32>
    %c1 = arith.constant 1 : index
    %7 = memref.load %arg1[%c1] : memref<18xi32, #tpu.memory_space<smem>>
    %8 = arith.index_cast %7 : i32 to index
    %c0_14 = arith.constant 0 : index
    %c0_15 = arith.constant 0 : index
    %9 = vector.load %arg2[%8, %c0_14, %c0_15] : memref<40x1x32xf32, #tpu.memory_space<vmem>>, vector<1x1x32xf32>
    %10 = vector.shape_cast %9 : vector<1x1x32xf32> to vector<1x32xf32>
    %c2 = arith.constant 2 : index
    %11 = memref.load %arg1[%c2] : memref<18xi32, #tpu.memory_space<smem>>
    %12 = arith.index_cast %11 : i32 to index
    %c0_16 = arith.constant 0 : index
    %c0_17 = arith.constant 0 : index
    %13 = vector.load %arg2[%12, %c0_16, %c0_17] : memref<40x1x32xf32, #tpu.memory_space<vmem>>, vector<1x1x32xf32>
    %14 = vector.shape_cast %13 : vector<1x1x32xf32> to vector<1x32xf32>
    %c3 = arith.constant 3 : index
    %15 = memref.load %arg1[%c3] : memref<18xi32, #tpu.memory_space<smem>>
    %16 = arith.index_cast %15 : i32 to index
    %c0_18 = arith.constant 0 : index
    %c0_19 = arith.constant 0 : index
    %17 = vector.load %arg2[%16, %c0_18, %c0_19] : memref<40x1x32xf32, #tpu.memory_space<vmem>>, vector<1x1x32xf32>
    %18 = vector.shape_cast %17 : vector<1x1x32xf32> to vector<1x32xf32>
    %c4 = arith.constant 4 : index
    %19 = memref.load %arg1[%c4] : memref<18xi32, #tpu.memory_space<smem>>
    %20 = arith.index_cast %19 : i32 to index
    %c0_20 = arith.constant 0 : index
    %c0_21 = arith.constant 0 : index
    %21 = vector.load %arg2[%20, %c0_20, %c0_21] : memref<40x1x32xf32, #tpu.memory_space<vmem>>, vector<1x1x32xf32>
    %22 = vector.shape_cast %21 : vector<1x1x32xf32> to vector<1x32xf32>
    %c5 = arith.constant 5 : index
    %23 = memref.load %arg1[%c5] : memref<18xi32, #tpu.memory_space<smem>>
    %24 = arith.index_cast %23 : i32 to index
    %c0_22 = arith.constant 0 : index
    %c0_23 = arith.constant 0 : index
    %25 = vector.load %arg2[%24, %c0_22, %c0_23] : memref<40x1x32xf32, #tpu.memory_space<vmem>>, vector<1x1x32xf32>
    %26 = vector.shape_cast %25 : vector<1x1x32xf32> to vector<1x32xf32>
    %c6 = arith.constant 6 : index
    %27 = memref.load %arg1[%c6] : memref<18xi32, #tpu.memory_space<smem>>
    %28 = arith.index_cast %27 : i32 to index
    %c0_24 = arith.constant 0 : index
    %c0_25 = arith.constant 0 : index
    %29 = vector.load %arg2[%28, %c0_24, %c0_25] : memref<40x1x32xf32, #tpu.memory_space<vmem>>, vector<1x1x32xf32>
    %30 = vector.shape_cast %29 : vector<1x1x32xf32> to vector<1x32xf32>
    %c7 = arith.constant 7 : index
    %31 = memref.load %arg1[%c7] : memref<18xi32, #tpu.memory_space<smem>>
    %32 = arith.index_cast %31 : i32 to index
    %c0_26 = arith.constant 0 : index
    %c0_27 = arith.constant 0 : index
    %33 = vector.load %arg2[%32, %c0_26, %c0_27] : memref<40x1x32xf32, #tpu.memory_space<vmem>>, vector<1x1x32xf32>
    %34 = vector.shape_cast %33 : vector<1x1x32xf32> to vector<1x32xf32>
    %c8 = arith.constant 8 : index
    %35 = memref.load %arg1[%c8] : memref<18xi32, #tpu.memory_space<smem>>
    %36 = arith.index_cast %35 : i32 to index
    %c0_28 = arith.constant 0 : index
    %c0_29 = arith.constant 0 : index
    %37 = vector.load %arg2[%36, %c0_28, %c0_29] : memref<40x1x32xf32, #tpu.memory_space<vmem>>, vector<1x1x32xf32>
    %38 = vector.shape_cast %37 : vector<1x1x32xf32> to vector<1x32xf32>
    %c9 = arith.constant 9 : index
    %39 = memref.load %arg1[%c9] : memref<18xi32, #tpu.memory_space<smem>>
    %40 = arith.index_cast %39 : i32 to index
    %c0_30 = arith.constant 0 : index
    %c0_31 = arith.constant 0 : index
    %41 = vector.load %arg2[%40, %c0_30, %c0_31] : memref<40x1x32xf32, #tpu.memory_space<vmem>>, vector<1x1x32xf32>
    %42 = vector.shape_cast %41 : vector<1x1x32xf32> to vector<1x32xf32>
    %c10 = arith.constant 10 : index
    %43 = memref.load %arg1[%c10] : memref<18xi32, #tpu.memory_space<smem>>
    %44 = arith.index_cast %43 : i32 to index
    %c0_32 = arith.constant 0 : index
    %c0_33 = arith.constant 0 : index
    %45 = vector.load %arg2[%44, %c0_32, %c0_33] : memref<40x1x32xf32, #tpu.memory_space<vmem>>, vector<1x1x32xf32>
    %46 = vector.shape_cast %45 : vector<1x1x32xf32> to vector<1x32xf32>
    %c11 = arith.constant 11 : index
    %47 = memref.load %arg1[%c11] : memref<18xi32, #tpu.memory_space<smem>>
    %48 = arith.index_cast %47 : i32 to index
    %c0_34 = arith.constant 0 : index
    %c0_35 = arith.constant 0 : index
    %49 = vector.load %arg2[%48, %c0_34, %c0_35] : memref<40x1x32xf32, #tpu.memory_space<vmem>>, vector<1x1x32xf32>
    %50 = vector.shape_cast %49 : vector<1x1x32xf32> to vector<1x32xf32>
    %c12 = arith.constant 12 : index
    %51 = memref.load %arg1[%c12] : memref<18xi32, #tpu.memory_space<smem>>
    %52 = arith.index_cast %51 : i32 to index
    %c0_36 = arith.constant 0 : index
    %c0_37 = arith.constant 0 : index
    %53 = vector.load %arg2[%52, %c0_36, %c0_37] : memref<40x1x32xf32, #tpu.memory_space<vmem>>, vector<1x1x32xf32>
    %54 = vector.shape_cast %53 : vector<1x1x32xf32> to vector<1x32xf32>
    %c13 = arith.constant 13 : index
    %55 = memref.load %arg1[%c13] : memref<18xi32, #tpu.memory_space<smem>>
    %56 = arith.index_cast %55 : i32 to index
    %c0_38 = arith.constant 0 : index
    %c0_39 = arith.constant 0 : index
    %57 = vector.load %arg2[%56, %c0_38, %c0_39] : memref<40x1x32xf32, #tpu.memory_space<vmem>>, vector<1x1x32xf32>
    %58 = vector.shape_cast %57 : vector<1x1x32xf32> to vector<1x32xf32>
    %c14 = arith.constant 14 : index
    %59 = memref.load %arg1[%c14] : memref<18xi32, #tpu.memory_space<smem>>
    %60 = arith.index_cast %59 : i32 to index
    %c0_40 = arith.constant 0 : index
    %c0_41 = arith.constant 0 : index
    %61 = vector.load %arg2[%60, %c0_40, %c0_41] : memref<40x1x32xf32, #tpu.memory_space<vmem>>, vector<1x1x32xf32>
    %62 = vector.shape_cast %61 : vector<1x1x32xf32> to vector<1x32xf32>
    %c15 = arith.constant 15 : index
    %63 = memref.load %arg1[%c15] : memref<18xi32, #tpu.memory_space<smem>>
    %64 = arith.index_cast %63 : i32 to index
    %c0_42 = arith.constant 0 : index
    %c0_43 = arith.constant 0 : index
    %65 = vector.load %arg2[%64, %c0_42, %c0_43] : memref<40x1x32xf32, #tpu.memory_space<vmem>>, vector<1x1x32xf32>
    %66 = vector.shape_cast %65 : vector<1x1x32xf32> to vector<1x32xf32>
    %c16 = arith.constant 16 : index
    %67 = memref.load %arg1[%c16] : memref<18xi32, #tpu.memory_space<smem>>
    %68 = arith.index_cast %67 : i32 to index
    %c0_44 = arith.constant 0 : index
    %c0_45 = arith.constant 0 : index
    %69 = vector.load %arg2[%68, %c0_44, %c0_45] : memref<40x1x32xf32, #tpu.memory_space<vmem>>, vector<1x1x32xf32>
    %70 = vector.shape_cast %69 : vector<1x1x32xf32> to vector<1x32xf32>
    %c17 = arith.constant 17 : index
    %71 = memref.load %arg1[%c17] : memref<18xi32, #tpu.memory_space<smem>>
    %72 = arith.index_cast %71 : i32 to index
    %c0_46 = arith.constant 0 : index
    %c0_47 = arith.constant 0 : index
    %73 = vector.load %arg2[%72, %c0_46, %c0_47] : memref<40x1x32xf32, #tpu.memory_space<vmem>>, vector<1x1x32xf32>
    %74 = vector.shape_cast %73 : vector<1x1x32xf32> to vector<1x32xf32>
    %75 = tpu.concatenate %6, %10, %14, %18, %22, %26, %30, %34, %38, %42, %46, %50, %54, %58, %62, %66 in 0 : vector<1x32xf32>, vector<1x32xf32>, vector<1x32xf32>, vector<1x32xf32>, vector<1x32xf32>, vector<1x32xf32>, vector<1x32xf32>, vector<1x32xf32>, vector<1x32xf32>, vector<1x32xf32>, vector<1x32xf32>, vector<1x32xf32>, vector<1x32xf32>, vector<1x32xf32>, vector<1x32xf32>, vector<1x32xf32> -> vector<16x32xf32>
    %76 = tpu.concatenate %70, %74 in 0 : vector<1x32xf32>, vector<1x32xf32> -> vector<2x32xf32>
    %77 = tpu.concatenate %75, %76 in 0 : vector<16x32xf32>, vector<2x32xf32> -> vector<18x32xf32>
    %78 = vector.extract_strided_slice %0 {offsets = [0, 0, 0, 0], sizes = [1, 1, 32, 32], strides = [1, 1, 1, 1]} : vector<2x4x32x32xf32> to vector<1x1x32x32xf32>
    %79 = vector.shape_cast %78 : vector<1x1x32x32xf32> to vector<32x32xf32>
    %cst = arith.constant dense<0.000000e+00> : vector<18x32xf32>
    %80 = tpu.matmul %77, %79, %cst {dimension_numbers = #tpu.dot_dimension_numbers<[1], [0], [0], [1], [0, 0, 1, 1], [], []>} : vector<18x32xf32>, vector<32x32xf32>, vector<18x32xf32> -> vector<18x32xf32>
    %81 = vector.extract_strided_slice %2 {offsets = [0, 0, 0, 0], sizes = [1, 1, 1, 32], strides = [1, 1, 1, 1]} : vector<2x4x1x32xf32> to vector<1x1x1x32xf32>
    %82 = vector.shape_cast %81 : vector<1x1x1x32xf32> to vector<1x32xf32>
    %83 = vector.broadcast %82 : vector<1x32xf32> to vector<18x32xf32>
    %84 = arith.addf %80, %83 : vector<18x32xf32>
    %85 = vector.extract_strided_slice %0 {offsets = [0, 1, 0, 0], sizes = [1, 1, 32, 32], strides = [1, 1, 1, 1]} : vector<2x4x32x32xf32> to vector<1x1x32x32xf32>
    %86 = vector.shape_cast %85 : vector<1x1x32x32xf32> to vector<32x32xf32>
    %cst_48 = arith.constant dense<0.000000e+00> : vector<18x32xf32>
    %87 = tpu.matmul %77, %86, %cst_48 {dimension_numbers = #tpu.dot_dimension_numbers<[1], [0], [0], [1], [0, 0, 1, 1], [], []>} : vector<18x32xf32>, vector<32x32xf32>, vector<18x32xf32> -> vector<18x32xf32>
    %88 = vector.extract_strided_slice %2 {offsets = [0, 1, 0, 0], sizes = [1, 1, 1, 32], strides = [1, 1, 1, 1]} : vector<2x4x1x32xf32> to vector<1x1x1x32xf32>
    %89 = vector.shape_cast %88 : vector<1x1x1x32xf32> to vector<1x32xf32>
    %90 = vector.broadcast %89 : vector<1x32xf32> to vector<18x32xf32>
    %91 = arith.addf %87, %90 : vector<18x32xf32>
    %92 = vector.extract_strided_slice %0 {offsets = [0, 2, 0, 0], sizes = [1, 1, 32, 32], strides = [1, 1, 1, 1]} : vector<2x4x32x32xf32> to vector<1x1x32x32xf32>
    %93 = vector.shape_cast %92 : vector<1x1x32x32xf32> to vector<32x32xf32>
    %cst_49 = arith.constant dense<0.000000e+00> : vector<18x32xf32>
    %94 = tpu.matmul %77, %93, %cst_49 {dimension_numbers = #tpu.dot_dimension_numbers<[1], [0], [0], [1], [0, 0, 1, 1], [], []>} : vector<18x32xf32>, vector<32x32xf32>, vector<18x32xf32> -> vector<18x32xf32>
    %95 = vector.extract_strided_slice %2 {offsets = [0, 2, 0, 0], sizes = [1, 1, 1, 32], strides = [1, 1, 1, 1]} : vector<2x4x1x32xf32> to vector<1x1x1x32xf32>
    %96 = vector.shape_cast %95 : vector<1x1x1x32xf32> to vector<1x32xf32>
    %97 = vector.broadcast %96 : vector<1x32xf32> to vector<18x32xf32>
    %98 = arith.addf %94, %97 : vector<18x32xf32>
    %99 = vector.extract_strided_slice %0 {offsets = [0, 3, 0, 0], sizes = [1, 1, 32, 32], strides = [1, 1, 1, 1]} : vector<2x4x32x32xf32> to vector<1x1x32x32xf32>
    %100 = vector.shape_cast %99 : vector<1x1x32x32xf32> to vector<32x32xf32>
    %cst_50 = arith.constant dense<0.000000e+00> : vector<18x32xf32>
    %101 = tpu.matmul %77, %100, %cst_50 {dimension_numbers = #tpu.dot_dimension_numbers<[1], [0], [0], [1], [0, 0, 1, 1], [], []>} : vector<18x32xf32>, vector<32x32xf32>, vector<18x32xf32> -> vector<18x32xf32>
    %102 = vector.extract_strided_slice %2 {offsets = [0, 3, 0, 0], sizes = [1, 1, 1, 32], strides = [1, 1, 1, 1]} : vector<2x4x1x32xf32> to vector<1x1x1x32xf32>
    %103 = vector.shape_cast %102 : vector<1x1x1x32xf32> to vector<1x32xf32>
    %104 = vector.broadcast %103 : vector<1x32xf32> to vector<18x32xf32>
    %105 = arith.addf %101, %104 : vector<18x32xf32>
    %cst_51 = arith.constant 0.000000e+00 : f32
    %106 = vector.broadcast %cst_51 : f32 to vector<2x32xf32>
    %107 = vector.extract_strided_slice %84 {offsets = [0, 0], sizes = [2, 32], strides = [1, 1]} : vector<18x32xf32> to vector<2x32xf32>
    %108 = vector.extract_strided_slice %91 {offsets = [0, 0], sizes = [2, 32], strides = [1, 1]} : vector<18x32xf32> to vector<2x32xf32>
    %109 = vector.extract_strided_slice %98 {offsets = [0, 0], sizes = [2, 32], strides = [1, 1]} : vector<18x32xf32> to vector<2x32xf32>
    %110 = vector.extract_strided_slice %105 {offsets = [0, 0], sizes = [2, 32], strides = [1, 1]} : vector<18x32xf32> to vector<2x32xf32>
    %111 = vector.extract_strided_slice %1 {offsets = [0, 0, 0, 0], sizes = [1, 4, 32, 32], strides = [1, 1, 1, 1]} : vector<2x4x32x32xf32> to vector<1x4x32x32xf32>
    %112 = vector.shape_cast %111 : vector<1x4x32x32xf32> to vector<4x32x32xf32>
    %113 = vector.extract_strided_slice %112 {offsets = [0, 0, 0], sizes = [1, 32, 32], strides = [1, 1, 1]} : vector<4x32x32xf32> to vector<1x32x32xf32>
    %114 = vector.shape_cast %113 : vector<1x32x32xf32> to vector<32x32xf32>
    %cst_52 = arith.constant dense<0.000000e+00> : vector<2x32xf32>
    %115 = tpu.matmul %106, %114, %cst_52 {dimension_numbers = #tpu.dot_dimension_numbers<[1], [0], [0], [1], [0, 0, 1, 1], [], []>} : vector<2x32xf32>, vector<32x32xf32>, vector<2x32xf32> -> vector<2x32xf32>
    %116 = arith.addf %107, %115 : vector<2x32xf32>
    %117 = arith.negf %116 : vector<2x32xf32>
    %118 = math.exp %117 : vector<2x32xf32>
    %cst_53 = arith.constant 1.000000e+00 : f32
    %119 = vector.broadcast %cst_53 : f32 to vector<2x32xf32>
    %120 = arith.addf %119, %118 : vector<2x32xf32>
    %121 = arith.divf %119, %120 : vector<2x32xf32>
    %122 = vector.extract_strided_slice %112 {offsets = [1, 0, 0], sizes = [1, 32, 32], strides = [1, 1, 1]} : vector<4x32x32xf32> to vector<1x32x32xf32>
    %123 = vector.shape_cast %122 : vector<1x32x32xf32> to vector<32x32xf32>
    %cst_54 = arith.constant dense<0.000000e+00> : vector<2x32xf32>
    %124 = tpu.matmul %106, %123, %cst_54 {dimension_numbers = #tpu.dot_dimension_numbers<[1], [0], [0], [1], [0, 0, 1, 1], [], []>} : vector<2x32xf32>, vector<32x32xf32>, vector<2x32xf32> -> vector<2x32xf32>
    %125 = arith.addf %108, %124 : vector<2x32xf32>
    %126 = arith.negf %125 : vector<2x32xf32>
    %127 = math.exp %126 : vector<2x32xf32>
    %cst_55 = arith.constant 1.000000e+00 : f32
    %128 = vector.broadcast %cst_55 : f32 to vector<2x32xf32>
    %129 = arith.addf %128, %127 : vector<2x32xf32>
    %130 = arith.divf %128, %129 : vector<2x32xf32>
    %131 = vector.extract_strided_slice %112 {offsets = [2, 0, 0], sizes = [1, 32, 32], strides = [1, 1, 1]} : vector<4x32x32xf32> to vector<1x32x32xf32>
    %132 = vector.shape_cast %131 : vector<1x32x32xf32> to vector<32x32xf32>
    %cst_56 = arith.constant dense<0.000000e+00> : vector<2x32xf32>
    %133 = tpu.matmul %106, %132, %cst_56 {dimension_numbers = #tpu.dot_dimension_numbers<[1], [0], [0], [1], [0, 0, 1, 1], [], []>} : vector<2x32xf32>, vector<32x32xf32>, vector<2x32xf32> -> vector<2x32xf32>
    %134 = arith.addf %109, %133 : vector<2x32xf32>
    %135 = math.tanh %134 : vector<2x32xf32>
    %136 = vector.extract_strided_slice %112 {offsets = [3, 0, 0], sizes = [1, 32, 32], strides = [1, 1, 1]} : vector<4x32x32xf32> to vector<1x32x32xf32>
    %137 = vector.shape_cast %136 : vector<1x32x32xf32> to vector<32x32xf32>
    %cst_57 = arith.constant dense<0.000000e+00> : vector<2x32xf32>
    %138 = tpu.matmul %106, %137, %cst_57 {dimension_numbers = #tpu.dot_dimension_numbers<[1], [0], [0], [1], [0, 0, 1, 1], [], []>} : vector<2x32xf32>, vector<32x32xf32>, vector<2x32xf32> -> vector<2x32xf32>
    %139 = arith.addf %110, %138 : vector<2x32xf32>
    %140 = arith.negf %139 : vector<2x32xf32>
    %141 = math.exp %140 : vector<2x32xf32>
    %cst_58 = arith.constant 1.000000e+00 : f32
    %142 = vector.broadcast %cst_58 : f32 to vector<2x32xf32>
    %143 = arith.addf %142, %141 : vector<2x32xf32>
    %144 = arith.divf %142, %143 : vector<2x32xf32>
    %145 = arith.mulf %130, %106 : vector<2x32xf32>
    %146 = arith.mulf %121, %135 : vector<2x32xf32>
    %147 = arith.addf %145, %146 : vector<2x32xf32>
    %148 = math.tanh %147 : vector<2x32xf32>
    %149 = arith.mulf %144, %148 : vector<2x32xf32>
    %150 = vector.extract_strided_slice %84 {offsets = [2, 0], sizes = [2, 32], strides = [1, 1]} : vector<18x32xf32> to vector<2x32xf32>
    %151 = vector.extract_strided_slice %91 {offsets = [2, 0], sizes = [2, 32], strides = [1, 1]} : vector<18x32xf32> to vector<2x32xf32>
    %152 = vector.extract_strided_slice %98 {offsets = [2, 0], sizes = [2, 32], strides = [1, 1]} : vector<18x32xf32> to vector<2x32xf32>
    %153 = vector.extract_strided_slice %105 {offsets = [2, 0], sizes = [2, 32], strides = [1, 1]} : vector<18x32xf32> to vector<2x32xf32>
    %154 = vector.extract_strided_slice %1 {offsets = [0, 0, 0, 0], sizes = [1, 4, 32, 32], strides = [1, 1, 1, 1]} : vector<2x4x32x32xf32> to vector<1x4x32x32xf32>
    %155 = vector.shape_cast %154 : vector<1x4x32x32xf32> to vector<4x32x32xf32>
    %156 = vector.extract_strided_slice %155 {offsets = [0, 0, 0], sizes = [1, 32, 32], strides = [1, 1, 1]} : vector<4x32x32xf32> to vector<1x32x32xf32>
    %157 = vector.shape_cast %156 : vector<1x32x32xf32> to vector<32x32xf32>
    %cst_59 = arith.constant dense<0.000000e+00> : vector<2x32xf32>
    %158 = tpu.matmul %149, %157, %cst_59 {dimension_numbers = #tpu.dot_dimension_numbers<[1], [0], [0], [1], [0, 0, 1, 1], [], []>} : vector<2x32xf32>, vector<32x32xf32>, vector<2x32xf32> -> vector<2x32xf32>
    %159 = arith.addf %150, %158 : vector<2x32xf32>
    %160 = arith.negf %159 : vector<2x32xf32>
    %161 = math.exp %160 : vector<2x32xf32>
    %cst_60 = arith.constant 1.000000e+00 : f32
    %162 = vector.broadcast %cst_60 : f32 to vector<2x32xf32>
    %163 = arith.addf %162, %161 : vector<2x32xf32>
    %164 = arith.divf %162, %163 : vector<2x32xf32>
    %165 = vector.extract_strided_slice %155 {offsets = [1, 0, 0], sizes = [1, 32, 32], strides = [1, 1, 1]} : vector<4x32x32xf32> to vector<1x32x32xf32>
    %166 = vector.shape_cast %165 : vector<1x32x32xf32> to vector<32x32xf32>
    %cst_61 = arith.constant dense<0.000000e+00> : vector<2x32xf32>
    %167 = tpu.matmul %149, %166, %cst_61 {dimension_numbers = #tpu.dot_dimension_numbers<[1], [0], [0], [1], [0, 0, 1, 1], [], []>} : vector<2x32xf32>, vector<32x32xf32>, vector<2x32xf32> -> vector<2x32xf32>
    %168 = arith.addf %151, %167 : vector<2x32xf32>
    %169 = arith.negf %168 : vector<2x32xf32>
    %170 = math.exp %169 : vector<2x32xf32>
    %cst_62 = arith.constant 1.000000e+00 : f32
    %171 = vector.broadcast %cst_62 : f32 to vector<2x32xf32>
    %172 = arith.addf %171, %170 : vector<2x32xf32>
    %173 = arith.divf %171, %172 : vector<2x32xf32>
    %174 = vector.extract_strided_slice %155 {offsets = [2, 0, 0], sizes = [1, 32, 32], strides = [1, 1, 1]} : vector<4x32x32xf32> to vector<1x32x32xf32>
    %175 = vector.shape_cast %174 : vector<1x32x32xf32> to vector<32x32xf32>
    %cst_63 = arith.constant dense<0.000000e+00> : vector<2x32xf32>
    %176 = tpu.matmul %149, %175, %cst_63 {dimension_numbers = #tpu.dot_dimension_numbers<[1], [0], [0], [1], [0, 0, 1, 1], [], []>} : vector<2x32xf32>, vector<32x32xf32>, vector<2x32xf32> -> vector<2x32xf32>
    %177 = arith.addf %152, %176 : vector<2x32xf32>
    %178 = math.tanh %177 : vector<2x32xf32>
    %179 = vector.extract_strided_slice %155 {offsets = [3, 0, 0], sizes = [1, 32, 32], strides = [1, 1, 1]} : vector<4x32x32xf32> to vector<1x32x32xf32>
    %180 = vector.shape_cast %179 : vector<1x32x32xf32> to vector<32x32xf32>
    %cst_64 = arith.constant dense<0.000000e+00> : vector<2x32xf32>
    %181 = tpu.matmul %149, %180, %cst_64 {dimension_numbers = #tpu.dot_dimension_numbers<[1], [0], [0], [1], [0, 0, 1, 1], [], []>} : vector<2x32xf32>, vector<32x32xf32>, vector<2x32xf32> -> vector<2x32xf32>
    %182 = arith.addf %153, %181 : vector<2x32xf32>
    %183 = arith.negf %182 : vector<2x32xf32>
    %184 = math.exp %183 : vector<2x32xf32>
    %cst_65 = arith.constant 1.000000e+00 : f32
    %185 = vector.broadcast %cst_65 : f32 to vector<2x32xf32>
    %186 = arith.addf %185, %184 : vector<2x32xf32>
    %187 = arith.divf %185, %186 : vector<2x32xf32>
    %188 = arith.mulf %173, %147 : vector<2x32xf32>
    %189 = arith.mulf %164, %178 : vector<2x32xf32>
    %190 = arith.addf %188, %189 : vector<2x32xf32>
    %191 = math.tanh %190 : vector<2x32xf32>
    %192 = arith.mulf %187, %191 : vector<2x32xf32>
    %193 = vector.extract_strided_slice %0 {offsets = [1, 0, 0, 0], sizes = [1, 1, 32, 32], strides = [1, 1, 1, 1]} : vector<2x4x32x32xf32> to vector<1x1x32x32xf32>
    %194 = vector.shape_cast %193 : vector<1x1x32x32xf32> to vector<32x32xf32>
    %cst_66 = arith.constant dense<0.000000e+00> : vector<2x32xf32>
    %195 = tpu.matmul %149, %194, %cst_66 {dimension_numbers = #tpu.dot_dimension_numbers<[1], [0], [0], [1], [0, 0, 1, 1], [], []>} : vector<2x32xf32>, vector<32x32xf32>, vector<2x32xf32> -> vector<2x32xf32>
    %196 = vector.extract_strided_slice %2 {offsets = [1, 0, 0, 0], sizes = [1, 1, 1, 32], strides = [1, 1, 1, 1]} : vector<2x4x1x32xf32> to vector<1x1x1x32xf32>
    %197 = vector.shape_cast %196 : vector<1x1x1x32xf32> to vector<1x32xf32>
    %198 = vector.broadcast %197 : vector<1x32xf32> to vector<2x32xf32>
    %199 = arith.addf %195, %198 : vector<2x32xf32>
    %200 = vector.extract_strided_slice %0 {offsets = [1, 1, 0, 0], sizes = [1, 1, 32, 32], strides = [1, 1, 1, 1]} : vector<2x4x32x32xf32> to vector<1x1x32x32xf32>
    %201 = vector.shape_cast %200 : vector<1x1x32x32xf32> to vector<32x32xf32>
    %cst_67 = arith.constant dense<0.000000e+00> : vector<2x32xf32>
    %202 = tpu.matmul %149, %201, %cst_67 {dimension_numbers = #tpu.dot_dimension_numbers<[1], [0], [0], [1], [0, 0, 1, 1], [], []>} : vector<2x32xf32>, vector<32x32xf32>, vector<2x32xf32> -> vector<2x32xf32>
    %203 = vector.extract_strided_slice %2 {offsets = [1, 1, 0, 0], sizes = [1, 1, 1, 32], strides = [1, 1, 1, 1]} : vector<2x4x1x32xf32> to vector<1x1x1x32xf32>
    %204 = vector.shape_cast %203 : vector<1x1x1x32xf32> to vector<1x32xf32>
    %205 = vector.broadcast %204 : vector<1x32xf32> to vector<2x32xf32>
    %206 = arith.addf %202, %205 : vector<2x32xf32>
    %207 = vector.extract_strided_slice %0 {offsets = [1, 2, 0, 0], sizes = [1, 1, 32, 32], strides = [1, 1, 1, 1]} : vector<2x4x32x32xf32> to vector<1x1x32x32xf32>
    %208 = vector.shape_cast %207 : vector<1x1x32x32xf32> to vector<32x32xf32>
    %cst_68 = arith.constant dense<0.000000e+00> : vector<2x32xf32>
    %209 = tpu.matmul %149, %208, %cst_68 {dimension_numbers = #tpu.dot_dimension_numbers<[1], [0], [0], [1], [0, 0, 1, 1], [], []>} : vector<2x32xf32>, vector<32x32xf32>, vector<2x32xf32> -> vector<2x32xf32>
    %210 = vector.extract_strided_slice %2 {offsets = [1, 2, 0, 0], sizes = [1, 1, 1, 32], strides = [1, 1, 1, 1]} : vector<2x4x1x32xf32> to vector<1x1x1x32xf32>
    %211 = vector.shape_cast %210 : vector<1x1x1x32xf32> to vector<1x32xf32>
    %212 = vector.broadcast %211 : vector<1x32xf32> to vector<2x32xf32>
    %213 = arith.addf %209, %212 : vector<2x32xf32>
    %214 = vector.extract_strided_slice %0 {offsets = [1, 3, 0, 0], sizes = [1, 1, 32, 32], strides = [1, 1, 1, 1]} : vector<2x4x32x32xf32> to vector<1x1x32x32xf32>
    %215 = vector.shape_cast %214 : vector<1x1x32x32xf32> to vector<32x32xf32>
    %cst_69 = arith.constant dense<0.000000e+00> : vector<2x32xf32>
    %216 = tpu.matmul %149, %215, %cst_69 {dimension_numbers = #tpu.dot_dimension_numbers<[1], [0], [0], [1], [0, 0, 1, 1], [], []>} : vector<2x32xf32>, vector<32x32xf32>, vector<2x32xf32> -> vector<2x32xf32>
    %217 = vector.extract_strided_slice %2 {offsets = [1, 3, 0, 0], sizes = [1, 1, 1, 32], strides = [1, 1, 1, 1]} : vector<2x4x1x32xf32> to vector<1x1x1x32xf32>
    %218 = vector.shape_cast %217 : vector<1x1x1x32xf32> to vector<1x32xf32>
    %219 = vector.broadcast %218 : vector<1x32xf32> to vector<2x32xf32>
    %220 = arith.addf %216, %219 : vector<2x32xf32>
    %221 = vector.extract_strided_slice %1 {offsets = [1, 0, 0, 0], sizes = [1, 4, 32, 32], strides = [1, 1, 1, 1]} : vector<2x4x32x32xf32> to vector<1x4x32x32xf32>
    %222 = vector.shape_cast %221 : vector<1x4x32x32xf32> to vector<4x32x32xf32>
    %223 = vector.extract_strided_slice %222 {offsets = [0, 0, 0], sizes = [1, 32, 32], strides = [1, 1, 1]} : vector<4x32x32xf32> to vector<1x32x32xf32>
    %224 = vector.shape_cast %223 : vector<1x32x32xf32> to vector<32x32xf32>
    %cst_70 = arith.constant dense<0.000000e+00> : vector<2x32xf32>
    %225 = tpu.matmul %106, %224, %cst_70 {dimension_numbers = #tpu.dot_dimension_numbers<[1], [0], [0], [1], [0, 0, 1, 1], [], []>} : vector<2x32xf32>, vector<32x32xf32>, vector<2x32xf32> -> vector<2x32xf32>
    %226 = arith.addf %199, %225 : vector<2x32xf32>
    %227 = arith.negf %226 : vector<2x32xf32>
    %228 = math.exp %227 : vector<2x32xf32>
    %cst_71 = arith.constant 1.000000e+00 : f32
    %229 = vector.broadcast %cst_71 : f32 to vector<2x32xf32>
    %230 = arith.addf %229, %228 : vector<2x32xf32>
    %231 = arith.divf %229, %230 : vector<2x32xf32>
    %232 = vector.extract_strided_slice %222 {offsets = [1, 0, 0], sizes = [1, 32, 32], strides = [1, 1, 1]} : vector<4x32x32xf32> to vector<1x32x32xf32>
    %233 = vector.shape_cast %232 : vector<1x32x32xf32> to vector<32x32xf32>
    %cst_72 = arith.constant dense<0.000000e+00> : vector<2x32xf32>
    %234 = tpu.matmul %106, %233, %cst_72 {dimension_numbers = #tpu.dot_dimension_numbers<[1], [0], [0], [1], [0, 0, 1, 1], [], []>} : vector<2x32xf32>, vector<32x32xf32>, vector<2x32xf32> -> vector<2x32xf32>
    %235 = arith.addf %206, %234 : vector<2x32xf32>
    %236 = arith.negf %235 : vector<2x32xf32>
    %237 = math.exp %236 : vector<2x32xf32>
    %cst_73 = arith.constant 1.000000e+00 : f32
    %238 = vector.broadcast %cst_73 : f32 to vector<2x32xf32>
    %239 = arith.addf %238, %237 : vector<2x32xf32>
    %240 = arith.divf %238, %239 : vector<2x32xf32>
    %241 = vector.extract_strided_slice %222 {offsets = [2, 0, 0], sizes = [1, 32, 32], strides = [1, 1, 1]} : vector<4x32x32xf32> to vector<1x32x32xf32>
    %242 = vector.shape_cast %241 : vector<1x32x32xf32> to vector<32x32xf32>
    %cst_74 = arith.constant dense<0.000000e+00> : vector<2x32xf32>
    %243 = tpu.matmul %106, %242, %cst_74 {dimension_numbers = #tpu.dot_dimension_numbers<[1], [0], [0], [1], [0, 0, 1, 1], [], []>} : vector<2x32xf32>, vector<32x32xf32>, vector<2x32xf32> -> vector<2x32xf32>
    %244 = arith.addf %213, %243 : vector<2x32xf32>
    %245 = math.tanh %244 : vector<2x32xf32>
    %246 = vector.extract_strided_slice %222 {offsets = [3, 0, 0], sizes = [1, 32, 32], strides = [1, 1, 1]} : vector<4x32x32xf32> to vector<1x32x32xf32>
    %247 = vector.shape_cast %246 : vector<1x32x32xf32> to vector<32x32xf32>
    %cst_75 = arith.constant dense<0.000000e+00> : vector<2x32xf32>
    %248 = tpu.matmul %106, %247, %cst_75 {dimension_numbers = #tpu.dot_dimension_numbers<[1], [0], [0], [1], [0, 0, 1, 1], [], []>} : vector<2x32xf32>, vector<32x32xf32>, vector<2x32xf32> -> vector<2x32xf32>
    %249 = arith.addf %220, %248 : vector<2x32xf32>
    %250 = arith.negf %249 : vector<2x32xf32>
    %251 = math.exp %250 : vector<2x32xf32>
    %cst_76 = arith.constant 1.000000e+00 : f32
    %252 = vector.broadcast %cst_76 : f32 to vector<2x32xf32>
    %253 = arith.addf %252, %251 : vector<2x32xf32>
    %254 = arith.divf %252, %253 : vector<2x32xf32>
    %255 = arith.mulf %240, %106 : vector<2x32xf32>
    %256 = arith.mulf %231, %245 : vector<2x32xf32>
    %257 = arith.addf %255, %256 : vector<2x32xf32>
    %258 = math.tanh %257 : vector<2x32xf32>
    %259 = arith.mulf %254, %258 : vector<2x32xf32>
    %260 = vector.extract_strided_slice %84 {offsets = [4, 0], sizes = [2, 32], strides = [1, 1]} : vector<18x32xf32> to vector<2x32xf32>
    %261 = vector.extract_strided_slice %91 {offsets = [4, 0], sizes = [2, 32], strides = [1, 1]} : vector<18x32xf32> to vector<2x32xf32>
    %262 = vector.extract_strided_slice %98 {offsets = [4, 0], sizes = [2, 32], strides = [1, 1]} : vector<18x32xf32> to vector<2x32xf32>
    %263 = vector.extract_strided_slice %105 {offsets = [4, 0], sizes = [2, 32], strides = [1, 1]} : vector<18x32xf32> to vector<2x32xf32>
    %264 = vector.extract_strided_slice %1 {offsets = [0, 0, 0, 0], sizes = [1, 4, 32, 32], strides = [1, 1, 1, 1]} : vector<2x4x32x32xf32> to vector<1x4x32x32xf32>
    %265 = vector.shape_cast %264 : vector<1x4x32x32xf32> to vector<4x32x32xf32>
    %266 = vector.extract_strided_slice %265 {offsets = [0, 0, 0], sizes = [1, 32, 32], strides = [1, 1, 1]} : vector<4x32x32xf32> to vector<1x32x32xf32>
    %267 = vector.shape_cast %266 : vector<1x32x32xf32> to vector<32x32xf32>
    %cst_77 = arith.constant dense<0.000000e+00> : vector<2x32xf32>
    %268 = tpu.matmul %192, %267, %cst_77 {dimension_numbers = #tpu.dot_dimension_numbers<[1], [0], [0], [1], [0, 0, 1, 1], [], []>} : vector<2x32xf32>, vector<32x32xf32>, vector<2x32xf32> -> vector<2x32xf32>
    %269 = arith.addf %260, %268 : vector<2x32xf32>
    %270 = arith.negf %269 : vector<2x32xf32>
    %271 = math.exp %270 : vector<2x32xf32>
    %cst_78 = arith.constant 1.000000e+00 : f32
    %272 = vector.broadcast %cst_78 : f32 to vector<2x32xf32>
    %273 = arith.addf %272, %271 : vector<2x32xf32>
    %274 = arith.divf %272, %273 : vector<2x32xf32>
    %275 = vector.extract_strided_slice %265 {offsets = [1, 0, 0], sizes = [1, 32, 32], strides = [1, 1, 1]} : vector<4x32x32xf32> to vector<1x32x32xf32>
    %276 = vector.shape_cast %275 : vector<1x32x32xf32> to vector<32x32xf32>
    %cst_79 = arith.constant dense<0.000000e+00> : vector<2x32xf32>
    %277 = tpu.matmul %192, %276, %cst_79 {dimension_numbers = #tpu.dot_dimension_numbers<[1], [0], [0], [1], [0, 0, 1, 1], [], []>} : vector<2x32xf32>, vector<32x32xf32>, vector<2x32xf32> -> vector<2x32xf32>
    %278 = arith.addf %261, %277 : vector<2x32xf32>
    %279 = arith.negf %278 : vector<2x32xf32>
    %280 = math.exp %279 : vector<2x32xf32>
    %cst_80 = arith.constant 1.000000e+00 : f32
    %281 = vector.broadcast %cst_80 : f32 to vector<2x32xf32>
    %282 = arith.addf %281, %280 : vector<2x32xf32>
    %283 = arith.divf %281, %282 : vector<2x32xf32>
    %284 = vector.extract_strided_slice %265 {offsets = [2, 0, 0], sizes = [1, 32, 32], strides = [1, 1, 1]} : vector<4x32x32xf32> to vector<1x32x32xf32>
    %285 = vector.shape_cast %284 : vector<1x32x32xf32> to vector<32x32xf32>
    %cst_81 = arith.constant dense<0.000000e+00> : vector<2x32xf32>
    %286 = tpu.matmul %192, %285, %cst_81 {dimension_numbers = #tpu.dot_dimension_numbers<[1], [0], [0], [1], [0, 0, 1, 1], [], []>} : vector<2x32xf32>, vector<32x32xf32>, vector<2x32xf32> -> vector<2x32xf32>
    %287 = arith.addf %262, %286 : vector<2x32xf32>
    %288 = math.tanh %287 : vector<2x32xf32>
    %289 = vector.extract_strided_slice %265 {offsets = [3, 0, 0], sizes = [1, 32, 32], strides = [1, 1, 1]} : vector<4x32x32xf32> to vector<1x32x32xf32>
    %290 = vector.shape_cast %289 : vector<1x32x32xf32> to vector<32x32xf32>
    %cst_82 = arith.constant dense<0.000000e+00> : vector<2x32xf32>
    %291 = tpu.matmul %192, %290, %cst_82 {dimension_numbers = #tpu.dot_dimension_numbers<[1], [0], [0], [1], [0, 0, 1, 1], [], []>} : vector<2x32xf32>, vector<32x32xf32>, vector<2x32xf32> -> vector<2x32xf32>
    %292 = arith.addf %263, %291 : vector<2x32xf32>
    %293 = arith.negf %292 : vector<2x32xf32>
    %294 = math.exp %293 : vector<2x32xf32>
    %cst_83 = arith.constant 1.000000e+00 : f32
    %295 = vector.broadcast %cst_83 : f32 to vector<2x32xf32>
    %296 = arith.addf %295, %294 : vector<2x32xf32>
    %297 = arith.divf %295, %296 : vector<2x32xf32>
    %298 = arith.mulf %283, %190 : vector<2x32xf32>
    %299 = arith.mulf %274, %288 : vector<2x32xf32>
    %300 = arith.addf %298, %299 : vector<2x32xf32>
    %301 = math.tanh %300 : vector<2x32xf32>
    %302 = arith.mulf %297, %301 : vector<2x32xf32>
    %303 = vector.extract_strided_slice %0 {offsets = [1, 0, 0, 0], sizes = [1, 1, 32, 32], strides = [1, 1, 1, 1]} : vector<2x4x32x32xf32> to vector<1x1x32x32xf32>
    %304 = vector.shape_cast %303 : vector<1x1x32x32xf32> to vector<32x32xf32>
    %cst_84 = arith.constant dense<0.000000e+00> : vector<2x32xf32>
    %305 = tpu.matmul %192, %304, %cst_84 {dimension_numbers = #tpu.dot_dimension_numbers<[1], [0], [0], [1], [0, 0, 1, 1], [], []>} : vector<2x32xf32>, vector<32x32xf32>, vector<2x32xf32> -> vector<2x32xf32>
    %306 = vector.extract_strided_slice %2 {offsets = [1, 0, 0, 0], sizes = [1, 1, 1, 32], strides = [1, 1, 1, 1]} : vector<2x4x1x32xf32> to vector<1x1x1x32xf32>
    %307 = vector.shape_cast %306 : vector<1x1x1x32xf32> to vector<1x32xf32>
    %308 = vector.broadcast %307 : vector<1x32xf32> to vector<2x32xf32>
    %309 = arith.addf %305, %308 : vector<2x32xf32>
    %310 = vector.extract_strided_slice %0 {offsets = [1, 1, 0, 0], sizes = [1, 1, 32, 32], strides = [1, 1, 1, 1]} : vector<2x4x32x32xf32> to vector<1x1x32x32xf32>
    %311 = vector.shape_cast %310 : vector<1x1x32x32xf32> to vector<32x32xf32>
    %cst_85 = arith.constant dense<0.000000e+00> : vector<2x32xf32>
    %312 = tpu.matmul %192, %311, %cst_85 {dimension_numbers = #tpu.dot_dimension_numbers<[1], [0], [0], [1], [0, 0, 1, 1], [], []>} : vector<2x32xf32>, vector<32x32xf32>, vector<2x32xf32> -> vector<2x32xf32>
    %313 = vector.extract_strided_slice %2 {offsets = [1, 1, 0, 0], sizes = [1, 1, 1, 32], strides = [1, 1, 1, 1]} : vector<2x4x1x32xf32> to vector<1x1x1x32xf32>
    %314 = vector.shape_cast %313 : vector<1x1x1x32xf32> to vector<1x32xf32>
    %315 = vector.broadcast %314 : vector<1x32xf32> to vector<2x32xf32>
    %316 = arith.addf %312, %315 : vector<2x32xf32>
    %317 = vector.extract_strided_slice %0 {offsets = [1, 2, 0, 0], sizes = [1, 1, 32, 32], strides = [1, 1, 1, 1]} : vector<2x4x32x32xf32> to vector<1x1x32x32xf32>
    %318 = vector.shape_cast %317 : vector<1x1x32x32xf32> to vector<32x32xf32>
    %cst_86 = arith.constant dense<0.000000e+00> : vector<2x32xf32>
    %319 = tpu.matmul %192, %318, %cst_86 {dimension_numbers = #tpu.dot_dimension_numbers<[1], [0], [0], [1], [0, 0, 1, 1], [], []>} : vector<2x32xf32>, vector<32x32xf32>, vector<2x32xf32> -> vector<2x32xf32>
    %320 = vector.extract_strided_slice %2 {offsets = [1, 2, 0, 0], sizes = [1, 1, 1, 32], strides = [1, 1, 1, 1]} : vector<2x4x1x32xf32> to vector<1x1x1x32xf32>
    %321 = vector.shape_cast %320 : vector<1x1x1x32xf32> to vector<1x32xf32>
    %322 = vector.broadcast %321 : vector<1x32xf32> to vector<2x32xf32>
    %323 = arith.addf %319, %322 : vector<2x32xf32>
    %324 = vector.extract_strided_slice %0 {offsets = [1, 3, 0, 0], sizes = [1, 1, 32, 32], strides = [1, 1, 1, 1]} : vector<2x4x32x32xf32> to vector<1x1x32x32xf32>
    %325 = vector.shape_cast %324 : vector<1x1x32x32xf32> to vector<32x32xf32>
    %cst_87 = arith.constant dense<0.000000e+00> : vector<2x32xf32>
    %326 = tpu.matmul %192, %325, %cst_87 {dimension_numbers = #tpu.dot_dimension_numbers<[1], [0], [0], [1], [0, 0, 1, 1], [], []>} : vector<2x32xf32>, vector<32x32xf32>, vector<2x32xf32> -> vector<2x32xf32>
    %327 = vector.extract_strided_slice %2 {offsets = [1, 3, 0, 0], sizes = [1, 1, 1, 32], strides = [1, 1, 1, 1]} : vector<2x4x1x32xf32> to vector<1x1x1x32xf32>
    %328 = vector.shape_cast %327 : vector<1x1x1x32xf32> to vector<1x32xf32>
    %329 = vector.broadcast %328 : vector<1x32xf32> to vector<2x32xf32>
    %330 = arith.addf %326, %329 : vector<2x32xf32>
    %331 = vector.extract_strided_slice %1 {offsets = [1, 0, 0, 0], sizes = [1, 4, 32, 32], strides = [1, 1, 1, 1]} : vector<2x4x32x32xf32> to vector<1x4x32x32xf32>
    %332 = vector.shape_cast %331 : vector<1x4x32x32xf32> to vector<4x32x32xf32>
    %333 = vector.extract_strided_slice %332 {offsets = [0, 0, 0], sizes = [1, 32, 32], strides = [1, 1, 1]} : vector<4x32x32xf32> to vector<1x32x32xf32>
    %334 = vector.shape_cast %333 : vector<1x32x32xf32> to vector<32x32xf32>
    %cst_88 = arith.constant dense<0.000000e+00> : vector<2x32xf32>
    %335 = tpu.matmul %259, %334, %cst_88 {dimension_numbers = #tpu.dot_dimension_numbers<[1], [0], [0], [1], [0, 0, 1, 1], [], []>} : vector<2x32xf32>, vector<32x32xf32>, vector<2x32xf32> -> vector<2x32xf32>
    %336 = arith.addf %309, %335 : vector<2x32xf32>
    %337 = arith.negf %336 : vector<2x32xf32>
    %338 = math.exp %337 : vector<2x32xf32>
    %cst_89 = arith.constant 1.000000e+00 : f32
    %339 = vector.broadcast %cst_89 : f32 to vector<2x32xf32>
    %340 = arith.addf %339, %338 : vector<2x32xf32>
    %341 = arith.divf %339, %340 : vector<2x32xf32>
    %342 = vector.extract_strided_slice %332 {offsets = [1, 0, 0], sizes = [1, 32, 32], strides = [1, 1, 1]} : vector<4x32x32xf32> to vector<1x32x32xf32>
    %343 = vector.shape_cast %342 : vector<1x32x32xf32> to vector<32x32xf32>
    %cst_90 = arith.constant dense<0.000000e+00> : vector<2x32xf32>
    %344 = tpu.matmul %259, %343, %cst_90 {dimension_numbers = #tpu.dot_dimension_numbers<[1], [0], [0], [1], [0, 0, 1, 1], [], []>} : vector<2x32xf32>, vector<32x32xf32>, vector<2x32xf32> -> vector<2x32xf32>
    %345 = arith.addf %316, %344 : vector<2x32xf32>
    %346 = arith.negf %345 : vector<2x32xf32>
    %347 = math.exp %346 : vector<2x32xf32>
    %cst_91 = arith.constant 1.000000e+00 : f32
    %348 = vector.broadcast %cst_91 : f32 to vector<2x32xf32>
    %349 = arith.addf %348, %347 : vector<2x32xf32>
    %350 = arith.divf %348, %349 : vector<2x32xf32>
    %351 = vector.extract_strided_slice %332 {offsets = [2, 0, 0], sizes = [1, 32, 32], strides = [1, 1, 1]} : vector<4x32x32xf32> to vector<1x32x32xf32>
    %352 = vector.shape_cast %351 : vector<1x32x32xf32> to vector<32x32xf32>
    %cst_92 = arith.constant dense<0.000000e+00> : vector<2x32xf32>
    %353 = tpu.matmul %259, %352, %cst_92 {dimension_numbers = #tpu.dot_dimension_numbers<[1], [0], [0], [1], [0, 0, 1, 1], [], []>} : vector<2x32xf32>, vector<32x32xf32>, vector<2x32xf32> -> vector<2x32xf32>
    %354 = arith.addf %323, %353 : vector<2x32xf32>
    %355 = math.tanh %354 : vector<2x32xf32>
    %356 = vector.extract_strided_slice %332 {offsets = [3, 0, 0], sizes = [1, 32, 32], strides = [1, 1, 1]} : vector<4x32x32xf32> to vector<1x32x32xf32>
    %357 = vector.shape_cast %356 : vector<1x32x32xf32> to vector<32x32xf32>
    %cst_93 = arith.constant dense<0.000000e+00> : vector<2x32xf32>
    %358 = tpu.matmul %259, %357, %cst_93 {dimension_numbers = #tpu.dot_dimension_numbers<[1], [0], [0], [1], [0, 0, 1, 1], [], []>} : vector<2x32xf32>, vector<32x32xf32>, vector<2x32xf32> -> vector<2x32xf32>
    %359 = arith.addf %330, %358 : vector<2x32xf32>
    %360 = arith.negf %359 : vector<2x32xf32>
    %361 = math.exp %360 : vector<2x32xf32>
    %cst_94 = arith.constant 1.000000e+00 : f32
    %362 = vector.broadcast %cst_94 : f32 to vector<2x32xf32>
    %363 = arith.addf %362, %361 : vector<2x32xf32>
    %364 = arith.divf %362, %363 : vector<2x32xf32>
    %365 = arith.mulf %350, %257 : vector<2x32xf32>
    %366 = arith.mulf %341, %355 : vector<2x32xf32>
    %367 = arith.addf %365, %366 : vector<2x32xf32>
    %368 = math.tanh %367 : vector<2x32xf32>
    %369 = arith.mulf %364, %368 : vector<2x32xf32>
    %370 = vector.extract_strided_slice %84 {offsets = [6, 0], sizes = [2, 32], strides = [1, 1]} : vector<18x32xf32> to vector<2x32xf32>
    %371 = vector.extract_strided_slice %91 {offsets = [6, 0], sizes = [2, 32], strides = [1, 1]} : vector<18x32xf32> to vector<2x32xf32>
    %372 = vector.extract_strided_slice %98 {offsets = [6, 0], sizes = [2, 32], strides = [1, 1]} : vector<18x32xf32> to vector<2x32xf32>
    %373 = vector.extract_strided_slice %105 {offsets = [6, 0], sizes = [2, 32], strides = [1, 1]} : vector<18x32xf32> to vector<2x32xf32>
    %374 = vector.extract_strided_slice %1 {offsets = [0, 0, 0, 0], sizes = [1, 4, 32, 32], strides = [1, 1, 1, 1]} : vector<2x4x32x32xf32> to vector<1x4x32x32xf32>
    %375 = vector.shape_cast %374 : vector<1x4x32x32xf32> to vector<4x32x32xf32>
    %376 = vector.extract_strided_slice %375 {offsets = [0, 0, 0], sizes = [1, 32, 32], strides = [1, 1, 1]} : vector<4x32x32xf32> to vector<1x32x32xf32>
    %377 = vector.shape_cast %376 : vector<1x32x32xf32> to vector<32x32xf32>
    %cst_95 = arith.constant dense<0.000000e+00> : vector<2x32xf32>
    %378 = tpu.matmul %302, %377, %cst_95 {dimension_numbers = #tpu.dot_dimension_numbers<[1], [0], [0], [1], [0, 0, 1, 1], [], []>} : vector<2x32xf32>, vector<32x32xf32>, vector<2x32xf32> -> vector<2x32xf32>
    %379 = arith.addf %370, %378 : vector<2x32xf32>
    %380 = arith.negf %379 : vector<2x32xf32>
    %381 = math.exp %380 : vector<2x32xf32>
    %cst_96 = arith.constant 1.000000e+00 : f32
    %382 = vector.broadcast %cst_96 : f32 to vector<2x32xf32>
    %383 = arith.addf %382, %381 : vector<2x32xf32>
    %384 = arith.divf %382, %383 : vector<2x32xf32>
    %385 = vector.extract_strided_slice %375 {offsets = [1, 0, 0], sizes = [1, 32, 32], strides = [1, 1, 1]} : vector<4x32x32xf32> to vector<1x32x32xf32>
    %386 = vector.shape_cast %385 : vector<1x32x32xf32> to vector<32x32xf32>
    %cst_97 = arith.constant dense<0.000000e+00> : vector<2x32xf32>
    %387 = tpu.matmul %302, %386, %cst_97 {dimension_numbers = #tpu.dot_dimension_numbers<[1], [0], [0], [1], [0, 0, 1, 1], [], []>} : vector<2x32xf32>, vector<32x32xf32>, vector<2x32xf32> -> vector<2x32xf32>
    %388 = arith.addf %371, %387 : vector<2x32xf32>
    %389 = arith.negf %388 : vector<2x32xf32>
    %390 = math.exp %389 : vector<2x32xf32>
    %cst_98 = arith.constant 1.000000e+00 : f32
    %391 = vector.broadcast %cst_98 : f32 to vector<2x32xf32>
    %392 = arith.addf %391, %390 : vector<2x32xf32>
    %393 = arith.divf %391, %392 : vector<2x32xf32>
    %394 = vector.extract_strided_slice %375 {offsets = [2, 0, 0], sizes = [1, 32, 32], strides = [1, 1, 1]} : vector<4x32x32xf32> to vector<1x32x32xf32>
    %395 = vector.shape_cast %394 : vector<1x32x32xf32> to vector<32x32xf32>
    %cst_99 = arith.constant dense<0.000000e+00> : vector<2x32xf32>
    %396 = tpu.matmul %302, %395, %cst_99 {dimension_numbers = #tpu.dot_dimension_numbers<[1], [0], [0], [1], [0, 0, 1, 1], [], []>} : vector<2x32xf32>, vector<32x32xf32>, vector<2x32xf32> -> vector<2x32xf32>
    %397 = arith.addf %372, %396 : vector<2x32xf32>
    %398 = math.tanh %397 : vector<2x32xf32>
    %399 = vector.extract_strided_slice %375 {offsets = [3, 0, 0], sizes = [1, 32, 32], strides = [1, 1, 1]} : vector<4x32x32xf32> to vector<1x32x32xf32>
    %400 = vector.shape_cast %399 : vector<1x32x32xf32> to vector<32x32xf32>
    %cst_100 = arith.constant dense<0.000000e+00> : vector<2x32xf32>
    %401 = tpu.matmul %302, %400, %cst_100 {dimension_numbers = #tpu.dot_dimension_numbers<[1], [0], [0], [1], [0, 0, 1, 1], [], []>} : vector<2x32xf32>, vector<32x32xf32>, vector<2x32xf32> -> vector<2x32xf32>
    %402 = arith.addf %373, %401 : vector<2x32xf32>
    %403 = arith.negf %402 : vector<2x32xf32>
    %404 = math.exp %403 : vector<2x32xf32>
    %cst_101 = arith.constant 1.000000e+00 : f32
    %405 = vector.broadcast %cst_101 : f32 to vector<2x32xf32>
    %406 = arith.addf %405, %404 : vector<2x32xf32>
    %407 = arith.divf %405, %406 : vector<2x32xf32>
    %408 = arith.mulf %393, %300 : vector<2x32xf32>
    %409 = arith.mulf %384, %398 : vector<2x32xf32>
    %410 = arith.addf %408, %409 : vector<2x32xf32>
    %411 = math.tanh %410 : vector<2x32xf32>
    %412 = arith.mulf %407, %411 : vector<2x32xf32>
    %413 = vector.extract_strided_slice %0 {offsets = [1, 0, 0, 0], sizes = [1, 1, 32, 32], strides = [1, 1, 1, 1]} : vector<2x4x32x32xf32> to vector<1x1x32x32xf32>
    %414 = vector.shape_cast %413 : vector<1x1x32x32xf32> to vector<32x32xf32>
    %cst_102 = arith.constant dense<0.000000e+00> : vector<2x32xf32>
    %415 = tpu.matmul %302, %414, %cst_102 {dimension_numbers = #tpu.dot_dimension_numbers<[1], [0], [0], [1], [0, 0, 1, 1], [], []>} : vector<2x32xf32>, vector<32x32xf32>, vector<2x32xf32> -> vector<2x32xf32>
    %416 = vector.extract_strided_slice %2 {offsets = [1, 0, 0, 0], sizes = [1, 1, 1, 32], strides = [1, 1, 1, 1]} : vector<2x4x1x32xf32> to vector<1x1x1x32xf32>
    %417 = vector.shape_cast %416 : vector<1x1x1x32xf32> to vector<1x32xf32>
    %418 = vector.broadcast %417 : vector<1x32xf32> to vector<2x32xf32>
    %419 = arith.addf %415, %418 : vector<2x32xf32>
    %420 = vector.extract_strided_slice %0 {offsets = [1, 1, 0, 0], sizes = [1, 1, 32, 32], strides = [1, 1, 1, 1]} : vector<2x4x32x32xf32> to vector<1x1x32x32xf32>
    %421 = vector.shape_cast %420 : vector<1x1x32x32xf32> to vector<32x32xf32>
    %cst_103 = arith.constant dense<0.000000e+00> : vector<2x32xf32>
    %422 = tpu.matmul %302, %421, %cst_103 {dimension_numbers = #tpu.dot_dimension_numbers<[1], [0], [0], [1], [0, 0, 1, 1], [], []>} : vector<2x32xf32>, vector<32x32xf32>, vector<2x32xf32> -> vector<2x32xf32>
    %423 = vector.extract_strided_slice %2 {offsets = [1, 1, 0, 0], sizes = [1, 1, 1, 32], strides = [1, 1, 1, 1]} : vector<2x4x1x32xf32> to vector<1x1x1x32xf32>
    %424 = vector.shape_cast %423 : vector<1x1x1x32xf32> to vector<1x32xf32>
    %425 = vector.broadcast %424 : vector<1x32xf32> to vector<2x32xf32>
    %426 = arith.addf %422, %425 : vector<2x32xf32>
    %427 = vector.extract_strided_slice %0 {offsets = [1, 2, 0, 0], sizes = [1, 1, 32, 32], strides = [1, 1, 1, 1]} : vector<2x4x32x32xf32> to vector<1x1x32x32xf32>
    %428 = vector.shape_cast %427 : vector<1x1x32x32xf32> to vector<32x32xf32>
    %cst_104 = arith.constant dense<0.000000e+00> : vector<2x32xf32>
    %429 = tpu.matmul %302, %428, %cst_104 {dimension_numbers = #tpu.dot_dimension_numbers<[1], [0], [0], [1], [0, 0, 1, 1], [], []>} : vector<2x32xf32>, vector<32x32xf32>, vector<2x32xf32> -> vector<2x32xf32>
    %430 = vector.extract_strided_slice %2 {offsets = [1, 2, 0, 0], sizes = [1, 1, 1, 32], strides = [1, 1, 1, 1]} : vector<2x4x1x32xf32> to vector<1x1x1x32xf32>
    %431 = vector.shape_cast %430 : vector<1x1x1x32xf32> to vector<1x32xf32>
    %432 = vector.broadcast %431 : vector<1x32xf32> to vector<2x32xf32>
    %433 = arith.addf %429, %432 : vector<2x32xf32>
    %434 = vector.extract_strided_slice %0 {offsets = [1, 3, 0, 0], sizes = [1, 1, 32, 32], strides = [1, 1, 1, 1]} : vector<2x4x32x32xf32> to vector<1x1x32x32xf32>
    %435 = vector.shape_cast %434 : vector<1x1x32x32xf32> to vector<32x32xf32>
    %cst_105 = arith.constant dense<0.000000e+00> : vector<2x32xf32>
    %436 = tpu.matmul %302, %435, %cst_105 {dimension_numbers = #tpu.dot_dimension_numbers<[1], [0], [0], [1], [0, 0, 1, 1], [], []>} : vector<2x32xf32>, vector<32x32xf32>, vector<2x32xf32> -> vector<2x32xf32>
    %437 = vector.extract_strided_slice %2 {offsets = [1, 3, 0, 0], sizes = [1, 1, 1, 32], strides = [1, 1, 1, 1]} : vector<2x4x1x32xf32> to vector<1x1x1x32xf32>
    %438 = vector.shape_cast %437 : vector<1x1x1x32xf32> to vector<1x32xf32>
    %439 = vector.broadcast %438 : vector<1x32xf32> to vector<2x32xf32>
    %440 = arith.addf %436, %439 : vector<2x32xf32>
    %441 = vector.extract_strided_slice %1 {offsets = [1, 0, 0, 0], sizes = [1, 4, 32, 32], strides = [1, 1, 1, 1]} : vector<2x4x32x32xf32> to vector<1x4x32x32xf32>
    %442 = vector.shape_cast %441 : vector<1x4x32x32xf32> to vector<4x32x32xf32>
    %443 = vector.extract_strided_slice %442 {offsets = [0, 0, 0], sizes = [1, 32, 32], strides = [1, 1, 1]} : vector<4x32x32xf32> to vector<1x32x32xf32>
    %444 = vector.shape_cast %443 : vector<1x32x32xf32> to vector<32x32xf32>
    %cst_106 = arith.constant dense<0.000000e+00> : vector<2x32xf32>
    %445 = tpu.matmul %369, %444, %cst_106 {dimension_numbers = #tpu.dot_dimension_numbers<[1], [0], [0], [1], [0, 0, 1, 1], [], []>} : vector<2x32xf32>, vector<32x32xf32>, vector<2x32xf32> -> vector<2x32xf32>
    %446 = arith.addf %419, %445 : vector<2x32xf32>
    %447 = arith.negf %446 : vector<2x32xf32>
    %448 = math.exp %447 : vector<2x32xf32>
    %cst_107 = arith.constant 1.000000e+00 : f32
    %449 = vector.broadcast %cst_107 : f32 to vector<2x32xf32>
    %450 = arith.addf %449, %448 : vector<2x32xf32>
    %451 = arith.divf %449, %450 : vector<2x32xf32>
    %452 = vector.extract_strided_slice %442 {offsets = [1, 0, 0], sizes = [1, 32, 32], strides = [1, 1, 1]} : vector<4x32x32xf32> to vector<1x32x32xf32>
    %453 = vector.shape_cast %452 : vector<1x32x32xf32> to vector<32x32xf32>
    %cst_108 = arith.constant dense<0.000000e+00> : vector<2x32xf32>
    %454 = tpu.matmul %369, %453, %cst_108 {dimension_numbers = #tpu.dot_dimension_numbers<[1], [0], [0], [1], [0, 0, 1, 1], [], []>} : vector<2x32xf32>, vector<32x32xf32>, vector<2x32xf32> -> vector<2x32xf32>
    %455 = arith.addf %426, %454 : vector<2x32xf32>
    %456 = arith.negf %455 : vector<2x32xf32>
    %457 = math.exp %456 : vector<2x32xf32>
    %cst_109 = arith.constant 1.000000e+00 : f32
    %458 = vector.broadcast %cst_109 : f32 to vector<2x32xf32>
    %459 = arith.addf %458, %457 : vector<2x32xf32>
    %460 = arith.divf %458, %459 : vector<2x32xf32>
    %461 = vector.extract_strided_slice %442 {offsets = [2, 0, 0], sizes = [1, 32, 32], strides = [1, 1, 1]} : vector<4x32x32xf32> to vector<1x32x32xf32>
    %462 = vector.shape_cast %461 : vector<1x32x32xf32> to vector<32x32xf32>
    %cst_110 = arith.constant dense<0.000000e+00> : vector<2x32xf32>
    %463 = tpu.matmul %369, %462, %cst_110 {dimension_numbers = #tpu.dot_dimension_numbers<[1], [0], [0], [1], [0, 0, 1, 1], [], []>} : vector<2x32xf32>, vector<32x32xf32>, vector<2x32xf32> -> vector<2x32xf32>
    %464 = arith.addf %433, %463 : vector<2x32xf32>
    %465 = math.tanh %464 : vector<2x32xf32>
    %466 = vector.extract_strided_slice %442 {offsets = [3, 0, 0], sizes = [1, 32, 32], strides = [1, 1, 1]} : vector<4x32x32xf32> to vector<1x32x32xf32>
    %467 = vector.shape_cast %466 : vector<1x32x32xf32> to vector<32x32xf32>
    %cst_111 = arith.constant dense<0.000000e+00> : vector<2x32xf32>
    %468 = tpu.matmul %369, %467, %cst_111 {dimension_numbers = #tpu.dot_dimension_numbers<[1], [0], [0], [1], [0, 0, 1, 1], [], []>} : vector<2x32xf32>, vector<32x32xf32>, vector<2x32xf32> -> vector<2x32xf32>
    %469 = arith.addf %440, %468 : vector<2x32xf32>
    %470 = arith.negf %469 : vector<2x32xf32>
    %471 = math.exp %470 : vector<2x32xf32>
    %cst_112 = arith.constant 1.000000e+00 : f32
    %472 = vector.broadcast %cst_112 : f32 to vector<2x32xf32>
    %473 = arith.addf %472, %471 : vector<2x32xf32>
    %474 = arith.divf %472, %473 : vector<2x32xf32>
    %475 = arith.mulf %460, %367 : vector<2x32xf32>
    %476 = arith.mulf %451, %465 : vector<2x32xf32>
    %477 = arith.addf %475, %476 : vector<2x32xf32>
    %478 = math.tanh %477 : vector<2x32xf32>
    %479 = arith.mulf %474, %478 : vector<2x32xf32>
    %480 = vector.extract_strided_slice %84 {offsets = [8, 0], sizes = [2, 32], strides = [1, 1]} : vector<18x32xf32> to vector<2x32xf32>
    %481 = vector.extract_strided_slice %91 {offsets = [8, 0], sizes = [2, 32], strides = [1, 1]} : vector<18x32xf32> to vector<2x32xf32>
    %482 = vector.extract_strided_slice %98 {offsets = [8, 0], sizes = [2, 32], strides = [1, 1]} : vector<18x32xf32> to vector<2x32xf32>
    %483 = vector.extract_strided_slice %105 {offsets = [8, 0], sizes = [2, 32], strides = [1, 1]} : vector<18x32xf32> to vector<2x32xf32>
    %484 = vector.extract_strided_slice %1 {offsets = [0, 0, 0, 0], sizes = [1, 4, 32, 32], strides = [1, 1, 1, 1]} : vector<2x4x32x32xf32> to vector<1x4x32x32xf32>
    %485 = vector.shape_cast %484 : vector<1x4x32x32xf32> to vector<4x32x32xf32>
    %486 = vector.extract_strided_slice %485 {offsets = [0, 0, 0], sizes = [1, 32, 32], strides = [1, 1, 1]} : vector<4x32x32xf32> to vector<1x32x32xf32>
    %487 = vector.shape_cast %486 : vector<1x32x32xf32> to vector<32x32xf32>
    %cst_113 = arith.constant dense<0.000000e+00> : vector<2x32xf32>
    %488 = tpu.matmul %412, %487, %cst_113 {dimension_numbers = #tpu.dot_dimension_numbers<[1], [0], [0], [1], [0, 0, 1, 1], [], []>} : vector<2x32xf32>, vector<32x32xf32>, vector<2x32xf32> -> vector<2x32xf32>
    %489 = arith.addf %480, %488 : vector<2x32xf32>
    %490 = arith.negf %489 : vector<2x32xf32>
    %491 = math.exp %490 : vector<2x32xf32>
    %cst_114 = arith.constant 1.000000e+00 : f32
    %492 = vector.broadcast %cst_114 : f32 to vector<2x32xf32>
    %493 = arith.addf %492, %491 : vector<2x32xf32>
    %494 = arith.divf %492, %493 : vector<2x32xf32>
    %495 = vector.extract_strided_slice %485 {offsets = [1, 0, 0], sizes = [1, 32, 32], strides = [1, 1, 1]} : vector<4x32x32xf32> to vector<1x32x32xf32>
    %496 = vector.shape_cast %495 : vector<1x32x32xf32> to vector<32x32xf32>
    %cst_115 = arith.constant dense<0.000000e+00> : vector<2x32xf32>
    %497 = tpu.matmul %412, %496, %cst_115 {dimension_numbers = #tpu.dot_dimension_numbers<[1], [0], [0], [1], [0, 0, 1, 1], [], []>} : vector<2x32xf32>, vector<32x32xf32>, vector<2x32xf32> -> vector<2x32xf32>
    %498 = arith.addf %481, %497 : vector<2x32xf32>
    %499 = arith.negf %498 : vector<2x32xf32>
    %500 = math.exp %499 : vector<2x32xf32>
    %cst_116 = arith.constant 1.000000e+00 : f32
    %501 = vector.broadcast %cst_116 : f32 to vector<2x32xf32>
    %502 = arith.addf %501, %500 : vector<2x32xf32>
    %503 = arith.divf %501, %502 : vector<2x32xf32>
    %504 = vector.extract_strided_slice %485 {offsets = [2, 0, 0], sizes = [1, 32, 32], strides = [1, 1, 1]} : vector<4x32x32xf32> to vector<1x32x32xf32>
    %505 = vector.shape_cast %504 : vector<1x32x32xf32> to vector<32x32xf32>
    %cst_117 = arith.constant dense<0.000000e+00> : vector<2x32xf32>
    %506 = tpu.matmul %412, %505, %cst_117 {dimension_numbers = #tpu.dot_dimension_numbers<[1], [0], [0], [1], [0, 0, 1, 1], [], []>} : vector<2x32xf32>, vector<32x32xf32>, vector<2x32xf32> -> vector<2x32xf32>
    %507 = arith.addf %482, %506 : vector<2x32xf32>
    %508 = math.tanh %507 : vector<2x32xf32>
    %509 = vector.extract_strided_slice %485 {offsets = [3, 0, 0], sizes = [1, 32, 32], strides = [1, 1, 1]} : vector<4x32x32xf32> to vector<1x32x32xf32>
    %510 = vector.shape_cast %509 : vector<1x32x32xf32> to vector<32x32xf32>
    %cst_118 = arith.constant dense<0.000000e+00> : vector<2x32xf32>
    %511 = tpu.matmul %412, %510, %cst_118 {dimension_numbers = #tpu.dot_dimension_numbers<[1], [0], [0], [1], [0, 0, 1, 1], [], []>} : vector<2x32xf32>, vector<32x32xf32>, vector<2x32xf32> -> vector<2x32xf32>
    %512 = arith.addf %483, %511 : vector<2x32xf32>
    %513 = arith.negf %512 : vector<2x32xf32>
    %514 = math.exp %513 : vector<2x32xf32>
    %cst_119 = arith.constant 1.000000e+00 : f32
    %515 = vector.broadcast %cst_119 : f32 to vector<2x32xf32>
    %516 = arith.addf %515, %514 : vector<2x32xf32>
    %517 = arith.divf %515, %516 : vector<2x32xf32>
    %518 = arith.mulf %503, %410 : vector<2x32xf32>
    %519 = arith.mulf %494, %508 : vector<2x32xf32>
    %520 = arith.addf %518, %519 : vector<2x32xf32>
    %521 = math.tanh %520 : vector<2x32xf32>
    %522 = arith.mulf %517, %521 : vector<2x32xf32>
    %523 = vector.extract_strided_slice %0 {offsets = [1, 0, 0, 0], sizes = [1, 1, 32, 32], strides = [1, 1, 1, 1]} : vector<2x4x32x32xf32> to vector<1x1x32x32xf32>
    %524 = vector.shape_cast %523 : vector<1x1x32x32xf32> to vector<32x32xf32>
    %cst_120 = arith.constant dense<0.000000e+00> : vector<2x32xf32>
    %525 = tpu.matmul %412, %524, %cst_120 {dimension_numbers = #tpu.dot_dimension_numbers<[1], [0], [0], [1], [0, 0, 1, 1], [], []>} : vector<2x32xf32>, vector<32x32xf32>, vector<2x32xf32> -> vector<2x32xf32>
    %526 = vector.extract_strided_slice %2 {offsets = [1, 0, 0, 0], sizes = [1, 1, 1, 32], strides = [1, 1, 1, 1]} : vector<2x4x1x32xf32> to vector<1x1x1x32xf32>
    %527 = vector.shape_cast %526 : vector<1x1x1x32xf32> to vector<1x32xf32>
    %528 = vector.broadcast %527 : vector<1x32xf32> to vector<2x32xf32>
    %529 = arith.addf %525, %528 : vector<2x32xf32>
    %530 = vector.extract_strided_slice %0 {offsets = [1, 1, 0, 0], sizes = [1, 1, 32, 32], strides = [1, 1, 1, 1]} : vector<2x4x32x32xf32> to vector<1x1x32x32xf32>
    %531 = vector.shape_cast %530 : vector<1x1x32x32xf32> to vector<32x32xf32>
    %cst_121 = arith.constant dense<0.000000e+00> : vector<2x32xf32>
    %532 = tpu.matmul %412, %531, %cst_121 {dimension_numbers = #tpu.dot_dimension_numbers<[1], [0], [0], [1], [0, 0, 1, 1], [], []>} : vector<2x32xf32>, vector<32x32xf32>, vector<2x32xf32> -> vector<2x32xf32>
    %533 = vector.extract_strided_slice %2 {offsets = [1, 1, 0, 0], sizes = [1, 1, 1, 32], strides = [1, 1, 1, 1]} : vector<2x4x1x32xf32> to vector<1x1x1x32xf32>
    %534 = vector.shape_cast %533 : vector<1x1x1x32xf32> to vector<1x32xf32>
    %535 = vector.broadcast %534 : vector<1x32xf32> to vector<2x32xf32>
    %536 = arith.addf %532, %535 : vector<2x32xf32>
    %537 = vector.extract_strided_slice %0 {offsets = [1, 2, 0, 0], sizes = [1, 1, 32, 32], strides = [1, 1, 1, 1]} : vector<2x4x32x32xf32> to vector<1x1x32x32xf32>
    %538 = vector.shape_cast %537 : vector<1x1x32x32xf32> to vector<32x32xf32>
    %cst_122 = arith.constant dense<0.000000e+00> : vector<2x32xf32>
    %539 = tpu.matmul %412, %538, %cst_122 {dimension_numbers = #tpu.dot_dimension_numbers<[1], [0], [0], [1], [0, 0, 1, 1], [], []>} : vector<2x32xf32>, vector<32x32xf32>, vector<2x32xf32> -> vector<2x32xf32>
    %540 = vector.extract_strided_slice %2 {offsets = [1, 2, 0, 0], sizes = [1, 1, 1, 32], strides = [1, 1, 1, 1]} : vector<2x4x1x32xf32> to vector<1x1x1x32xf32>
    %541 = vector.shape_cast %540 : vector<1x1x1x32xf32> to vector<1x32xf32>
    %542 = vector.broadcast %541 : vector<1x32xf32> to vector<2x32xf32>
    %543 = arith.addf %539, %542 : vector<2x32xf32>
    %544 = vector.extract_strided_slice %0 {offsets = [1, 3, 0, 0], sizes = [1, 1, 32, 32], strides = [1, 1, 1, 1]} : vector<2x4x32x32xf32> to vector<1x1x32x32xf32>
    %545 = vector.shape_cast %544 : vector<1x1x32x32xf32> to vector<32x32xf32>
    %cst_123 = arith.constant dense<0.000000e+00> : vector<2x32xf32>
    %546 = tpu.matmul %412, %545, %cst_123 {dimension_numbers = #tpu.dot_dimension_numbers<[1], [0], [0], [1], [0, 0, 1, 1], [], []>} : vector<2x32xf32>, vector<32x32xf32>, vector<2x32xf32> -> vector<2x32xf32>
    %547 = vector.extract_strided_slice %2 {offsets = [1, 3, 0, 0], sizes = [1, 1, 1, 32], strides = [1, 1, 1, 1]} : vector<2x4x1x32xf32> to vector<1x1x1x32xf32>
    %548 = vector.shape_cast %547 : vector<1x1x1x32xf32> to vector<1x32xf32>
    %549 = vector.broadcast %548 : vector<1x32xf32> to vector<2x32xf32>
    %550 = arith.addf %546, %549 : vector<2x32xf32>
    %551 = vector.extract_strided_slice %1 {offsets = [1, 0, 0, 0], sizes = [1, 4, 32, 32], strides = [1, 1, 1, 1]} : vector<2x4x32x32xf32> to vector<1x4x32x32xf32>
    %552 = vector.shape_cast %551 : vector<1x4x32x32xf32> to vector<4x32x32xf32>
    %553 = vector.extract_strided_slice %552 {offsets = [0, 0, 0], sizes = [1, 32, 32], strides = [1, 1, 1]} : vector<4x32x32xf32> to vector<1x32x32xf32>
    %554 = vector.shape_cast %553 : vector<1x32x32xf32> to vector<32x32xf32>
    %cst_124 = arith.constant dense<0.000000e+00> : vector<2x32xf32>
    %555 = tpu.matmul %479, %554, %cst_124 {dimension_numbers = #tpu.dot_dimension_numbers<[1], [0], [0], [1], [0, 0, 1, 1], [], []>} : vector<2x32xf32>, vector<32x32xf32>, vector<2x32xf32> -> vector<2x32xf32>
    %556 = arith.addf %529, %555 : vector<2x32xf32>
    %557 = arith.negf %556 : vector<2x32xf32>
    %558 = math.exp %557 : vector<2x32xf32>
    %cst_125 = arith.constant 1.000000e+00 : f32
    %559 = vector.broadcast %cst_125 : f32 to vector<2x32xf32>
    %560 = arith.addf %559, %558 : vector<2x32xf32>
    %561 = arith.divf %559, %560 : vector<2x32xf32>
    %562 = vector.extract_strided_slice %552 {offsets = [1, 0, 0], sizes = [1, 32, 32], strides = [1, 1, 1]} : vector<4x32x32xf32> to vector<1x32x32xf32>
    %563 = vector.shape_cast %562 : vector<1x32x32xf32> to vector<32x32xf32>
    %cst_126 = arith.constant dense<0.000000e+00> : vector<2x32xf32>
    %564 = tpu.matmul %479, %563, %cst_126 {dimension_numbers = #tpu.dot_dimension_numbers<[1], [0], [0], [1], [0, 0, 1, 1], [], []>} : vector<2x32xf32>, vector<32x32xf32>, vector<2x32xf32> -> vector<2x32xf32>
    %565 = arith.addf %536, %564 : vector<2x32xf32>
    %566 = arith.negf %565 : vector<2x32xf32>
    %567 = math.exp %566 : vector<2x32xf32>
    %cst_127 = arith.constant 1.000000e+00 : f32
    %568 = vector.broadcast %cst_127 : f32 to vector<2x32xf32>
    %569 = arith.addf %568, %567 : vector<2x32xf32>
    %570 = arith.divf %568, %569 : vector<2x32xf32>
    %571 = vector.extract_strided_slice %552 {offsets = [2, 0, 0], sizes = [1, 32, 32], strides = [1, 1, 1]} : vector<4x32x32xf32> to vector<1x32x32xf32>
    %572 = vector.shape_cast %571 : vector<1x32x32xf32> to vector<32x32xf32>
    %cst_128 = arith.constant dense<0.000000e+00> : vector<2x32xf32>
    %573 = tpu.matmul %479, %572, %cst_128 {dimension_numbers = #tpu.dot_dimension_numbers<[1], [0], [0], [1], [0, 0, 1, 1], [], []>} : vector<2x32xf32>, vector<32x32xf32>, vector<2x32xf32> -> vector<2x32xf32>
    %574 = arith.addf %543, %573 : vector<2x32xf32>
    %575 = math.tanh %574 : vector<2x32xf32>
    %576 = vector.extract_strided_slice %552 {offsets = [3, 0, 0], sizes = [1, 32, 32], strides = [1, 1, 1]} : vector<4x32x32xf32> to vector<1x32x32xf32>
    %577 = vector.shape_cast %576 : vector<1x32x32xf32> to vector<32x32xf32>
    %cst_129 = arith.constant dense<0.000000e+00> : vector<2x32xf32>
    %578 = tpu.matmul %479, %577, %cst_129 {dimension_numbers = #tpu.dot_dimension_numbers<[1], [0], [0], [1], [0, 0, 1, 1], [], []>} : vector<2x32xf32>, vector<32x32xf32>, vector<2x32xf32> -> vector<2x32xf32>
    %579 = arith.addf %550, %578 : vector<2x32xf32>
    %580 = arith.negf %579 : vector<2x32xf32>
    %581 = math.exp %580 : vector<2x32xf32>
    %cst_130 = arith.constant 1.000000e+00 : f32
    %582 = vector.broadcast %cst_130 : f32 to vector<2x32xf32>
    %583 = arith.addf %582, %581 : vector<2x32xf32>
    %584 = arith.divf %582, %583 : vector<2x32xf32>
    %585 = arith.mulf %570, %477 : vector<2x32xf32>
    %586 = arith.mulf %561, %575 : vector<2x32xf32>
    %587 = arith.addf %585, %586 : vector<2x32xf32>
    %588 = math.tanh %587 : vector<2x32xf32>
    %589 = arith.mulf %584, %588 : vector<2x32xf32>
    %590 = vector.extract_strided_slice %84 {offsets = [10, 0], sizes = [2, 32], strides = [1, 1]} : vector<18x32xf32> to vector<2x32xf32>
    %591 = vector.extract_strided_slice %91 {offsets = [10, 0], sizes = [2, 32], strides = [1, 1]} : vector<18x32xf32> to vector<2x32xf32>
    %592 = vector.extract_strided_slice %98 {offsets = [10, 0], sizes = [2, 32], strides = [1, 1]} : vector<18x32xf32> to vector<2x32xf32>
    %593 = vector.extract_strided_slice %105 {offsets = [10, 0], sizes = [2, 32], strides = [1, 1]} : vector<18x32xf32> to vector<2x32xf32>
    %594 = vector.extract_strided_slice %1 {offsets = [0, 0, 0, 0], sizes = [1, 4, 32, 32], strides = [1, 1, 1, 1]} : vector<2x4x32x32xf32> to vector<1x4x32x32xf32>
    %595 = vector.shape_cast %594 : vector<1x4x32x32xf32> to vector<4x32x32xf32>
    %596 = vector.extract_strided_slice %595 {offsets = [0, 0, 0], sizes = [1, 32, 32], strides = [1, 1, 1]} : vector<4x32x32xf32> to vector<1x32x32xf32>
    %597 = vector.shape_cast %596 : vector<1x32x32xf32> to vector<32x32xf32>
    %cst_131 = arith.constant dense<0.000000e+00> : vector<2x32xf32>
    %598 = tpu.matmul %522, %597, %cst_131 {dimension_numbers = #tpu.dot_dimension_numbers<[1], [0], [0], [1], [0, 0, 1, 1], [], []>} : vector<2x32xf32>, vector<32x32xf32>, vector<2x32xf32> -> vector<2x32xf32>
    %599 = arith.addf %590, %598 : vector<2x32xf32>
    %600 = arith.negf %599 : vector<2x32xf32>
    %601 = math.exp %600 : vector<2x32xf32>
    %cst_132 = arith.constant 1.000000e+00 : f32
    %602 = vector.broadcast %cst_132 : f32 to vector<2x32xf32>
    %603 = arith.addf %602, %601 : vector<2x32xf32>
    %604 = arith.divf %602, %603 : vector<2x32xf32>
    %605 = vector.extract_strided_slice %595 {offsets = [1, 0, 0], sizes = [1, 32, 32], strides = [1, 1, 1]} : vector<4x32x32xf32> to vector<1x32x32xf32>
    %606 = vector.shape_cast %605 : vector<1x32x32xf32> to vector<32x32xf32>
    %cst_133 = arith.constant dense<0.000000e+00> : vector<2x32xf32>
    %607 = tpu.matmul %522, %606, %cst_133 {dimension_numbers = #tpu.dot_dimension_numbers<[1], [0], [0], [1], [0, 0, 1, 1], [], []>} : vector<2x32xf32>, vector<32x32xf32>, vector<2x32xf32> -> vector<2x32xf32>
    %608 = arith.addf %591, %607 : vector<2x32xf32>
    %609 = arith.negf %608 : vector<2x32xf32>
    %610 = math.exp %609 : vector<2x32xf32>
    %cst_134 = arith.constant 1.000000e+00 : f32
    %611 = vector.broadcast %cst_134 : f32 to vector<2x32xf32>
    %612 = arith.addf %611, %610 : vector<2x32xf32>
    %613 = arith.divf %611, %612 : vector<2x32xf32>
    %614 = vector.extract_strided_slice %595 {offsets = [2, 0, 0], sizes = [1, 32, 32], strides = [1, 1, 1]} : vector<4x32x32xf32> to vector<1x32x32xf32>
    %615 = vector.shape_cast %614 : vector<1x32x32xf32> to vector<32x32xf32>
    %cst_135 = arith.constant dense<0.000000e+00> : vector<2x32xf32>
    %616 = tpu.matmul %522, %615, %cst_135 {dimension_numbers = #tpu.dot_dimension_numbers<[1], [0], [0], [1], [0, 0, 1, 1], [], []>} : vector<2x32xf32>, vector<32x32xf32>, vector<2x32xf32> -> vector<2x32xf32>
    %617 = arith.addf %592, %616 : vector<2x32xf32>
    %618 = math.tanh %617 : vector<2x32xf32>
    %619 = vector.extract_strided_slice %595 {offsets = [3, 0, 0], sizes = [1, 32, 32], strides = [1, 1, 1]} : vector<4x32x32xf32> to vector<1x32x32xf32>
    %620 = vector.shape_cast %619 : vector<1x32x32xf32> to vector<32x32xf32>
    %cst_136 = arith.constant dense<0.000000e+00> : vector<2x32xf32>
    %621 = tpu.matmul %522, %620, %cst_136 {dimension_numbers = #tpu.dot_dimension_numbers<[1], [0], [0], [1], [0, 0, 1, 1], [], []>} : vector<2x32xf32>, vector<32x32xf32>, vector<2x32xf32> -> vector<2x32xf32>
    %622 = arith.addf %593, %621 : vector<2x32xf32>
    %623 = arith.negf %622 : vector<2x32xf32>
    %624 = math.exp %623 : vector<2x32xf32>
    %cst_137 = arith.constant 1.000000e+00 : f32
    %625 = vector.broadcast %cst_137 : f32 to vector<2x32xf32>
    %626 = arith.addf %625, %624 : vector<2x32xf32>
    %627 = arith.divf %625, %626 : vector<2x32xf32>
    %628 = arith.mulf %613, %520 : vector<2x32xf32>
    %629 = arith.mulf %604, %618 : vector<2x32xf32>
    %630 = arith.addf %628, %629 : vector<2x32xf32>
    %631 = math.tanh %630 : vector<2x32xf32>
    %632 = arith.mulf %627, %631 : vector<2x32xf32>
    %633 = vector.extract_strided_slice %0 {offsets = [1, 0, 0, 0], sizes = [1, 1, 32, 32], strides = [1, 1, 1, 1]} : vector<2x4x32x32xf32> to vector<1x1x32x32xf32>
    %634 = vector.shape_cast %633 : vector<1x1x32x32xf32> to vector<32x32xf32>
    %cst_138 = arith.constant dense<0.000000e+00> : vector<2x32xf32>
    %635 = tpu.matmul %522, %634, %cst_138 {dimension_numbers = #tpu.dot_dimension_numbers<[1], [0], [0], [1], [0, 0, 1, 1], [], []>} : vector<2x32xf32>, vector<32x32xf32>, vector<2x32xf32> -> vector<2x32xf32>
    %636 = vector.extract_strided_slice %2 {offsets = [1, 0, 0, 0], sizes = [1, 1, 1, 32], strides = [1, 1, 1, 1]} : vector<2x4x1x32xf32> to vector<1x1x1x32xf32>
    %637 = vector.shape_cast %636 : vector<1x1x1x32xf32> to vector<1x32xf32>
    %638 = vector.broadcast %637 : vector<1x32xf32> to vector<2x32xf32>
    %639 = arith.addf %635, %638 : vector<2x32xf32>
    %640 = vector.extract_strided_slice %0 {offsets = [1, 1, 0, 0], sizes = [1, 1, 32, 32], strides = [1, 1, 1, 1]} : vector<2x4x32x32xf32> to vector<1x1x32x32xf32>
    %641 = vector.shape_cast %640 : vector<1x1x32x32xf32> to vector<32x32xf32>
    %cst_139 = arith.constant dense<0.000000e+00> : vector<2x32xf32>
    %642 = tpu.matmul %522, %641, %cst_139 {dimension_numbers = #tpu.dot_dimension_numbers<[1], [0], [0], [1], [0, 0, 1, 1], [], []>} : vector<2x32xf32>, vector<32x32xf32>, vector<2x32xf32> -> vector<2x32xf32>
    %643 = vector.extract_strided_slice %2 {offsets = [1, 1, 0, 0], sizes = [1, 1, 1, 32], strides = [1, 1, 1, 1]} : vector<2x4x1x32xf32> to vector<1x1x1x32xf32>
    %644 = vector.shape_cast %643 : vector<1x1x1x32xf32> to vector<1x32xf32>
    %645 = vector.broadcast %644 : vector<1x32xf32> to vector<2x32xf32>
    %646 = arith.addf %642, %645 : vector<2x32xf32>
    %647 = vector.extract_strided_slice %0 {offsets = [1, 2, 0, 0], sizes = [1, 1, 32, 32], strides = [1, 1, 1, 1]} : vector<2x4x32x32xf32> to vector<1x1x32x32xf32>
    %648 = vector.shape_cast %647 : vector<1x1x32x32xf32> to vector<32x32xf32>
    %cst_140 = arith.constant dense<0.000000e+00> : vector<2x32xf32>
    %649 = tpu.matmul %522, %648, %cst_140 {dimension_numbers = #tpu.dot_dimension_numbers<[1], [0], [0], [1], [0, 0, 1, 1], [], []>} : vector<2x32xf32>, vector<32x32xf32>, vector<2x32xf32> -> vector<2x32xf32>
    %650 = vector.extract_strided_slice %2 {offsets = [1, 2, 0, 0], sizes = [1, 1, 1, 32], strides = [1, 1, 1, 1]} : vector<2x4x1x32xf32> to vector<1x1x1x32xf32>
    %651 = vector.shape_cast %650 : vector<1x1x1x32xf32> to vector<1x32xf32>
    %652 = vector.broadcast %651 : vector<1x32xf32> to vector<2x32xf32>
    %653 = arith.addf %649, %652 : vector<2x32xf32>
    %654 = vector.extract_strided_slice %0 {offsets = [1, 3, 0, 0], sizes = [1, 1, 32, 32], strides = [1, 1, 1, 1]} : vector<2x4x32x32xf32> to vector<1x1x32x32xf32>
    %655 = vector.shape_cast %654 : vector<1x1x32x32xf32> to vector<32x32xf32>
    %cst_141 = arith.constant dense<0.000000e+00> : vector<2x32xf32>
    %656 = tpu.matmul %522, %655, %cst_141 {dimension_numbers = #tpu.dot_dimension_numbers<[1], [0], [0], [1], [0, 0, 1, 1], [], []>} : vector<2x32xf32>, vector<32x32xf32>, vector<2x32xf32> -> vector<2x32xf32>
    %657 = vector.extract_strided_slice %2 {offsets = [1, 3, 0, 0], sizes = [1, 1, 1, 32], strides = [1, 1, 1, 1]} : vector<2x4x1x32xf32> to vector<1x1x1x32xf32>
    %658 = vector.shape_cast %657 : vector<1x1x1x32xf32> to vector<1x32xf32>
    %659 = vector.broadcast %658 : vector<1x32xf32> to vector<2x32xf32>
    %660 = arith.addf %656, %659 : vector<2x32xf32>
    %661 = vector.extract_strided_slice %1 {offsets = [1, 0, 0, 0], sizes = [1, 4, 32, 32], strides = [1, 1, 1, 1]} : vector<2x4x32x32xf32> to vector<1x4x32x32xf32>
    %662 = vector.shape_cast %661 : vector<1x4x32x32xf32> to vector<4x32x32xf32>
    %663 = vector.extract_strided_slice %662 {offsets = [0, 0, 0], sizes = [1, 32, 32], strides = [1, 1, 1]} : vector<4x32x32xf32> to vector<1x32x32xf32>
    %664 = vector.shape_cast %663 : vector<1x32x32xf32> to vector<32x32xf32>
    %cst_142 = arith.constant dense<0.000000e+00> : vector<2x32xf32>
    %665 = tpu.matmul %589, %664, %cst_142 {dimension_numbers = #tpu.dot_dimension_numbers<[1], [0], [0], [1], [0, 0, 1, 1], [], []>} : vector<2x32xf32>, vector<32x32xf32>, vector<2x32xf32> -> vector<2x32xf32>
    %666 = arith.addf %639, %665 : vector<2x32xf32>
    %667 = arith.negf %666 : vector<2x32xf32>
    %668 = math.exp %667 : vector<2x32xf32>
    %cst_143 = arith.constant 1.000000e+00 : f32
    %669 = vector.broadcast %cst_143 : f32 to vector<2x32xf32>
    %670 = arith.addf %669, %668 : vector<2x32xf32>
    %671 = arith.divf %669, %670 : vector<2x32xf32>
    %672 = vector.extract_strided_slice %662 {offsets = [1, 0, 0], sizes = [1, 32, 32], strides = [1, 1, 1]} : vector<4x32x32xf32> to vector<1x32x32xf32>
    %673 = vector.shape_cast %672 : vector<1x32x32xf32> to vector<32x32xf32>
    %cst_144 = arith.constant dense<0.000000e+00> : vector<2x32xf32>
    %674 = tpu.matmul %589, %673, %cst_144 {dimension_numbers = #tpu.dot_dimension_numbers<[1], [0], [0], [1], [0, 0, 1, 1], [], []>} : vector<2x32xf32>, vector<32x32xf32>, vector<2x32xf32> -> vector<2x32xf32>
    %675 = arith.addf %646, %674 : vector<2x32xf32>
    %676 = arith.negf %675 : vector<2x32xf32>
    %677 = math.exp %676 : vector<2x32xf32>
    %cst_145 = arith.constant 1.000000e+00 : f32
    %678 = vector.broadcast %cst_145 : f32 to vector<2x32xf32>
    %679 = arith.addf %678, %677 : vector<2x32xf32>
    %680 = arith.divf %678, %679 : vector<2x32xf32>
    %681 = vector.extract_strided_slice %662 {offsets = [2, 0, 0], sizes = [1, 32, 32], strides = [1, 1, 1]} : vector<4x32x32xf32> to vector<1x32x32xf32>
    %682 = vector.shape_cast %681 : vector<1x32x32xf32> to vector<32x32xf32>
    %cst_146 = arith.constant dense<0.000000e+00> : vector<2x32xf32>
    %683 = tpu.matmul %589, %682, %cst_146 {dimension_numbers = #tpu.dot_dimension_numbers<[1], [0], [0], [1], [0, 0, 1, 1], [], []>} : vector<2x32xf32>, vector<32x32xf32>, vector<2x32xf32> -> vector<2x32xf32>
    %684 = arith.addf %653, %683 : vector<2x32xf32>
    %685 = math.tanh %684 : vector<2x32xf32>
    %686 = vector.extract_strided_slice %662 {offsets = [3, 0, 0], sizes = [1, 32, 32], strides = [1, 1, 1]} : vector<4x32x32xf32> to vector<1x32x32xf32>
    %687 = vector.shape_cast %686 : vector<1x32x32xf32> to vector<32x32xf32>
    %cst_147 = arith.constant dense<0.000000e+00> : vector<2x32xf32>
    %688 = tpu.matmul %589, %687, %cst_147 {dimension_numbers = #tpu.dot_dimension_numbers<[1], [0], [0], [1], [0, 0, 1, 1], [], []>} : vector<2x32xf32>, vector<32x32xf32>, vector<2x32xf32> -> vector<2x32xf32>
    %689 = arith.addf %660, %688 : vector<2x32xf32>
    %690 = arith.negf %689 : vector<2x32xf32>
    %691 = math.exp %690 : vector<2x32xf32>
    %cst_148 = arith.constant 1.000000e+00 : f32
    %692 = vector.broadcast %cst_148 : f32 to vector<2x32xf32>
    %693 = arith.addf %692, %691 : vector<2x32xf32>
    %694 = arith.divf %692, %693 : vector<2x32xf32>
    %695 = arith.mulf %680, %587 : vector<2x32xf32>
    %696 = arith.mulf %671, %685 : vector<2x32xf32>
    %697 = arith.addf %695, %696 : vector<2x32xf32>
    %698 = math.tanh %697 : vector<2x32xf32>
    %699 = arith.mulf %694, %698 : vector<2x32xf32>
    %700 = vector.extract_strided_slice %84 {offsets = [12, 0], sizes = [2, 32], strides = [1, 1]} : vector<18x32xf32> to vector<2x32xf32>
    %701 = vector.extract_strided_slice %91 {offsets = [12, 0], sizes = [2, 32], strides = [1, 1]} : vector<18x32xf32> to vector<2x32xf32>
    %702 = vector.extract_strided_slice %98 {offsets = [12, 0], sizes = [2, 32], strides = [1, 1]} : vector<18x32xf32> to vector<2x32xf32>
    %703 = vector.extract_strided_slice %105 {offsets = [12, 0], sizes = [2, 32], strides = [1, 1]} : vector<18x32xf32> to vector<2x32xf32>
    %704 = vector.extract_strided_slice %1 {offsets = [0, 0, 0, 0], sizes = [1, 4, 32, 32], strides = [1, 1, 1, 1]} : vector<2x4x32x32xf32> to vector<1x4x32x32xf32>
    %705 = vector.shape_cast %704 : vector<1x4x32x32xf32> to vector<4x32x32xf32>
    %706 = vector.extract_strided_slice %705 {offsets = [0, 0, 0], sizes = [1, 32, 32], strides = [1, 1, 1]} : vector<4x32x32xf32> to vector<1x32x32xf32>
    %707 = vector.shape_cast %706 : vector<1x32x32xf32> to vector<32x32xf32>
    %cst_149 = arith.constant dense<0.000000e+00> : vector<2x32xf32>
    %708 = tpu.matmul %632, %707, %cst_149 {dimension_numbers = #tpu.dot_dimension_numbers<[1], [0], [0], [1], [0, 0, 1, 1], [], []>} : vector<2x32xf32>, vector<32x32xf32>, vector<2x32xf32> -> vector<2x32xf32>
    %709 = arith.addf %700, %708 : vector<2x32xf32>
    %710 = arith.negf %709 : vector<2x32xf32>
    %711 = math.exp %710 : vector<2x32xf32>
    %cst_150 = arith.constant 1.000000e+00 : f32
    %712 = vector.broadcast %cst_150 : f32 to vector<2x32xf32>
    %713 = arith.addf %712, %711 : vector<2x32xf32>
    %714 = arith.divf %712, %713 : vector<2x32xf32>
    %715 = vector.extract_strided_slice %705 {offsets = [1, 0, 0], sizes = [1, 32, 32], strides = [1, 1, 1]} : vector<4x32x32xf32> to vector<1x32x32xf32>
    %716 = vector.shape_cast %715 : vector<1x32x32xf32> to vector<32x32xf32>
    %cst_151 = arith.constant dense<0.000000e+00> : vector<2x32xf32>
    %717 = tpu.matmul %632, %716, %cst_151 {dimension_numbers = #tpu.dot_dimension_numbers<[1], [0], [0], [1], [0, 0, 1, 1], [], []>} : vector<2x32xf32>, vector<32x32xf32>, vector<2x32xf32> -> vector<2x32xf32>
    %718 = arith.addf %701, %717 : vector<2x32xf32>
    %719 = arith.negf %718 : vector<2x32xf32>
    %720 = math.exp %719 : vector<2x32xf32>
    %cst_152 = arith.constant 1.000000e+00 : f32
    %721 = vector.broadcast %cst_152 : f32 to vector<2x32xf32>
    %722 = arith.addf %721, %720 : vector<2x32xf32>
    %723 = arith.divf %721, %722 : vector<2x32xf32>
    %724 = vector.extract_strided_slice %705 {offsets = [2, 0, 0], sizes = [1, 32, 32], strides = [1, 1, 1]} : vector<4x32x32xf32> to vector<1x32x32xf32>
    %725 = vector.shape_cast %724 : vector<1x32x32xf32> to vector<32x32xf32>
    %cst_153 = arith.constant dense<0.000000e+00> : vector<2x32xf32>
    %726 = tpu.matmul %632, %725, %cst_153 {dimension_numbers = #tpu.dot_dimension_numbers<[1], [0], [0], [1], [0, 0, 1, 1], [], []>} : vector<2x32xf32>, vector<32x32xf32>, vector<2x32xf32> -> vector<2x32xf32>
    %727 = arith.addf %702, %726 : vector<2x32xf32>
    %728 = math.tanh %727 : vector<2x32xf32>
    %729 = vector.extract_strided_slice %705 {offsets = [3, 0, 0], sizes = [1, 32, 32], strides = [1, 1, 1]} : vector<4x32x32xf32> to vector<1x32x32xf32>
    %730 = vector.shape_cast %729 : vector<1x32x32xf32> to vector<32x32xf32>
    %cst_154 = arith.constant dense<0.000000e+00> : vector<2x32xf32>
    %731 = tpu.matmul %632, %730, %cst_154 {dimension_numbers = #tpu.dot_dimension_numbers<[1], [0], [0], [1], [0, 0, 1, 1], [], []>} : vector<2x32xf32>, vector<32x32xf32>, vector<2x32xf32> -> vector<2x32xf32>
    %732 = arith.addf %703, %731 : vector<2x32xf32>
    %733 = arith.negf %732 : vector<2x32xf32>
    %734 = math.exp %733 : vector<2x32xf32>
    %cst_155 = arith.constant 1.000000e+00 : f32
    %735 = vector.broadcast %cst_155 : f32 to vector<2x32xf32>
    %736 = arith.addf %735, %734 : vector<2x32xf32>
    %737 = arith.divf %735, %736 : vector<2x32xf32>
    %738 = arith.mulf %723, %630 : vector<2x32xf32>
    %739 = arith.mulf %714, %728 : vector<2x32xf32>
    %740 = arith.addf %738, %739 : vector<2x32xf32>
    %741 = math.tanh %740 : vector<2x32xf32>
    %742 = arith.mulf %737, %741 : vector<2x32xf32>
    %743 = vector.extract_strided_slice %0 {offsets = [1, 0, 0, 0], sizes = [1, 1, 32, 32], strides = [1, 1, 1, 1]} : vector<2x4x32x32xf32> to vector<1x1x32x32xf32>
    %744 = vector.shape_cast %743 : vector<1x1x32x32xf32> to vector<32x32xf32>
    %cst_156 = arith.constant dense<0.000000e+00> : vector<2x32xf32>
    %745 = tpu.matmul %632, %744, %cst_156 {dimension_numbers = #tpu.dot_dimension_numbers<[1], [0], [0], [1], [0, 0, 1, 1], [], []>} : vector<2x32xf32>, vector<32x32xf32>, vector<2x32xf32> -> vector<2x32xf32>
    %746 = vector.extract_strided_slice %2 {offsets = [1, 0, 0, 0], sizes = [1, 1, 1, 32], strides = [1, 1, 1, 1]} : vector<2x4x1x32xf32> to vector<1x1x1x32xf32>
    %747 = vector.shape_cast %746 : vector<1x1x1x32xf32> to vector<1x32xf32>
    %748 = vector.broadcast %747 : vector<1x32xf32> to vector<2x32xf32>
    %749 = arith.addf %745, %748 : vector<2x32xf32>
    %750 = vector.extract_strided_slice %0 {offsets = [1, 1, 0, 0], sizes = [1, 1, 32, 32], strides = [1, 1, 1, 1]} : vector<2x4x32x32xf32> to vector<1x1x32x32xf32>
    %751 = vector.shape_cast %750 : vector<1x1x32x32xf32> to vector<32x32xf32>
    %cst_157 = arith.constant dense<0.000000e+00> : vector<2x32xf32>
    %752 = tpu.matmul %632, %751, %cst_157 {dimension_numbers = #tpu.dot_dimension_numbers<[1], [0], [0], [1], [0, 0, 1, 1], [], []>} : vector<2x32xf32>, vector<32x32xf32>, vector<2x32xf32> -> vector<2x32xf32>
    %753 = vector.extract_strided_slice %2 {offsets = [1, 1, 0, 0], sizes = [1, 1, 1, 32], strides = [1, 1, 1, 1]} : vector<2x4x1x32xf32> to vector<1x1x1x32xf32>
    %754 = vector.shape_cast %753 : vector<1x1x1x32xf32> to vector<1x32xf32>
    %755 = vector.broadcast %754 : vector<1x32xf32> to vector<2x32xf32>
    %756 = arith.addf %752, %755 : vector<2x32xf32>
    %757 = vector.extract_strided_slice %0 {offsets = [1, 2, 0, 0], sizes = [1, 1, 32, 32], strides = [1, 1, 1, 1]} : vector<2x4x32x32xf32> to vector<1x1x32x32xf32>
    %758 = vector.shape_cast %757 : vector<1x1x32x32xf32> to vector<32x32xf32>
    %cst_158 = arith.constant dense<0.000000e+00> : vector<2x32xf32>
    %759 = tpu.matmul %632, %758, %cst_158 {dimension_numbers = #tpu.dot_dimension_numbers<[1], [0], [0], [1], [0, 0, 1, 1], [], []>} : vector<2x32xf32>, vector<32x32xf32>, vector<2x32xf32> -> vector<2x32xf32>
    %760 = vector.extract_strided_slice %2 {offsets = [1, 2, 0, 0], sizes = [1, 1, 1, 32], strides = [1, 1, 1, 1]} : vector<2x4x1x32xf32> to vector<1x1x1x32xf32>
    %761 = vector.shape_cast %760 : vector<1x1x1x32xf32> to vector<1x32xf32>
    %762 = vector.broadcast %761 : vector<1x32xf32> to vector<2x32xf32>
    %763 = arith.addf %759, %762 : vector<2x32xf32>
    %764 = vector.extract_strided_slice %0 {offsets = [1, 3, 0, 0], sizes = [1, 1, 32, 32], strides = [1, 1, 1, 1]} : vector<2x4x32x32xf32> to vector<1x1x32x32xf32>
    %765 = vector.shape_cast %764 : vector<1x1x32x32xf32> to vector<32x32xf32>
    %cst_159 = arith.constant dense<0.000000e+00> : vector<2x32xf32>
    %766 = tpu.matmul %632, %765, %cst_159 {dimension_numbers = #tpu.dot_dimension_numbers<[1], [0], [0], [1], [0, 0, 1, 1], [], []>} : vector<2x32xf32>, vector<32x32xf32>, vector<2x32xf32> -> vector<2x32xf32>
    %767 = vector.extract_strided_slice %2 {offsets = [1, 3, 0, 0], sizes = [1, 1, 1, 32], strides = [1, 1, 1, 1]} : vector<2x4x1x32xf32> to vector<1x1x1x32xf32>
    %768 = vector.shape_cast %767 : vector<1x1x1x32xf32> to vector<1x32xf32>
    %769 = vector.broadcast %768 : vector<1x32xf32> to vector<2x32xf32>
    %770 = arith.addf %766, %769 : vector<2x32xf32>
    %771 = vector.extract_strided_slice %1 {offsets = [1, 0, 0, 0], sizes = [1, 4, 32, 32], strides = [1, 1, 1, 1]} : vector<2x4x32x32xf32> to vector<1x4x32x32xf32>
    %772 = vector.shape_cast %771 : vector<1x4x32x32xf32> to vector<4x32x32xf32>
    %773 = vector.extract_strided_slice %772 {offsets = [0, 0, 0], sizes = [1, 32, 32], strides = [1, 1, 1]} : vector<4x32x32xf32> to vector<1x32x32xf32>
    %774 = vector.shape_cast %773 : vector<1x32x32xf32> to vector<32x32xf32>
    %cst_160 = arith.constant dense<0.000000e+00> : vector<2x32xf32>
    %775 = tpu.matmul %699, %774, %cst_160 {dimension_numbers = #tpu.dot_dimension_numbers<[1], [0], [0], [1], [0, 0, 1, 1], [], []>} : vector<2x32xf32>, vector<32x32xf32>, vector<2x32xf32> -> vector<2x32xf32>
    %776 = arith.addf %749, %775 : vector<2x32xf32>
    %777 = arith.negf %776 : vector<2x32xf32>
    %778 = math.exp %777 : vector<2x32xf32>
    %cst_161 = arith.constant 1.000000e+00 : f32
    %779 = vector.broadcast %cst_161 : f32 to vector<2x32xf32>
    %780 = arith.addf %779, %778 : vector<2x32xf32>
    %781 = arith.divf %779, %780 : vector<2x32xf32>
    %782 = vector.extract_strided_slice %772 {offsets = [1, 0, 0], sizes = [1, 32, 32], strides = [1, 1, 1]} : vector<4x32x32xf32> to vector<1x32x32xf32>
    %783 = vector.shape_cast %782 : vector<1x32x32xf32> to vector<32x32xf32>
    %cst_162 = arith.constant dense<0.000000e+00> : vector<2x32xf32>
    %784 = tpu.matmul %699, %783, %cst_162 {dimension_numbers = #tpu.dot_dimension_numbers<[1], [0], [0], [1], [0, 0, 1, 1], [], []>} : vector<2x32xf32>, vector<32x32xf32>, vector<2x32xf32> -> vector<2x32xf32>
    %785 = arith.addf %756, %784 : vector<2x32xf32>
    %786 = arith.negf %785 : vector<2x32xf32>
    %787 = math.exp %786 : vector<2x32xf32>
    %cst_163 = arith.constant 1.000000e+00 : f32
    %788 = vector.broadcast %cst_163 : f32 to vector<2x32xf32>
    %789 = arith.addf %788, %787 : vector<2x32xf32>
    %790 = arith.divf %788, %789 : vector<2x32xf32>
    %791 = vector.extract_strided_slice %772 {offsets = [2, 0, 0], sizes = [1, 32, 32], strides = [1, 1, 1]} : vector<4x32x32xf32> to vector<1x32x32xf32>
    %792 = vector.shape_cast %791 : vector<1x32x32xf32> to vector<32x32xf32>
    %cst_164 = arith.constant dense<0.000000e+00> : vector<2x32xf32>
    %793 = tpu.matmul %699, %792, %cst_164 {dimension_numbers = #tpu.dot_dimension_numbers<[1], [0], [0], [1], [0, 0, 1, 1], [], []>} : vector<2x32xf32>, vector<32x32xf32>, vector<2x32xf32> -> vector<2x32xf32>
    %794 = arith.addf %763, %793 : vector<2x32xf32>
    %795 = math.tanh %794 : vector<2x32xf32>
    %796 = vector.extract_strided_slice %772 {offsets = [3, 0, 0], sizes = [1, 32, 32], strides = [1, 1, 1]} : vector<4x32x32xf32> to vector<1x32x32xf32>
    %797 = vector.shape_cast %796 : vector<1x32x32xf32> to vector<32x32xf32>
    %cst_165 = arith.constant dense<0.000000e+00> : vector<2x32xf32>
    %798 = tpu.matmul %699, %797, %cst_165 {dimension_numbers = #tpu.dot_dimension_numbers<[1], [0], [0], [1], [0, 0, 1, 1], [], []>} : vector<2x32xf32>, vector<32x32xf32>, vector<2x32xf32> -> vector<2x32xf32>
    %799 = arith.addf %770, %798 : vector<2x32xf32>
    %800 = arith.negf %799 : vector<2x32xf32>
    %801 = math.exp %800 : vector<2x32xf32>
    %cst_166 = arith.constant 1.000000e+00 : f32
    %802 = vector.broadcast %cst_166 : f32 to vector<2x32xf32>
    %803 = arith.addf %802, %801 : vector<2x32xf32>
    %804 = arith.divf %802, %803 : vector<2x32xf32>
    %805 = arith.mulf %790, %697 : vector<2x32xf32>
    %806 = arith.mulf %781, %795 : vector<2x32xf32>
    %807 = arith.addf %805, %806 : vector<2x32xf32>
    %808 = math.tanh %807 : vector<2x32xf32>
    %809 = arith.mulf %804, %808 : vector<2x32xf32>
    %810 = vector.extract_strided_slice %84 {offsets = [14, 0], sizes = [2, 32], strides = [1, 1]} : vector<18x32xf32> to vector<2x32xf32>
    %811 = vector.extract_strided_slice %91 {offsets = [14, 0], sizes = [2, 32], strides = [1, 1]} : vector<18x32xf32> to vector<2x32xf32>
    %812 = vector.extract_strided_slice %98 {offsets = [14, 0], sizes = [2, 32], strides = [1, 1]} : vector<18x32xf32> to vector<2x32xf32>
    %813 = vector.extract_strided_slice %105 {offsets = [14, 0], sizes = [2, 32], strides = [1, 1]} : vector<18x32xf32> to vector<2x32xf32>
    %814 = vector.extract_strided_slice %1 {offsets = [0, 0, 0, 0], sizes = [1, 4, 32, 32], strides = [1, 1, 1, 1]} : vector<2x4x32x32xf32> to vector<1x4x32x32xf32>
    %815 = vector.shape_cast %814 : vector<1x4x32x32xf32> to vector<4x32x32xf32>
    %816 = vector.extract_strided_slice %815 {offsets = [0, 0, 0], sizes = [1, 32, 32], strides = [1, 1, 1]} : vector<4x32x32xf32> to vector<1x32x32xf32>
    %817 = vector.shape_cast %816 : vector<1x32x32xf32> to vector<32x32xf32>
    %cst_167 = arith.constant dense<0.000000e+00> : vector<2x32xf32>
    %818 = tpu.matmul %742, %817, %cst_167 {dimension_numbers = #tpu.dot_dimension_numbers<[1], [0], [0], [1], [0, 0, 1, 1], [], []>} : vector<2x32xf32>, vector<32x32xf32>, vector<2x32xf32> -> vector<2x32xf32>
    %819 = arith.addf %810, %818 : vector<2x32xf32>
    %820 = arith.negf %819 : vector<2x32xf32>
    %821 = math.exp %820 : vector<2x32xf32>
    %cst_168 = arith.constant 1.000000e+00 : f32
    %822 = vector.broadcast %cst_168 : f32 to vector<2x32xf32>
    %823 = arith.addf %822, %821 : vector<2x32xf32>
    %824 = arith.divf %822, %823 : vector<2x32xf32>
    %825 = vector.extract_strided_slice %815 {offsets = [1, 0, 0], sizes = [1, 32, 32], strides = [1, 1, 1]} : vector<4x32x32xf32> to vector<1x32x32xf32>
    %826 = vector.shape_cast %825 : vector<1x32x32xf32> to vector<32x32xf32>
    %cst_169 = arith.constant dense<0.000000e+00> : vector<2x32xf32>
    %827 = tpu.matmul %742, %826, %cst_169 {dimension_numbers = #tpu.dot_dimension_numbers<[1], [0], [0], [1], [0, 0, 1, 1], [], []>} : vector<2x32xf32>, vector<32x32xf32>, vector<2x32xf32> -> vector<2x32xf32>
    %828 = arith.addf %811, %827 : vector<2x32xf32>
    %829 = arith.negf %828 : vector<2x32xf32>
    %830 = math.exp %829 : vector<2x32xf32>
    %cst_170 = arith.constant 1.000000e+00 : f32
    %831 = vector.broadcast %cst_170 : f32 to vector<2x32xf32>
    %832 = arith.addf %831, %830 : vector<2x32xf32>
    %833 = arith.divf %831, %832 : vector<2x32xf32>
    %834 = vector.extract_strided_slice %815 {offsets = [2, 0, 0], sizes = [1, 32, 32], strides = [1, 1, 1]} : vector<4x32x32xf32> to vector<1x32x32xf32>
    %835 = vector.shape_cast %834 : vector<1x32x32xf32> to vector<32x32xf32>
    %cst_171 = arith.constant dense<0.000000e+00> : vector<2x32xf32>
    %836 = tpu.matmul %742, %835, %cst_171 {dimension_numbers = #tpu.dot_dimension_numbers<[1], [0], [0], [1], [0, 0, 1, 1], [], []>} : vector<2x32xf32>, vector<32x32xf32>, vector<2x32xf32> -> vector<2x32xf32>
    %837 = arith.addf %812, %836 : vector<2x32xf32>
    %838 = math.tanh %837 : vector<2x32xf32>
    %839 = vector.extract_strided_slice %815 {offsets = [3, 0, 0], sizes = [1, 32, 32], strides = [1, 1, 1]} : vector<4x32x32xf32> to vector<1x32x32xf32>
    %840 = vector.shape_cast %839 : vector<1x32x32xf32> to vector<32x32xf32>
    %cst_172 = arith.constant dense<0.000000e+00> : vector<2x32xf32>
    %841 = tpu.matmul %742, %840, %cst_172 {dimension_numbers = #tpu.dot_dimension_numbers<[1], [0], [0], [1], [0, 0, 1, 1], [], []>} : vector<2x32xf32>, vector<32x32xf32>, vector<2x32xf32> -> vector<2x32xf32>
    %842 = arith.addf %813, %841 : vector<2x32xf32>
    %843 = arith.negf %842 : vector<2x32xf32>
    %844 = math.exp %843 : vector<2x32xf32>
    %cst_173 = arith.constant 1.000000e+00 : f32
    %845 = vector.broadcast %cst_173 : f32 to vector<2x32xf32>
    %846 = arith.addf %845, %844 : vector<2x32xf32>
    %847 = arith.divf %845, %846 : vector<2x32xf32>
    %848 = arith.mulf %833, %740 : vector<2x32xf32>
    %849 = arith.mulf %824, %838 : vector<2x32xf32>
    %850 = arith.addf %848, %849 : vector<2x32xf32>
    %851 = math.tanh %850 : vector<2x32xf32>
    %852 = arith.mulf %847, %851 : vector<2x32xf32>
    %853 = vector.extract_strided_slice %0 {offsets = [1, 0, 0, 0], sizes = [1, 1, 32, 32], strides = [1, 1, 1, 1]} : vector<2x4x32x32xf32> to vector<1x1x32x32xf32>
    %854 = vector.shape_cast %853 : vector<1x1x32x32xf32> to vector<32x32xf32>
    %cst_174 = arith.constant dense<0.000000e+00> : vector<2x32xf32>
    %855 = tpu.matmul %742, %854, %cst_174 {dimension_numbers = #tpu.dot_dimension_numbers<[1], [0], [0], [1], [0, 0, 1, 1], [], []>} : vector<2x32xf32>, vector<32x32xf32>, vector<2x32xf32> -> vector<2x32xf32>
    %856 = vector.extract_strided_slice %2 {offsets = [1, 0, 0, 0], sizes = [1, 1, 1, 32], strides = [1, 1, 1, 1]} : vector<2x4x1x32xf32> to vector<1x1x1x32xf32>
    %857 = vector.shape_cast %856 : vector<1x1x1x32xf32> to vector<1x32xf32>
    %858 = vector.broadcast %857 : vector<1x32xf32> to vector<2x32xf32>
    %859 = arith.addf %855, %858 : vector<2x32xf32>
    %860 = vector.extract_strided_slice %0 {offsets = [1, 1, 0, 0], sizes = [1, 1, 32, 32], strides = [1, 1, 1, 1]} : vector<2x4x32x32xf32> to vector<1x1x32x32xf32>
    %861 = vector.shape_cast %860 : vector<1x1x32x32xf32> to vector<32x32xf32>
    %cst_175 = arith.constant dense<0.000000e+00> : vector<2x32xf32>
    %862 = tpu.matmul %742, %861, %cst_175 {dimension_numbers = #tpu.dot_dimension_numbers<[1], [0], [0], [1], [0, 0, 1, 1], [], []>} : vector<2x32xf32>, vector<32x32xf32>, vector<2x32xf32> -> vector<2x32xf32>
    %863 = vector.extract_strided_slice %2 {offsets = [1, 1, 0, 0], sizes = [1, 1, 1, 32], strides = [1, 1, 1, 1]} : vector<2x4x1x32xf32> to vector<1x1x1x32xf32>
    %864 = vector.shape_cast %863 : vector<1x1x1x32xf32> to vector<1x32xf32>
    %865 = vector.broadcast %864 : vector<1x32xf32> to vector<2x32xf32>
    %866 = arith.addf %862, %865 : vector<2x32xf32>
    %867 = vector.extract_strided_slice %0 {offsets = [1, 2, 0, 0], sizes = [1, 1, 32, 32], strides = [1, 1, 1, 1]} : vector<2x4x32x32xf32> to vector<1x1x32x32xf32>
    %868 = vector.shape_cast %867 : vector<1x1x32x32xf32> to vector<32x32xf32>
    %cst_176 = arith.constant dense<0.000000e+00> : vector<2x32xf32>
    %869 = tpu.matmul %742, %868, %cst_176 {dimension_numbers = #tpu.dot_dimension_numbers<[1], [0], [0], [1], [0, 0, 1, 1], [], []>} : vector<2x32xf32>, vector<32x32xf32>, vector<2x32xf32> -> vector<2x32xf32>
    %870 = vector.extract_strided_slice %2 {offsets = [1, 2, 0, 0], sizes = [1, 1, 1, 32], strides = [1, 1, 1, 1]} : vector<2x4x1x32xf32> to vector<1x1x1x32xf32>
    %871 = vector.shape_cast %870 : vector<1x1x1x32xf32> to vector<1x32xf32>
    %872 = vector.broadcast %871 : vector<1x32xf32> to vector<2x32xf32>
    %873 = arith.addf %869, %872 : vector<2x32xf32>
    %874 = vector.extract_strided_slice %0 {offsets = [1, 3, 0, 0], sizes = [1, 1, 32, 32], strides = [1, 1, 1, 1]} : vector<2x4x32x32xf32> to vector<1x1x32x32xf32>
    %875 = vector.shape_cast %874 : vector<1x1x32x32xf32> to vector<32x32xf32>
    %cst_177 = arith.constant dense<0.000000e+00> : vector<2x32xf32>
    %876 = tpu.matmul %742, %875, %cst_177 {dimension_numbers = #tpu.dot_dimension_numbers<[1], [0], [0], [1], [0, 0, 1, 1], [], []>} : vector<2x32xf32>, vector<32x32xf32>, vector<2x32xf32> -> vector<2x32xf32>
    %877 = vector.extract_strided_slice %2 {offsets = [1, 3, 0, 0], sizes = [1, 1, 1, 32], strides = [1, 1, 1, 1]} : vector<2x4x1x32xf32> to vector<1x1x1x32xf32>
    %878 = vector.shape_cast %877 : vector<1x1x1x32xf32> to vector<1x32xf32>
    %879 = vector.broadcast %878 : vector<1x32xf32> to vector<2x32xf32>
    %880 = arith.addf %876, %879 : vector<2x32xf32>
    %881 = vector.extract_strided_slice %1 {offsets = [1, 0, 0, 0], sizes = [1, 4, 32, 32], strides = [1, 1, 1, 1]} : vector<2x4x32x32xf32> to vector<1x4x32x32xf32>
    %882 = vector.shape_cast %881 : vector<1x4x32x32xf32> to vector<4x32x32xf32>
    %883 = vector.extract_strided_slice %882 {offsets = [0, 0, 0], sizes = [1, 32, 32], strides = [1, 1, 1]} : vector<4x32x32xf32> to vector<1x32x32xf32>
    %884 = vector.shape_cast %883 : vector<1x32x32xf32> to vector<32x32xf32>
    %cst_178 = arith.constant dense<0.000000e+00> : vector<2x32xf32>
    %885 = tpu.matmul %809, %884, %cst_178 {dimension_numbers = #tpu.dot_dimension_numbers<[1], [0], [0], [1], [0, 0, 1, 1], [], []>} : vector<2x32xf32>, vector<32x32xf32>, vector<2x32xf32> -> vector<2x32xf32>
    %886 = arith.addf %859, %885 : vector<2x32xf32>
    %887 = arith.negf %886 : vector<2x32xf32>
    %888 = math.exp %887 : vector<2x32xf32>
    %cst_179 = arith.constant 1.000000e+00 : f32
    %889 = vector.broadcast %cst_179 : f32 to vector<2x32xf32>
    %890 = arith.addf %889, %888 : vector<2x32xf32>
    %891 = arith.divf %889, %890 : vector<2x32xf32>
    %892 = vector.extract_strided_slice %882 {offsets = [1, 0, 0], sizes = [1, 32, 32], strides = [1, 1, 1]} : vector<4x32x32xf32> to vector<1x32x32xf32>
    %893 = vector.shape_cast %892 : vector<1x32x32xf32> to vector<32x32xf32>
    %cst_180 = arith.constant dense<0.000000e+00> : vector<2x32xf32>
    %894 = tpu.matmul %809, %893, %cst_180 {dimension_numbers = #tpu.dot_dimension_numbers<[1], [0], [0], [1], [0, 0, 1, 1], [], []>} : vector<2x32xf32>, vector<32x32xf32>, vector<2x32xf32> -> vector<2x32xf32>
    %895 = arith.addf %866, %894 : vector<2x32xf32>
    %896 = arith.negf %895 : vector<2x32xf32>
    %897 = math.exp %896 : vector<2x32xf32>
    %cst_181 = arith.constant 1.000000e+00 : f32
    %898 = vector.broadcast %cst_181 : f32 to vector<2x32xf32>
    %899 = arith.addf %898, %897 : vector<2x32xf32>
    %900 = arith.divf %898, %899 : vector<2x32xf32>
    %901 = vector.extract_strided_slice %882 {offsets = [2, 0, 0], sizes = [1, 32, 32], strides = [1, 1, 1]} : vector<4x32x32xf32> to vector<1x32x32xf32>
    %902 = vector.shape_cast %901 : vector<1x32x32xf32> to vector<32x32xf32>
    %cst_182 = arith.constant dense<0.000000e+00> : vector<2x32xf32>
    %903 = tpu.matmul %809, %902, %cst_182 {dimension_numbers = #tpu.dot_dimension_numbers<[1], [0], [0], [1], [0, 0, 1, 1], [], []>} : vector<2x32xf32>, vector<32x32xf32>, vector<2x32xf32> -> vector<2x32xf32>
    %904 = arith.addf %873, %903 : vector<2x32xf32>
    %905 = math.tanh %904 : vector<2x32xf32>
    %906 = vector.extract_strided_slice %882 {offsets = [3, 0, 0], sizes = [1, 32, 32], strides = [1, 1, 1]} : vector<4x32x32xf32> to vector<1x32x32xf32>
    %907 = vector.shape_cast %906 : vector<1x32x32xf32> to vector<32x32xf32>
    %cst_183 = arith.constant dense<0.000000e+00> : vector<2x32xf32>
    %908 = tpu.matmul %809, %907, %cst_183 {dimension_numbers = #tpu.dot_dimension_numbers<[1], [0], [0], [1], [0, 0, 1, 1], [], []>} : vector<2x32xf32>, vector<32x32xf32>, vector<2x32xf32> -> vector<2x32xf32>
    %909 = arith.addf %880, %908 : vector<2x32xf32>
    %910 = arith.negf %909 : vector<2x32xf32>
    %911 = math.exp %910 : vector<2x32xf32>
    %cst_184 = arith.constant 1.000000e+00 : f32
    %912 = vector.broadcast %cst_184 : f32 to vector<2x32xf32>
    %913 = arith.addf %912, %911 : vector<2x32xf32>
    %914 = arith.divf %912, %913 : vector<2x32xf32>
    %915 = arith.mulf %900, %807 : vector<2x32xf32>
    %916 = arith.mulf %891, %905 : vector<2x32xf32>
    %917 = arith.addf %915, %916 : vector<2x32xf32>
    %918 = math.tanh %917 : vector<2x32xf32>
    %919 = arith.mulf %914, %918 : vector<2x32xf32>
    %920 = vector.extract_strided_slice %84 {offsets = [16, 0], sizes = [2, 32], strides = [1, 1]} : vector<18x32xf32> to vector<2x32xf32>
    %921 = vector.extract_strided_slice %91 {offsets = [16, 0], sizes = [2, 32], strides = [1, 1]} : vector<18x32xf32> to vector<2x32xf32>
    %922 = vector.extract_strided_slice %98 {offsets = [16, 0], sizes = [2, 32], strides = [1, 1]} : vector<18x32xf32> to vector<2x32xf32>
    %923 = vector.extract_strided_slice %105 {offsets = [16, 0], sizes = [2, 32], strides = [1, 1]} : vector<18x32xf32> to vector<2x32xf32>
    %924 = vector.extract_strided_slice %1 {offsets = [0, 0, 0, 0], sizes = [1, 4, 32, 32], strides = [1, 1, 1, 1]} : vector<2x4x32x32xf32> to vector<1x4x32x32xf32>
    %925 = vector.shape_cast %924 : vector<1x4x32x32xf32> to vector<4x32x32xf32>
    %926 = vector.extract_strided_slice %925 {offsets = [0, 0, 0], sizes = [1, 32, 32], strides = [1, 1, 1]} : vector<4x32x32xf32> to vector<1x32x32xf32>
    %927 = vector.shape_cast %926 : vector<1x32x32xf32> to vector<32x32xf32>
    %cst_185 = arith.constant dense<0.000000e+00> : vector<2x32xf32>
    %928 = tpu.matmul %852, %927, %cst_185 {dimension_numbers = #tpu.dot_dimension_numbers<[1], [0], [0], [1], [0, 0, 1, 1], [], []>} : vector<2x32xf32>, vector<32x32xf32>, vector<2x32xf32> -> vector<2x32xf32>
    %929 = arith.addf %920, %928 : vector<2x32xf32>
    %930 = arith.negf %929 : vector<2x32xf32>
    %931 = math.exp %930 : vector<2x32xf32>
    %cst_186 = arith.constant 1.000000e+00 : f32
    %932 = vector.broadcast %cst_186 : f32 to vector<2x32xf32>
    %933 = arith.addf %932, %931 : vector<2x32xf32>
    %934 = arith.divf %932, %933 : vector<2x32xf32>
    %935 = vector.extract_strided_slice %925 {offsets = [1, 0, 0], sizes = [1, 32, 32], strides = [1, 1, 1]} : vector<4x32x32xf32> to vector<1x32x32xf32>
    %936 = vector.shape_cast %935 : vector<1x32x32xf32> to vector<32x32xf32>
    %cst_187 = arith.constant dense<0.000000e+00> : vector<2x32xf32>
    %937 = tpu.matmul %852, %936, %cst_187 {dimension_numbers = #tpu.dot_dimension_numbers<[1], [0], [0], [1], [0, 0, 1, 1], [], []>} : vector<2x32xf32>, vector<32x32xf32>, vector<2x32xf32> -> vector<2x32xf32>
    %938 = arith.addf %921, %937 : vector<2x32xf32>
    %939 = arith.negf %938 : vector<2x32xf32>
    %940 = math.exp %939 : vector<2x32xf32>
    %cst_188 = arith.constant 1.000000e+00 : f32
    %941 = vector.broadcast %cst_188 : f32 to vector<2x32xf32>
    %942 = arith.addf %941, %940 : vector<2x32xf32>
    %943 = arith.divf %941, %942 : vector<2x32xf32>
    %944 = vector.extract_strided_slice %925 {offsets = [2, 0, 0], sizes = [1, 32, 32], strides = [1, 1, 1]} : vector<4x32x32xf32> to vector<1x32x32xf32>
    %945 = vector.shape_cast %944 : vector<1x32x32xf32> to vector<32x32xf32>
    %cst_189 = arith.constant dense<0.000000e+00> : vector<2x32xf32>
    %946 = tpu.matmul %852, %945, %cst_189 {dimension_numbers = #tpu.dot_dimension_numbers<[1], [0], [0], [1], [0, 0, 1, 1], [], []>} : vector<2x32xf32>, vector<32x32xf32>, vector<2x32xf32> -> vector<2x32xf32>
    %947 = arith.addf %922, %946 : vector<2x32xf32>
    %948 = math.tanh %947 : vector<2x32xf32>
    %949 = vector.extract_strided_slice %925 {offsets = [3, 0, 0], sizes = [1, 32, 32], strides = [1, 1, 1]} : vector<4x32x32xf32> to vector<1x32x32xf32>
    %950 = vector.shape_cast %949 : vector<1x32x32xf32> to vector<32x32xf32>
    %cst_190 = arith.constant dense<0.000000e+00> : vector<2x32xf32>
    %951 = tpu.matmul %852, %950, %cst_190 {dimension_numbers = #tpu.dot_dimension_numbers<[1], [0], [0], [1], [0, 0, 1, 1], [], []>} : vector<2x32xf32>, vector<32x32xf32>, vector<2x32xf32> -> vector<2x32xf32>
    %952 = arith.addf %923, %951 : vector<2x32xf32>
    %953 = arith.negf %952 : vector<2x32xf32>
    %954 = math.exp %953 : vector<2x32xf32>
    %cst_191 = arith.constant 1.000000e+00 : f32
    %955 = vector.broadcast %cst_191 : f32 to vector<2x32xf32>
    %956 = arith.addf %955, %954 : vector<2x32xf32>
    %957 = arith.divf %955, %956 : vector<2x32xf32>
    %958 = arith.mulf %943, %850 : vector<2x32xf32>
    %959 = arith.mulf %934, %948 : vector<2x32xf32>
    %960 = arith.addf %958, %959 : vector<2x32xf32>
    %961 = math.tanh %960 : vector<2x32xf32>
    %962 = arith.mulf %957, %961 : vector<2x32xf32>
    %963 = vector.extract_strided_slice %0 {offsets = [1, 0, 0, 0], sizes = [1, 1, 32, 32], strides = [1, 1, 1, 1]} : vector<2x4x32x32xf32> to vector<1x1x32x32xf32>
    %964 = vector.shape_cast %963 : vector<1x1x32x32xf32> to vector<32x32xf32>
    %cst_192 = arith.constant dense<0.000000e+00> : vector<2x32xf32>
    %965 = tpu.matmul %852, %964, %cst_192 {dimension_numbers = #tpu.dot_dimension_numbers<[1], [0], [0], [1], [0, 0, 1, 1], [], []>} : vector<2x32xf32>, vector<32x32xf32>, vector<2x32xf32> -> vector<2x32xf32>
    %966 = vector.extract_strided_slice %2 {offsets = [1, 0, 0, 0], sizes = [1, 1, 1, 32], strides = [1, 1, 1, 1]} : vector<2x4x1x32xf32> to vector<1x1x1x32xf32>
    %967 = vector.shape_cast %966 : vector<1x1x1x32xf32> to vector<1x32xf32>
    %968 = vector.broadcast %967 : vector<1x32xf32> to vector<2x32xf32>
    %969 = arith.addf %965, %968 : vector<2x32xf32>
    %970 = vector.extract_strided_slice %0 {offsets = [1, 1, 0, 0], sizes = [1, 1, 32, 32], strides = [1, 1, 1, 1]} : vector<2x4x32x32xf32> to vector<1x1x32x32xf32>
    %971 = vector.shape_cast %970 : vector<1x1x32x32xf32> to vector<32x32xf32>
    %cst_193 = arith.constant dense<0.000000e+00> : vector<2x32xf32>
    %972 = tpu.matmul %852, %971, %cst_193 {dimension_numbers = #tpu.dot_dimension_numbers<[1], [0], [0], [1], [0, 0, 1, 1], [], []>} : vector<2x32xf32>, vector<32x32xf32>, vector<2x32xf32> -> vector<2x32xf32>
    %973 = vector.extract_strided_slice %2 {offsets = [1, 1, 0, 0], sizes = [1, 1, 1, 32], strides = [1, 1, 1, 1]} : vector<2x4x1x32xf32> to vector<1x1x1x32xf32>
    %974 = vector.shape_cast %973 : vector<1x1x1x32xf32> to vector<1x32xf32>
    %975 = vector.broadcast %974 : vector<1x32xf32> to vector<2x32xf32>
    %976 = arith.addf %972, %975 : vector<2x32xf32>
    %977 = vector.extract_strided_slice %0 {offsets = [1, 2, 0, 0], sizes = [1, 1, 32, 32], strides = [1, 1, 1, 1]} : vector<2x4x32x32xf32> to vector<1x1x32x32xf32>
    %978 = vector.shape_cast %977 : vector<1x1x32x32xf32> to vector<32x32xf32>
    %cst_194 = arith.constant dense<0.000000e+00> : vector<2x32xf32>
    %979 = tpu.matmul %852, %978, %cst_194 {dimension_numbers = #tpu.dot_dimension_numbers<[1], [0], [0], [1], [0, 0, 1, 1], [], []>} : vector<2x32xf32>, vector<32x32xf32>, vector<2x32xf32> -> vector<2x32xf32>
    %980 = vector.extract_strided_slice %2 {offsets = [1, 2, 0, 0], sizes = [1, 1, 1, 32], strides = [1, 1, 1, 1]} : vector<2x4x1x32xf32> to vector<1x1x1x32xf32>
    %981 = vector.shape_cast %980 : vector<1x1x1x32xf32> to vector<1x32xf32>
    %982 = vector.broadcast %981 : vector<1x32xf32> to vector<2x32xf32>
    %983 = arith.addf %979, %982 : vector<2x32xf32>
    %984 = vector.extract_strided_slice %0 {offsets = [1, 3, 0, 0], sizes = [1, 1, 32, 32], strides = [1, 1, 1, 1]} : vector<2x4x32x32xf32> to vector<1x1x32x32xf32>
    %985 = vector.shape_cast %984 : vector<1x1x32x32xf32> to vector<32x32xf32>
    %cst_195 = arith.constant dense<0.000000e+00> : vector<2x32xf32>
    %986 = tpu.matmul %852, %985, %cst_195 {dimension_numbers = #tpu.dot_dimension_numbers<[1], [0], [0], [1], [0, 0, 1, 1], [], []>} : vector<2x32xf32>, vector<32x32xf32>, vector<2x32xf32> -> vector<2x32xf32>
    %987 = vector.extract_strided_slice %2 {offsets = [1, 3, 0, 0], sizes = [1, 1, 1, 32], strides = [1, 1, 1, 1]} : vector<2x4x1x32xf32> to vector<1x1x1x32xf32>
    %988 = vector.shape_cast %987 : vector<1x1x1x32xf32> to vector<1x32xf32>
    %989 = vector.broadcast %988 : vector<1x32xf32> to vector<2x32xf32>
    %990 = arith.addf %986, %989 : vector<2x32xf32>
    %991 = vector.extract_strided_slice %1 {offsets = [1, 0, 0, 0], sizes = [1, 4, 32, 32], strides = [1, 1, 1, 1]} : vector<2x4x32x32xf32> to vector<1x4x32x32xf32>
    %992 = vector.shape_cast %991 : vector<1x4x32x32xf32> to vector<4x32x32xf32>
    %993 = vector.extract_strided_slice %992 {offsets = [0, 0, 0], sizes = [1, 32, 32], strides = [1, 1, 1]} : vector<4x32x32xf32> to vector<1x32x32xf32>
    %994 = vector.shape_cast %993 : vector<1x32x32xf32> to vector<32x32xf32>
    %cst_196 = arith.constant dense<0.000000e+00> : vector<2x32xf32>
    %995 = tpu.matmul %919, %994, %cst_196 {dimension_numbers = #tpu.dot_dimension_numbers<[1], [0], [0], [1], [0, 0, 1, 1], [], []>} : vector<2x32xf32>, vector<32x32xf32>, vector<2x32xf32> -> vector<2x32xf32>
    %996 = arith.addf %969, %995 : vector<2x32xf32>
    %997 = arith.negf %996 : vector<2x32xf32>
    %998 = math.exp %997 : vector<2x32xf32>
    %cst_197 = arith.constant 1.000000e+00 : f32
    %999 = vector.broadcast %cst_197 : f32 to vector<2x32xf32>
    %1000 = arith.addf %999, %998 : vector<2x32xf32>
    %1001 = arith.divf %999, %1000 : vector<2x32xf32>
    %1002 = vector.extract_strided_slice %992 {offsets = [1, 0, 0], sizes = [1, 32, 32], strides = [1, 1, 1]} : vector<4x32x32xf32> to vector<1x32x32xf32>
    %1003 = vector.shape_cast %1002 : vector<1x32x32xf32> to vector<32x32xf32>
    %cst_198 = arith.constant dense<0.000000e+00> : vector<2x32xf32>
    %1004 = tpu.matmul %919, %1003, %cst_198 {dimension_numbers = #tpu.dot_dimension_numbers<[1], [0], [0], [1], [0, 0, 1, 1], [], []>} : vector<2x32xf32>, vector<32x32xf32>, vector<2x32xf32> -> vector<2x32xf32>
    %1005 = arith.addf %976, %1004 : vector<2x32xf32>
    %1006 = arith.negf %1005 : vector<2x32xf32>
    %1007 = math.exp %1006 : vector<2x32xf32>
    %cst_199 = arith.constant 1.000000e+00 : f32
    %1008 = vector.broadcast %cst_199 : f32 to vector<2x32xf32>
    %1009 = arith.addf %1008, %1007 : vector<2x32xf32>
    %1010 = arith.divf %1008, %1009 : vector<2x32xf32>
    %1011 = vector.extract_strided_slice %992 {offsets = [2, 0, 0], sizes = [1, 32, 32], strides = [1, 1, 1]} : vector<4x32x32xf32> to vector<1x32x32xf32>
    %1012 = vector.shape_cast %1011 : vector<1x32x32xf32> to vector<32x32xf32>
    %cst_200 = arith.constant dense<0.000000e+00> : vector<2x32xf32>
    %1013 = tpu.matmul %919, %1012, %cst_200 {dimension_numbers = #tpu.dot_dimension_numbers<[1], [0], [0], [1], [0, 0, 1, 1], [], []>} : vector<2x32xf32>, vector<32x32xf32>, vector<2x32xf32> -> vector<2x32xf32>
    %1014 = arith.addf %983, %1013 : vector<2x32xf32>
    %1015 = math.tanh %1014 : vector<2x32xf32>
    %1016 = vector.extract_strided_slice %992 {offsets = [3, 0, 0], sizes = [1, 32, 32], strides = [1, 1, 1]} : vector<4x32x32xf32> to vector<1x32x32xf32>
    %1017 = vector.shape_cast %1016 : vector<1x32x32xf32> to vector<32x32xf32>
    %cst_201 = arith.constant dense<0.000000e+00> : vector<2x32xf32>
    %1018 = tpu.matmul %919, %1017, %cst_201 {dimension_numbers = #tpu.dot_dimension_numbers<[1], [0], [0], [1], [0, 0, 1, 1], [], []>} : vector<2x32xf32>, vector<32x32xf32>, vector<2x32xf32> -> vector<2x32xf32>
    %1019 = arith.addf %990, %1018 : vector<2x32xf32>
    %1020 = arith.negf %1019 : vector<2x32xf32>
    %1021 = math.exp %1020 : vector<2x32xf32>
    %cst_202 = arith.constant 1.000000e+00 : f32
    %1022 = vector.broadcast %cst_202 : f32 to vector<2x32xf32>
    %1023 = arith.addf %1022, %1021 : vector<2x32xf32>
    %1024 = arith.divf %1022, %1023 : vector<2x32xf32>
    %1025 = arith.mulf %1010, %917 : vector<2x32xf32>
    %1026 = arith.mulf %1001, %1015 : vector<2x32xf32>
    %1027 = arith.addf %1025, %1026 : vector<2x32xf32>
    %1028 = math.tanh %1027 : vector<2x32xf32>
    %1029 = arith.mulf %1024, %1028 : vector<2x32xf32>
    %1030 = vector.extract_strided_slice %0 {offsets = [1, 0, 0, 0], sizes = [1, 1, 32, 32], strides = [1, 1, 1, 1]} : vector<2x4x32x32xf32> to vector<1x1x32x32xf32>
    %1031 = vector.shape_cast %1030 : vector<1x1x32x32xf32> to vector<32x32xf32>
    %cst_203 = arith.constant dense<0.000000e+00> : vector<2x32xf32>
    %1032 = tpu.matmul %962, %1031, %cst_203 {dimension_numbers = #tpu.dot_dimension_numbers<[1], [0], [0], [1], [0, 0, 1, 1], [], []>} : vector<2x32xf32>, vector<32x32xf32>, vector<2x32xf32> -> vector<2x32xf32>
    %1033 = vector.extract_strided_slice %2 {offsets = [1, 0, 0, 0], sizes = [1, 1, 1, 32], strides = [1, 1, 1, 1]} : vector<2x4x1x32xf32> to vector<1x1x1x32xf32>
    %1034 = vector.shape_cast %1033 : vector<1x1x1x32xf32> to vector<1x32xf32>
    %1035 = vector.broadcast %1034 : vector<1x32xf32> to vector<2x32xf32>
    %1036 = arith.addf %1032, %1035 : vector<2x32xf32>
    %1037 = vector.extract_strided_slice %0 {offsets = [1, 1, 0, 0], sizes = [1, 1, 32, 32], strides = [1, 1, 1, 1]} : vector<2x4x32x32xf32> to vector<1x1x32x32xf32>
    %1038 = vector.shape_cast %1037 : vector<1x1x32x32xf32> to vector<32x32xf32>
    %cst_204 = arith.constant dense<0.000000e+00> : vector<2x32xf32>
    %1039 = tpu.matmul %962, %1038, %cst_204 {dimension_numbers = #tpu.dot_dimension_numbers<[1], [0], [0], [1], [0, 0, 1, 1], [], []>} : vector<2x32xf32>, vector<32x32xf32>, vector<2x32xf32> -> vector<2x32xf32>
    %1040 = vector.extract_strided_slice %2 {offsets = [1, 1, 0, 0], sizes = [1, 1, 1, 32], strides = [1, 1, 1, 1]} : vector<2x4x1x32xf32> to vector<1x1x1x32xf32>
    %1041 = vector.shape_cast %1040 : vector<1x1x1x32xf32> to vector<1x32xf32>
    %1042 = vector.broadcast %1041 : vector<1x32xf32> to vector<2x32xf32>
    %1043 = arith.addf %1039, %1042 : vector<2x32xf32>
    %1044 = vector.extract_strided_slice %0 {offsets = [1, 2, 0, 0], sizes = [1, 1, 32, 32], strides = [1, 1, 1, 1]} : vector<2x4x32x32xf32> to vector<1x1x32x32xf32>
    %1045 = vector.shape_cast %1044 : vector<1x1x32x32xf32> to vector<32x32xf32>
    %cst_205 = arith.constant dense<0.000000e+00> : vector<2x32xf32>
    %1046 = tpu.matmul %962, %1045, %cst_205 {dimension_numbers = #tpu.dot_dimension_numbers<[1], [0], [0], [1], [0, 0, 1, 1], [], []>} : vector<2x32xf32>, vector<32x32xf32>, vector<2x32xf32> -> vector<2x32xf32>
    %1047 = vector.extract_strided_slice %2 {offsets = [1, 2, 0, 0], sizes = [1, 1, 1, 32], strides = [1, 1, 1, 1]} : vector<2x4x1x32xf32> to vector<1x1x1x32xf32>
    %1048 = vector.shape_cast %1047 : vector<1x1x1x32xf32> to vector<1x32xf32>
    %1049 = vector.broadcast %1048 : vector<1x32xf32> to vector<2x32xf32>
    %1050 = arith.addf %1046, %1049 : vector<2x32xf32>
    %1051 = vector.extract_strided_slice %0 {offsets = [1, 3, 0, 0], sizes = [1, 1, 32, 32], strides = [1, 1, 1, 1]} : vector<2x4x32x32xf32> to vector<1x1x32x32xf32>
    %1052 = vector.shape_cast %1051 : vector<1x1x32x32xf32> to vector<32x32xf32>
    %cst_206 = arith.constant dense<0.000000e+00> : vector<2x32xf32>
    %1053 = tpu.matmul %962, %1052, %cst_206 {dimension_numbers = #tpu.dot_dimension_numbers<[1], [0], [0], [1], [0, 0, 1, 1], [], []>} : vector<2x32xf32>, vector<32x32xf32>, vector<2x32xf32> -> vector<2x32xf32>
    %1054 = vector.extract_strided_slice %2 {offsets = [1, 3, 0, 0], sizes = [1, 1, 1, 32], strides = [1, 1, 1, 1]} : vector<2x4x1x32xf32> to vector<1x1x1x32xf32>
    %1055 = vector.shape_cast %1054 : vector<1x1x1x32xf32> to vector<1x32xf32>
    %1056 = vector.broadcast %1055 : vector<1x32xf32> to vector<2x32xf32>
    %1057 = arith.addf %1053, %1056 : vector<2x32xf32>
    %1058 = vector.extract_strided_slice %1 {offsets = [1, 0, 0, 0], sizes = [1, 4, 32, 32], strides = [1, 1, 1, 1]} : vector<2x4x32x32xf32> to vector<1x4x32x32xf32>
    %1059 = vector.shape_cast %1058 : vector<1x4x32x32xf32> to vector<4x32x32xf32>
    %1060 = vector.extract_strided_slice %1059 {offsets = [0, 0, 0], sizes = [1, 32, 32], strides = [1, 1, 1]} : vector<4x32x32xf32> to vector<1x32x32xf32>
    %1061 = vector.shape_cast %1060 : vector<1x32x32xf32> to vector<32x32xf32>
    %cst_207 = arith.constant dense<0.000000e+00> : vector<2x32xf32>
    %1062 = tpu.matmul %1029, %1061, %cst_207 {dimension_numbers = #tpu.dot_dimension_numbers<[1], [0], [0], [1], [0, 0, 1, 1], [], []>} : vector<2x32xf32>, vector<32x32xf32>, vector<2x32xf32> -> vector<2x32xf32>
    %1063 = arith.addf %1036, %1062 : vector<2x32xf32>
    %1064 = arith.negf %1063 : vector<2x32xf32>
    %1065 = math.exp %1064 : vector<2x32xf32>
    %cst_208 = arith.constant 1.000000e+00 : f32
    %1066 = vector.broadcast %cst_208 : f32 to vector<2x32xf32>
    %1067 = arith.addf %1066, %1065 : vector<2x32xf32>
    %1068 = arith.divf %1066, %1067 : vector<2x32xf32>
    %1069 = vector.extract_strided_slice %1059 {offsets = [1, 0, 0], sizes = [1, 32, 32], strides = [1, 1, 1]} : vector<4x32x32xf32> to vector<1x32x32xf32>
    %1070 = vector.shape_cast %1069 : vector<1x32x32xf32> to vector<32x32xf32>
    %cst_209 = arith.constant dense<0.000000e+00> : vector<2x32xf32>
    %1071 = tpu.matmul %1029, %1070, %cst_209 {dimension_numbers = #tpu.dot_dimension_numbers<[1], [0], [0], [1], [0, 0, 1, 1], [], []>} : vector<2x32xf32>, vector<32x32xf32>, vector<2x32xf32> -> vector<2x32xf32>
    %1072 = arith.addf %1043, %1071 : vector<2x32xf32>
    %1073 = arith.negf %1072 : vector<2x32xf32>
    %1074 = math.exp %1073 : vector<2x32xf32>
    %cst_210 = arith.constant 1.000000e+00 : f32
    %1075 = vector.broadcast %cst_210 : f32 to vector<2x32xf32>
    %1076 = arith.addf %1075, %1074 : vector<2x32xf32>
    %1077 = arith.divf %1075, %1076 : vector<2x32xf32>
    %1078 = vector.extract_strided_slice %1059 {offsets = [2, 0, 0], sizes = [1, 32, 32], strides = [1, 1, 1]} : vector<4x32x32xf32> to vector<1x32x32xf32>
    %1079 = vector.shape_cast %1078 : vector<1x32x32xf32> to vector<32x32xf32>
    %cst_211 = arith.constant dense<0.000000e+00> : vector<2x32xf32>
    %1080 = tpu.matmul %1029, %1079, %cst_211 {dimension_numbers = #tpu.dot_dimension_numbers<[1], [0], [0], [1], [0, 0, 1, 1], [], []>} : vector<2x32xf32>, vector<32x32xf32>, vector<2x32xf32> -> vector<2x32xf32>
    %1081 = arith.addf %1050, %1080 : vector<2x32xf32>
    %1082 = math.tanh %1081 : vector<2x32xf32>
    %1083 = vector.extract_strided_slice %1059 {offsets = [3, 0, 0], sizes = [1, 32, 32], strides = [1, 1, 1]} : vector<4x32x32xf32> to vector<1x32x32xf32>
    %1084 = vector.shape_cast %1083 : vector<1x32x32xf32> to vector<32x32xf32>
    %cst_212 = arith.constant dense<0.000000e+00> : vector<2x32xf32>
    %1085 = tpu.matmul %1029, %1084, %cst_212 {dimension_numbers = #tpu.dot_dimension_numbers<[1], [0], [0], [1], [0, 0, 1, 1], [], []>} : vector<2x32xf32>, vector<32x32xf32>, vector<2x32xf32> -> vector<2x32xf32>
    %1086 = arith.addf %1057, %1085 : vector<2x32xf32>
    %1087 = arith.negf %1086 : vector<2x32xf32>
    %1088 = math.exp %1087 : vector<2x32xf32>
    %cst_213 = arith.constant 1.000000e+00 : f32
    %1089 = vector.broadcast %cst_213 : f32 to vector<2x32xf32>
    %1090 = arith.addf %1089, %1088 : vector<2x32xf32>
    %1091 = arith.divf %1089, %1090 : vector<2x32xf32>
    %1092 = arith.mulf %1077, %1027 : vector<2x32xf32>
    %1093 = arith.mulf %1068, %1082 : vector<2x32xf32>
    %1094 = arith.addf %1092, %1093 : vector<2x32xf32>
    %1095 = math.tanh %1094 : vector<2x32xf32>
    %1096 = arith.mulf %1091, %1095 : vector<2x32xf32>
    %1097 = vector.shape_cast %259 : vector<2x32xf32> to vector<2x1x32xf32>
    %1098 = vector.shape_cast %369 : vector<2x32xf32> to vector<2x1x32xf32>
    %1099 = vector.shape_cast %479 : vector<2x32xf32> to vector<2x1x32xf32>
    %1100 = vector.shape_cast %589 : vector<2x32xf32> to vector<2x1x32xf32>
    %1101 = vector.shape_cast %699 : vector<2x32xf32> to vector<2x1x32xf32>
    %1102 = vector.shape_cast %809 : vector<2x32xf32> to vector<2x1x32xf32>
    %1103 = vector.shape_cast %919 : vector<2x32xf32> to vector<2x1x32xf32>
    %1104 = vector.shape_cast %1029 : vector<2x32xf32> to vector<2x1x32xf32>
    %1105 = vector.shape_cast %1096 : vector<2x32xf32> to vector<2x1x32xf32>
    %1106 = tpu.concatenate %1097, %1098, %1099, %1100, %1101, %1102, %1103, %1104, %1105 in 1 : vector<2x1x32xf32>, vector<2x1x32xf32>, vector<2x1x32xf32>, vector<2x1x32xf32>, vector<2x1x32xf32>, vector<2x1x32xf32>, vector<2x1x32xf32>, vector<2x1x32xf32>, vector<2x1x32xf32> -> vector<2x9x32xf32>
    %1107 = vector.shape_cast %1106 : vector<2x9x32xf32> to vector<18x32xf32>
    %c0_214 = arith.constant 0 : index
    %c0_215 = arith.constant 0 : index
    %c0_216 = arith.constant 0 : index
    %1108 = vector.load %arg6[%c0_214, %c0_215, %c0_216] : memref<2x8x48xf32, #tpu.memory_space<vmem>>, vector<2x8x48xf32>
    %1109 = vector.shape_cast %1108 : vector<2x8x48xf32> to vector<16x48xf32>
    %c0_217 = arith.constant 0 : index
    %c0_218 = arith.constant 0 : index
    %1110 = vector.load %arg7[%c0_217, %c0_218] : memref<48x32xf32, #tpu.memory_space<vmem>>, vector<48x32xf32>
    %cst_219 = arith.constant dense<0.000000e+00> : vector<16x32xf32>
    %1111 = tpu.matmul %1109, %1110, %cst_219 {dimension_numbers = #tpu.dot_dimension_numbers<[1], [0], [0], [1], [0, 0, 1, 1], [], []>} : vector<16x48xf32>, vector<48x32xf32>, vector<16x32xf32> -> vector<16x32xf32>
    %c0_220 = arith.constant 0 : index
    %c0_221 = arith.constant 0 : index
    %1112 = vector.load %arg8[%c0_220, %c0_221] : memref<32x32xf32, #tpu.memory_space<vmem>>, vector<32x32xf32>
    %cst_222 = arith.constant dense<0.000000e+00> : vector<18x32xf32>
    %1113 = tpu.matmul %1107, %1112, %cst_222 {dimension_numbers = #tpu.dot_dimension_numbers<[1], [0], [0], [1], [0, 0, 1, 1], [], []>} : vector<18x32xf32>, vector<32x32xf32>, vector<18x32xf32> -> vector<18x32xf32>
    %1114 = vector.shape_cast %1111 : vector<16x32xf32> to vector<2x8x1x32xf32>
    %1115 = vector.shape_cast %1113 : vector<18x32xf32> to vector<2x1x9x32xf32>
    %1116 = vector.broadcast %1114 : vector<2x8x1x32xf32> to vector<2x8x9x32xf32>
    %1117 = vector.broadcast %1115 : vector<2x1x9x32xf32> to vector<2x8x9x32xf32>
    %1118 = arith.addf %1116, %1117 : vector<2x8x9x32xf32>
    %1119 = arith.negf %1118 : vector<2x8x9x32xf32>
    %1120 = math.exp %1119 : vector<2x8x9x32xf32>
    %cst_223 = arith.constant 1.000000e+00 : f32
    %1121 = vector.broadcast %cst_223 : f32 to vector<2x8x9x32xf32>
    %1122 = arith.addf %1121, %1120 : vector<2x8x9x32xf32>
    %1123 = arith.divf %1121, %1122 : vector<2x8x9x32xf32>
    %1124 = arith.mulf %1118, %1123 : vector<2x8x9x32xf32>
    %1125 = vector.shape_cast %1124 : vector<2x8x9x32xf32> to vector<144x32xf32>
    %c0_224 = arith.constant 0 : index
    %c0_225 = arith.constant 0 : index
    %1126 = vector.load %arg9[%c0_224, %c0_225] : memref<32x128xf32, #tpu.memory_space<vmem>>, vector<32x128xf32>
    %cst_226 = arith.constant dense<0.000000e+00> : vector<144x128xf32>
    %1127 = tpu.matmul %1125, %1126, %cst_226 {dimension_numbers = #tpu.dot_dimension_numbers<[1], [0], [0], [1], [0, 0, 1, 1], [], []>} : vector<144x32xf32>, vector<32x128xf32>, vector<144x128xf32> -> vector<144x128xf32>
    %c0_227 = arith.constant 0 : index
    %c0_228 = arith.constant 0 : index
    %1128 = vector.load %arg10[%c0_227, %c0_228] : memref<1x128xf32, #tpu.memory_space<vmem>>, vector<1x128xf32>
    %1129 = vector.broadcast %1128 : vector<1x128xf32> to vector<144x128xf32>
    %1130 = arith.addf %1127, %1129 : vector<144x128xf32>
    %1131 = vector.shape_cast %1130 : vector<144x128xf32> to vector<2x72x128xf32>
    %c0_229 = arith.constant 0 : index
    %c0_230 = arith.constant 0 : index
    %c0_231 = arith.constant 0 : index
    %1132 = vector.load %arg13[%c0_229, %c0_230, %c0_231] : memref<2x72x128xf32, #tpu.memory_space<vmem>>, vector<2x72x128xf32>
    tpu.vector_store %arg13[%c0_229, %c0_230, %c0_231], %1131 {strides = array<i32>} : memref<2x72x128xf32, #tpu.memory_space<vmem>>, vector<2x72x128xf32>,
    %c0_232 = arith.constant 0 : index
    %c0_233 = arith.constant 0 : index
    %1133 = vector.load %arg11[%c0_232, %c0_233] : memref<32x128xf32, #tpu.memory_space<vmem>>, vector<32x128xf32>
    %cst_234 = arith.constant dense<0.000000e+00> : vector<18x128xf32>
    %1134 = tpu.matmul %1107, %1133, %cst_234 {dimension_numbers = #tpu.dot_dimension_numbers<[1], [0], [0], [1], [0, 0, 1, 1], [], []>} : vector<18x32xf32>, vector<32x128xf32>, vector<18x128xf32> -> vector<18x128xf32>
    %c0_235 = arith.constant 0 : index
    %c0_236 = arith.constant 0 : index
    %1135 = vector.load %arg12[%c0_235, %c0_236] : memref<1x128xf32, #tpu.memory_space<vmem>>, vector<1x128xf32>
    %1136 = vector.broadcast %1135 : vector<1x128xf32> to vector<18x128xf32>
    %1137 = arith.addf %1134, %1136 : vector<18x128xf32>
    %c0_237 = arith.constant 0 : index
    %c0_238 = arith.constant 0 : index
    %1138 = vector.load %arg14[%c0_237, %c0_238] : memref<18x128xf32, #tpu.memory_space<vmem>>, vector<18x128xf32>
    tpu.vector_store %arg14[%c0_237, %c0_238], %1137 {strides = array<i32>} : memref<18x128xf32, #tpu.memory_space<vmem>>, vector<18x128xf32>,
    return
  }
  func.func @transform_0(%arg0: i32, %arg1: memref<18xi32, #tpu.memory_space<smem>>) -> (i32, i32, i32) {
    %c0_i32 = arith.constant 0 : i32
    %c0_i32_0 = arith.constant 0 : i32
    %c0_i32_1 = arith.constant 0 : i32
    %c0_i32_2 = arith.constant 0 : i32
    return %c0_i32, %c0_i32_0, %c0_i32_1 : i32, i32, i32
  }
  func.func @transform_1(%arg0: i32, %arg1: memref<18xi32, #tpu.memory_space<smem>>) -> (i32, i32, i32, i32) {
    %c0_i32 = arith.constant 0 : i32
    %c0_i32_0 = arith.constant 0 : i32
    %c0_i32_1 = arith.constant 0 : i32
    %c0_i32_2 = arith.constant 0 : i32
    %c0_i32_3 = arith.constant 0 : i32
    return %c0_i32, %c0_i32_0, %c0_i32_1, %c0_i32_2 : i32, i32, i32, i32
  }
  func.func @transform_2(%arg0: i32, %arg1: memref<18xi32, #tpu.memory_space<smem>>) -> (i32, i32, i32, i32) {
    %c0_i32 = arith.constant 0 : i32
    %c0_i32_0 = arith.constant 0 : i32
    %c0_i32_1 = arith.constant 0 : i32
    %c0_i32_2 = arith.constant 0 : i32
    %c0_i32_3 = arith.constant 0 : i32
    return %c0_i32, %c0_i32_0, %c0_i32_1, %c0_i32_2 : i32, i32, i32, i32
  }
  func.func @transform_3(%arg0: i32, %arg1: memref<18xi32, #tpu.memory_space<smem>>) -> (i32, i32, i32, i32) {
    %c0_i32 = arith.constant 0 : i32
    %c0_i32_0 = arith.constant 0 : i32
    %c0_i32_1 = arith.constant 0 : i32
    %c0_i32_2 = arith.constant 0 : i32
    %c0_i32_3 = arith.constant 0 : i32
    return %c0_i32, %c0_i32_0, %c0_i32_1, %c0_i32_2 : i32, i32, i32, i32
  }
  func.func @transform_4(%arg0: i32, %arg1: memref<18xi32, #tpu.memory_space<smem>>) -> (i32, i32, i32) {
    %c0_i32 = arith.constant 0 : i32
    %c0_i32_0 = arith.constant 0 : i32
    %c0_i32_1 = arith.constant 0 : i32
    %c0_i32_2 = arith.constant 0 : i32
    return %c0_i32, %c0_i32_0, %c0_i32_1 : i32, i32, i32
  }
  func.func @transform_5(%arg0: i32, %arg1: memref<18xi32, #tpu.memory_space<smem>>) -> (i32, i32) {
    %c0_i32 = arith.constant 0 : i32
    %c0_i32_0 = arith.constant 0 : i32
    %c0_i32_1 = arith.constant 0 : i32
    return %c0_i32, %c0_i32_0 : i32, i32
  }
  func.func @transform_6(%arg0: i32, %arg1: memref<18xi32, #tpu.memory_space<smem>>) -> (i32, i32) {
    %c0_i32 = arith.constant 0 : i32
    %c0_i32_0 = arith.constant 0 : i32
    %c0_i32_1 = arith.constant 0 : i32
    return %c0_i32, %c0_i32_0 : i32, i32
  }
  func.func @transform_7(%arg0: i32, %arg1: memref<18xi32, #tpu.memory_space<smem>>) -> (i32, i32) {
    %c0_i32 = arith.constant 0 : i32
    %c0_i32_0 = arith.constant 0 : i32
    %c0_i32_1 = arith.constant 0 : i32
    return %c0_i32, %c0_i32_0 : i32, i32
  }
  func.func @transform_8(%arg0: i32, %arg1: memref<18xi32, #tpu.memory_space<smem>>) -> (i32, i32) {
    %c0_i32 = arith.constant 0 : i32
    %c0_i32_0 = arith.constant 0 : i32
    %c0_i32_1 = arith.constant 0 : i32
    return %c0_i32, %c0_i32_0 : i32, i32
  }
  func.func @transform_9(%arg0: i32, %arg1: memref<18xi32, #tpu.memory_space<smem>>) -> (i32, i32) {
    %c0_i32 = arith.constant 0 : i32
    %c0_i32_0 = arith.constant 0 : i32
    %c0_i32_1 = arith.constant 0 : i32
    return %c0_i32, %c0_i32_0 : i32, i32
  }
  func.func @transform_10(%arg0: i32, %arg1: memref<18xi32, #tpu.memory_space<smem>>) -> (i32, i32) {
    %c0_i32 = arith.constant 0 : i32
    %c0_i32_0 = arith.constant 0 : i32
    %c0_i32_1 = arith.constant 0 : i32
    return %c0_i32, %c0_i32_0 : i32, i32
  }
  func.func @transform_11(%arg0: i32, %arg1: memref<18xi32, #tpu.memory_space<smem>>) -> (i32, i32, i32) {
    %c0_i32 = arith.constant 0 : i32
    %c0_i32_0 = arith.constant 0 : i32
    %c0_i32_1 = arith.constant 0 : i32
    %c0_i32_2 = arith.constant 0 : i32
    return %c0_i32, %c0_i32_0, %c0_i32_1 : i32, i32, i32
  }
  func.func @transform_12(%arg0: i32, %arg1: memref<18xi32, #tpu.memory_space<smem>>) -> (i32, i32) {
    %c0_i32 = arith.constant 0 : i32
    %c0_i32_0 = arith.constant 0 : i32
    %c0_i32_1 = arith.constant 0 : i32
    return %c0_i32, %c0_i32_0 : i32, i32
  }
}

</mosaic_0001>

<bundles_post_ra>
// kernel: transducer_decoder_forward.1
= control target key start
LH: loop header
LB: loop body
LE: loop exit
PB: predicated region body
PF: predicated region fallthrough
CT: control target
= control target key end

     0   :  { %s18480_s0 = inlined_call_operand.vmem [shape: s32[18], index: 0, kind: input, shape index: {}]   ;;  %s18481_s1 = inlined_call_operand.vmem [shape: f32[40,1,32], index: 1, kind: input, shape index: {}]   ;;  %s18482_s2 = inlined_call_operand.hbm [shape: f32[2,4,32,32], index: 2, kind: input, shape index: {}]   ;;  %s18483_s3 = inlined_call_operand.hbm [shape: f32[2,4,32,32], index: 3, kind: input, shape index: {}]   ;;  %s18484_s4 = inlined_call_operand.vmem [shape: f32[2,4,1,32], index: 4, kind: input, shape index: {}]   ;;  %s18485_s5 = inlined_call_operand.vmem [shape: f32[2,8,48], index: 5, kind: input, shape index: {}]   ;;  %s18486_s6 = inlined_call_operand.vmem [shape: f32[48,32], index: 6, kind: input, shape index: {}]   ;;  %s18487_s7 = inlined_call_operand.vmem [shape: f32[32,32], index: 7, kind: input, shape index: {}]   ;;  %s18488_s8 = inlined_call_operand.vmem [shape: f32[32,128], index: 8, kind: input, shape index: {}]   ;;  %s18489_s9 = inlined_call_operand.vmem [shape: f32[1,128], index: 9, kind: input, shape index: {}]   ;;  %s18490_s10 = inlined_call_operand.vmem [shape: f32[32,128], index: 10, kind: input, shape index: {}]   ;;  %s18491_s11 = inlined_call_operand.vmem [shape: f32[1,128], index: 11, kind: input, shape index: {}]   ;;  %s18492_s12 = inlined_call_operand.vmem [shape: f32[2,72,128], index: 12, kind: output, shape index: {0}]   ;;  %s18493_s13 = inlined_call_operand.vmem [shape: f32[18,128], index: 13, kind: output, shape index: {1}]  }
   0x1   :  { %18502 = sst [smem:[#allocation17_spill]] %s18489_s9  ;;  %s19_s27 = sshll.u32 %s18480_s0, 4  ;;  %s20_s27 = int_to_ptr.vmem [resolvable:$true] %s19_s27 }
   0x2   :  { %18503 = sst [smem:[#allocation18_spill]] %s18492_s12  ;;  %s16070_s28 = scalar_lea.vmem %s20_s27, 16 }
   0x3   :  { %18504 = sst [smem:[#allocation19_spill]] %s18493_s13  ;;  %p16071_p0 = scmp.ne.s32.totalorder %s20_s27, %s16070_s28 }
   0x4   :  { %p16075_p1 = scmp.lt.s32.totalorder %s20_s27, %s20_s27  ;;  %p16076_p2 = scmp.lt.s32.totalorder %s16070_s28, %s16070_s28 }
   0x6   :  { %p16077_p3 = por %p16076_p2, %p16075_p1 }
   0x8   :  { %p16078_p4 = pnand %p16077_p3, %p16071_p0 }
   0xa   :  { %16081 = shalt.err (!%p16078_p4)  }
   0xb   :  { %s16132_s29 = smov [#allocation3]  }
   0xc   :  { %22 = dma.vmem_to_smem %s20_s27, 16, %s16132_s29, [#allocation2] }
   0xd   :  { %16126 = dma.done.wait [#allocation2], 16 }
   0xe   :  { %16127 = vsyncadd [#allocation2], 4294967280 }
   0xf   :  { %24 = sfence }
  0x10   :  { %25 = vsyncpa [#allocation5], 0 }
  0x11   :  { %26 = vsyncpa [#allocation7], 0  ;;  %s16133_s30 = smov [#allocation4]   ;;  %s16082_s16 = scalar_lea.hbm %s18482_s2, 4096 }
  0x12   :  { %s34_s14 = sshll.u32 %s16133_s30, 4  ;;  %p16083_p5 = scmp.ne.s32.totalorder %s18482_s2, %s16082_s16  ;;  %s35_s14 = int_to_ptr.vmem [resolvable:$true] %s34_s14 }
  0x13   :  { %p16086_p6 = scmp.lt.u32.totalorder %s16082_s16, %s18482_s2 }
  0x15   :  { %p16088_p7 = pnand %p16086_p6, %p16083_p5 }
  0x17   :  { %16091 = shalt.err (!%p16088_p7)
}
  0x18   :  { %s16092_s21 = scalar_lea.vmem %s35_s14, 4096  ;;  %p16097_p9 = scmp.lt.s32.totalorder %s35_s14, %s35_s14 }
  0x19   :  { %p16093_p8 = scmp.ne.s32.totalorder %s35_s14, %s16092_s21  ;;  %p16098_p10 = scmp.lt.s32.totalorder %s16092_s21, %s16092_s21 }
  0x1b   :  { %p16099_p11 = por %p16098_p10, %p16097_p9 }
  0x1d   :  { %p16100_p12 = pnand %p16099_p11, %p16093_p8 }
  0x1f   :  { %16103 = shalt.err (!%p16100_p12)
}
  0x20   :  { %s16134_s22 = smov 128   ;;  %s16135_s23 = smov 8  }
  0x21   :  { %40 = dma.hbm_to_vmem [thread:$0]  %s18482_s2, 4096, %s35_s14, [#allocation5], %s16134_s22, %s16134_s22, %s16135_s23  }
  0x22   :  { %s16136_s26 = smov [#allocation6]   ;;  %s16104_s30 = scalar_lea.hbm %s18483_s3, 4096 }
  0x23   :  { %s46_s27 = sshll.u32 %s16136_s26, 4  ;;  %p16105_p13 = scmp.ne.s32.totalorder %s18483_s3, %s16104_s30  ;;  %s47_s27 = int_to_ptr.vmem [resolvable:$true] %s46_s27 }
  0x24   :  { %p16108_p0 = scmp.lt.u32.totalorder %s16104_s30, %s18483_s3 }
  0x26   :  { %p16110_p1 = pnand %p16108_p0, %p16105_p13 }
  0x28   :  { %16113 = shalt.err (!%p16110_p1)
}
  0x29   :  { %s16114_s18 = scalar_lea.vmem %s47_s27, 4096  ;;  %p16119_p3 = scmp.lt.s32.totalorder %s47_s27, %s47_s27 }
  0x2a   :  { %p16115_p2 = scmp.ne.s32.totalorder %s47_s27, %s16114_s18  ;;  %p16120_p4 = scmp.lt.s32.totalorder %s16114_s18, %s16114_s18 }
  0x2c   :  { %p16121_p5 = por %p16120_p4, %p16119_p3 }
  0x2e   :  { %p16122_p6 = pnand %p16121_p5, %p16115_p2 }
  0x30   :  { %16125 = shalt.err (!%p16122_p6)
}
  0x31   :  { %52 = dma.hbm_to_vmem [thread:$0]  %s18483_s3, 4096, %s47_s27, [#allocation7], %s16134_s22, %s16134_s22, %s16135_s23  }
  0x32   :  { %16128 = dma.done.wait [#allocation5], 4096  }
  0x33   :  { %16129 = vsyncadd [#allocation5], 4294963200 }
  0x34   :  { %16130 = dma.done.wait [#allocation7], 4096  }
  0x35   :  { %16131 = vsyncadd [#allocation7], 4294963200  ;;  %v16137_v0 = vmov 0.0|0.0   ;;  %s16240_s19 = sld [smem:[#allocation3]]  ;;  %s16242_s20 = sld [smem:[#allocation3 + $0x1]]  ;;  %vm16138_vm0 = vmmov 0  }
  0x36   :  { %14808 = vmatprep.subr.bf16.mxu1 %v16137_v0  ;;  %14820 = vmatprep.subr.bf16.mxu0 %v16137_v0  ;;  %v16139_v1 = vmov 0.0   ;;  %s16248_s3 = sld [smem:[#allocation3 + $0x2]]  ;;  %s16250_s21 = sld [smem:[#allocation3 + $0x3]]  ;;  %v75_v2 = vld [vmem:[#allocation4] sm:$0xff]  ;;  %v76_v3 = vld [vmem:[#allocation4 + $0x8] sm:$0xff]  ;;  %vm285_vm1 = vcmask 1040384  }
  0x37   :  { %13476 = vmatprep.mubr.msk.f32.mxu1 %vm16138_vm0, %v16139_v1  ;;  %13510 = vmatprep.mubr.msk.f32.mxu0 %vm16138_vm0, %v16139_v1  ;;  %s16252_s22 = sld [smem:[#allocation3 + $0x4]]  ;;  %s16254_s23 = sld [smem:[#allocation3 + $0x5]]  ;;  %v83_v4 = vld [vmem:[#allocation4 + $0x40] sm:$0xff]  ;;  %v14809_v5 = vpack.c.bf16 %v76_v3, %v75_v2  ;;  %v84_v6 = vld [vmem:[#allocation4 + $0x48] sm:$0xff]  ;;  %v77_v7 = vld [vmem:[#allocation4 + $0x10] sm:$0xff]  ;;  %vm287_vm2 = vcmask 1041408  }
  0x38   :  { %s16256_s24 = sld [smem:[#allocation3 + $0x6]]  ;;  %s16258_s25 = sld [smem:[#allocation3 + $0x7]]  ;;  %v78_v8 = vld [vmem:[#allocation4 + $0x18] sm:$0xff]  ;;  %vm289_vm3 = vcmask 1042432   ;;  %vm291_vm4 = vcmask 1043456   ;;  %v14821_v9 = vpack.c.bf16 %v84_v6, %v83_v4  ;;  %v85_v10 = vld [vmem:[#allocation4 + $0x50] sm:$0xff] }
  0x39   :  { %s16260_s26 = sld [smem:[#allocation3 + $0x8]]  ;;  %s16262_s27 = sld [smem:[#allocation3 + $0x9]]  ;;  %v86_v11 = vld [vmem:[#allocation4 + $0x58] sm:$0xff]  ;;  %vm293_vm5 = vcmask 1044480   ;;  %vm295_vm6 = vcmask 1045504   ;;  %14810 = vmatpush3.bf16.msra.mxu1 %v14809_v5  ;;  %v14812_v13 = vpack.c.bf16 %v78_v8, %v77_v7  ;;  %vm297_vm7 = vcmask 1046528  }
  0x3a   :  { %s16264_s28 = sld [smem:[#allocation3 + $0xa]]  ;;  %s16266_s29 = sld [smem:[#allocation3 + $0xb]]  ;;  %14822 = vmatpush3.bf16.msra.mxu0 %v14821_v9  ;;  %14811 = vmatprep.subr.bf16.mxu1 %v16137_v0  ;;  %v14824_v17 = vpack.c.bf16 %v86_v11, %v85_v10  ;;  %vm319_vm8 = vcmask 261120   ;;  %v79_v24 = vld [vmem:[#allocation4 + $0x20] sm:$0xff]  ;;  %v80_v25 = vld [vmem:[#allocation4 + $0x28] sm:$0xff]  ;;  %v81_v40 = vld [vmem:[#allocation4 + $0x30] sm:$0xff] }
  0x3b   :  { %s148_s0 = scalar_lea.vmem %s18481_s1, %s16240_s19  ;;  %s151_s18 = scalar_lea.vmem %s18481_s1, %s16242_s20  ;;  %14823 = vmatprep.subr.bf16.mxu0 %v16137_v0  ;;  %v14815_v34 = vpack.c.bf16 %v80_v25, %v79_v24  ;;  %v107_v35 = vld [vmem:[#allocation6] sm:$0xff]  ;;  %v108_v36 = vld [vmem:[#allocation6 + $0x8] sm:$0xff]  ;;  %v82_v41 = vld [vmem:[#allocation4 + $0x38] sm:$0xff]  ;;  %vm9332_vm9 = vcmask 392192  }
  0x3c   :  { %s154_s12 = scalar_lea.vmem %s18481_s1, %s16248_s3  ;;  %s157_s30 = scalar_lea.vmem %s18481_s1, %s16250_s21  ;;  %v149_v12 = vld [vmem:[%s148_s0] sm:$0x1]  ;;  %v16336_v39 = vpack.c.bf16 %v108_v36, %v107_v35  ;;  %v109_v43 = vld [vmem:[#allocation6 + $0x10] sm:$0xff]  ;;  %v110_v44 = vld [vmem:[#allocation6 + $0x18] sm:$0xff]  ;;  %v14818_v46 = vpack.c.bf16 %v82_v41, %v81_v40 }
  0x3d   :  { %s160_s15 = scalar_lea.vmem %s18481_s1, %s16252_s22  ;;  %s163_s3 = scalar_lea.vmem %s18481_s1, %s16254_s23  ;;  %v12587_v14 = vld [vmem:[%s151_s18] ss:$0 sm:$0xff]  ;;  %14813 = vmatpush3.bf16.msra.mxu1 %v14812_v13  ;;  %v16363_v47 = vpack.c.bf16 %v110_v44, %v109_v43  ;;  %v88_v60 = vld [vmem:[#allocation4 + $0x68] sm:$0xff]  ;;  %v89_v2 = vld [vmem:[#allocation4 + $0x70] sm:$0xff] }
  0x3e   :  { %v12588_v15 = vld [vmem:[%s154_s12] ss:$0 sm:$0xff]  ;;  %s166_s21 = scalar_lea.vmem %s18481_s1, %s16256_s24  ;;  %s169_s22 = scalar_lea.vmem %s18481_s1, %s16258_s25  ;;  %v286_v21 = vsel %vm285_vm1, %v149_v12, %v12587_v14  ;;  %14825 = vmatpush3.bf16.msra.mxu0 %v14824_v17  ;;  %14814 = vmatprep.subr.bf16.mxu1 %v16137_v0  ;;  %v116_v62 = vld [vmem:[#allocation6 + $0x48] sm:$0xff]  ;;  %v90_v3 = vld [vmem:[#allocation4 + $0x78] sm:$0xff] }
  0x3f   :  { %v12589_v16 = vld [vmem:[%s157_s30] ss:$0 sm:$0xff]  ;;  %s172_s18 = scalar_lea.vmem %s18481_s1, %s16260_s26  ;;  %s175_s30 = scalar_lea.vmem %s18481_s1, %s16262_s27  ;;  %v288_v23 = vsel %vm287_vm2, %v286_v21, %v12588_v15  ;;  %14832 = vmatprep.subr.bf16.mxu0 %v16137_v0  ;;  %v117_v5 = vld [vmem:[#allocation6 + $0x50] sm:$0xff]  ;;  %v118_v6 = vld [vmem:[#allocation6 + $0x58] sm:$0xff]  ;;  %v14830_v7 = vpack.c.bf16 %v90_v3, %v89_v2 }
  0x40   :  { %v12590_v18 = vld [vmem:[%s160_s15] ss:$0 sm:$0xff]  ;;  %s178_s20 = scalar_lea.vmem %s18481_s1, %s16264_s28  ;;  %s181_s26 = scalar_lea.vmem %s18481_s1, %s16266_s29  ;;  %v290_v26 = vsel %vm289_vm3, %v288_v23, %v12589_v16  ;;  %v16412_v8 = vpack.c.bf16 %v118_v6, %v117_v5  ;;  %v112_v10 = vld [vmem:[#allocation6 + $0x28] sm:$0xff]  ;;  %v113_v12 = vld [vmem:[#allocation6 + $0x30] sm:$0xff] }
  0x41   :  { %v12591_v19 = vld [vmem:[%s163_s3] ss:$0 sm:$0xff]  ;;  %v292_v30 = vsel %vm291_vm4, %v290_v26, %v12590_v18  ;;  %s16322_s27 = sld [smem:[#allocation3 + $0xc]]  ;;  %s16324_s17 = sld [smem:[#allocation3 + $0xd]]  ;;  %v114_v13 = vld [vmem:[#allocation6 + $0x38] sm:$0xff]  ;;  %v120_v16 = vld [vmem:[#allocation6 + $0x68] sm:$0xff] }
  0x42   :  { %v12592_v20 = vld [vmem:[%s166_s21] ss:$0 sm:$0xff]  ;;  %v294_v33 = vsel %vm293_vm5, %v292_v30, %v12591_v19  ;;  %s16329_s28 = sld [smem:[#allocation3 + $0xe]]  ;;  %s16331_s29 = sld [smem:[#allocation3 + $0xf]]  ;;  %v16438_v14 = vpack.c.bf16 %v114_v13, %v113_v12  ;;  %v121_v18 = vld [vmem:[#allocation6 + $0x70] sm:$0xff]  ;;  %v122_v19 = vld [vmem:[#allocation6 + $0x78] sm:$0xff] }
  0x43   :  { %v12593_v22 = vld [vmem:[%s169_s22] ss:$0 sm:$0xff]  ;;  %v296_v37 = vsel %vm295_vm6, %v294_v33, %v12592_v20  ;;  %s16338_s3 = sld [smem:[#allocation3 + $0x10]]  ;;  %s16340_s9 = sld [smem:[#allocation3 + $0x11]]  ;;  %v16455_v20 = vpack.c.bf16 %v122_v19, %v121_v18  ;;  %v12610_v43 = vld [vmem:[%s18484_s4 + $0x2] ss:$0 sm:$0xff] }
  0x44   :  { %v173_v27 = vld [vmem:[%s172_s18] sm:$0x1]  ;;  %v16343_v42 = vsel %vm297_vm7, %v296_v37, %v12593_v22  ;;  %v12614_v2 = vld [vmem:[%s18484_s4 + $0x3] ss:$0 sm:$0xff]  ;;  %s18528_s18 = sld [smem:[#allocation17_spill]] }
  0x45   :  { %v12594_v28 = vld [vmem:[%s175_s30] ss:$0 sm:$0xff]  ;;  %13477 = vmatmul.mubr.msk.f32.vlgmr.msra.gmra.mrb[0].mxu1 %vm319_vm8, %v16343_v42  ;;  %13511 = vmatmul.mubr.msk.f32.vlgmr.msra.gmra.mrb[0].mxu0 %vm319_vm8, %v16343_v42  ;;  %s18529_s30 = sld [smem:[#allocation18_spill]] }
  0x46   :  { %v12595_v29 = vld [vmem:[%s178_s20] ss:$0 sm:$0xff]  ;;  %v299_v32 = vsel %vm285_vm1, %v173_v27, %v12594_v28  ;;  %14816 = vmatpush3.bf16.msra.mxu1 %v14815_v34  ;;  %13479 = vmatprep.mubr.msk.f32.mxu1 %vm16138_vm0, %v16139_v1 }
  0x47   :  { %v12596_v31 = vld [vmem:[%s181_s26] ss:$0 sm:$0xff]  ;;  %v300_v38 = vsel %vm287_vm2, %v299_v32, %v12595_v29  ;;  %13513 = vmatprep.mubr.msk.f32.mxu0 %vm16138_vm0, %v16139_v1  ;;  %s184_s0 = scalar_lea.vmem %s18481_s1, %s16322_s27  ;;  %s187_s12 = scalar_lea.vmem %s18481_s1, %s16324_s17  ;;  %14834 = vmatpush3.bf16.msra.mxu0 %v16336_v39 }
  0x48   :  { %v301_v45 = vsel %vm289_vm3, %v300_v38, %v12596_v31  ;;  %v12597_v48 = vld [vmem:[%s184_s0] ss:$0 sm:$0xff]  ;;  %s190_s24 = scalar_lea.vmem %s18481_s1, %s16329_s28  ;;  %s193_s25 = scalar_lea.vmem %s18481_s1, %s16331_s29  ;;  %14817 = vmatprep.subr.bf16.mxu1 %v16137_v0  ;;  %14835 = vmatprep.subr.bf16.mxu0 %v16137_v0 }
  0x49   :  { %v12598_v49 = vld [vmem:[%s187_s12] ss:$0 sm:$0xff]  ;;  %v302_v52 = vsel %vm291_vm4, %v301_v45, %v12597_v48  ;;  %s196_s15 = scalar_lea.vmem %s18481_s1, %s16338_s3  ;;  %s199_s27 = scalar_lea.vmem %s18481_s1, %s16340_s9 }
  0x4a   :  { %v12599_v50 = vld [vmem:[%s190_s24] ss:$0 sm:$0xff]  ;;  %v303_v53 = vsel %vm293_vm5, %v302_v52, %v12598_v49  ;;  %14819 = vmatpush3.bf16.msra.mxu1 %v14818_v46  ;;  %s18505_s0 = sld [smem:[#allocation19_spill]] }
  0x4b   :  { %v12600_v51 = vld [vmem:[%s193_s25] ss:$0 sm:$0xff]  ;;  %v304_v54 = vsel %vm295_vm6, %v303_v53, %v12599_v50  ;;  %14837 = vmatpush3.bf16.msra.mxu0 %v16363_v47  ;;  %14826 = vmatprep.subr.bf16.mxu1 %v16137_v0 }
  0x4c   :  { %v197_v55 = vld [vmem:[%s196_s15] sm:$0x1]  ;;  %v305_v57 = vsel %vm297_vm7, %v304_v54, %v12600_v51  ;;  %14844 = vmatprep.subr.bf16.mxu0 %v16137_v0 }
  0x4d   :  { %v12601_v56 = vld [vmem:[%s199_s27] ss:$0 sm:$0xff]  ;;  %13480 = vmatmul.mubr.msk.f32.gmra.mrb[2].mxu1 %vm319_vm8, %v305_v57  ;;  %13514 = vmatmul.mubr.msk.f32.gmra.mrb[2].mxu0 %vm319_vm8, %v305_v57 }
  0x4e   :  { %13482 = vmatprep.mubr.msk.f32.mxu1 %vm16138_vm0, %v16139_v1  ;;  %13516 = vmatprep.mubr.msk.f32.mxu0 %vm16138_vm0, %v16139_v1  ;;  %v312_v58 = vsel %vm285_vm1, %v197_v55, %v12601_v56  ;;  %v87_v59 = vld [vmem:[#allocation4 + $0x60] sm:$0xff] }
  0x4f   :  { %v115_v61 = vld [vmem:[#allocation6 + $0x40] sm:$0xff]  ;;  %v14827_v63 = vpack.c.bf16 %v88_v60, %v87_v59 }
  0x50   :  { %v16403_v4 = vpack.c.bf16 %v116_v62, %v115_v61  ;;  %v111_v9 = vld [vmem:[#allocation6 + $0x20] sm:$0xff] }
  0x51   :  { %13483 = vmatmul.mubr.msk.f32.gmra.mrb[4].mxu1 %vm319_vm8, %v312_v58  ;;  %13517 = vmatmul.mubr.msk.f32.gmra.mrb[4].mxu0 %vm319_vm8, %v312_v58  ;;  %v16426_v11 = vpack.c.bf16 %v112_v10, %v111_v9  ;;  %v119_v15 = vld [vmem:[#allocation6 + $0x60] sm:$0xff] }
  0x52   :  { %13493 = vmatprep.mubr.msk.f32.mxu1 %vm16138_vm0, %v16139_v1  ;;  %13544 = vmatprep.mubr.msk.f32.mxu0 %vm16138_vm0, %v16139_v1  ;;  %v16451_v17 = vpack.c.bf16 %v120_v16, %v119_v15  ;;  %v12602_v25 = vld [vmem:[%s18484_s4] ss:$0 sm:$0xff]  ;;  %v12606_v56 = vld [vmem:[%s18484_s4 + $0x1] ss:$0 sm:$0xff] }
  0x55   :  { %13494 = vmatmul.mubr.msk.f32.vlgmr.msra.gmra.mrb[6].mxu1 %vm319_vm8, %v16343_v42  ;;  %13545 = vmatmul.mubr.f32.vlgmr.msra.gmra.mrb[6].mxu0 %v16139_v1 }
  0x56   :  { %14828 = vmatpush3.bf16.msra.mxu1 %v14827_v63  ;;  %13496 = vmatprep.mubr.msk.f32.mxu1 %vm16138_vm0, %v16139_v1 }
  0x57   :  { %14829 = vmatprep.subr.bf16.mxu1 %v16137_v0  ;;  %14846 = vmatpush3.bf16.msra.mxu0 %v16403_v4 }
  0x58   :  { %14847 = vmatprep.subr.bf16.mxu0 %v16137_v0  ;;  %13566 = vmatprep.mubr.msk.f32.mxu0 %vm16138_vm0, %v16139_v1 }
  0x59   :  { %13497 = vmatmul.mubr.msk.f32.gmra.mrb[8].mxu1 %vm319_vm8, %v305_v57 }
  0x5a   :  { %13499 = vmatprep.mubr.msk.f32.mxu1 %vm16138_vm0, %v16139_v1  ;;  %14831 = vmatpush3.bf16.msra.mxu1 %v14830_v7 }
  0x5b   :  { %14838 = vmatprep.subr.bf16.mxu1 %v16137_v0  ;;  %14849 = vmatpush3.bf16.msra.mxu0 %v16412_v8 }
  0x5c   :  { %14856 = vmatprep.subr.bf16.mxu0 %v16137_v0 }
  0x5d   :  { %13500 = vmatmul.mubr.msk.f32.gmra.mrb[10].mxu1 %vm319_vm8, %v312_v58 }
  0x5e   :  { %13527 = vmatprep.mubr.msk.f32.mxu1 %vm16138_vm0, %v16139_v1  ;;  %13567 = vmatmul.mubr.f32.vlgmr.msra.gmra.mrb[8].mxu0 %v16139_v1 }
  0x5f   :  { %14858 = vmatpush3.bf16.msra.mxu0 %v16336_v39  ;;  %13588 = vmatprep.mubr.msk.f32.mxu0 %vm16138_vm0, %v16139_v1 }
  0x60   :  { %14859 = vmatprep.subr.bf16.mxu0 %v16137_v0 }
  0x61   :  { %13528 = vmatmul.mubr.msk.f32.vlgmr.msra.gmra.mrb[12].mxu1 %vm319_vm8, %v16343_v42 }
  0x62   :  { %14840 = vmatpush3.bf16.msra.mxu1 %v16426_v11  ;;  %13530 = vmatprep.mubr.msk.f32.mxu1 %vm16138_vm0, %v16139_v1 }
  0x63   :  { %14841 = vmatprep.subr.bf16.mxu1 %v16137_v0  ;;  %14861 = vmatpush3.bf16.msra.mxu0 %v16363_v47 }
  0x64   :  { %14868 = vmatprep.subr.bf16.mxu0 %v16137_v0 }
  0x65   :  { %13531 = vmatmul.mubr.msk.f32.gmra.mrb[14].mxu1 %vm319_vm8, %v305_v57 }
  0x66   :  { %13533 = vmatprep.mubr.msk.f32.mxu1 %vm16138_vm0, %v16139_v1  ;;  %14843 = vmatpush3.bf16.msra.mxu1 %v16438_v14 }
  0x67   :  { %14850 = vmatprep.subr.bf16.mxu1 %v16137_v0 }
  0x69   :  { %13534 = vmatmul.mubr.msk.f32.gmra.mrb[16].mxu1 %vm319_vm8, %v312_v58 }
  0x6a   :  { %13555 = vmatprep.mubr.msk.f32.mxu1 %vm16138_vm0, %v16139_v1 }
  0x6d   :  { %13556 = vmatmul.mubr.f32.vlgmr.msra.gmra.mrb[18].mxu1 %v16139_v1 }
  0x6e   :  { %14852 = vmatpush3.bf16.msra.mxu1 %v16451_v17  ;;  %13577 = vmatprep.mubr.msk.f32.mxu1 %vm16138_vm0, %v16139_v1 }
  0x6f   :  { %14853 = vmatprep.subr.bf16.mxu1 %v16137_v0 }
  0x72   :  { %14855 = vmatpush3.bf16.msra.mxu1 %v16455_v20 }
  0x73   :  { %14862 = vmatprep.subr.bf16.mxu1 %v16137_v0 }
  0x75   :  { %13578 = vmatmul.mubr.f32.vlgmr.msra.gmra.mrb[20].mxu1 %v16139_v1 }
  0x76   :  { %14864 = vmatpush3.bf16.msra.mxu1 %v16426_v11  ;;  %13599 = vmatprep.mubr.msk.f32.mxu1 %vm16138_vm0, %v16139_v1 }
  0x77   :  { %14865 = vmatprep.subr.bf16.mxu1 %v16137_v0 }
  0x7a   :  { %14867 = vmatpush3.bf16.msra.mxu1 %v16438_v14 }
  0x7b   :  { %14874 = vmatprep.subr.bf16.mxu1 %v16137_v0 }
 0x118   :  { %v395_v21 = vpop.f32.mrb[0].mxu1  ;;  %v567_v22 = vpop.f32.mrb[0].mxu0 }
 0x119   :  { %v13478_v23 = vpop.f32.mrb[1].mxu1  ;;  %v13512_v24 = vpop.f32.mrb[1].mxu0  ;;  %v16478_v34 = vadd.f32 %v12602_v25, %v395_v21  ;;  %v16486_v45 = vadd.f32 %v12610_v43, %v567_v22  ;;  %v99_v43 = vld [vmem:[#allocation4 + $0xc0] sm:$0xff] }
 0x120   :  { %v400_v26 = vpop.f32.mrb[2].mxu1  ;;  %v16472_v27 = vpop.f32.mrb[2].mxu0 }
 0x121   :  { %v16474_v28 = vadd.f32 %v12602_v25, %v400_v26  ;;  %v13481_v29 = vpop.f32.mrb[3].mxu1  ;;  %v13515_v30 = vpop.f32.mrb[3].mxu0  ;;  %v92_v26 = vld [vmem:[#allocation4 + $0x88] sm:$0xff] }
 0x122   :  { %v95_v29 = vld [vmem:[#allocation4 + $0xa0] sm:$0xff]  ;;  %v96_v30 = vld [vmem:[#allocation4 + $0xa8] sm:$0xff] }
 0x124   :  { %v405_v31 = vpop.f32.mrb[4].mxu1 }
 0x125   :  { %v16476_v32 = vadd.f32 %v12602_v25, %v405_v31  ;;  %v13484_v33 = vpop.f32.mrb[5].mxu1  ;;  %v91_v25 = vld [vmem:[#allocation4 + $0x80] sm:$0xff] }
 0x126   :  { %v16522_v31 = vpack.c.bf16 %v92_v26, %v91_v25  ;;  %v16524_v33 = vpack.c.bf16 %v96_v30, %v95_v29  ;;  %v137_v25 = vld [vmem:[#allocation6 + $0xf0] sm:$0xff]  ;;  %v138_v26 = vld [vmem:[#allocation6 + $0xf8] sm:$0xff] }
 0x127   :  { %v16606_v30 = vpack.c.bf16 %v138_v26, %v137_v25  ;;  %v16640_v26 = vld [vmem:[%s18484_s4 + $0x4] ss:$0 sm:$0xff] }
 0x128   :  { %v481_v35 = vpop.f32.mrb[6].mxu1  ;;  %v736_v36 = vpop.f32.mrb[6].mxu0 }
 0x129   :  { %v740_v37 = vadd.f32 %v736_v36, %v16478_v34  ;;  %v13495_v38 = vpop.f32.mrb[7].mxu1  ;;  %v13546_v40 = vpop.f32.mrb[7].mxu0  ;;  %v16494_v57 = vadd.f32 %v12606_v56, %v481_v35  ;;  %v93_v35 = vld [vmem:[#allocation4 + $0x90] sm:$0xff]  ;;  %v94_v36 = vld [vmem:[#allocation4 + $0x98] sm:$0xff] }
 0x12a   :  { %v98_v38 = vld [vmem:[#allocation4 + $0xb8] sm:$0xff]  ;;  %v16534_v40 = vpack.c.bf16 %v94_v36, %v93_v35 }
 0x12b   :  { %v12618_v41 = vmul.f32 -1.442695, %v740_v37  ;;  %v97_v37 = vld [vmem:[#allocation4 + $0xb0] sm:$0xff] }
 0x12c   :  { %v16481_v42 = vpop.f32.mrb[8].mxu1 }
 0x12d   :  { %15640 = vpow2.f32 %v12618_v41  ;;  %v13498_v44 = vpop.f32.mrb[9].mxu1  ;;  %v16536_v41 = vpack.c.bf16 %v98_v38, %v97_v37 }
 0x12e   :  { %v100_v44 = vld [vmem:[#allocation4 + $0xc8] sm:$0xff] }
 0x131   :  { %v890_v46 = vpop.f32.mrb[8].mxu0 }
 0x132   :  { %v13568_v48 = vpop.f32.mrb[9].mxu0  ;;  %v894_v50 = vadd.f32 %v890_v46, %v16486_v45  ;;  %v103_v46 = vld [vmem:[#allocation4 + $0xe0] sm:$0xff] }
 0x133   :  { %v104_v48 = vld [vmem:[#allocation4 + $0xe8] sm:$0xff] }
 0x134   :  { %v653_v49 = vpop.f32.mrb[12].mxu1  ;;  %15642 = vtanh.f32 %v894_v50  ;;  %v16548_v50 = vpack.c.bf16 %v104_v48, %v103_v46 }
 0x135   :  { %v13529_v51 = vpop.f32.mrb[13].mxu1  ;;  %v16500_v5 = vadd.f32 %v12614_v2, %v653_v49  ;;  %v16546_v49 = vpack.c.bf16 %v100_v44, %v99_v43 }
 0x136   :  { %v101_v51 = vld [vmem:[#allocation4 + $0xd0] sm:$0xff] }
 0x137   :  { %v15641_v52 = vpop.eup %15640 }
 0x138   :  { %v744_v53 = vadd.f32 1.0, %v15641_v52  ;;  %v16489_v54 = vpop.f32.mrb[14].mxu1  ;;  %v102_v52 = vld [vmem:[#allocation4 + $0xd8] sm:$0xff] }
 0x139   :  { %v13532_v55 = vpop.f32.mrb[15].mxu1  ;;  %v16558_v56 = vpack.c.bf16 %v102_v52, %v101_v51 }
 0x13a   :  { %15644 = vrcp.f32 %v744_v53  ;;  %v105_v53 = vld [vmem:[#allocation4 + $0xf0] sm:$0xff]  ;;  %v106_v55 = vld [vmem:[#allocation4 + $0xf8] sm:$0xff] }
 0x13e   :  { %v15643_v61 = vpop.eup %15642 }
 0x140   :  { %v813_v58 = vpop.f32.mrb[18].mxu1 }
 0x141   :  { %v817_v59 = vadd.f32 %v813_v58, %v16494_v57  ;;  %v13557_v60 = vpop.f32.mrb[19].mxu1  ;;  %v16560_v58 = vpack.c.bf16 %v106_v55, %v105_v53 }
 0x142   :  { %v124_v60 = vld [vmem:[#allocation6 + $0x88] sm:$0xff] }
 0x143   :  { %v12619_v62 = vmul.f32 -1.442695, %v817_v59  ;;  %v123_v59 = vld [vmem:[#allocation6 + $0x80] sm:$0xff] }
 0x144   :  { %v15645_v63 = vpop.eup %15644 }
 0x145   :  { %15646 = vpow2.f32 %v12619_v62  ;;  %v974_v3 = vmul.f32 %v15645_v63, %v15643_v61  ;;  %v127_v61 = vld [vmem:[#allocation6 + $0xa0] sm:$0xff]  ;;  %v128_v62 = vld [vmem:[#allocation6 + $0xa8] sm:$0xff]  ;;  %v16570_v63 = vpack.c.bf16 %v124_v60, %v123_v59 }
 0x146   :  { %v16572_v2 = vpack.c.bf16 %v128_v62, %v127_v61 }
 0x148   :  { %v962_v6 = vpop.f32.mrb[20].mxu1 }
 0x149   :  { %v966_v7 = vadd.f32 %v962_v6, %v16500_v5  ;;  %v13579_v9 = vpop.f32.mrb[21].mxu1  ;;  %v126_v6 = vld [vmem:[#allocation6 + $0x98] sm:$0xff] }
 0x14a   :  { %v130_v9 = vld [vmem:[#allocation6 + $0xb8] sm:$0xff] }
 0x14b   :  { %v12620_v10 = vmul.f32 -1.442695, %v966_v7  ;;  %v129_v7 = vld [vmem:[#allocation6 + $0xb0] sm:$0xff] }
 0x14d   :  { %15648 = vpow2.f32 %v12620_v10 }
 0x14f   :  { %v15647_v12 = vpop.eup %15646 }
 0x150   :  { %v821_v13 = vadd.f32 1.0, %v15647_v12  ;;  %v16584_v12 = vpack.c.bf16 %v130_v9, %v129_v7 }
 0x152   :  { %15650 = vrcp.f32 %v821_v13  ;;  %v131_v13 = vld [vmem:[#allocation6 + $0xc0] sm:$0xff] }
 0x157   :  { %v15649_v15 = vpop.eup %15648 }
 0x158   :  { %v970_v18 = vadd.f32 1.0, %v15649_v15  ;;  %v132_v15 = vld [vmem:[#allocation6 + $0xc8] sm:$0xff] }
 0x15a   :  { %15652 = vrcp.f32 %v970_v18  ;;  %v136_v18 = vld [vmem:[#allocation6 + $0xe8] sm:$0xff] }
 0x15c   :  { %v15651_v16 = vpop.eup %15650 }
 0x15d   :  { %v973_v19 = vmul.f32 0.0, %v15651_v16  ;;  %v135_v16 = vld [vmem:[#allocation6 + $0xe0] sm:$0xff] }
 0x15f   :  { %v16503_v21 = vadd.f32 %v974_v3, %v973_v19  ;;  %v125_v3 = vld [vmem:[#allocation6 + $0x90] sm:$0xff]  ;;  %v16594_v19 = vpack.c.bf16 %v132_v15, %v131_v13 }
 0x160   :  { %v16582_v10 = vpack.c.bf16 %v126_v6, %v125_v3 }
 0x161   :  { %15654 = vtanh.f32 %v16503_v21  ;;  %v1297_v25 = vrot.slane %v16503_v21, 6 }
 0x164   :  { %v15653_v22 = vpop.eup %15652 }
 0x16b   :  { %v15655_v23 = vpop.eup %15654 }
 0x16c   :  { %v16506_v24 = vmul.f32 %v15655_v23, %v15653_v22  ;;  %v16596_v22 = vpack.c.bf16 %v136_v18, %v135_v16  ;;  %v133_v23 = vld [vmem:[#allocation6 + $0xd0] sm:$0xff] }
 0x16e   :  { %13589 = vmatmul.mubr.msk.f32.vlgmr.msra.gmra.mrb[10].mxu0 %vm319_vm8, %v16506_v24  ;;  %13600 = vmatmul.mubr.msk.f32.vlgmr.msra.gmra.mrb[22].mxu1 %vm319_vm8, %v16506_v24 }
 0x16f   :  { %14870 = vmatpush3.bf16.msra.mxu0 %v16403_v4  ;;  %14876 = vmatpush3.bf16.msra.mxu1 %v16451_v17 }
 0x170   :  { %14871 = vmatprep.subr.bf16.mxu0 %v16137_v0  ;;  %14877 = vmatprep.subr.bf16.mxu1 %v16137_v0 }
 0x171   :  { %13610 = vmatprep.mubr.msk.f32.mxu0 %vm16138_vm0, %v16139_v1  ;;  %13621 = vmatprep.mubr.msk.f32.mxu1 %vm16138_vm0, %v16139_v1 }
 0x173   :  { %14873 = vmatpush3.bf16.msra.mxu0 %v16412_v8  ;;  %14879 = vmatpush3.bf16.msra.mxu1 %v16455_v20 }
 0x174   :  { %14880 = vmatprep.subr.bf16.mxu0 %v16137_v0  ;;  %14886 = vmatprep.subr.bf16.mxu1 %v16137_v0 }
 0x176   :  { %13611 = vmatmul.mubr.msk.f32.vlgmr.msra.gmra.mrb[12].mxu0 %vm319_vm8, %v16506_v24  ;;  %13622 = vmatmul.mubr.msk.f32.vlgmr.msra.gmra.mrb[24].mxu1 %vm319_vm8, %v16506_v24 }
 0x177   :  { %14882 = vmatpush3.bf16.msra.mxu0 %v16522_v31  ;;  %14888 = vmatpush3.bf16.msra.mxu1 %v16524_v33 }
 0x178   :  { %14883 = vmatprep.subr.bf16.mxu0 %v16137_v0  ;;  %14889 = vmatprep.subr.bf16.mxu1 %v16137_v0 }
 0x179   :  { %13632 = vmatprep.mubr.msk.f32.mxu0 %vm16138_vm0, %v16139_v1  ;;  %13643 = vmatprep.mubr.msk.f32.mxu1 %vm16138_vm0, %v16139_v1 }
 0x17b   :  { %14885 = vmatpush3.bf16.msra.mxu0 %v16534_v40  ;;  %14891 = vmatpush3.bf16.msra.mxu1 %v16536_v41 }
 0x17c   :  { %14892 = vmatprep.subr.bf16.mxu0 %v16137_v0  ;;  %14898 = vmatprep.subr.bf16.mxu1 %v16137_v0 }
 0x17e   :  { %13633 = vmatmul.mubr.msk.f32.vlgmr.msra.gmra.mrb[14].mxu0 %vm319_vm8, %v16506_v24  ;;  %13644 = vmatmul.mubr.msk.f32.vlgmr.msra.gmra.mrb[26].mxu1 %vm319_vm8, %v16506_v24 }
 0x17f   :  { %14894 = vmatpush3.bf16.msra.mxu0 %v16546_v49  ;;  %14900 = vmatpush3.bf16.msra.mxu1 %v16548_v50 }
 0x180   :  { %14895 = vmatprep.subr.bf16.mxu0 %v16137_v0  ;;  %14901 = vmatprep.subr.bf16.mxu1 %v16137_v0 }
 0x181   :  { %13654 = vmatprep.mubr.msk.f32.mxu0 %vm16138_vm0, %v16139_v1  ;;  %13665 = vmatprep.mubr.msk.f32.mxu1 %vm16138_vm0, %v16139_v1 }
 0x183   :  { %14897 = vmatpush3.bf16.msra.mxu0 %v16558_v56  ;;  %14903 = vmatpush3.bf16.msra.mxu1 %v16560_v58 }
 0x184   :  { %14904 = vmatprep.subr.bf16.mxu0 %v16137_v0  ;;  %14910 = vmatprep.subr.bf16.mxu1 %v16137_v0 }
 0x186   :  { %13655 = vmatmul.mubr.msk.f32.vlgmr.msra.gmra.mrb[16].mxu0 %vm319_vm8, %v16506_v24  ;;  %13666 = vmatmul.mubr.msk.f32.vlgmr.msra.gmra.mrb[28].mxu1 %vm319_vm8, %v16506_v24  ;;  %v134_v24 = vld [vmem:[#allocation6 + $0xd8] sm:$0xff] }
 0x187   :  { %14906 = vmatpush3.bf16.msra.mxu0 %v16570_v63  ;;  %14912 = vmatpush3.bf16.msra.mxu1 %v16572_v2  ;;  %v16604_v29 = vpack.c.bf16 %v134_v24, %v133_v23 }
 0x188   :  { %14907 = vmatprep.subr.bf16.mxu0 %v16137_v0  ;;  %14913 = vmatprep.subr.bf16.mxu1 %v16137_v0 }
 0x189   :  { %13676 = vmatprep.mubr.msk.f32.mxu0 %vm16138_vm0, %v16139_v1  ;;  %13687 = vmatprep.mubr.msk.f32.mxu1 %vm16138_vm0, %v16139_v1 }
 0x18b   :  { %14909 = vmatpush3.bf16.msra.mxu0 %v16582_v10  ;;  %14915 = vmatpush3.bf16.msra.mxu1 %v16584_v12 }
 0x18c   :  { %14916 = vmatprep.subr.bf16.mxu0 %v16137_v0  ;;  %14922 = vmatprep.subr.bf16.mxu1 %v16137_v0 }
 0x18e   :  { %13677 = vmatmul.mubr.f32.vlgmr.msra.gmra.mrb[14].mxu0 %v16139_v1  ;;  %13688 = vmatmul.mubr.f32.vlgmr.msra.gmra.mrb[26].mxu1 %v16139_v1 }
 0x18f   :  { %14918 = vmatpush3.bf16.msra.mxu0 %v16594_v19  ;;  %14924 = vmatpush3.bf16.msra.mxu1 %v16596_v22 }
 0x190   :  { %14919 = vmatprep.subr.bf16.mxu0 %v16137_v0  ;;  %14925 = vmatprep.subr.bf16.mxu1 %v16137_v0 }
 0x191   :  { %13698 = vmatprep.mubr.msk.f32.mxu0 %vm16138_vm0, %v16139_v1  ;;  %13709 = vmatprep.mubr.msk.f32.mxu1 %vm16138_vm0, %v16139_v1 }
 0x193   :  { %14921 = vmatpush3.bf16.msra.mxu0 %v16604_v29  ;;  %14927 = vmatpush3.bf16.msra.mxu1 %v16606_v30 }
 0x194   :  { %14928 = vmatprep.subr.bf16.mxu0 %v16137_v0  ;;  %14934 = vmatprep.subr.bf16.mxu1 %v16137_v0 }
 0x196   :  { %13699 = vmatmul.mubr.f32.vlgmr.msra.gmra.mrb[16].mxu0 %v16139_v1  ;;  %13710 = vmatmul.mubr.f32.vlgmr.msra.gmra.mrb[28].mxu1 %v16139_v1 }
 0x197   :  { %14930 = vmatpush3.bf16.msra.mxu0 %v16336_v39  ;;  %14936 = vmatpush3.bf16.msra.mxu1 %v16426_v11 }
 0x198   :  { %14931 = vmatprep.subr.bf16.mxu0 %v16137_v0  ;;  %14937 = vmatprep.subr.bf16.mxu1 %v16137_v0 }
 0x199   :  { %13720 = vmatprep.mubr.msk.f32.mxu0 %vm16138_vm0, %v16139_v1  ;;  %13731 = vmatprep.mubr.msk.f32.mxu1 %vm16138_vm0, %v16139_v1 }
 0x19b   :  { %14933 = vmatpush3.bf16.msra.mxu0 %v16363_v47  ;;  %14939 = vmatpush3.bf16.msra.mxu1 %v16438_v14 }
 0x19c   :  { %14940 = vmatprep.subr.bf16.mxu0 %v16137_v0  ;;  %14946 = vmatprep.subr.bf16.mxu1 %v16137_v0 }
 0x241   :  { %v1047_v35 = vpop.f32.mrb[10].mxu0  ;;  %v1127_v36 = vpop.f32.mrb[22].mxu1 }
 0x242   :  { %v1052_v37 = vrot.slane %v1047_v35, 6  ;;  %v1132_v38 = vrot.slane %v1127_v36, 6  ;;  %v13590_v43 = vpop.f32.mrb[11].mxu0  ;;  %v13601_v44 = vpop.f32.mrb[23].mxu1  ;;  %v16645_v35 = vld [vmem:[%s18484_s4 + $0x5] ss:$0 sm:$0xff] }
 0x244   :  { %v1054_v46 = vadd.f32 %v1052_v37, %v16478_v34  ;;  %v1134_v48 = vadd.f32 %v1132_v38, %v16494_v57 }
 0x246   :  { %v12622_v51 = vmul.f32 -1.442695, %v1054_v46  ;;  %v12624_v52 = vmul.f32 -1.442695, %v1134_v48 }
 0x248   :  { %15656 = vpow2.f32 %v12622_v51 }
 0x249   :  { %15658 = vpow2.f32 %v12624_v52  ;;  %v1207_v53 = vpop.f32.mrb[12].mxu0  ;;  %v1282_v55 = vpop.f32.mrb[24].mxu1 }
 0x24a   :  { %v1287_v59 = vrot.slane %v1282_v55, 6  ;;  %v13612_v60 = vpop.f32.mrb[13].mxu0  ;;  %v13623_v61 = vpop.f32.mrb[25].mxu1  ;;  %v1212_v62 = vrot.slane %v1207_v53, 6 }
 0x24c   :  { %v1289_v3 = vadd.f32 %v1287_v59, %v16500_v5  ;;  %v1214_v7 = vadd.f32 %v1212_v62, %v16486_v45 }
 0x24e   :  { %v12627_v6 = vmul.f32 -1.442695, %v1289_v3 }
 0x250   :  { %15660 = vpow2.f32 %v12627_v6  ;;  %v16655_v6 = vld [vmem:[%s18484_s4 + $0x6] ss:$0 sm:$0xff] }
 0x251   :  { %15662 = vtanh.f32 %v1214_v7  ;;  %v16660_v7 = vld [vmem:[%s18484_s4 + $0x7] ss:$0 sm:$0xff] }
 0x252   :  { %v15657_v9 = vpop.eup %15656 }
 0x253   :  { %v15659_v13 = vpop.eup %15658  ;;  %v1058_v15 = vadd.f32 1.0, %v15657_v9 }
 0x254   :  { %v1138_v16 = vadd.f32 1.0, %v15659_v13 }
 0x255   :  { %15664 = vrcp.f32 %v1058_v15 }
 0x256   :  { %15666 = vrcp.f32 %v1138_v16 }
 0x25a   :  { %v15661_v18 = vpop.eup %15660 }
 0x25b   :  { %v15663_v23 = vpop.eup %15662  ;;  %v1293_v38 = vadd.f32 1.0, %v15661_v18 }
 0x25d   :  { %15668 = vrcp.f32 %v1293_v38 }
 0x25f   :  { %v15665_v24 = vpop.eup %15664 }
 0x260   :  { %v15667_v36 = vpop.eup %15666  ;;  %v1300_v37 = vmul.f32 %v15665_v24, %v15663_v23 }
 0x261   :  { %v1299_v43 = vmul.f32 %v15667_v36, %v1297_v25  ;;  %v1674_v44 = vpop.f32.mrb[14].mxu0  ;;  %v1751_v46 = vpop.f32.mrb[26].mxu1 }
 0x262   :  { %v15517_v48 = vadd.f32 %v16640_v26, %v1674_v44  ;;  %v15518_v21 = vadd.f32 %v16645_v35, %v1751_v46  ;;  %v13678_v51 = vpop.f32.mrb[15].mxu0  ;;  %v13689_v52 = vpop.f32.mrb[27].mxu1 }
 0x263   :  { %v16649_v53 = vadd.f32 %v1300_v37, %v1299_v43 }
 0x264   :  { %v12636_v55 = vmul.f32 -1.442695, %v15517_v48  ;;  %v12637_v59 = vmul.f32 -1.442695, %v15518_v21 }
 0x265   :  { %15670 = vtanh.f32 %v16649_v53 }
 0x266   :  { %15672 = vpow2.f32 %v12636_v55 }
 0x267   :  { %15674 = vpow2.f32 %v12637_v59  ;;  %v15669_v9 = vpop.eup %15668 }
 0x269   :  { %v1828_v60 = vpop.f32.mrb[16].mxu0  ;;  %v1900_v61 = vpop.f32.mrb[28].mxu1 }
 0x26a   :  { %v13700_v62 = vpop.f32.mrb[17].mxu0  ;;  %v13711_v3 = vpop.f32.mrb[29].mxu1  ;;  %v15519_v13 = vadd.f32 %v16655_v6, %v1828_v60  ;;  %v15520_v15 = vadd.f32 %v16660_v7, %v1900_v61 }
 0x26c   :  { %15676 = vtanh.f32 %v15519_v13  ;;  %v12638_v38 = vmul.f32 -1.442695, %v15520_v15 }
 0x26f   :  { %v15671_v16 = vpop.eup %15670 }
 0x270   :  { %v15673_v18 = vpop.eup %15672  ;;  %v1303_v23 = vmul.f32 %v15671_v16, %v15669_v9 }
 0x271   :  { %v15675_v24 = vpop.eup %15674  ;;  %v1682_v25 = vadd.f32 1.0, %v15673_v18 }
 0x272   :  { %v1917_v36 = vrot.slane %v1303_v23, 2  ;;  %v1759_v37 = vadd.f32 1.0, %v15675_v24 }
 0x273   :  { %15678 = vrcp.f32 %v1682_v25 }
 0x274   :  { %15680 = vrcp.f32 %v1759_v37  ;;  %13721 = vmatmul.mubr.msk.f32.vlgmr.msra.gmra.mrb[18].mxu0 %vm319_vm8, %v1917_v36  ;;  %13732 = vmatmul.mubr.msk.f32.vlgmr.msra.gmra.mrb[30].mxu1 %vm319_vm8, %v1917_v36 }
 0x275   :  { %14942 = vmatpush3.bf16.msra.mxu0 %v16403_v4  ;;  %14948 = vmatpush3.bf16.msra.mxu1 %v16451_v17  ;;  %15682 = vpow2.f32 %v12638_v38 }
 0x276   :  { %14943 = vmatprep.subr.bf16.mxu0 %v16137_v0  ;;  %14949 = vmatprep.subr.bf16.mxu1 %v16137_v0  ;;  %v15677_v43 = vpop.eup %15676 }
 0x277   :  { %13742 = vmatprep.mubr.msk.f32.mxu0 %vm16138_vm0, %v16139_v1  ;;  %13753 = vmatprep.mubr.msk.f32.mxu1 %vm16138_vm0, %v16139_v1 }
 0x279   :  { %14945 = vmatpush3.bf16.msra.mxu0 %v16412_v8  ;;  %14951 = vmatpush3.bf16.msra.mxu1 %v16455_v20 }
 0x27a   :  { %14952 = vmatprep.subr.bf16.mxu0 %v16137_v0  ;;  %14958 = vmatprep.subr.bf16.mxu1 %v16137_v0 }
 0x27c   :  { %13743 = vmatmul.mubr.msk.f32.vlgmr.msra.gmra.mrb[20].mxu0 %vm319_vm8, %v1917_v36  ;;  %13754 = vmatmul.mubr.msk.f32.vlgmr.msra.gmra.mrb[32].mxu1 %vm319_vm8, %v1917_v36 }
 0x27d   :  { %v15679_v44 = vpop.eup %15678  ;;  %14954 = vmatpush3.bf16.msra.mxu0 %v16522_v31  ;;  %14960 = vmatpush3.bf16.msra.mxu1 %v16524_v33 }
 0x27e   :  { %v15681_v46 = vpop.eup %15680  ;;  %v1912_v48 = vmul.f32 %v15679_v44, %v15677_v43  ;;  %14955 = vmatprep.subr.bf16.mxu0 %v16137_v0  ;;  %14961 = vmatprep.subr.bf16.mxu1 %v16137_v0 }
 0x27f   :  { %v1911_v21 = vmul.f32 0.0, %v15681_v46  ;;  %13764 = vmatprep.mubr.msk.f32.mxu0 %vm16138_vm0, %v16139_v1  ;;  %13775 = vmatprep.mubr.msk.f32.mxu1 %vm16138_vm0, %v16139_v1  ;;  %v15683_v51 = vpop.eup %15682 }
 0x280   :  { %v1908_v55 = vadd.f32 1.0, %v15683_v51 }
 0x281   :  { %v16688_v52 = vadd.f32 %v1912_v48, %v1911_v21  ;;  %14957 = vmatpush3.bf16.msra.mxu0 %v16534_v40  ;;  %14963 = vmatpush3.bf16.msra.mxu1 %v16536_v41 }
 0x282   :  { %14964 = vmatprep.subr.bf16.mxu0 %v16137_v0  ;;  %14970 = vmatprep.subr.bf16.mxu1 %v16137_v0 }
 0x283   :  { %15684 = vtanh.f32 %v16688_v52 }
 0x284   :  { %13765 = vmatmul.mubr.msk.f32.vlgmr.msra.gmra.mrb[22].mxu0 %vm319_vm8, %v1917_v36  ;;  %13776 = vmatmul.mubr.msk.f32.vlgmr.msra.gmra.mrb[34].mxu1 %vm319_vm8, %v1917_v36  ;;  %15686 = vrcp.f32 %v1908_v55 }
 0x285   :  { %14966 = vmatpush3.bf16.msra.mxu0 %v16546_v49  ;;  %14972 = vmatpush3.bf16.msra.mxu1 %v16548_v50 }
 0x286   :  { %14967 = vmatprep.subr.bf16.mxu0 %v16137_v0  ;;  %14973 = vmatprep.subr.bf16.mxu1 %v16137_v0 }
 0x287   :  { %13786 = vmatprep.mubr.msk.f32.mxu0 %vm16138_vm0, %v16139_v1  ;;  %13797 = vmatprep.mubr.msk.f32.mxu1 %vm16138_vm0, %v16139_v1 }
 0x289   :  { %14969 = vmatpush3.bf16.msra.mxu0 %v16558_v56  ;;  %14975 = vmatpush3.bf16.msra.mxu1 %v16560_v58 }
 0x28a   :  { %14976 = vmatprep.subr.bf16.mxu0 %v16137_v0  ;;  %14982 = vmatprep.subr.bf16.mxu1 %v16137_v0 }
 0x28c   :  { %13787 = vmatmul.mubr.msk.f32.vlgmr.msra.gmra.mrb[24].mxu0 %vm319_vm8, %v1917_v36  ;;  %13798 = vmatmul.mubr.msk.f32.vlgmr.msra.gmra.mrb[36].mxu1 %vm319_vm8, %v1917_v36 }
 0x28d   :  { %14978 = vmatpush3.bf16.msra.mxu0 %v16570_v63  ;;  %14984 = vmatpush3.bf16.msra.mxu1 %v16572_v2  ;;  %v15685_v59 = vpop.eup %15684 }
 0x28e   :  { %14979 = vmatprep.subr.bf16.mxu0 %v16137_v0  ;;  %14985 = vmatprep.subr.bf16.mxu1 %v16137_v0  ;;  %v15687_v60 = vpop.eup %15686 }
 0x28f   :  { %13808 = vmatprep.mubr.msk.f32.mxu0 %vm16138_vm0, %v16139_v1  ;;  %13819 = vmatprep.mubr.msk.f32.mxu1 %vm16138_vm0, %v16139_v1  ;;  %v16721_v61 = vmul.f32 %v15687_v60, %v15685_v59 }
 0x291   :  { %14981 = vmatpush3.bf16.msra.mxu0 %v16582_v10  ;;  %14987 = vmatpush3.bf16.msra.mxu1 %v16584_v12 }
 0x292   :  { %14988 = vmatprep.subr.bf16.mxu0 %v16137_v0  ;;  %14994 = vmatprep.subr.bf16.mxu1 %v16137_v0 }
 0x294   :  { %13809 = vmatmul.mubr.msk.f32.vlgmr.msra.gmra.mrb[22].mxu0 %vm319_vm8, %v16721_v61  ;;  %13820 = vmatmul.mubr.msk.f32.vlgmr.msra.gmra.mrb[34].mxu1 %vm319_vm8, %v16721_v61 }
 0x295   :  { %14990 = vmatpush3.bf16.msra.mxu0 %v16594_v19  ;;  %14996 = vmatpush3.bf16.msra.mxu1 %v16596_v22 }
 0x296   :  { %14991 = vmatprep.subr.bf16.mxu0 %v16137_v0  ;;  %14997 = vmatprep.subr.bf16.mxu1 %v16137_v0 }
 0x297   :  { %13830 = vmatprep.mubr.msk.f32.mxu0 %vm16138_vm0, %v16139_v1  ;;  %13841 = vmatprep.mubr.msk.f32.mxu1 %vm16138_vm0, %v16139_v1 }
 0x299   :  { %14993 = vmatpush3.bf16.msra.mxu0 %v16604_v29  ;;  %14999 = vmatpush3.bf16.msra.mxu1 %v16606_v30 }
 0x29a   :  { %15000 = vmatprep.subr.bf16.mxu0 %v16137_v0  ;;  %15006 = vmatprep.subr.bf16.mxu1 %v16137_v0 }
 0x29c   :  { %13831 = vmatmul.mubr.msk.f32.vlgmr.msra.gmra.mrb[24].mxu0 %vm319_vm8, %v16721_v61  ;;  %13842 = vmatmul.mubr.msk.f32.vlgmr.msra.gmra.mrb[36].mxu1 %vm319_vm8, %v16721_v61 }
 0x29d   :  { %15002 = vmatpush3.bf16.msra.mxu0 %v16336_v39  ;;  %15008 = vmatpush3.bf16.msra.mxu1 %v16426_v11 }
 0x29e   :  { %15003 = vmatprep.subr.bf16.mxu0 %v16137_v0  ;;  %15009 = vmatprep.subr.bf16.mxu1 %v16137_v0 }
 0x29f   :  { %13852 = vmatprep.mubr.msk.f32.mxu0 %vm16138_vm0, %v16139_v1  ;;  %13863 = vmatprep.mubr.msk.f32.mxu1 %vm16138_vm0, %v16139_v1 }
 0x2a1   :  { %15005 = vmatpush3.bf16.msra.mxu0 %v16363_v47  ;;  %15011 = vmatpush3.bf16.msra.mxu1 %v16438_v14 }
 0x2a2   :  { %15012 = vmatprep.subr.bf16.mxu0 %v16137_v0  ;;  %15018 = vmatprep.subr.bf16.mxu1 %v16137_v0 }
 0x347   :  { %v1986_v62 = vpop.f32.mrb[18].mxu0  ;;  %v2066_v3 = vpop.f32.mrb[30].mxu1 }
 0x348   :  { %v1991_v9 = vrot.slane %v1986_v62, 4  ;;  %v2071_v13 = vrot.slane %v2066_v3, 4  ;;  %v13722_v15 = vpop.f32.mrb[19].mxu0  ;;  %v13733_v16 = vpop.f32.mrb[31].mxu1 }
 0x349   :  { %v2236_v15 = vrot.slane %v16649_v53, 6 }
 0x34a   :  { %v1993_v18 = vadd.f32 %v1991_v9, %v16478_v34  ;;  %v2073_v23 = vadd.f32 %v2071_v13, %v16494_v57 }
 0x34c   :  { %v12640_v24 = vmul.f32 -1.442695, %v1993_v18  ;;  %v12642_v25 = vmul.f32 -1.442695, %v2073_v23 }
 0x34e   :  { %15688 = vpow2.f32 %v12640_v24 }
 0x34f   :  { %15690 = vpow2.f32 %v12642_v25  ;;  %v2146_v36 = vpop.f32.mrb[20].mxu0  ;;  %v2221_v37 = vpop.f32.mrb[32].mxu1 }
 0x350   :  { %v2226_v38 = vrot.slane %v2221_v37, 4  ;;  %v13744_v43 = vpop.f32.mrb[21].mxu0  ;;  %v13755_v44 = vpop.f32.mrb[33].mxu1  ;;  %v2151_v46 = vrot.slane %v2146_v36, 4 }
 0x352   :  { %v2228_v48 = vadd.f32 %v2226_v38, %v16500_v5  ;;  %v2153_v51 = vadd.f32 %v2151_v46, %v16486_v45 }
 0x354   :  { %v12645_v21 = vmul.f32 -1.442695, %v2228_v48 }
 0x356   :  { %15692 = vpow2.f32 %v12645_v21 }
 0x357   :  { %15694 = vtanh.f32 %v2153_v51 }
 0x358   :  { %v15689_v55 = vpop.eup %15688 }
 0x359   :  { %v15691_v59 = vpop.eup %15690  ;;  %v1997_v60 = vadd.f32 1.0, %v15689_v55 }
 0x35a   :  { %v2077_v62 = vadd.f32 1.0, %v15691_v59 }
 0x35b   :  { %15696 = vrcp.f32 %v1997_v60 }
 0x35c   :  { %15698 = vrcp.f32 %v2077_v62 }
 0x360   :  { %v15693_v3 = vpop.eup %15692 }
 0x361   :  { %v15695_v9 = vpop.eup %15694  ;;  %v2232_v23 = vadd.f32 1.0, %v15693_v3 }
 0x363   :  { %15700 = vrcp.f32 %v2232_v23 }
 0x365   :  { %v15697_v13 = vpop.eup %15696 }
 0x366   :  { %v15699_v16 = vpop.eup %15698  ;;  %v2239_v18 = vmul.f32 %v15697_v13, %v15695_v9 }
 0x367   :  { %v2238_v24 = vmul.f32 %v15699_v16, %v2236_v15  ;;  %v2592_v25 = vpop.f32.mrb[22].mxu0  ;;  %v2669_v36 = vpop.f32.mrb[34].mxu1 }
 0x368   :  { %v15521_v37 = vadd.f32 %v16640_v26, %v2592_v25  ;;  %v15522_v38 = vadd.f32 %v16645_v35, %v2669_v36  ;;  %v13810_v43 = vpop.f32.mrb[23].mxu0  ;;  %v13821_v44 = vpop.f32.mrb[35].mxu1 }
 0x369   :  { %v16764_v46 = vadd.f32 %v2239_v18, %v2238_v24 }
 0x36a   :  { %v12651_v48 = vmul.f32 -1.442695, %v15521_v37  ;;  %v12653_v21 = vmul.f32 -1.442695, %v15522_v38 }
 0x36b   :  { %15702 = vtanh.f32 %v16764_v46 }
 0x36c   :  { %15704 = vpow2.f32 %v12651_v48 }
 0x36d   :  { %15706 = vpow2.f32 %v12653_v21  ;;  %v15701_v3 = vpop.eup %15700 }
 0x36f   :  { %v2746_v53 = vpop.f32.mrb[24].mxu0  ;;  %v2818_v51 = vpop.f32.mrb[36].mxu1 }
 0x370   :  { %v15524_v55 = vadd.f32 %v16660_v7, %v2818_v51  ;;  %v13832_v59 = vpop.f32.mrb[25].mxu0  ;;  %v13843_v60 = vpop.f32.mrb[37].mxu1  ;;  %v15523_v9 = vadd.f32 %v16655_v6, %v2746_v53  ;;  %v16140_v51 = vmov 1966171168  }
 0x371   :  { %v8914_v59 = vlaneseq }
 0x372   :  { %v12656_v62 = vmul.f32 -1.442695, %v15524_v55  ;;  %v8912_v55 = vunpack.c.l.s4 %v16140_v51 }
 0x373   :  { %v8915_v60 = vshrl.u32 %v8914_v59, 7 }
 0x374   :  { %15708 = vpow2.f32 %v12656_v62 }
 0x375   :  { %v15703_v13 = vpop.eup %15702  ;;  %15710 = vtanh.f32 %v15523_v9 }
 0x376   :  { %v15705_v15 = vpop.eup %15704  ;;  %v2242_v16 = vmul.f32 %v15703_v13, %v15701_v3 }
 0x377   :  { %v15707_v18 = vpop.eup %15706  ;;  %v2600_v23 = vadd.f32 1.0, %v15705_v15 }
 0x378   :  { %v2835_v24 = vrot.slane %v2242_v16, 4  ;;  %v2677_v25 = vadd.f32 1.0, %v15707_v18  ;;  %v16830_v18 = vsub.s32 0, %v8915_v60 }
 0x379   :  { %15712 = vrcp.f32 %v2600_v23 }
 0x37a   :  { %15714 = vrcp.f32 %v2677_v25  ;;  %13853 = vmatmul.mubr.msk.f32.vlgmr.msra.gmra.mrb[26].mxu0 %vm319_vm8, %v2835_v24  ;;  %13864 = vmatmul.mubr.msk.f32.vlgmr.msra.gmra.mrb[38].mxu1 %vm319_vm8, %v2835_v24 }
 0x37b   :  { %15014 = vmatpush3.bf16.msra.mxu0 %v16403_v4  ;;  %15020 = vmatpush3.bf16.msra.mxu1 %v16451_v17 }
 0x37c   :  { %15015 = vmatprep.subr.bf16.mxu0 %v16137_v0  ;;  %15021 = vmatprep.subr.bf16.mxu1 %v16137_v0 }
 0x37d   :  { %13874 = vmatprep.mubr.msk.f32.mxu0 %vm16138_vm0, %v16139_v1  ;;  %13885 = vmatprep.mubr.msk.f32.mxu1 %vm16138_vm0, %v16139_v1 }
 0x37e   :  { %v15709_v36 = vpop.eup %15708 }
 0x37f   :  { %15017 = vmatpush3.bf16.msra.mxu0 %v16412_v8  ;;  %15023 = vmatpush3.bf16.msra.mxu1 %v16455_v20  ;;  %v15711_v37 = vpop.eup %15710  ;;  %v2826_v48 = vadd.f32 1.0, %v15709_v36 }
 0x380   :  { %15024 = vmatprep.subr.bf16.mxu0 %v16137_v0  ;;  %15030 = vmatprep.subr.bf16.mxu1 %v16137_v0 }
 0x381   :  { %15716 = vrcp.f32 %v2826_v48 }
 0x382   :  { %13875 = vmatmul.mubr.msk.f32.vlgmr.msra.gmra.mrb[28].mxu0 %vm319_vm8, %v2835_v24  ;;  %13886 = vmatmul.mubr.msk.f32.vlgmr.msra.gmra.mrb[40].mxu1 %vm319_vm8, %v2835_v24 }
 0x383   :  { %v15713_v38 = vpop.eup %15712  ;;  %15026 = vmatpush3.bf16.msra.mxu0 %v16522_v31  ;;  %15032 = vmatpush3.bf16.msra.mxu1 %v16524_v33 }
 0x384   :  { %v15715_v43 = vpop.eup %15714  ;;  %v2830_v44 = vmul.f32 %v15713_v38, %v15711_v37  ;;  %15027 = vmatprep.subr.bf16.mxu0 %v16137_v0  ;;  %15033 = vmatprep.subr.bf16.mxu1 %v16137_v0 }
 0x385   :  { %v2829_v21 = vmul.f32 %v15715_v43, %v16688_v52  ;;  %13896 = vmatprep.mubr.msk.f32.mxu0 %vm16138_vm0, %v16139_v1  ;;  %13907 = vmatprep.mubr.msk.f32.mxu1 %vm16138_vm0, %v16139_v1  ;;  %v8913_v52 = vunpack.c.0.s8 %v8912_v55 }
 0x387   :  { %v16794_v53 = vadd.f32 %v2830_v44, %v2829_v21  ;;  %15029 = vmatpush3.bf16.msra.mxu0 %v16534_v40  ;;  %15035 = vmatpush3.bf16.msra.mxu1 %v16536_v41  ;;  %v16813_v62 = vsub.s32 %v8913_v52, %v8915_v60 }
 0x388   :  { %15036 = vmatprep.subr.bf16.mxu0 %v16137_v0  ;;  %15042 = vmatprep.subr.bf16.mxu1 %v16137_v0 }
 0x389   :  { %15718 = vtanh.f32 %v16794_v53  ;;  %v8917_v13 = vrot.slane %v16721_v61, %v16813_v62 }
 0x38a   :  { %13897 = vmatmul.mubr.msk.f32.vlgmr.msra.gmra.mrb[30].mxu0 %vm319_vm8, %v2835_v24  ;;  %13908 = vmatmul.mubr.msk.f32.vlgmr.msra.gmra.mrb[42].mxu1 %vm319_vm8, %v2835_v24 }
 0x38b   :  { %15038 = vmatpush3.bf16.msra.mxu0 %v16546_v49  ;;  %15044 = vmatpush3.bf16.msra.mxu1 %v16548_v50  ;;  %v15717_v3 = vpop.eup %15716  ;;  %v8918_v61 = vcombine.high %v8917_v13, %v8917_v13  ;;  %v8925_v25 = vrot.slane %v8917_v13, %v16813_v62 }
 0x38c   :  { %15039 = vmatprep.subr.bf16.mxu0 %v16137_v0  ;;  %15045 = vmatprep.subr.bf16.mxu1 %v16137_v0 }
 0x38d   :  { %13918 = vmatprep.mubr.msk.f32.mxu0 %vm16138_vm0, %v16139_v1  ;;  %13929 = vmatprep.mubr.msk.f32.mxu1 %vm16138_vm0, %v16139_v1  ;;  %v8932_v38 = vrot.slane %v8918_v61, %v16813_v62 }
 0x38f   :  { %15041 = vmatpush3.bf16.msra.mxu0 %v16558_v56  ;;  %15047 = vmatpush3.bf16.msra.mxu1 %v16560_v58 }
 0x390   :  { %15048 = vmatprep.subr.bf16.mxu0 %v16137_v0  ;;  %15054 = vmatprep.subr.bf16.mxu1 %v16137_v0 }
 0x392   :  { %13919 = vmatmul.mubr.msk.f32.vlgmr.msra.gmra.mrb[32].mxu0 %vm319_vm8, %v2835_v24  ;;  %13930 = vmatmul.mubr.msk.f32.vlgmr.msra.gmra.mrb[44].mxu1 %vm319_vm8, %v2835_v24 }
 0x393   :  { %v15719_v9 = vpop.eup %15718  ;;  %15050 = vmatpush3.bf16.msra.mxu0 %v16570_v63  ;;  %15056 = vmatpush3.bf16.msra.mxu1 %v16572_v2 }
 0x394   :  { %15051 = vmatprep.subr.bf16.mxu0 %v16137_v0  ;;  %15057 = vmatprep.subr.bf16.mxu1 %v16137_v0  ;;  %v2833_v15 = vmul.f32 %v15719_v9, %v15717_v3 }
 0x395   :  { %13940 = vmatprep.mubr.msk.f32.mxu0 %vm16138_vm0, %v16139_v1  ;;  %13951 = vmatprep.mubr.msk.f32.mxu1 %vm16138_vm0, %v16139_v1 }
 0x396   :  { %v8941_v16 = vrot.slane %v2833_v15, %v16813_v62 }
 0x397   :  { %15053 = vmatpush3.bf16.msra.mxu0 %v16582_v10  ;;  %15059 = vmatpush3.bf16.msra.mxu1 %v16584_v12 }
 0x398   :  { %v8942_v23 = vcombine.high %v8941_v16, %v8941_v16  ;;  %v8949_v24 = vrot.slane %v8941_v16, %v16813_v62  ;;  %15060 = vmatprep.subr.bf16.mxu0 %v16137_v0  ;;  %15066 = vmatprep.subr.bf16.mxu1 %v16137_v0 }
 0x39a   :  { %13941 = vmatmul.mubr.msk.f32.vlgmr.msra.gmra.mrb[30].mxu0 %vm319_vm8, %v2833_v15  ;;  %v8956_v36 = vrot.slane %v8942_v23, %v16813_v62  ;;  %v9115_v37 = vrot.slane %v8949_v24, %v16830_v18  ;;  %13952 = vmatmul.mubr.msk.f32.vlgmr.msra.gmra.mrb[42].mxu1 %vm319_vm8, %v2833_v15 }
 0x39b   :  { %15062 = vmatpush3.bf16.msra.mxu0 %v16594_v19  ;;  %15068 = vmatpush3.bf16.msra.mxu1 %v16596_v22 }
 0x39c   :  { %v9119_v43 = vrot.slane %v8956_v36, %v16830_v18  ;;  %v16847_v44 = vsel %vm285_vm1, %v8925_v25, %v9115_v37  ;;  %15063 = vmatprep.subr.bf16.mxu0 %v16137_v0  ;;  %15069 = vmatprep.subr.bf16.mxu1 %v16137_v0 }
 0x39d   :  { %13962 = vmatprep.mubr.msk.f32.mxu0 %vm16138_vm0, %v16139_v1  ;;  %13973 = vmatprep.mubr.msk.f32.mxu1 %vm16138_vm0, %v16139_v1 }
 0x39e   :  { %v16856_v48 = vsel %vm285_vm1, %v8932_v38, %v9119_v43 }
 0x39f   :  { %15065 = vmatpush3.bf16.msra.mxu0 %v16604_v29  ;;  %15071 = vmatpush3.bf16.msra.mxu1 %v16606_v30 }
 0x3a0   :  { %15072 = vmatprep.subr.bf16.mxu0 %v16137_v0  ;;  %15078 = vmatprep.subr.bf16.mxu1 %v16137_v0 }
 0x3a2   :  { %13963 = vmatmul.mubr.msk.f32.vlgmr.msra.gmra.mrb[32].mxu0 %vm319_vm8, %v2833_v15  ;;  %13974 = vmatmul.mubr.msk.f32.vlgmr.msra.gmra.mrb[44].mxu1 %vm319_vm8, %v2833_v15 }
 0x3a3   :  { %15074 = vmatpush3.bf16.msra.mxu0 %v16336_v39  ;;  %15080 = vmatpush3.bf16.msra.mxu1 %v16426_v11 }
 0x3a4   :  { %15075 = vmatprep.subr.bf16.mxu0 %v16137_v0  ;;  %15081 = vmatprep.subr.bf16.mxu1 %v16137_v0 }
 0x3a5   :  { %13984 = vmatprep.mubr.msk.f32.mxu0 %vm16138_vm0, %v16139_v1  ;;  %13995 = vmatprep.mubr.msk.f32.mxu1 %vm16138_vm0, %v16139_v1 }
 0x3a7   :  { %15077 = vmatpush3.bf16.msra.mxu0 %v16363_v47  ;;  %15083 = vmatpush3.bf16.msra.mxu1 %v16438_v14 }
 0x3a8   :  { %15084 = vmatprep.subr.bf16.mxu0 %v16137_v0  ;;  %15090 = vmatprep.subr.bf16.mxu1 %v16137_v0 }
 0x44d   :  { %v2904_v21 = vpop.f32.mrb[26].mxu0  ;;  %v2984_v51 = vpop.f32.mrb[38].mxu1 }
 0x44e   :  { %v2909_v55 = vrot.slane %v2904_v21, 2  ;;  %v2989_v59 = vrot.slane %v2984_v51, 2  ;;  %v13854_v52 = vpop.f32.mrb[27].mxu0  ;;  %v13865_v60 = vpop.f32.mrb[39].mxu1 }
 0x44f   :  { %v3154_v60 = vrot.slane %v16764_v46, 6 }
 0x450   :  { %v2911_v3 = vadd.f32 %v2909_v55, %v16478_v34  ;;  %v2991_v9 = vadd.f32 %v2989_v59, %v16494_v57 }
 0x452   :  { %v12658_v13 = vmul.f32 -1.442695, %v2911_v3  ;;  %v12660_v15 = vmul.f32 -1.442695, %v2991_v9 }
 0x454   :  { %15720 = vpow2.f32 %v12658_v13 }
 0x455   :  { %15722 = vpow2.f32 %v12660_v15  ;;  %v3064_v16 = vpop.f32.mrb[28].mxu0  ;;  %v3139_v61 = vpop.f32.mrb[40].mxu1 }
 0x456   :  { %v3144_v23 = vrot.slane %v3139_v61, 2  ;;  %v13876_v24 = vpop.f32.mrb[29].mxu0  ;;  %v13887_v25 = vpop.f32.mrb[41].mxu1  ;;  %v3069_v36 = vrot.slane %v3064_v16, 2 }
 0x458   :  { %v3146_v37 = vadd.f32 %v3144_v23, %v16500_v5  ;;  %v3071_v43 = vadd.f32 %v3069_v36, %v16486_v45 }
 0x45a   :  { %v12663_v38 = vmul.f32 -1.442695, %v3146_v37 }
 0x45c   :  { %15724 = vpow2.f32 %v12663_v38 }
 0x45d   :  { %15726 = vtanh.f32 %v3071_v43 }
 0x45e   :  { %v15721_v21 = vpop.eup %15720 }
 0x45f   :  { %v15723_v51 = vpop.eup %15722  ;;  %v2915_v34 = vadd.f32 1.0, %v15721_v21 }
 0x460   :  { %v2995_v57 = vadd.f32 1.0, %v15723_v51 }
 0x461   :  { %15728 = vrcp.f32 %v2915_v34 }
 0x462   :  { %15730 = vrcp.f32 %v2995_v57 }
 0x466   :  { %v15725_v55 = vpop.eup %15724 }
 0x467   :  { %v15727_v59 = vpop.eup %15726  ;;  %v3150_v13 = vadd.f32 1.0, %v15725_v55 }
 0x469   :  { %15732 = vrcp.f32 %v3150_v13 }
 0x46b   :  { %v15729_v52 = vpop.eup %15728 }
 0x46c   :  { %v15731_v3 = vpop.eup %15730  ;;  %v3157_v9 = vmul.f32 %v15729_v52, %v15727_v59 }
 0x46d   :  { %v3156_v5 = vmul.f32 %v15731_v3, %v3154_v60  ;;  %v3510_v15 = vpop.f32.mrb[30].mxu0  ;;  %v3587_v16 = vpop.f32.mrb[42].mxu1 }
 0x46e   :  { %v15525_v45 = vadd.f32 %v16640_v26, %v3510_v15  ;;  %v15526_v61 = vadd.f32 %v16645_v35, %v3587_v16  ;;  %v13942_v23 = vpop.f32.mrb[31].mxu0  ;;  %v13953_v24 = vpop.f32.mrb[43].mxu1 }
 0x46f   :  { %v16883_v25 = vadd.f32 %v3157_v9, %v3156_v5 }
 0x470   :  { %v12669_v36 = vmul.f32 -1.442695, %v15525_v45  ;;  %v12671_v37 = vmul.f32 -1.442695, %v15526_v61 }
 0x471   :  { %15734 = vtanh.f32 %v16883_v25 }
 0x472   :  { %15736 = vpow2.f32 %v12669_v36 }
 0x473   :  { %15738 = vpow2.f32 %v12671_v37  ;;  %v15733_v57 = vpop.eup %15732 }
 0x475   :  { %v3664_v46 = vpop.f32.mrb[32].mxu0  ;;  %v3736_v38 = vpop.f32.mrb[44].mxu1 }
 0x476   :  { %v15528_v43 = vadd.f32 %v16660_v7, %v3736_v38  ;;  %v13964_v21 = vpop.f32.mrb[33].mxu0  ;;  %v13975_v51 = vpop.f32.mrb[45].mxu1  ;;  %v15527_v55 = vadd.f32 %v16655_v6, %v3664_v46 }
 0x478   :  { %v12674_v34 = vmul.f32 -1.442695, %v15528_v43 }
 0x47a   :  { %15740 = vpow2.f32 %v12674_v34 }
 0x47b   :  { %v15735_v59 = vpop.eup %15734  ;;  %15742 = vtanh.f32 %v15527_v55 }
 0x47c   :  { %v15737_v52 = vpop.eup %15736  ;;  %v3160_v60 = vmul.f32 %v15735_v59, %v15733_v57 }
 0x47d   :  { %v15739_v3 = vpop.eup %15738  ;;  %v3518_v9 = vadd.f32 1.0, %v15737_v52 }
 0x47e   :  { %v3753_v13 = vrot.slane %v3160_v60, 6  ;;  %v3595_v5 = vadd.f32 1.0, %v15739_v3 }
 0x47f   :  { %15744 = vrcp.f32 %v3518_v9 }
 0x480   :  { %15746 = vrcp.f32 %v3595_v5  ;;  %13985 = vmatmul.mubr.msk.f32.vlgmr.msra.gmra.mrb[34].mxu0 %vm319_vm8, %v3753_v13  ;;  %13996 = vmatmul.mubr.msk.f32.vlgmr.msra.gmra.mrb[46].mxu1 %vm319_vm8, %v3753_v13 }
 0x481   :  { %15086 = vmatpush3.bf16.msra.mxu0 %v16403_v4  ;;  %15092 = vmatpush3.bf16.msra.mxu1 %v16451_v17 }
 0x482   :  { %15087 = vmatprep.subr.bf16.mxu0 %v16137_v0  ;;  %15093 = vmatprep.subr.bf16.mxu1 %v16137_v0 }
 0x483   :  { %14006 = vmatprep.mubr.msk.f32.mxu0 %vm16138_vm0, %v16139_v1  ;;  %14017 = vmatprep.mubr.msk.f32.mxu1 %vm16138_vm0, %v16139_v1 }
 0x484   :  { %v15741_v15 = vpop.eup %15740 }
 0x485   :  { %15089 = vmatpush3.bf16.msra.mxu0 %v16412_v8  ;;  %15095 = vmatpush3.bf16.msra.mxu1 %v16455_v20  ;;  %v15743_v16 = vpop.eup %15742  ;;  %v3744_v24 = vadd.f32 1.0, %v15741_v15 }
 0x486   :  { %15096 = vmatprep.subr.bf16.mxu0 %v16137_v0  ;;  %15102 = vmatprep.subr.bf16.mxu1 %v16137_v0 }
 0x487   :  { %15748 = vrcp.f32 %v3744_v24 }
 0x488   :  { %14007 = vmatmul.mubr.msk.f32.vlgmr.msra.gmra.mrb[36].mxu0 %vm319_vm8, %v3753_v13  ;;  %14018 = vmatmul.mubr.msk.f32.vlgmr.msra.gmra.mrb[48].mxu1 %vm319_vm8, %v3753_v13 }
 0x489   :  { %v15745_v45 = vpop.eup %15744  ;;  %15098 = vmatpush3.bf16.msra.mxu0 %v16522_v31  ;;  %15104 = vmatpush3.bf16.msra.mxu1 %v16524_v33 }
 0x48a   :  { %v15747_v61 = vpop.eup %15746  ;;  %v3748_v23 = vmul.f32 %v15745_v45, %v15743_v16  ;;  %15099 = vmatprep.subr.bf16.mxu0 %v16137_v0  ;;  %15105 = vmatprep.subr.bf16.mxu1 %v16137_v0 }
 0x48b   :  { %v3747_v36 = vmul.f32 %v15747_v61, %v16794_v53  ;;  %14028 = vmatprep.mubr.msk.f32.mxu0 %vm16138_vm0, %v16139_v1  ;;  %14039 = vmatprep.mubr.msk.f32.mxu1 %vm16138_vm0, %v16139_v1  ;;  %v16057_v61 = vld [vmem:[%s18484_s4 + $0x3] ss:$0 sm:$0xff] }
 0x48d   :  { %v16913_v37 = vadd.f32 %v3748_v23, %v3747_v36  ;;  %15101 = vmatpush3.bf16.msra.mxu0 %v16534_v40  ;;  %15107 = vmatpush3.bf16.msra.mxu1 %v16536_v41  ;;  %v17001_v23 = vadd.f32 %v16057_v61, %v16489_v54 }
 0x48e   :  { %15108 = vmatprep.subr.bf16.mxu0 %v16137_v0  ;;  %15114 = vmatprep.subr.bf16.mxu1 %v16137_v0 }
 0x48f   :  { %15750 = vtanh.f32 %v16913_v37 }
 0x490   :  { %14029 = vmatmul.mubr.msk.f32.vlgmr.msra.gmra.mrb[38].mxu0 %vm319_vm8, %v3753_v13  ;;  %14040 = vmatmul.mubr.msk.f32.vlgmr.msra.gmra.mrb[50].mxu1 %vm319_vm8, %v3753_v13 }
 0x491   :  { %15110 = vmatpush3.bf16.msra.mxu0 %v16546_v49  ;;  %15116 = vmatpush3.bf16.msra.mxu1 %v16548_v50  ;;  %v15749_v53 = vpop.eup %15748 }
 0x492   :  { %15111 = vmatprep.subr.bf16.mxu0 %v16137_v0  ;;  %15117 = vmatprep.subr.bf16.mxu1 %v16137_v0 }
 0x493   :  { %14050 = vmatprep.mubr.msk.f32.mxu0 %vm16138_vm0, %v16139_v1  ;;  %14061 = vmatprep.mubr.msk.f32.mxu1 %vm16138_vm0, %v16139_v1 }
 0x495   :  { %15113 = vmatpush3.bf16.msra.mxu0 %v16558_v56  ;;  %15119 = vmatpush3.bf16.msra.mxu1 %v16560_v58 }
 0x496   :  { %15120 = vmatprep.subr.bf16.mxu0 %v16137_v0  ;;  %15126 = vmatprep.subr.bf16.mxu1 %v16137_v0 }
 0x498   :  { %14051 = vmatmul.mubr.msk.f32.vlgmr.msra.gmra.mrb[40].mxu0 %vm319_vm8, %v3753_v13  ;;  %14062 = vmatmul.mubr.msk.f32.vlgmr.msra.gmra.mrb[52].mxu1 %vm319_vm8, %v3753_v13 }
 0x499   :  { %v15751_v46 = vpop.eup %15750  ;;  %15122 = vmatpush3.bf16.msra.mxu0 %v16570_v63  ;;  %15128 = vmatpush3.bf16.msra.mxu1 %v16572_v2 }
 0x49a   :  { %15123 = vmatprep.subr.bf16.mxu0 %v16137_v0  ;;  %15129 = vmatprep.subr.bf16.mxu1 %v16137_v0  ;;  %v3751_v38 = vmul.f32 %v15751_v46, %v15749_v53 }
 0x49b   :  { %14072 = vmatprep.mubr.msk.f32.mxu0 %vm16138_vm0, %v16139_v1  ;;  %14083 = vmatprep.mubr.msk.f32.mxu1 %vm16138_vm0, %v16139_v1 }
 0x49c   :  { %v8963_v43 = vrot.slane %v3751_v38, %v16813_v62 }
 0x49d   :  { %15125 = vmatpush3.bf16.msra.mxu0 %v16582_v10  ;;  %15131 = vmatpush3.bf16.msra.mxu1 %v16584_v12 }
 0x49e   :  { %v8964_v21 = vcombine.high %v8963_v43, %v8963_v43  ;;  %v8971_v51 = vrot.slane %v8963_v43, %v16813_v62  ;;  %15132 = vmatprep.subr.bf16.mxu0 %v16137_v0  ;;  %15138 = vmatprep.subr.bf16.mxu1 %v16137_v0 }
 0x4a0   :  { %14073 = vmatmul.mubr.msk.f32.vlgmr.msra.gmra.mrb[38].mxu0 %vm319_vm8, %v3751_v38  ;;  %v8978_v34 = vrot.slane %v8964_v21, %v16813_v62  ;;  %v9125_v57 = vrot.slane %v8971_v51, %v16830_v18  ;;  %14084 = vmatmul.mubr.msk.f32.vlgmr.msra.gmra.mrb[50].mxu1 %vm319_vm8, %v3751_v38 }
 0x4a1   :  { %15134 = vmatpush3.bf16.msra.mxu0 %v16594_v19  ;;  %15140 = vmatpush3.bf16.msra.mxu1 %v16596_v22 }
 0x4a2   :  { %v9129_v55 = vrot.slane %v8978_v34, %v16830_v18  ;;  %v16959_v59 = vsel %vm287_vm2, %v16847_v44, %v9125_v57  ;;  %15135 = vmatprep.subr.bf16.mxu0 %v16137_v0  ;;  %15141 = vmatprep.subr.bf16.mxu1 %v16137_v0  ;;  %v16056_v44 = vld [vmem:[%s18484_s4 + $0x1] ss:$0 sm:$0xff] }
 0x4a3   :  { %14094 = vmatprep.mubr.msk.f32.mxu0 %vm16138_vm0, %v16139_v1  ;;  %14105 = vmatprep.mubr.msk.f32.mxu1 %vm16138_vm0, %v16139_v1 }
 0x4a4   :  { %v16969_v52 = vsel %vm287_vm2, %v16856_v48, %v9129_v55  ;;  %v16993_v48 = vadd.f32 %v16056_v44, %v16481_v42 }
 0x4a5   :  { %15137 = vmatpush3.bf16.msra.mxu0 %v16604_v29  ;;  %15143 = vmatpush3.bf16.msra.mxu1 %v16606_v30 }
 0x4a6   :  { %15144 = vmatprep.subr.bf16.mxu0 %v16137_v0  ;;  %15150 = vmatprep.subr.bf16.mxu1 %v16137_v0 }
 0x4a8   :  { %14095 = vmatmul.mubr.msk.f32.vlgmr.msra.gmra.mrb[40].mxu0 %vm319_vm8, %v3751_v38  ;;  %14106 = vmatmul.mubr.msk.f32.vlgmr.msra.gmra.mrb[52].mxu1 %vm319_vm8, %v3751_v38  ;;  %v16058_v38 = vld [vmem:[%s18484_s4 + $0x2] ss:$0 sm:$0xff] }
 0x4a9   :  { %15146 = vmatpush3.bf16.msra.mxu0 %v16336_v39  ;;  %15152 = vmatpush3.bf16.msra.mxu1 %v16426_v11  ;;  %v17008_v43 = vadd.f32 %v16058_v38, %v16472_v27 }
 0x4aa   :  { %15147 = vmatprep.subr.bf16.mxu0 %v16137_v0  ;;  %15153 = vmatprep.subr.bf16.mxu1 %v16137_v0 }
 0x4ab   :  { %14116 = vmatprep.mubr.msk.f32.mxu0 %vm16138_vm0, %v16139_v1  ;;  %14127 = vmatprep.mubr.msk.f32.mxu1 %vm16138_vm0, %v16139_v1 }
 0x4ad   :  { %15149 = vmatpush3.bf16.msra.mxu0 %v16363_v47  ;;  %15155 = vmatpush3.bf16.msra.mxu1 %v16438_v14 }
 0x4ae   :  { %15156 = vmatprep.subr.bf16.mxu0 %v16137_v0  ;;  %15162 = vmatprep.subr.bf16.mxu1 %v16137_v0 }
 0x553   :  { %v3822_v60 = vpop.f32.mrb[34].mxu0  ;;  %v3899_v3 = vpop.f32.mrb[46].mxu1 }
 0x554   :  { %v3826_v9 = vadd.f32 %v3822_v60, %v16474_v28  ;;  %v3903_v13 = vadd.f32 %v3899_v3, %v16993_v48  ;;  %v13986_v5 = vpop.f32.mrb[35].mxu0  ;;  %v13997_v15 = vpop.f32.mrb[47].mxu1 }
 0x556   :  { %v12676_v16 = vmul.f32 -1.442695, %v3826_v9  ;;  %v12678_v45 = vmul.f32 -1.442695, %v3903_v13  ;;  %v4060_v9 = vrot.slane %v16883_v25, 6 }
 0x558   :  { %15752 = vpow2.f32 %v12676_v16 }
 0x559   :  { %15754 = vpow2.f32 %v12678_v45 }
 0x55b   :  { %v3976_v42 = vpop.f32.mrb[36].mxu0  ;;  %v4048_v24 = vpop.f32.mrb[48].mxu1 }
 0x55c   :  { %v4052_v36 = vadd.f32 %v4048_v24, %v17001_v23  ;;  %v14008_v53 = vpop.f32.mrb[37].mxu0  ;;  %v14019_v46 = vpop.f32.mrb[49].mxu1  ;;  %v3980_v51 = vadd.f32 %v3976_v42, %v17008_v43 }
 0x55e   :  { %v12681_v21 = vmul.f32 -1.442695, %v4052_v36 }
 0x560   :  { %15756 = vpow2.f32 %v12681_v21 }
 0x561   :  { %15758 = vtanh.f32 %v3980_v51 }
 0x562   :  { %v15753_v34 = vpop.eup %15752 }
 0x563   :  { %v15755_v57 = vpop.eup %15754  ;;  %v3830_v54 = vadd.f32 1.0, %v15753_v34 }
 0x564   :  { %v3907_v55 = vadd.f32 1.0, %v15755_v57 }
 0x565   :  { %15760 = vrcp.f32 %v3830_v54 }
 0x566   :  { %15762 = vrcp.f32 %v3907_v55 }
 0x56a   :  { %v15757_v44 = vpop.eup %15756 }
 0x56b   :  { %v15759_v60 = vpop.eup %15758  ;;  %v4056_v27 = vadd.f32 1.0, %v15757_v44 }
 0x56d   :  { %15764 = vrcp.f32 %v4056_v27 }
 0x56f   :  { %v15761_v3 = vpop.eup %15760 }
 0x570   :  { %v15763_v13 = vpop.eup %15762  ;;  %v4063_v5 = vmul.f32 %v15761_v3, %v15759_v60 }
 0x571   :  { %v4062_v15 = vmul.f32 %v15763_v13, %v4060_v9 }
 0x573   :  { %v17012_v16 = vadd.f32 %v4063_v5, %v4062_v15  ;;  %v4416_v45 = vpop.f32.mrb[38].mxu0  ;;  %v4493_v61 = vpop.f32.mrb[50].mxu1 }
 0x574   :  { %v15529_v42 = vadd.f32 %v16640_v26, %v4416_v45  ;;  %v15530_v24 = vadd.f32 %v16645_v35, %v4493_v61  ;;  %v14074_v36 = vpop.f32.mrb[39].mxu0  ;;  %v14085_v53 = vpop.f32.mrb[51].mxu1 }
 0x575   :  { %15766 = vtanh.f32 %v17012_v16 }
 0x576   :  { %v12687_v46 = vmul.f32 -1.442695, %v15529_v42  ;;  %v12689_v38 = vmul.f32 -1.442695, %v15530_v24 }
 0x577   :  { %v15765_v54 = vpop.eup %15764 }
 0x578   :  { %15768 = vpow2.f32 %v12687_v46 }
 0x579   :  { %15770 = vpow2.f32 %v12689_v38 }
 0x57b   :  { %v4570_v25 = vpop.f32.mrb[40].mxu0  ;;  %v4642_v21 = vpop.f32.mrb[52].mxu1 }
 0x57c   :  { %v15532_v51 = vadd.f32 %v16660_v7, %v4642_v21  ;;  %v14096_v34 = vpop.f32.mrb[41].mxu0  ;;  %v14107_v57 = vpop.f32.mrb[53].mxu1  ;;  %v15531_v35 = vadd.f32 %v16655_v6, %v4570_v25 }
 0x57e   :  { %v12692_v44 = vmul.f32 -1.442695, %v15532_v51 }
 0x57f   :  { %v15767_v55 = vpop.eup %15766 }
 0x580   :  { %v4066_v26 = vmul.f32 %v15767_v55, %v15765_v54  ;;  %15772 = vpow2.f32 %v12692_v44 }
 0x581   :  { %15774 = vtanh.f32 %v15531_v35 }
 0x582   :  { %v15769_v60 = vpop.eup %15768  ;;  %14117 = vmatmul.mubr.msk.f32.vlgmr.msra.gmra.mrb[42].mxu0 %vm319_vm8, %v4066_v26  ;;  %14128 = vmatmul.mubr.msk.f32.vlgmr.msra.gmra.mrb[54].mxu1 %vm319_vm8, %v4066_v26 }
 0x583   :  { %v15771_v3 = vpop.eup %15770  ;;  %v4424_v9 = vadd.f32 1.0, %v15769_v60  ;;  %15158 = vmatpush3.bf16.msra.mxu0 %v16403_v4  ;;  %15164 = vmatpush3.bf16.msra.mxu1 %v16451_v17 }
 0x584   :  { %v4501_v7 = vadd.f32 1.0, %v15771_v3  ;;  %15159 = vmatprep.subr.bf16.mxu0 %v16137_v0  ;;  %15165 = vmatprep.subr.bf16.mxu1 %v16137_v0 }
 0x585   :  { %15776 = vrcp.f32 %v4424_v9  ;;  %14138 = vmatprep.mubr.msk.f32.mxu0 %vm16138_vm0, %v16139_v1  ;;  %14149 = vmatprep.mubr.msk.f32.mxu1 %vm16138_vm0, %v16139_v1 }
 0x586   :  { %15778 = vrcp.f32 %v4501_v7 }
 0x587   :  { %15161 = vmatpush3.bf16.msra.mxu0 %v16412_v8  ;;  %15167 = vmatpush3.bf16.msra.mxu1 %v16455_v20 }
 0x588   :  { %15168 = vmatprep.subr.bf16.mxu0 %v16137_v0  ;;  %15174 = vmatprep.subr.bf16.mxu1 %v16137_v0 }
 0x58a   :  { %14139 = vmatmul.mubr.msk.f32.vlgmr.msra.gmra.mrb[44].mxu0 %vm319_vm8, %v4066_v26  ;;  %14150 = vmatmul.mubr.msk.f32.vlgmr.msra.gmra.mrb[56].mxu1 %vm319_vm8, %v4066_v26  ;;  %v15773_v6 = vpop.eup %15772 }
 0x58b   :  { %15170 = vmatpush3.bf16.msra.mxu0 %v16522_v31  ;;  %15176 = vmatpush3.bf16.msra.mxu1 %v16524_v33  ;;  %v15775_v13 = vpop.eup %15774  ;;  %v4650_v45 = vadd.f32 1.0, %v15773_v6 }
 0x58c   :  { %15171 = vmatprep.subr.bf16.mxu0 %v16137_v0  ;;  %15177 = vmatprep.subr.bf16.mxu1 %v16137_v0 }
 0x58d   :  { %14160 = vmatprep.mubr.msk.f32.mxu0 %vm16138_vm0, %v16139_v1  ;;  %14171 = vmatprep.mubr.msk.f32.mxu1 %vm16138_vm0, %v16139_v1  ;;  %15780 = vrcp.f32 %v4650_v45 }
 0x58f   :  { %v15777_v5 = vpop.eup %15776  ;;  %15173 = vmatpush3.bf16.msra.mxu0 %v16534_v40  ;;  %15179 = vmatpush3.bf16.msra.mxu1 %v16536_v41 }
 0x590   :  { %v15779_v27 = vpop.eup %15778  ;;  %v4654_v15 = vmul.f32 %v15777_v5, %v15775_v13  ;;  %15180 = vmatprep.subr.bf16.mxu0 %v16137_v0  ;;  %15186 = vmatprep.subr.bf16.mxu1 %v16137_v0 }
 0x591   :  { %v4653_v61 = vmul.f32 %v15779_v27, %v16913_v37 }
 0x592   :  { %14161 = vmatmul.mubr.msk.f32.vlgmr.msra.gmra.mrb[46].mxu0 %vm319_vm8, %v4066_v26  ;;  %14172 = vmatmul.mubr.msk.f32.vlgmr.msra.gmra.mrb[58].mxu1 %vm319_vm8, %v4066_v26 }
 0x593   :  { %v17050_v42 = vadd.f32 %v4654_v15, %v4653_v61  ;;  %15182 = vmatpush3.bf16.msra.mxu0 %v16546_v49  ;;  %15188 = vmatpush3.bf16.msra.mxu1 %v16548_v50 }
 0x594   :  { %15183 = vmatprep.subr.bf16.mxu0 %v16137_v0  ;;  %15189 = vmatprep.subr.bf16.mxu1 %v16137_v0 }
 0x595   :  { %15782 = vtanh.f32 %v17050_v42  ;;  %14182 = vmatprep.mubr.msk.f32.mxu0 %vm16138_vm0, %v16139_v1  ;;  %14193 = vmatprep.mubr.msk.f32.mxu1 %vm16138_vm0, %v16139_v1 }
 0x597   :  { %15185 = vmatpush3.bf16.msra.mxu0 %v16558_v56  ;;  %15191 = vmatpush3.bf16.msra.mxu1 %v16560_v58  ;;  %v15781_v37 = vpop.eup %15780 }
 0x598   :  { %15192 = vmatprep.subr.bf16.mxu0 %v16137_v0  ;;  %15198 = vmatprep.subr.bf16.mxu1 %v16137_v0 }
 0x59a   :  { %14183 = vmatmul.mubr.msk.f32.vlgmr.msra.gmra.mrb[48].mxu0 %vm319_vm8, %v4066_v26  ;;  %14194 = vmatmul.mubr.msk.f32.vlgmr.msra.gmra.mrb[60].mxu1 %vm319_vm8, %v4066_v26 }
 0x59b   :  { %15194 = vmatpush3.bf16.msra.mxu0 %v16570_v63  ;;  %15200 = vmatpush3.bf16.msra.mxu1 %v16572_v2 }
 0x59c   :  { %15195 = vmatprep.subr.bf16.mxu0 %v16137_v0  ;;  %15201 = vmatprep.subr.bf16.mxu1 %v16137_v0 }
 0x59d   :  { %14204 = vmatprep.mubr.msk.f32.mxu0 %vm16138_vm0, %v16139_v1  ;;  %14215 = vmatprep.mubr.msk.f32.mxu1 %vm16138_vm0, %v16139_v1 }
 0x59f   :  { %v15783_v24 = vpop.eup %15782  ;;  %15197 = vmatpush3.bf16.msra.mxu0 %v16582_v10  ;;  %15203 = vmatpush3.bf16.msra.mxu1 %v16584_v12 }
 0x5a0   :  { %v4657_v36 = vmul.f32 %v15783_v24, %v15781_v37  ;;  %15204 = vmatprep.subr.bf16.mxu0 %v16137_v0  ;;  %15210 = vmatprep.subr.bf16.mxu1 %v16137_v0 }
 0x5a2   :  { %14205 = vmatmul.mubr.msk.f32.vlgmr.msra.gmra.mrb[46].mxu0 %vm319_vm8, %v4657_v36  ;;  %v8985_v53 = vrot.slane %v4657_v36, %v16813_v62  ;;  %14216 = vmatmul.mubr.msk.f32.vlgmr.msra.gmra.mrb[58].mxu1 %vm319_vm8, %v4657_v36 }
 0x5a3   :  { %15206 = vmatpush3.bf16.msra.mxu0 %v16594_v19  ;;  %15212 = vmatpush3.bf16.msra.mxu1 %v16596_v22 }
 0x5a4   :  { %v8986_v46 = vcombine.high %v8985_v53, %v8985_v53  ;;  %v8993_v38 = vrot.slane %v8985_v53, %v16813_v62  ;;  %15207 = vmatprep.subr.bf16.mxu0 %v16137_v0  ;;  %15213 = vmatprep.subr.bf16.mxu1 %v16137_v0 }
 0x5a5   :  { %14226 = vmatprep.mubr.msk.f32.mxu0 %vm16138_vm0, %v16139_v1  ;;  %14237 = vmatprep.mubr.msk.f32.mxu1 %vm16138_vm0, %v16139_v1 }
 0x5a6   :  { %v9000_v25 = vrot.slane %v8986_v46, %v16813_v62  ;;  %v9135_v21 = vrot.slane %v8993_v38, %v16830_v18 }
 0x5a7   :  { %15209 = vmatpush3.bf16.msra.mxu0 %v16604_v29  ;;  %15215 = vmatpush3.bf16.msra.mxu1 %v16606_v30 }
 0x5a8   :  { %v9139_v51 = vrot.slane %v9000_v25, %v16830_v18  ;;  %v17098_v34 = vsel %vm289_vm3, %v16959_v59, %v9135_v21  ;;  %15216 = vmatprep.subr.bf16.mxu0 %v16137_v0  ;;  %15222 = vmatprep.subr.bf16.mxu1 %v16137_v0 }
 0x5aa   :  { %14227 = vmatmul.mubr.msk.f32.vlgmr.msra.gmra.mrb[48].mxu0 %vm319_vm8, %v4657_v36  ;;  %14238 = vmatmul.mubr.msk.f32.vlgmr.msra.gmra.mrb[60].mxu1 %vm319_vm8, %v4657_v36  ;;  %v17106_v57 = vsel %vm289_vm3, %v16969_v52, %v9139_v51  ;;  %v4977_v51 = vrot.slane %v17012_v16, 6 }
 0x5ab   :  { %15218 = vmatpush3.bf16.msra.mxu0 %v16336_v39  ;;  %15224 = vmatpush3.bf16.msra.mxu1 %v16426_v11 }
 0x5ac   :  { %15219 = vmatprep.subr.bf16.mxu0 %v16137_v0  ;;  %15225 = vmatprep.subr.bf16.mxu1 %v16137_v0 }
 0x5ad   :  { %14248 = vmatprep.mubr.msk.f32.mxu0 %vm16138_vm0, %v16139_v1  ;;  %14259 = vmatprep.mubr.msk.f32.mxu1 %vm16138_vm0, %v16139_v1 }
 0x5af   :  { %15221 = vmatpush3.bf16.msra.mxu0 %v16363_v47  ;;  %15227 = vmatpush3.bf16.msra.mxu1 %v16438_v14 }
 0x5b0   :  { %15228 = vmatprep.subr.bf16.mxu0 %v16137_v0  ;;  %15234 = vmatprep.subr.bf16.mxu1 %v16137_v0 }
 0x655   :  { %v4727_v59 = vpop.f32.mrb[42].mxu0  ;;  %v4807_v52 = vpop.f32.mrb[54].mxu1 }
 0x656   :  { %v4732_v54 = vrot.slane %v4727_v59, 6  ;;  %v4812_v55 = vrot.slane %v4807_v52, 6  ;;  %v14118_v44 = vpop.f32.mrb[43].mxu0  ;;  %v14129_v26 = vpop.f32.mrb[55].mxu1 }
 0x658   :  { %v4734_v35 = vadd.f32 %v4732_v54, %v16474_v28  ;;  %v4814_v60 = vadd.f32 %v4812_v55, %v16993_v48 }
 0x65a   :  { %v12694_v3 = vmul.f32 -1.442695, %v4734_v35  ;;  %v12696_v9 = vmul.f32 -1.442695, %v4814_v60  ;;  %v17128_v35 = vld [vmem:[%s18484_s4 + $0x4] ss:$0 sm:$0xff] }
 0x65c   :  { %15784 = vpow2.f32 %v12694_v3  ;;  %v17134_v3 = vld [vmem:[%s18484_s4 + $0x5] ss:$0 sm:$0xff] }
 0x65d   :  { %15786 = vpow2.f32 %v12696_v9  ;;  %v4887_v7 = vpop.f32.mrb[44].mxu0  ;;  %v4962_v6 = vpop.f32.mrb[56].mxu1 }
 0x65e   :  { %v4967_v13 = vrot.slane %v4962_v6, 6  ;;  %v14140_v5 = vpop.f32.mrb[45].mxu0  ;;  %v14151_v27 = vpop.f32.mrb[57].mxu1  ;;  %v4892_v15 = vrot.slane %v4887_v7, 6 }
 0x660   :  { %v4969_v45 = vadd.f32 %v4967_v13, %v17001_v23  ;;  %v4894_v37 = vadd.f32 %v4892_v15, %v17008_v43 }
 0x662   :  { %v12699_v61 = vmul.f32 -1.442695, %v4969_v45  ;;  %v17143_v45 = vld [vmem:[%s18484_s4 + $0x7] ss:$0 sm:$0xff] }
 0x664   :  { %15788 = vpow2.f32 %v12699_v61 }
 0x665   :  { %15790 = vtanh.f32 %v4894_v37 }
 0x666   :  { %v15785_v24 = vpop.eup %15784 }
 0x667   :  { %v15787_v36 = vpop.eup %15786  ;;  %v4738_v53 = vadd.f32 1.0, %v15785_v24 }
 0x668   :  { %v4818_v46 = vadd.f32 1.0, %v15787_v36 }
 0x669   :  { %15792 = vrcp.f32 %v4738_v53 }
 0x66a   :  { %15794 = vrcp.f32 %v4818_v46  ;;  %v17149_v46 = vld [vmem:[%s18484_s4 + $0x6] ss:$0 sm:$0xff] }
 0x66e   :  { %v15789_v38 = vpop.eup %15788 }
 0x66f   :  { %v15791_v25 = vpop.eup %15790  ;;  %v4973_v54 = vadd.f32 1.0, %v15789_v38 }
 0x671   :  { %15796 = vrcp.f32 %v4973_v54 }
 0x673   :  { %v15793_v21 = vpop.eup %15792 }
 0x674   :  { %v15795_v59 = vpop.eup %15794  ;;  %v4980_v52 = vmul.f32 %v15793_v21, %v15791_v25 }
 0x675   :  { %v4979_v55 = vmul.f32 %v15795_v59, %v4977_v51  ;;  %v5333_v44 = vpop.f32.mrb[46].mxu0  ;;  %v5410_v26 = vpop.f32.mrb[58].mxu1 }
 0x676   :  { %v15533_v60 = vadd.f32 %v17128_v35, %v5333_v44  ;;  %v15534_v16 = vadd.f32 %v17134_v3, %v5410_v26  ;;  %v14206_v9 = vpop.f32.mrb[47].mxu0  ;;  %v14217_v7 = vpop.f32.mrb[59].mxu1 }
 0x677   :  { %v17137_v6 = vadd.f32 %v4980_v52, %v4979_v55 }
 0x678   :  { %v12705_v13 = vmul.f32 -1.442695, %v15533_v60  ;;  %v12707_v5 = vmul.f32 -1.442695, %v15534_v16 }
 0x679   :  { %15798 = vtanh.f32 %v17137_v6 }
 0x67a   :  { %15800 = vpow2.f32 %v12705_v13 }
 0x67b   :  { %15802 = vpow2.f32 %v12707_v5  ;;  %v15797_v53 = vpop.eup %15796 }
 0x67d   :  { %v5487_v27 = vpop.f32.mrb[48].mxu0  ;;  %v5559_v15 = vpop.f32.mrb[60].mxu1 }
 0x67e   :  { %v15536_v61 = vadd.f32 %v17143_v45, %v5559_v15  ;;  %v14228_v37 = vpop.f32.mrb[49].mxu0  ;;  %v14239_v24 = vpop.f32.mrb[61].mxu1  ;;  %v15535_v38 = vadd.f32 %v17149_v46, %v5487_v27 }
 0x680   :  { %v12710_v36 = vmul.f32 -1.442695, %v15536_v61 }
 0x682   :  { %15804 = vpow2.f32 %v12710_v36 }
 0x683   :  { %v15799_v25 = vpop.eup %15798  ;;  %15806 = vtanh.f32 %v15535_v38 }
 0x684   :  { %v15801_v21 = vpop.eup %15800  ;;  %v4983_v51 = vmul.f32 %v15799_v25, %v15797_v53 }
 0x685   :  { %v15803_v59 = vpop.eup %15802  ;;  %v5341_v52 = vadd.f32 1.0, %v15801_v21 }
 0x686   :  { %v5576_v54 = vrot.slane %v4983_v51, 2  ;;  %v5418_v55 = vadd.f32 1.0, %v15803_v59 }
 0x687   :  { %15808 = vrcp.f32 %v5341_v52 }
 0x688   :  { %15810 = vrcp.f32 %v5418_v55  ;;  %14249 = vmatmul.mubr.msk.f32.vlgmr.msra.gmra.mrb[50].mxu0 %vm319_vm8, %v5576_v54  ;;  %14260 = vmatmul.mubr.msk.f32.vlgmr.msra.gmra.mrb[62].mxu1 %vm319_vm8, %v5576_v54 }
 0x689   :  { %15230 = vmatpush3.bf16.msra.mxu0 %v16403_v4  ;;  %15236 = vmatpush3.bf16.msra.mxu1 %v16451_v17 }
 0x68a   :  { %15231 = vmatprep.subr.bf16.mxu0 %v16137_v0  ;;  %15237 = vmatprep.subr.bf16.mxu1 %v16137_v0 }
 0x68b   :  { %14270 = vmatprep.mubr.msk.f32.mxu0 %vm16138_vm0, %v16139_v1  ;;  %14281 = vmatprep.mubr.msk.f32.mxu1 %vm16138_vm0, %v16139_v1 }
 0x68c   :  { %v15805_v44 = vpop.eup %15804 }
 0x68d   :  { %15233 = vmatpush3.bf16.msra.mxu0 %v16412_v8  ;;  %15239 = vmatpush3.bf16.msra.mxu1 %v16455_v20  ;;  %v15807_v26 = vpop.eup %15806  ;;  %v5567_v7 = vadd.f32 1.0, %v15805_v44 }
 0x68e   :  { %15240 = vmatprep.subr.bf16.mxu0 %v16137_v0  ;;  %15246 = vmatprep.subr.bf16.mxu1 %v16137_v0 }
 0x68f   :  { %15812 = vrcp.f32 %v5567_v7 }
 0x690   :  { %14271 = vmatmul.mubr.msk.f32.vlgmr.msra.gmra.mrb[52].mxu0 %vm319_vm8, %v5576_v54  ;;  %14282 = vmatmul.mubr.msk.f32.vlgmr.msra.gmra.mrb[64].mxu1 %vm319_vm8, %v5576_v54 }
 0x691   :  { %v15809_v60 = vpop.eup %15808  ;;  %15242 = vmatpush3.bf16.msra.mxu0 %v16522_v31  ;;  %15248 = vmatpush3.bf16.msra.mxu1 %v16524_v33 }
 0x692   :  { %v15811_v16 = vpop.eup %15810  ;;  %v5571_v9 = vmul.f32 %v15809_v60, %v15807_v26  ;;  %15243 = vmatprep.subr.bf16.mxu0 %v16137_v0  ;;  %15249 = vmatprep.subr.bf16.mxu1 %v16137_v0 }
 0x693   :  { %v5570_v13 = vmul.f32 %v15811_v16, %v17050_v42  ;;  %14292 = vmatprep.mubr.msk.f32.mxu0 %vm16138_vm0, %v16139_v1  ;;  %14303 = vmatprep.mubr.msk.f32.mxu1 %vm16138_vm0, %v16139_v1 }
 0x695   :  { %v17177_v5 = vadd.f32 %v5571_v9, %v5570_v13  ;;  %15245 = vmatpush3.bf16.msra.mxu0 %v16534_v40  ;;  %15251 = vmatpush3.bf16.msra.mxu1 %v16536_v41 }
 0x696   :  { %15252 = vmatprep.subr.bf16.mxu0 %v16137_v0  ;;  %15258 = vmatprep.subr.bf16.mxu1 %v16137_v0 }
 0x697   :  { %15814 = vtanh.f32 %v17177_v5 }
 0x698   :  { %14293 = vmatmul.mubr.msk.f32.vlgmr.msra.gmra.mrb[54].mxu0 %vm319_vm8, %v5576_v54  ;;  %14304 = vmatmul.mubr.msk.f32.vlgmr.msra.gmra.mrb[66].mxu1 %vm319_vm8, %v5576_v54 }
 0x699   :  { %15254 = vmatpush3.bf16.msra.mxu0 %v16546_v49  ;;  %15260 = vmatpush3.bf16.msra.mxu1 %v16548_v50  ;;  %v15813_v42 = vpop.eup %15812 }
 0x69a   :  { %15255 = vmatprep.subr.bf16.mxu0 %v16137_v0  ;;  %15261 = vmatprep.subr.bf16.mxu1 %v16137_v0 }
 0x69b   :  { %14314 = vmatprep.mubr.msk.f32.mxu0 %vm16138_vm0, %v16139_v1  ;;  %14325 = vmatprep.mubr.msk.f32.mxu1 %vm16138_vm0, %v16139_v1 }
 0x69d   :  { %15257 = vmatpush3.bf16.msra.mxu0 %v16558_v56  ;;  %15263 = vmatpush3.bf16.msra.mxu1 %v16560_v58 }
 0x69e   :  { %15264 = vmatprep.subr.bf16.mxu0 %v16137_v0  ;;  %15270 = vmatprep.subr.bf16.mxu1 %v16137_v0 }
 0x6a0   :  { %14315 = vmatmul.mubr.msk.f32.vlgmr.msra.gmra.mrb[56].mxu0 %vm319_vm8, %v5576_v54  ;;  %14326 = vmatmul.mubr.msk.f32.vlgmr.msra.gmra.mrb[68].mxu1 %vm319_vm8, %v5576_v54 }
 0x6a1   :  { %v15815_v27 = vpop.eup %15814  ;;  %15266 = vmatpush3.bf16.msra.mxu0 %v16570_v63  ;;  %15272 = vmatpush3.bf16.msra.mxu1 %v16572_v2 }
 0x6a2   :  { %15267 = vmatprep.subr.bf16.mxu0 %v16137_v0  ;;  %15273 = vmatprep.subr.bf16.mxu1 %v16137_v0  ;;  %v5574_v15 = vmul.f32 %v15815_v27, %v15813_v42 }
 0x6a3   :  { %14336 = vmatprep.mubr.msk.f32.mxu0 %vm16138_vm0, %v16139_v1  ;;  %14347 = vmatprep.mubr.msk.f32.mxu1 %vm16138_vm0, %v16139_v1 }
 0x6a4   :  { %v9007_v61 = vrot.slane %v5574_v15, %v16813_v62 }
 0x6a5   :  { %15269 = vmatpush3.bf16.msra.mxu0 %v16582_v10  ;;  %15275 = vmatpush3.bf16.msra.mxu1 %v16584_v12 }
 0x6a6   :  { %v9008_v37 = vcombine.high %v9007_v61, %v9007_v61  ;;  %v9015_v24 = vrot.slane %v9007_v61, %v16813_v62  ;;  %15276 = vmatprep.subr.bf16.mxu0 %v16137_v0  ;;  %15282 = vmatprep.subr.bf16.mxu1 %v16137_v0 }
 0x6a8   :  { %14337 = vmatmul.mubr.msk.f32.vlgmr.msra.gmra.mrb[54].mxu0 %vm319_vm8, %v5574_v15  ;;  %v9022_v36 = vrot.slane %v9008_v37, %v16813_v62  ;;  %v9145_v53 = vrot.slane %v9015_v24, %v16830_v18  ;;  %14348 = vmatmul.mubr.msk.f32.vlgmr.msra.gmra.mrb[66].mxu1 %vm319_vm8, %v5574_v15 }
 0x6a9   :  { %15278 = vmatpush3.bf16.msra.mxu0 %v16594_v19  ;;  %15284 = vmatpush3.bf16.msra.mxu1 %v16596_v22 }
 0x6aa   :  { %v9149_v38 = vrot.slane %v9022_v36, %v16830_v18  ;;  %15279 = vmatprep.subr.bf16.mxu0 %v16137_v0  ;;  %15285 = vmatprep.subr.bf16.mxu1 %v16137_v0  ;;  %v17225_v25 = vsel %vm291_vm4, %v17098_v34, %v9145_v53 }
 0x6ab   :  { %14358 = vmatprep.mubr.msk.f32.mxu0 %vm16138_vm0, %v16139_v1  ;;  %14369 = vmatprep.mubr.msk.f32.mxu1 %vm16138_vm0, %v16139_v1 }
 0x6ac   :  { %v17233_v21 = vsel %vm291_vm4, %v17106_v57, %v9149_v38 }
 0x6ad   :  { %15281 = vmatpush3.bf16.msra.mxu0 %v16604_v29  ;;  %15287 = vmatpush3.bf16.msra.mxu1 %v16606_v30 }
 0x6ae   :  { %15288 = vmatprep.subr.bf16.mxu0 %v16137_v0  ;;  %15294 = vmatprep.subr.bf16.mxu1 %v16137_v0 }
 0x6b0   :  { %14359 = vmatmul.mubr.msk.f32.vlgmr.msra.gmra.mrb[56].mxu0 %vm319_vm8, %v5574_v15  ;;  %14370 = vmatmul.mubr.msk.f32.vlgmr.msra.gmra.mrb[68].mxu1 %vm319_vm8, %v5574_v15 }
 0x6b1   :  { %15290 = vmatpush3.bf16.msra.mxu0 %v16336_v39  ;;  %15296 = vmatpush3.bf16.msra.mxu1 %v16426_v11 }
 0x6b2   :  { %15291 = vmatprep.subr.bf16.mxu0 %v16137_v0  ;;  %15297 = vmatprep.subr.bf16.mxu1 %v16137_v0 }
 0x6b3   :  { %14380 = vmatprep.mubr.msk.f32.mxu0 %vm16138_vm0, %v16139_v1  ;;  %14391 = vmatprep.mubr.msk.f32.mxu1 %vm16138_vm0, %v16139_v1 }
 0x6b5   :  { %15293 = vmatpush3.bf16.msra.mxu0 %v16363_v47  ;;  %15299 = vmatpush3.bf16.msra.mxu1 %v16438_v14 }
 0x6b6   :  { %15300 = vmatprep.subr.bf16.mxu0 %v16137_v0  ;;  %15306 = vmatprep.subr.bf16.mxu1 %v16137_v0 }
 0x75b   :  { %v5645_v34 = vpop.f32.mrb[50].mxu0  ;;  %v5725_v57 = vpop.f32.mrb[62].mxu1 }
 0x75c   :  { %v5650_v51 = vrot.slane %v5645_v34, 4  ;;  %v5730_v59 = vrot.slane %v5725_v57, 4  ;;  %v14250_v52 = vpop.f32.mrb[51].mxu0  ;;  %v14261_v54 = vpop.f32.mrb[63].mxu1 }
 0x75e   :  { %v5652_v55 = vadd.f32 %v5650_v51, %v16474_v28  ;;  %v5732_v44 = vadd.f32 %v5730_v59, %v16993_v48  ;;  %v5895_v59 = vrot.slane %v17137_v6, 6 }
 0x760   :  { %v12712_v26 = vmul.f32 -1.442695, %v5652_v55  ;;  %v12714_v60 = vmul.f32 -1.442695, %v5732_v44 }
 0x762   :  { %15816 = vpow2.f32 %v12712_v26 }
 0x763   :  { %15818 = vpow2.f32 %v12714_v60  ;;  %v5805_v16 = vpop.f32.mrb[52].mxu0  ;;  %v5880_v9 = vpop.f32.mrb[64].mxu1 }
 0x764   :  { %v5885_v7 = vrot.slane %v5880_v9, 4  ;;  %v14272_v13 = vpop.f32.mrb[53].mxu0  ;;  %v14283_v42 = vpop.f32.mrb[65].mxu1  ;;  %v5810_v27 = vrot.slane %v5805_v16, 4 }
 0x766   :  { %v5887_v15 = vadd.f32 %v5885_v7, %v17001_v23  ;;  %v5812_v37 = vadd.f32 %v5810_v27, %v17008_v43 }
 0x768   :  { %v12717_v61 = vmul.f32 -1.442695, %v5887_v15 }
 0x76a   :  { %15820 = vpow2.f32 %v12717_v61 }
 0x76b   :  { %15822 = vtanh.f32 %v5812_v37 }
 0x76c   :  { %v15817_v24 = vpop.eup %15816 }
 0x76d   :  { %v15819_v36 = vpop.eup %15818  ;;  %v5656_v53 = vadd.f32 1.0, %v15817_v24 }
 0x76e   :  { %v5736_v38 = vadd.f32 1.0, %v15819_v36 }
 0x76f   :  { %15824 = vrcp.f32 %v5656_v53 }
 0x770   :  { %15826 = vrcp.f32 %v5736_v38 }
 0x774   :  { %v15821_v34 = vpop.eup %15820 }
 0x775   :  { %v15823_v57 = vpop.eup %15822  ;;  %v5891_v55 = vadd.f32 1.0, %v15821_v34 }
 0x777   :  { %15828 = vrcp.f32 %v5891_v55 }
 0x779   :  { %v15825_v51 = vpop.eup %15824 }
 0x77a   :  { %v15827_v52 = vpop.eup %15826  ;;  %v5898_v54 = vmul.f32 %v15825_v51, %v15823_v57 }
 0x77b   :  { %v5897_v44 = vmul.f32 %v15827_v52, %v5895_v59  ;;  %v6251_v26 = vpop.f32.mrb[54].mxu0  ;;  %v6328_v60 = vpop.f32.mrb[66].mxu1 }
 0x77c   :  { %v15537_v16 = vadd.f32 %v17128_v35, %v6251_v26  ;;  %v15538_v9 = vadd.f32 %v17134_v3, %v6328_v60  ;;  %v14338_v7 = vpop.f32.mrb[55].mxu0  ;;  %v14349_v13 = vpop.f32.mrb[67].mxu1 }
 0x77d   :  { %v17260_v42 = vadd.f32 %v5898_v54, %v5897_v44 }
 0x77e   :  { %v12723_v27 = vmul.f32 -1.442695, %v15537_v16  ;;  %v12725_v15 = vmul.f32 -1.442695, %v15538_v9 }
 0x77f   :  { %15830 = vtanh.f32 %v17260_v42 }
 0x780   :  { %15832 = vpow2.f32 %v12723_v27 }
 0x781   :  { %15834 = vpow2.f32 %v12725_v15  ;;  %v15829_v38 = vpop.eup %15828 }
 0x783   :  { %v6405_v6 = vpop.f32.mrb[56].mxu0  ;;  %v6477_v61 = vpop.f32.mrb[68].mxu1 }
 0x784   :  { %v15540_v37 = vadd.f32 %v17143_v45, %v6477_v61  ;;  %v14360_v24 = vpop.f32.mrb[57].mxu0  ;;  %v14371_v36 = vpop.f32.mrb[69].mxu1  ;;  %v15539_v34 = vadd.f32 %v17149_v46, %v6405_v6 }
 0x786   :  { %v12728_v53 = vmul.f32 -1.442695, %v15540_v37 }
 0x788   :  { %15836 = vpow2.f32 %v12728_v53 }
 0x789   :  { %v15831_v57 = vpop.eup %15830  ;;  %15838 = vtanh.f32 %v15539_v34 }
 0x78a   :  { %v15833_v51 = vpop.eup %15832  ;;  %v5901_v59 = vmul.f32 %v15831_v57, %v15829_v38 }
 0x78b   :  { %v15835_v52 = vpop.eup %15834  ;;  %v6259_v54 = vadd.f32 1.0, %v15833_v51 }
 0x78c   :  { %v6494_v55 = vrot.slane %v5901_v59, 4  ;;  %v6336_v44 = vadd.f32 1.0, %v15835_v52 }
 0x78d   :  { %15840 = vrcp.f32 %v6259_v54 }
 0x78e   :  { %15842 = vrcp.f32 %v6336_v44  ;;  %14381 = vmatmul.mubr.msk.f32.vlgmr.msra.gmra.mrb[58].mxu0 %vm319_vm8, %v6494_v55  ;;  %14392 = vmatmul.mubr.msk.f32.vlgmr.msra.gmra.mrb[70].mxu1 %vm319_vm8, %v6494_v55 }
 0x78f   :  { %15302 = vmatpush3.bf16.msra.mxu0 %v16403_v4  ;;  %15308 = vmatpush3.bf16.msra.mxu1 %v16451_v17 }
 0x790   :  { %15303 = vmatprep.subr.bf16.mxu0 %v16137_v0  ;;  %15309 = vmatprep.subr.bf16.mxu1 %v16137_v0 }
 0x791   :  { %14402 = vmatprep.mubr.msk.f32.mxu0 %vm16138_vm0, %v16139_v1  ;;  %14413 = vmatprep.mubr.msk.f32.mxu1 %vm16138_vm0, %v16139_v1 }
 0x792   :  { %v15837_v26 = vpop.eup %15836 }
 0x793   :  { %15305 = vmatpush3.bf16.msra.mxu0 %v16412_v8  ;;  %15311 = vmatpush3.bf16.msra.mxu1 %v16455_v20  ;;  %v15839_v60 = vpop.eup %15838  ;;  %v6485_v13 = vadd.f32 1.0, %v15837_v26 }
 0x794   :  { %15312 = vmatprep.subr.bf16.mxu0 %v16137_v0  ;;  %15318 = vmatprep.subr.bf16.mxu1 %v16137_v0 }
 0x795   :  { %15844 = vrcp.f32 %v6485_v13 }
 0x796   :  { %14403 = vmatmul.mubr.msk.f32.vlgmr.msra.gmra.mrb[60].mxu0 %vm319_vm8, %v6494_v55  ;;  %14414 = vmatmul.mubr.msk.f32.vlgmr.msra.gmra.mrb[72].mxu1 %vm319_vm8, %v6494_v55 }
 0x797   :  { %v15841_v16 = vpop.eup %15840  ;;  %15314 = vmatpush3.bf16.msra.mxu0 %v16522_v31  ;;  %15320 = vmatpush3.bf16.msra.mxu1 %v16524_v33 }
 0x798   :  { %v15843_v9 = vpop.eup %15842  ;;  %v6489_v7 = vmul.f32 %v15841_v16, %v15839_v60  ;;  %15315 = vmatprep.subr.bf16.mxu0 %v16137_v0  ;;  %15321 = vmatprep.subr.bf16.mxu1 %v16137_v0 }
 0x799   :  { %v6488_v27 = vmul.f32 %v15843_v9, %v17177_v5  ;;  %14424 = vmatprep.mubr.msk.f32.mxu0 %vm16138_vm0, %v16139_v1  ;;  %14435 = vmatprep.mubr.msk.f32.mxu1 %vm16138_vm0, %v16139_v1 }
 0x79b   :  { %v17290_v15 = vadd.f32 %v6489_v7, %v6488_v27  ;;  %15317 = vmatpush3.bf16.msra.mxu0 %v16534_v40  ;;  %15323 = vmatpush3.bf16.msra.mxu1 %v16536_v41 }
 0x79c   :  { %15324 = vmatprep.subr.bf16.mxu0 %v16137_v0  ;;  %15330 = vmatprep.subr.bf16.mxu1 %v16137_v0 }
 0x79d   :  { %15846 = vtanh.f32 %v17290_v15 }
 0x79e   :  { %14425 = vmatmul.mubr.msk.f32.vlgmr.msra.gmra.mrb[62].mxu0 %vm319_vm8, %v6494_v55  ;;  %14436 = vmatmul.mubr.msk.f32.vlgmr.msra.gmra.mrb[74].mxu1 %vm319_vm8, %v6494_v55 }
 0x79f   :  { %15326 = vmatpush3.bf16.msra.mxu0 %v16546_v49  ;;  %15332 = vmatpush3.bf16.msra.mxu1 %v16548_v50  ;;  %v15845_v5 = vpop.eup %15844 }
 0x7a0   :  { %15327 = vmatprep.subr.bf16.mxu0 %v16137_v0  ;;  %15333 = vmatprep.subr.bf16.mxu1 %v16137_v0 }
 0x7a1   :  { %14446 = vmatprep.mubr.msk.f32.mxu0 %vm16138_vm0, %v16139_v1  ;;  %14457 = vmatprep.mubr.msk.f32.mxu1 %vm16138_vm0, %v16139_v1 }
 0x7a3   :  { %15329 = vmatpush3.bf16.msra.mxu0 %v16558_v56  ;;  %15335 = vmatpush3.bf16.msra.mxu1 %v16560_v58 }
 0x7a4   :  { %15336 = vmatprep.subr.bf16.mxu0 %v16137_v0  ;;  %15342 = vmatprep.subr.bf16.mxu1 %v16137_v0 }
 0x7a6   :  { %14447 = vmatmul.mubr.msk.f32.vlgmr.msra.gmra.mrb[64].mxu0 %vm319_vm8, %v6494_v55  ;;  %14458 = vmatmul.mubr.msk.f32.vlgmr.msra.gmra.mrb[76].mxu1 %vm319_vm8, %v6494_v55 }
 0x7a7   :  { %v15847_v6 = vpop.eup %15846  ;;  %15338 = vmatpush3.bf16.msra.mxu0 %v16570_v63  ;;  %15344 = vmatpush3.bf16.msra.mxu1 %v16572_v2 }
 0x7a8   :  { %15339 = vmatprep.subr.bf16.mxu0 %v16137_v0  ;;  %15345 = vmatprep.subr.bf16.mxu1 %v16137_v0  ;;  %v6492_v61 = vmul.f32 %v15847_v6, %v15845_v5 }
 0x7a9   :  { %14468 = vmatprep.mubr.msk.f32.mxu0 %vm16138_vm0, %v16139_v1  ;;  %14479 = vmatprep.mubr.msk.f32.mxu1 %vm16138_vm0, %v16139_v1 }
 0x7aa   :  { %v9029_v37 = vrot.slane %v6492_v61, %v16813_v62 }
 0x7ab   :  { %15341 = vmatpush3.bf16.msra.mxu0 %v16582_v10  ;;  %15347 = vmatpush3.bf16.msra.mxu1 %v16584_v12 }
 0x7ac   :  { %v9030_v24 = vcombine.high %v9029_v37, %v9029_v37  ;;  %v9037_v36 = vrot.slane %v9029_v37, %v16813_v62  ;;  %15348 = vmatprep.subr.bf16.mxu0 %v16137_v0  ;;  %15354 = vmatprep.subr.bf16.mxu1 %v16137_v0 }
 0x7ae   :  { %14469 = vmatmul.mubr.msk.f32.vlgmr.msra.gmra.mrb[62].mxu0 %vm319_vm8, %v6492_v61  ;;  %v9044_v53 = vrot.slane %v9030_v24, %v16813_v62  ;;  %v9155_v38 = vrot.slane %v9037_v36, %v16830_v18  ;;  %14480 = vmatmul.mubr.msk.f32.vlgmr.msra.gmra.mrb[74].mxu1 %vm319_vm8, %v6492_v61 }
 0x7af   :  { %15350 = vmatpush3.bf16.msra.mxu0 %v16594_v19  ;;  %15356 = vmatpush3.bf16.msra.mxu1 %v16596_v22 }
 0x7b0   :  { %15351 = vmatprep.subr.bf16.mxu0 %v16137_v0  ;;  %15357 = vmatprep.subr.bf16.mxu1 %v16137_v0  ;;  %v17337_v34 = vsel %vm293_vm5, %v17225_v25, %v9155_v38  ;;  %v9159_v57 = vrot.slane %v9044_v53, %v16830_v18  ;;  %v6813_v53 = vrot.slane %v17260_v42, 6 }
 0x7b1   :  { %14490 = vmatprep.mubr.msk.f32.mxu0 %vm16138_vm0, %v16139_v1  ;;  %14501 = vmatprep.mubr.msk.f32.mxu1 %vm16138_vm0, %v16139_v1 }
 0x7b2   :  { %v17346_v51 = vsel %vm293_vm5, %v17233_v21, %v9159_v57 }
 0x7b3   :  { %15353 = vmatpush3.bf16.msra.mxu0 %v16604_v29  ;;  %15359 = vmatpush3.bf16.msra.mxu1 %v16606_v30 }
 0x7b4   :  { %15360 = vmatprep.subr.bf16.mxu0 %v16137_v0  ;;  %15366 = vmatprep.subr.bf16.mxu1 %v16137_v0 }
 0x7b6   :  { %14491 = vmatmul.mubr.msk.f32.vlgmr.msra.gmra.mrb[64].mxu0 %vm319_vm8, %v6492_v61  ;;  %14502 = vmatmul.mubr.msk.f32.vlgmr.msra.gmra.mrb[76].mxu1 %vm319_vm8, %v6492_v61 }
 0x7b7   :  { %15362 = vmatpush3.bf16.msra.mxu0 %v16336_v39  ;;  %15368 = vmatpush3.bf16.msra.mxu1 %v16426_v11 }
 0x7b8   :  { %15363 = vmatprep.subr.bf16.mxu0 %v16137_v0  ;;  %15369 = vmatprep.subr.bf16.mxu1 %v16137_v0 }
 0x7b9   :  { %14512 = vmatprep.mubr.msk.f32.mxu0 %vm16138_vm0, %v16139_v1  ;;  %14523 = vmatprep.mubr.msk.f32.mxu1 %vm16138_vm0, %v16139_v1 }
 0x7bb   :  { %15365 = vmatpush3.bf16.msra.mxu0 %v16363_v47  ;;  %15371 = vmatpush3.bf16.msra.mxu1 %v16438_v14 }
 0x7bc   :  { %15372 = vmatprep.subr.bf16.mxu0 %v16137_v0  ;;  %15378 = vmatprep.subr.bf16.mxu1 %v16137_v0 }
 0x861   :  { %v6563_v39 = vpop.f32.mrb[58].mxu0  ;;  %v6643_v11 = vpop.f32.mrb[70].mxu1 }
 0x862   :  { %v6568_v25 = vrot.slane %v6563_v39, 2  ;;  %v6648_v21 = vrot.slane %v6643_v11, 2  ;;  %v14382_v59 = vpop.f32.mrb[59].mxu0  ;;  %v14393_v52 = vpop.f32.mrb[71].mxu1 }
 0x864   :  { %v6570_v54 = vadd.f32 %v6568_v25, %v16474_v28  ;;  %v6650_v55 = vadd.f32 %v6648_v21, %v16993_v48 }
 0x866   :  { %v12730_v44 = vmul.f32 -1.442695, %v6570_v54  ;;  %v12732_v26 = vmul.f32 -1.442695, %v6650_v55 }
 0x868   :  { %15848 = vpow2.f32 %v12730_v44 }
 0x869   :  { %15850 = vpow2.f32 %v12732_v26  ;;  %v6723_v47 = vpop.f32.mrb[60].mxu0  ;;  %v6798_v14 = vpop.f32.mrb[72].mxu1 }
 0x86a   :  { %v6803_v60 = vrot.slane %v6798_v14, 2  ;;  %v14404_v16 = vpop.f32.mrb[61].mxu0  ;;  %v14415_v9 = vpop.f32.mrb[73].mxu1  ;;  %v6728_v7 = vrot.slane %v6723_v47, 2 }
 0x86c   :  { %v6805_v13 = vadd.f32 %v6803_v60, %v17001_v23  ;;  %v6730_v5 = vadd.f32 %v6728_v7, %v17008_v43 }
 0x86e   :  { %v12735_v27 = vmul.f32 -1.442695, %v6805_v13 }
 0x870   :  { %15852 = vpow2.f32 %v12735_v27 }
 0x871   :  { %15854 = vtanh.f32 %v6730_v5 }
 0x872   :  { %v15849_v6 = vpop.eup %15848 }
 0x873   :  { %v15851_v61 = vpop.eup %15850  ;;  %v6574_v28 = vadd.f32 1.0, %v15849_v6 }
 0x874   :  { %v6654_v48 = vadd.f32 1.0, %v15851_v61 }
 0x875   :  { %15856 = vrcp.f32 %v6574_v28 }
 0x876   :  { %15858 = vrcp.f32 %v6654_v48 }
 0x87a   :  { %v15853_v37 = vpop.eup %15852 }
 0x87b   :  { %v15855_v24 = vpop.eup %15854  ;;  %v6809_v39 = vadd.f32 1.0, %v15853_v37 }
 0x87d   :  { %15860 = vrcp.f32 %v6809_v39 }
 0x87f   :  { %v15857_v36 = vpop.eup %15856 }
 0x880   :  { %v15859_v38 = vpop.eup %15858  ;;  %v6816_v57 = vmul.f32 %v15857_v36, %v15855_v24 }
 0x881   :  { %v6815_v23 = vmul.f32 %v15859_v38, %v6813_v53  ;;  %v7169_v11 = vpop.f32.mrb[62].mxu0  ;;  %v7246_v25 = vpop.f32.mrb[74].mxu1 }
 0x882   :  { %v15541_v43 = vadd.f32 %v17128_v35, %v7169_v11  ;;  %v15542_v21 = vadd.f32 %v17134_v3, %v7246_v25  ;;  %v14470_v59 = vpop.f32.mrb[63].mxu0  ;;  %v14481_v52 = vpop.f32.mrb[75].mxu1 }
 0x883   :  { %v17373_v54 = vadd.f32 %v6816_v57, %v6815_v23 }
 0x884   :  { %v12741_v55 = vmul.f32 -1.442695, %v15541_v43  ;;  %v12743_v44 = vmul.f32 -1.442695, %v15542_v21 }
 0x885   :  { %15862 = vtanh.f32 %v17373_v54 }
 0x886   :  { %15864 = vpow2.f32 %v12741_v55 }
 0x887   :  { %15866 = vpow2.f32 %v12743_v44  ;;  %v15861_v9 = vpop.eup %15860 }
 0x889   :  { %v7323_v42 = vpop.f32.mrb[64].mxu0  ;;  %v7395_v26 = vpop.f32.mrb[76].mxu1 }
 0x88a   :  { %v15544_v47 = vadd.f32 %v17143_v45, %v7395_v26  ;;  %v14492_v14 = vpop.f32.mrb[65].mxu0  ;;  %v14503_v60 = vpop.f32.mrb[77].mxu1  ;;  %v15543_v7 = vadd.f32 %v17149_v46, %v7323_v42 }
 0x88b   :  { %v16064_v14 = vld [vmem:[%s18484_s4 + $0x3] ss:$0 sm:$0xff] }
 0x88c   :  { %v12746_v16 = vmul.f32 -1.442695, %v15544_v47 }
 0x88e   :  { %15868 = vpow2.f32 %v12746_v16 }
 0x88f   :  { %v15863_v13 = vpop.eup %15862  ;;  %15870 = vtanh.f32 %v15543_v7  ;;  %v16065_v7 = vld [vmem:[%s18484_s4 + $0x2] ss:$0 sm:$0xff] }
 0x890   :  { %v15865_v27 = vpop.eup %15864  ;;  %v6819_v5 = vmul.f32 %v15863_v13, %v15861_v9 }
 0x891   :  { %v15867_v6 = vpop.eup %15866  ;;  %v7177_v61 = vadd.f32 1.0, %v15865_v27 }
 0x892   :  { %v7412_v28 = vrot.slane %v6819_v5, 6  ;;  %v7254_v48 = vadd.f32 1.0, %v15867_v6 }
 0x893   :  { %15872 = vrcp.f32 %v7177_v61 }
 0x894   :  { %15874 = vrcp.f32 %v7254_v48  ;;  %14513 = vmatmul.mubr.msk.f32.vlgmr.msra.gmra.mrb[66].mxu0 %vm319_vm8, %v7412_v28  ;;  %14524 = vmatmul.mubr.msk.f32.vlgmr.msra.gmra.mrb[10].mxu1 %vm319_vm8, %v7412_v28 }
 0x895   :  { %15374 = vmatpush3.bf16.msra.mxu0 %v16403_v4  ;;  %15380 = vmatpush3.bf16.msra.mxu1 %v16451_v17 }
 0x896   :  { %15375 = vmatprep.subr.bf16.mxu0 %v16137_v0  ;;  %15381 = vmatprep.subr.bf16.mxu1 %v16137_v0 }
 0x897   :  { %14534 = vmatprep.mubr.msk.f32.mxu0 %vm16138_vm0, %v16139_v1  ;;  %14545 = vmatprep.mubr.msk.f32.mxu1 %vm16138_vm0, %v16139_v1 }
 0x898   :  { %v15869_v4 = vpop.eup %15868 }
 0x899   :  { %15377 = vmatpush3.bf16.msra.mxu0 %v16412_v8  ;;  %15383 = vmatpush3.bf16.msra.mxu1 %v16455_v20  ;;  %v15871_v17 = vpop.eup %15870  ;;  %v7403_v8 = vadd.f32 1.0, %v15869_v4 }
 0x89a   :  { %15384 = vmatprep.subr.bf16.mxu0 %v16137_v0  ;;  %15390 = vmatprep.subr.bf16.mxu1 %v16137_v0 }
 0x89b   :  { %15876 = vrcp.f32 %v7403_v8 }
 0x89c   :  { %14535 = vmatmul.mubr.msk.f32.vlgmr.msra.gmra.mrb[4].mxu0 %vm319_vm8, %v7412_v28  ;;  %14546 = vmatmul.mubr.msk.f32.vlgmr.msra.gmra.mrb[16].mxu1 %vm319_vm8, %v7412_v28 }
 0x89d   :  { %v15873_v37 = vpop.eup %15872  ;;  %15386 = vmatpush3.bf16.msra.mxu0 %v16522_v31  ;;  %15392 = vmatpush3.bf16.msra.mxu1 %v16524_v33 }
 0x89e   :  { %v15875_v24 = vpop.eup %15874  ;;  %v7407_v36 = vmul.f32 %v15873_v37, %v15871_v17  ;;  %15387 = vmatprep.subr.bf16.mxu0 %v16137_v0  ;;  %15393 = vmatprep.subr.bf16.mxu1 %v16137_v0  ;;  %v7719_v17 = vrot.slane %v17373_v54, 6 }
 0x89f   :  { %v7406_v20 = vmul.f32 %v15875_v24, %v17290_v15  ;;  %14556 = vmatprep.mubr.msk.f32.mxu0 %vm16138_vm0, %v16139_v1  ;;  %14567 = vmatprep.mubr.msk.f32.mxu1 %vm16138_vm0, %v16139_v1 }
 0x8a1   :  { %v17403_v53 = vadd.f32 %v7407_v36, %v7406_v20  ;;  %15389 = vmatpush3.bf16.msra.mxu0 %v16534_v40  ;;  %15395 = vmatpush3.bf16.msra.mxu1 %v16536_v41 }
 0x8a2   :  { %15396 = vmatprep.subr.bf16.mxu0 %v16137_v0  ;;  %15402 = vmatprep.subr.bf16.mxu1 %v16137_v0 }
 0x8a3   :  { %15878 = vtanh.f32 %v17403_v53 }
 0x8a4   :  { %14557 = vmatmul.mubr.msk.f32.vlgmr.msra.gmra.mrb[68].mxu0 %vm319_vm8, %v7412_v28  ;;  %14568 = vmatmul.mubr.msk.f32.vlgmr.msra.gmra.mrb[78].mxu1 %vm319_vm8, %v7412_v28 }
 0x8a5   :  { %15398 = vmatpush3.bf16.msra.mxu0 %v16546_v49  ;;  %15404 = vmatpush3.bf16.msra.mxu1 %v16548_v50  ;;  %v15877_v15 = vpop.eup %15876 }
 0x8a6   :  { %15399 = vmatprep.subr.bf16.mxu0 %v16137_v0  ;;  %15405 = vmatprep.subr.bf16.mxu1 %v16137_v0 }
 0x8a7   :  { %14578 = vmatprep.mubr.msk.f32.mxu0 %vm16138_vm0, %v16139_v1  ;;  %14589 = vmatprep.mubr.msk.f32.mxu1 %vm16138_vm0, %v16139_v1 }
 0x8a9   :  { %15401 = vmatpush3.bf16.msra.mxu0 %v16558_v56  ;;  %15407 = vmatpush3.bf16.msra.mxu1 %v16560_v58 }
 0x8aa   :  { %15408 = vmatprep.subr.bf16.mxu0 %v16137_v0  ;;  %15414 = vmatprep.subr.bf16.mxu1 %v16137_v0 }
 0x8ac   :  { %14579 = vmatmul.mubr.msk.f32.vlgmr.msra.gmra.mrb[70].mxu0 %vm319_vm8, %v7412_v28  ;;  %14590 = vmatmul.mubr.msk.f32.vlgmr.msra.gmra.mrb[80].mxu1 %vm319_vm8, %v7412_v28 }
 0x8ad   :  { %v15879_v38 = vpop.eup %15878  ;;  %15410 = vmatpush3.bf16.msra.mxu0 %v16570_v63  ;;  %15416 = vmatpush3.bf16.msra.mxu1 %v16572_v2 }
 0x8ae   :  { %15411 = vmatprep.subr.bf16.mxu0 %v16137_v0  ;;  %15417 = vmatprep.subr.bf16.mxu1 %v16137_v0  ;;  %v7410_v57 = vmul.f32 %v15879_v38, %v15877_v15 }
 0x8af   :  { %14600 = vmatprep.mubr.msk.f32.mxu0 %vm16138_vm0, %v16139_v1  ;;  %14611 = vmatprep.mubr.msk.f32.mxu1 %vm16138_vm0, %v16139_v1 }
 0x8b0   :  { %v9051_v39 = vrot.slane %v7410_v57, %v16813_v62 }
 0x8b1   :  { %15413 = vmatpush3.bf16.msra.mxu0 %v16582_v10  ;;  %15419 = vmatpush3.bf16.msra.mxu1 %v16584_v12 }
 0x8b2   :  { %v9052_v23 = vcombine.high %v9051_v39, %v9051_v39  ;;  %v9059_v11 = vrot.slane %v9051_v39, %v16813_v62  ;;  %15420 = vmatprep.subr.bf16.mxu0 %v16137_v0  ;;  %15426 = vmatprep.subr.bf16.mxu1 %v16137_v0 }
 0x8b4   :  { %14601 = vmatmul.mubr.msk.f32.vlgmr.msra.gmra.mrb[68].mxu0 %vm319_vm8, %v7410_v57  ;;  %v9066_v25 = vrot.slane %v9052_v23, %v16813_v62  ;;  %v9165_v43 = vrot.slane %v9059_v11, %v16830_v18  ;;  %14612 = vmatmul.mubr.msk.f32.vlgmr.msra.gmra.mrb[78].mxu1 %vm319_vm8, %v7410_v57 }
 0x8b5   :  { %15422 = vmatpush3.bf16.msra.mxu0 %v16594_v19  ;;  %15428 = vmatpush3.bf16.msra.mxu1 %v16596_v22 }
 0x8b6   :  { %15423 = vmatprep.subr.bf16.mxu0 %v16137_v0  ;;  %15429 = vmatprep.subr.bf16.mxu1 %v16137_v0  ;;  %v17450_v21 = vsel %vm295_vm6, %v17337_v34, %v9165_v43  ;;  %v9169_v59 = vrot.slane %v9066_v25, %v16830_v18 }
 0x8b7   :  { %14622 = vmatprep.mubr.msk.f32.mxu0 %vm16138_vm0, %v16139_v1  ;;  %14633 = vmatprep.mubr.msk.f32.mxu1 %vm16138_vm0, %v16139_v1 }
 0x8b8   :  { %v17459_v52 = vsel %vm295_vm6, %v17346_v51, %v9169_v59  ;;  %v16063_v51 = vld [vmem:[%s18484_s4 + $0x1] ss:$0 sm:$0xff] }
 0x8b9   :  { %15425 = vmatpush3.bf16.msra.mxu0 %v16604_v29  ;;  %15431 = vmatpush3.bf16.msra.mxu1 %v16606_v30 }
 0x8ba   :  { %15432 = vmatprep.subr.bf16.mxu0 %v16137_v0  ;;  %15438 = vmatprep.subr.bf16.mxu1 %v16137_v0 }
 0x8bc   :  { %14623 = vmatmul.mubr.msk.f32.vlgmr.msra.gmra.mrb[70].mxu0 %vm319_vm8, %v7410_v57  ;;  %14634 = vmatmul.mubr.msk.f32.vlgmr.msra.gmra.mrb[80].mxu1 %vm319_vm8, %v7410_v57 }
 0x8bd   :  { %15434 = vmatpush3.bf16.msra.mxu0 %v16522_v31  ;;  %15440 = vmatpush3.bf16.msra.mxu1 %v16524_v33 }
 0x8be   :  { %15435 = vmatprep.subr.bf16.mxu0 %v16137_v0  ;;  %15441 = vmatprep.subr.bf16.mxu1 %v16137_v0 }
 0x8bf   :  { %14644 = vmatprep.mubr.msk.f32.mxu0 %vm16138_vm0, %v16139_v1  ;;  %14655 = vmatprep.mubr.msk.f32.mxu1 %vm16138_vm0, %v16139_v1 }
 0x8c1   :  { %15437 = vmatpush3.bf16.msra.mxu0 %v16534_v40  ;;  %15443 = vmatpush3.bf16.msra.mxu1 %v16536_v41 }
 0x8c2   :  { %15444 = vmatprep.subr.bf16.mxu0 %v16137_v0  ;;  %15450 = vmatprep.subr.bf16.mxu1 %v16137_v0 }
 0x967   :  { %v7481_v31 = vpop.f32.mrb[66].mxu0  ;;  %v7558_v33 = vpop.f32.mrb[10].mxu1 }
 0x968   :  { %v7485_v34 = vadd.f32 %v7481_v31, %v16476_v32  ;;  %v15514_v55 = vadd.f32 %v16063_v51, %v7558_v33  ;;  %v14514_v44 = vpop.f32.mrb[67].mxu0  ;;  %v14525_v42 = vpop.f32.mrb[11].mxu1 }
 0x96a   :  { %v12748_v26 = vmul.f32 -1.442695, %v7485_v34  ;;  %v12750_v47 = vmul.f32 -1.442695, %v15514_v55 }
 0x96c   :  { %15880 = vpow2.f32 %v12748_v26 }
 0x96d   :  { %15882 = vpow2.f32 %v12750_v47 }
 0x96f   :  { %v7635_v40 = vpop.f32.mrb[4].mxu0  ;;  %v7707_v41 = vpop.f32.mrb[16].mxu1 }
 0x970   :  { %v15516_v60 = vadd.f32 %v16064_v14, %v7707_v41  ;;  %v14536_v16 = vpop.f32.mrb[5].mxu0  ;;  %v14547_v32 = vpop.f32.mrb[17].mxu1  ;;  %v15515_v13 = vadd.f32 %v16065_v7, %v7635_v40  ;;  %v9414_v7 = vld [vmem:[%s18487_s7] sm:$0xff] }
 0x972   :  { %v12753_v9 = vmul.f32 -1.442695, %v15516_v60 }
 0x974   :  { %15884 = vpow2.f32 %v12753_v9 }
 0x975   :  { %15886 = vtanh.f32 %v15515_v13  ;;  %v9415_v13 = vld [vmem:[%s18487_s7 + $0x8] sm:$0xff] }
 0x976   :  { %v15881_v27 = vpop.eup %15880 }
 0x977   :  { %v15883_v5 = vpop.eup %15882  ;;  %v7489_v6 = vadd.f32 1.0, %v15881_v27 }
 0x978   :  { %v7566_v61 = vadd.f32 1.0, %v15883_v5 }
 0x979   :  { %15888 = vrcp.f32 %v7489_v6  ;;  %v15493_v6 = vpack.c.bf16 %v9415_v13, %v9414_v7 }
 0x97a   :  { %15890 = vrcp.f32 %v7566_v61 }
 0x97e   :  { %v15885_v28 = vpop.eup %15884 }
 0x97f   :  { %v15887_v48 = vpop.eup %15886  ;;  %v7715_v36 = vadd.f32 1.0, %v15885_v28  ;;  %v9416_v28 = vld [vmem:[%s18487_s7 + $0x10] sm:$0xff] }
 0x981   :  { %15892 = vrcp.f32 %v7715_v36 }
 0x983   :  { %v15889_v4 = vpop.eup %15888 }
 0x984   :  { %v15891_v37 = vpop.eup %15890  ;;  %v7722_v24 = vmul.f32 %v15889_v4, %v15887_v48  ;;  %v9417_v48 = vld [vmem:[%s18487_s7 + $0x18] sm:$0xff] }
 0x985   :  { %v7721_v8 = vmul.f32 %v15891_v37, %v7719_v17  ;;  %v9330_v37 = vld [vmem:[%s18486_s6 + $0x20] sm:$0xff] }
 0x987   :  { %v7723_v20 = vadd.f32 %v7722_v24, %v7721_v8  ;;  %v8075_v15 = vpop.f32.mrb[68].mxu0  ;;  %v8152_v38 = vpop.f32.mrb[78].mxu1  ;;  %v9331_v24 = vld [vmem:[%s18486_s6 + $0x28] sm:$0xff]  ;;  %v15496_v8 = vpack.c.bf16 %v9417_v48, %v9416_v28 }
 0x988   :  { %v15545_v57 = vadd.f32 %v17128_v35, %v8075_v15  ;;  %v15546_v39 = vadd.f32 %v17134_v3, %v8152_v38  ;;  %v14602_v23 = vpop.f32.mrb[69].mxu0  ;;  %v14613_v11 = vpop.f32.mrb[79].mxu1  ;;  %v15488_v38 = vpack.c.bf16 %v9331_v24, %v9330_v37 }
 0x989   :  { %15894 = vtanh.f32 %v7723_v20 }
 0x98a   :  { %v12759_v25 = vmul.f32 -1.442695, %v15545_v57  ;;  %v12761_v43 = vmul.f32 -1.442695, %v15546_v39 }
 0x98b   :  { %v15893_v51 = vpop.eup %15892 }
 0x98c   :  { %15896 = vpow2.f32 %v12759_v25 }
 0x98d   :  { %15898 = vpow2.f32 %v12761_v43 }
 0x98f   :  { %v8229_v54 = vpop.f32.mrb[70].mxu0  ;;  %v8301_v59 = vpop.f32.mrb[80].mxu1 }
 0x990   :  { %v15548_v31 = vadd.f32 %v17143_v45, %v8301_v59  ;;  %v14624_v33 = vpop.f32.mrb[71].mxu0  ;;  %v14635_v34 = vpop.f32.mrb[81].mxu1  ;;  %v15547_v35 = vadd.f32 %v17149_v46, %v8229_v54 }
 0x992   :  { %v12764_v44 = vmul.f32 -1.442695, %v15548_v31 }
 0x993   :  { %v15895_v55 = vpop.eup %15894 }
 0x994   :  { %v7725_v42 = vmul.f32 %v15895_v55, %v15893_v51  ;;  %15900 = vpow2.f32 %v12764_v44  ;;  %v9325_v44 = vld [vmem:[%s18485_s5 + $0x8] sm:$0xff] }
 0x995   :  { %15902 = vtanh.f32 %v15547_v35 }
 0x996   :  { %v15897_v3 = vpop.eup %15896  ;;  %14645 = vmatmul.mubr.msk.f32.vlgmr.msra.gmra.mrb[72].mxu0 %vm319_vm8, %v7725_v42  ;;  %14656 = vmatmul.mubr.msk.f32.vlgmr.msra.gmra.mrb[82].mxu1 %vm319_vm8, %v7725_v42 }
 0x997   :  { %v15899_v26 = vpop.eup %15898  ;;  %v8083_v47 = vadd.f32 1.0, %v15897_v3  ;;  %15446 = vmatpush3.bf16.msra.mxu0 %v16546_v49  ;;  %15452 = vmatpush3.bf16.msra.mxu1 %v16548_v50 }
 0x998   :  { %v8160_v45 = vadd.f32 1.0, %v15899_v26  ;;  %15447 = vmatprep.subr.bf16.mxu0 %v16137_v0  ;;  %15453 = vmatprep.subr.bf16.mxu1 %v16137_v0 }
 0x999   :  { %15904 = vrcp.f32 %v8083_v47  ;;  %14666 = vmatprep.mubr.msk.f32.mxu0 %vm16138_vm0, %v16139_v1  ;;  %14677 = vmatprep.mubr.msk.f32.mxu1 %vm16138_vm0, %v16139_v1  ;;  %v12448_v47 = vld [vmem:[%s18490_s10] sm:$0xff] }
 0x99a   :  { %15906 = vrcp.f32 %v8160_v45  ;;  %v12449_v45 = vld [vmem:[%s18490_s10 + $0x8] sm:$0xff] }
 0x99b   :  { %15449 = vmatpush3.bf16.msra.mxu0 %v16558_v56  ;;  %15455 = vmatpush3.bf16.msra.mxu1 %v16560_v58 }
 0x99c   :  { %15456 = vmatprep.subr.bf16.mxu0 %v16137_v0  ;;  %15462 = vmatprep.subr.bf16.mxu1 %v16137_v0 }
 0x99e   :  { %14667 = vmatmul.mubr.msk.f32.vlgmr.msra.gmra.mrb[74].mxu0 %vm319_vm8, %v7725_v42  ;;  %14678 = vmatmul.mubr.msk.f32.vlgmr.msra.gmra.mrb[84].mxu1 %vm319_vm8, %v7725_v42  ;;  %v15901_v49 = vpop.eup %15900 }
 0x99f   :  { %15458 = vmatpush3.bf16.msra.mxu0 %v16570_v63  ;;  %15464 = vmatpush3.bf16.msra.mxu1 %v16572_v2  ;;  %v15903_v50 = vpop.eup %15902  ;;  %v8309_v2 = vadd.f32 1.0, %v15901_v49  ;;  %v15507_v49 = vpack.c.bf16 %v12449_v45, %v12448_v47 }
 0x9a0   :  { %15459 = vmatprep.subr.bf16.mxu0 %v16137_v0  ;;  %15465 = vmatprep.subr.bf16.mxu1 %v16137_v0 }
 0x9a1   :  { %14688 = vmatprep.mubr.msk.f32.mxu0 %vm16138_vm0, %v16139_v1  ;;  %14699 = vmatprep.mubr.msk.f32.mxu1 %vm16138_vm0, %v16139_v1  ;;  %15908 = vrcp.f32 %v8309_v2 }
 0x9a3   :  { %v15905_v56 = vpop.eup %15904  ;;  %15461 = vmatpush3.bf16.msra.mxu0 %v16582_v10  ;;  %15467 = vmatpush3.bf16.msra.mxu1 %v16584_v12  ;;  %v9326_v10 = vld [vmem:[%s18486_s6] sm:$0xff]  ;;  %v9327_v12 = vld [vmem:[%s18486_s6 + $0x8] sm:$0xff] }
 0x9a4   :  { %v15907_v58 = vpop.eup %15906  ;;  %v8313_v63 = vmul.f32 %v15905_v56, %v15903_v50  ;;  %15468 = vmatprep.subr.bf16.mxu0 %v16137_v0  ;;  %15474 = vmatprep.subr.bf16.mxu1 %v16137_v0  ;;  %v15480_v9 = vpack.c.bf16 %v9327_v12, %v9326_v10  ;;  %v12450_v50 = vld [vmem:[%s18490_s10 + $0x10] sm:$0xff]  ;;  %v12451_v56 = vld [vmem:[%s18490_s10 + $0x18] sm:$0xff] }
 0x9a5   :  { %v8312_v46 = vmul.f32 %v15907_v58, %v17403_v53  ;;  %v15510_v58 = vpack.c.bf16 %v12451_v56, %v12450_v50 }
 0x9a7   :  { %v17523_v40 = vadd.f32 %v8313_v63, %v8312_v46  ;;  %v16066_v46 = vld [vmem:[%s18484_s4 + $0x4] ss:$0 sm:$0xff] }
 0x9a9   :  { %15910 = vtanh.f32 %v17523_v40 }
 0x9ab   :  { %v15909_v41 = vpop.eup %15908 }
 0x9b3   :  { %v15911_v14 = vpop.eup %15910 }
 0x9b4   :  { %v8316_v60 = vmul.f32 %v15911_v14, %v15909_v41 }
 0x9b6   :  { %14689 = vmatmul.mubr.msk.f32.vlgmr.msra.gmra.mrb[72].mxu0 %vm319_vm8, %v8316_v60  ;;  %v9073_v53 = vrot.slane %v8316_v60, %v16813_v62  ;;  %14700 = vmatmul.mubr.msk.f32.vlgmr.msra.gmra.mrb[82].mxu1 %vm319_vm8, %v8316_v60 }
 0x9b7   :  { %15470 = vmatpush3.bf16.msra.mxu0 %v16594_v19  ;;  %15476 = vmatpush3.bf16.msra.mxu1 %v16596_v22  ;;  %v9328_v19 = vld [vmem:[%s18486_s6 + $0x10] sm:$0xff]  ;;  %v9329_v22 = vld [vmem:[%s18486_s6 + $0x18] sm:$0xff] }
 0x9b8   :  { %v9074_v16 = vcombine.high %v9073_v53, %v9073_v53  ;;  %v9081_v32 = vrot.slane %v9073_v53, %v16813_v62  ;;  %15471 = vmatprep.subr.bf16.mxu0 %v16137_v0  ;;  %15477 = vmatprep.subr.bf16.mxu1 %v16137_v0  ;;  %v15484_v61 = vpack.c.bf16 %v9329_v22, %v9328_v19 }
 0x9b9   :  { %14710 = vmatprep.mubr.msk.f32.mxu0 %vm16138_vm0, %v16139_v1  ;;  %14721 = vmatprep.mubr.msk.f32.mxu1 %vm16138_vm0, %v16139_v1 }
 0x9ba   :  { %v9175_v27 = vrot.slane %v9081_v32, %v16830_v18  ;;  %v9088_v5 = vrot.slane %v9074_v16, %v16813_v62 }
 0x9bb   :  { %15473 = vmatpush3.bf16.msra.mxu0 %v16604_v29  ;;  %15479 = vmatpush3.bf16.msra.mxu1 %v16606_v30 }
 0x9bc   :  { %15492 = vmatprep.subr.bf16.mxu1 %v16137_v0  ;;  %15481 = vmatprep.subr.bf16.mxu0 %v15480_v9  ;;  %v9194_v4 = vsel %vm297_vm7, %v17450_v21, %v9175_v27  ;;  %v9179_v29 = vrot.slane %v9088_v5, %v16830_v18  ;;  %v9324_v21 = vld [vmem:[%s18485_s5] sm:$0xff] }
 0x9bd   :  { %v9198_v17 = vcombine.high %v9194_v4, %v9194_v4  ;;  %v9205_v30 = vrot.slane %v9194_v4, %v16813_v62  ;;  %v16069_v27 = vld [vmem:[%s18484_s4 + $0x6] ss:$0 sm:$0xff] }
 0x9be   :  { %14711 = vmatmul.mubr.msk.f32.vlgmr.msra.gmra.mrb[74].mxu0 %vm319_vm8, %v8316_v60  ;;  %14722 = vmatmul.mubr.msk.f32.vlgmr.msra.gmra.mrb[84].mxu1 %vm319_vm8, %v8316_v60  ;;  %v17584_v36 = vsel %vm297_vm7, %v17459_v52, %v9179_v29 }
 0x9bf   :  { %15494 = vmatpush3.bf16.msra.mxu1 %v15493_v6  ;;  %15483 = vmatpush3.bf16.msra.mxu0 %v15480_v9  ;;  %v9212_v20 = vrot.slane %v9198_v17, %v16813_v62  ;;  %v9213_v15 = vcombine.high %v9205_v30, %v9205_v30  ;;  %v9221_v39 = vrot.slane %v9205_v30, %v16813_v62  ;;  %v16068_v9 = vld [vmem:[%s18484_s4 + $0x7] ss:$0 sm:$0xff] }
 0x9c0   :  { %15495 = vmatprep.subr.bf16.mxu1 %v16137_v0  ;;  %15485 = vmatprep.subr.bf16.mxu0 %v15484_v61 }
 0x9c1   :  { %14747 = vmatprep.mubr.msk.f32.mxu1 %vm16138_vm0, %v16139_v1  ;;  %v9214_v57 = vcombine.high %v9212_v20, %v9212_v20  ;;  %v9235_v23 = vrot.slane %v9213_v15, %v16813_v62  ;;  %14736 = vmatprep.mubr.msk.f32.mxu0 %vm9332_vm9, %v9324_v21  ;;  %v9228_v52 = vrot.slane %v9212_v20, %v16813_v62 }
 0x9c3   :  { %15497 = vmatpush3.bf16.msra.mxu1 %v15496_v8  ;;  %15487 = vmatpush3.bf16.msra.mxu0 %v15484_v61  ;;  %v9242_v11 = vrot.slane %v9214_v57, %v16813_v62  ;;  %v9418_v25 = vcombine.low %v9221_v39, %v9235_v23  ;;  %v12778_v43 = vcombine.high %v9221_v39, %v9235_v23 }
 0x9c4   :  { %15489 = vmatprep.subr.bf16.mxu0 %v15488_v38  ;;  %15506 = vmatprep.subr.bf16.mxu1 %v16137_v0  ;;  %v9261_v57 = vcombine.high %v17584_v36, %v17584_v36 }
 0x9c5   :  { %v9420_v54 = vcombine.low %v9228_v52, %v9242_v11  ;;  %v12779_v59 = vcombine.high %v9228_v52, %v9242_v11  ;;  %v9428_v31 = vrot.slane %v9418_v25, %v16813_v62  ;;  %v9435_v33 = vrot.slane %v12778_v43, %v16813_v62 }
 0x9c7   :  { %v9442_v34 = vrot.slane %v9420_v54, %v16813_v62  ;;  %v9449_v51 = vrot.slane %v12779_v59, %v16813_v62  ;;  %v9450_v55 = vcombine.low %v9428_v31, %v9435_v33  ;;  %15491 = vmatpush3.bf16.msra.mxu0 %v15488_v38  ;;  %v9268_v59 = vrot.slane %v17584_v36, %v16813_v62 }
 0x9c9   :  { %v9451_v35 = vcombine.low %v9442_v34, %v9449_v51  ;;  %v9458_v42 = vrot.slane %v9450_v55, %v16813_v62 }
 0x9ca   :  { %14737 = vmatmul.mubr.msk.f32.vlgmr.msra.gmra.mrb[76].mxu0 %vm9332_vm9, %v9325_v44 }
 0x9cb   :  { %v9465_v3 = vrot.slane %v9451_v35, %v16813_v62 }
 0x9cd   :  { %v17606_v26 = vcombine.low %v9458_v42, %v9465_v3  ;;  %v9275_v42 = vrot.slane %v9261_v57, %v16813_v62 }
 0x9cf   :  { %14748 = vmatmul.mubr.msk.f32.vlgmr.msra.gmra.mrb[86].mxu1 %vm319_vm8, %v17606_v26 }
 0x9d0   :  { %14750 = vmatprep.mubr.msk.f32.mxu1 %vm16138_vm0, %v16139_v1  ;;  %15508 = vmatpush3.bf16.msra.mxu1 %v15507_v49 }
 0x9d1   :  { %15509 = vmatprep.subr.bf16.mxu1 %v16137_v0  ;;  %v16067_v0 = vld [vmem:[%s18484_s4 + $0x5] ss:$0 sm:$0xff] }
 0x9d4   :  { %15511 = vmatpush3.bf16.msra.mxu1 %v15510_v58 }
 0xa89   :  { %v8669_v63 = vpop.f32.mrb[72].mxu0  ;;  %v8746_v2 = vpop.f32.mrb[82].mxu1 }
 0xa8a   :  { %v15549_v41 = vadd.f32 %v16066_v46, %v8669_v63  ;;  %v15550_v14 = vadd.f32 %v16067_v0, %v8746_v2  ;;  %v14690_v60 = vpop.f32.mrb[73].mxu0  ;;  %v14701_v10 = vpop.f32.mrb[83].mxu1  ;;  %v9276_v46 = vcombine.high %v9268_v59, %v9268_v59 }
 0xa8c   :  { %v12770_v12 = vmul.f32 -1.442695, %v15549_v41  ;;  %v12772_v53 = vmul.f32 -1.442695, %v15550_v14 }
 0xa8e   :  { %15912 = vpow2.f32 %v12770_v12 }
 0xa8f   :  { %15914 = vpow2.f32 %v12772_v53 }
 0xa91   :  { %v8823_v16 = vpop.f32.mrb[74].mxu0  ;;  %v8895_v32 = vpop.f32.mrb[84].mxu1 }
 0xa92   :  { %v15552_v7 = vadd.f32 %v16068_v9, %v8895_v32  ;;  %v14712_v13 = vpop.f32.mrb[75].mxu0  ;;  %v14723_v19 = vpop.f32.mrb[85].mxu1  ;;  %v15551_v5 = vadd.f32 %v16069_v27, %v8823_v16  ;;  %v9277_v32 = vcombine.high %v9275_v42, %v9275_v42 }
 0xa93   :  { %v9291_v13 = vrot.slane %v9275_v42, %v16813_v62  ;;  %v9298_v19 = vrot.slane %v9276_v46, %v16813_v62 }
 0xa94   :  { %v12775_v22 = vmul.f32 -1.442695, %v15552_v7 }
 0xa96   :  { %15916 = vpow2.f32 %v12775_v22 }
 0xa97   :  { %15918 = vtanh.f32 %v15551_v5 }
 0xa98   :  { %v15913_v6 = vpop.eup %15912 }
 0xa99   :  { %v15915_v61 = vpop.eup %15914  ;;  %v8677_v28 = vadd.f32 1.0, %v15913_v6 }
 0xa9a   :  { %v8754_v48 = vadd.f32 1.0, %v15915_v61 }
 0xa9b   :  { %15920 = vrcp.f32 %v8677_v28 }
 0xa9c   :  { %15922 = vrcp.f32 %v8754_v48 }
 0xa9d   :  { %v17637_v4 = vpop.f32.mrb[76].mxu0 }
 0xa9e   :  { %v9405_v29 = vpop.f32.mrb[77].mxu0 }
 0xa9f   :  { %v9619_v17 = vcombine.high %v9405_v29, %v9405_v29  ;;  %v9626_v37 = vrot.slane %v9405_v29, %v16813_v62 }
 0xaa0   :  { %v15917_v24 = vpop.eup %15916 }
 0xaa1   :  { %v15919_v15 = vpop.eup %15918  ;;  %v9633_v38 = vrot.slane %v9619_v17, %v16813_v62  ;;  %v8903_v43 = vadd.f32 1.0, %v15917_v24  ;;  %v9634_v54 = vcombine.high %v9626_v37, %v9626_v37  ;;  %v9642_v35 = vrot.slane %v9626_v37, %v16813_v62 }
 0xaa2   :  { %v9603_v30 = vpop.f32.mrb[86].mxu1  ;;  %v9284_v37 = vrot.slane %v9268_v59, %v16813_v62  ;;  %v9305_v24 = vrot.slane %v9277_v32, %v16813_v62 }
 0xaa3   :  { %v9720_v21 = vcombine.high %v9603_v30, %v9603_v30  ;;  %v9727_v8 = vrot.slane %v9603_v30, %v16813_v62  ;;  %v14749_v20 = vpop.f32.mrb[87].mxu1  ;;  %v9635_v44 = vcombine.high %v9633_v38, %v9633_v38  ;;  %15924 = vrcp.f32 %v8903_v43 }
 0xaa4   :  { %v9656_v36 = vrot.slane %v9634_v54, %v16813_v62  ;;  %v9664_v14 = vcombine.high %v9642_v35, %v9642_v35  ;;  %v17662_v9 = vrot.slane %v9642_v35, %v16830_v18 }
 0xaa5   :  { %v15921_v39 = vpop.eup %15920  ;;  %v9734_v23 = vrot.slane %v9720_v21, %v16813_v62  ;;  %v9735_v52 = vcombine.high %v9727_v8, %v9727_v8  ;;  %v9743_v34 = vrot.slane %v9727_v8, %v16813_v62  ;;  %v9663_v50 = vrot.slane %v9635_v44, %v16813_v62 }
 0xaa6   :  { %v15923_v11 = vpop.eup %15922  ;;  %v8907_v25 = vmul.f32 %v15921_v39, %v15919_v15  ;;  %v9666_v60 = vcombine.high %v9656_v36, %v9656_v36  ;;  %v17665_v7 = vrot.slane %v9656_v36, %v16830_v18  ;;  %v17672_v5 = vrot.slane %v9664_v14, %v16830_v18 }
 0xaa7   :  { %v8906_v31 = vmul.f32 %v15923_v11, %v17523_v40  ;;  %v9736_v33 = vcombine.high %v9734_v23, %v9734_v23  ;;  %v9757_v51 = vrot.slane %v9735_v52, %v16813_v62  ;;  %v9750_v55 = vrot.slane %v9734_v23, %v16813_v62 }
 0xaa8   :  { %v9649_v40 = vrot.slane %v9633_v38, %v16813_v62  ;;  %v9667_v16 = vcombine.high %v9663_v50, %v9663_v50  ;;  %v17675_v6 = vrot.slane %v9666_v60, %v16830_v18  ;;  %v17681_v28 = vrot.slane %v9663_v50, %v16830_v18 }
 0xaa9   :  { %v8908_v3 = vadd.f32 %v8907_v25, %v8906_v31  ;;  %v9764_v47 = vrot.slane %v9736_v33, %v16813_v62  ;;  %v9920_v45 = vcombine.low %v9743_v34, %v9757_v51  ;;  %v12783_v49 = vcombine.high %v9743_v34, %v9757_v51 }
 0xaaa   :  { %v9665_v12 = vcombine.high %v9649_v40, %v9649_v40  ;;  %v17678_v61 = vrot.slane %v9649_v40, %v16830_v18  ;;  %v17687_v17 = vrot.slane %v9667_v16, %v16830_v18  ;;  %v9307_v21 = vcombine.high %v9291_v13, %v9291_v13 }
 0xaab   :  { %15926 = vtanh.f32 %v8908_v3  ;;  %v9922_v56 = vcombine.low %v9750_v55, %v9764_v47  ;;  %v12784_v58 = vcombine.high %v9750_v55, %v9764_v47  ;;  %v9930_v63 = vrot.slane %v9920_v45, %v16813_v62 }
 0xaac   :  { %v9937_v2 = vrot.slane %v12783_v49, %v16813_v62  ;;  %v17684_v48 = vrot.slane %v9665_v12, %v16830_v18  ;;  %v9308_v8 = vcombine.high %v9298_v19, %v9298_v19  ;;  %v9306_v31 = vcombine.high %v9284_v37, %v9284_v37 }
 0xaad   :  { %v9944_v41 = vrot.slane %v9922_v56, %v16813_v62  ;;  %v9951_v0 = vrot.slane %v12784_v58, %v16813_v62  ;;  %v15925_v30 = vpop.eup %15924  ;;  %v9470_v51 = vcombine.low %v9305_v24, %v9307_v21  ;;  %v9309_v36 = vcombine.high %v9305_v24, %v9305_v24 }
 0xaae   :  { %v9952_v10 = vcombine.low %v9930_v63, %v9937_v2  ;;  %v9469_v34 = vcombine.low %v9308_v8, %v9291_v13  ;;  %v9468_v42 = vcombine.low %v9298_v19, %v9306_v31 }
 0xaaf   :  { %v9953_v53 = vcombine.low %v9944_v41, %v9951_v0  ;;  %v9498_v45 = vrot.slane %v9470_v51, %v16813_v62 }
 0xab0   :  { %v9960_v22 = vrot.slane %v9952_v10, %v16813_v62  ;;  %v9491_v47 = vrot.slane %v9469_v34, %v16813_v62  ;;  %v9484_v58 = vrot.slane %v9468_v42, %v16813_v62 }
 0xab1   :  { %v9967_v27 = vrot.slane %v9953_v53, %v16813_v62 }
 0xab2   :  { %v9500_v63 = vcombine.low %v9491_v47, %v9498_v45  ;;  %v11349_v47 = vld [vmem:[%s18488_s8 + $0x18] sm:$0xff] }
 0xab3   :  { %v9968_v29 = vcombine.low %v9960_v22, %v9967_v27 }
 0xab4   :  { %v9514_v60 = vrot.slane %v9500_v63, %v16813_v62 }
 0xab5   :  { %v15927_v20 = vpop.eup %15926  ;;  %v10050_v15 = vadd.f32 %v9968_v29, %v17662_v9  ;;  %v17693_v38 = vadd.f32 %v9968_v29, %v17665_v7  ;;  %v17696_v57 = vadd.f32 %v9968_v29, %v17672_v5  ;;  %v17699_v39 = vadd.f32 %v9968_v29, %v17675_v6 }
 0xab6   :  { %v8910_v23 = vmul.f32 %v15927_v20, %v15925_v30  ;;  %v17702_v52 = vadd.f32 %v9968_v29, %v17678_v61  ;;  %v17705_v11 = vadd.f32 %v9968_v29, %v17681_v28  ;;  %v17708_v25 = vadd.f32 %v9968_v29, %v17684_v48 }
 0xab7   :  { %v17711_v43 = vadd.f32 %v9968_v29, %v17687_v17  ;;  %v12785_v54 = vmul.f32 -1.442695, %v10050_v15 }
 0xab8   :  { %v9096_v59 = vrot.slane %v8910_v23, %v16813_v62  ;;  %v12797_v63 = vmul.f32 -1.442695, %v17708_v25 }
 0xab9   :  { %15928 = vpow2.f32 %v12785_v54 }
 0xaba   :  { %v9104_v33 = vrot.slane %v9096_v59, %v16813_v62  ;;  %v9097_v55 = vcombine.high %v9096_v59, %v9096_v59 }
 0xabc   :  { %v9253_v44 = vrot.slane %v9104_v33, %v16813_v62  ;;  %v9111_v35 = vrot.slane %v9097_v55, %v16813_v62 }
 0xabe   :  { %v9260_v3 = vrot.slane %v9253_v44, %v16813_v62  ;;  %v9316_v49 = vrot.slane %v9111_v35, %v16813_v62  ;;  %v11346_v44 = vld [vmem:[%s18488_s8] sm:$0xff]  ;;  %v11347_v35 = vld [vmem:[%s18488_s8 + $0x8] sm:$0xff] }
 0xabf   :  { %v15498_v42 = vpack.c.bf16 %v11347_v35, %v11346_v44 }
 0xac0   :  { %v9467_v40 = vcombine.low %v9260_v3, %v9284_v37  ;;  %v9323_v50 = vrot.slane %v9316_v49, %v16813_v62  ;;  %v11348_v3 = vld [vmem:[%s18488_s8 + $0x10] sm:$0xff]  ;;  %v12787_v49 = vmul.f32 -1.442695, %v17693_v38 }
 0xac1   :  { %v15502_v45 = vpack.c.bf16 %v11349_v47, %v11348_v3  ;;  %15499 = vmatprep.subr.bf16.mxu0 %v15498_v42 }
 0xac2   :  { %v9477_v56 = vrot.slane %v9467_v40, %v16813_v62  ;;  %v9516_v2 = vcombine.low %v9309_v36, %v9323_v50  ;;  %15501 = vmatpush3.bf16.msra.mxu0 %v15498_v42  ;;  %v12789_v40 = vmul.f32 -1.442695, %v17696_v57  ;;  %v12791_v36 = vmul.f32 -1.442695, %v17699_v39 }
 0xac3   :  { %v15929_v46 = vpop.eup %15928  ;;  %15503 = vmatprep.subr.bf16.mxu0 %v15502_v45  ;;  %v12793_v50 = vmul.f32 -1.442695, %v17702_v52 }
 0xac4   :  { %v10178_v41 = vadd.f32 1.0, %v15929_v46  ;;  %v9499_v0 = vcombine.low %v9477_v56, %v9484_v58  ;;  %v9523_v12 = vrot.slane %v9516_v2, %v16813_v62  ;;  %v12795_v58 = vmul.f32 -1.442695, %v17705_v11 }
 0xac5   :  { %v12799_v2 = vmul.f32 -1.442695, %v17711_v43 }
 0xac6   :  { %15930 = vrcp.f32 %v10178_v41  ;;  %v9507_v14 = vrot.slane %v9499_v0, %v16813_v62  ;;  %v9530_v53 = vrot.slane %v9523_v12, %v16813_v62  ;;  %15505 = vmatpush3.bf16.msra.mxu0 %v15502_v45 }
 0xac7   :  { %15932 = vpow2.f32 %v12787_v49 }
 0xac8   :  { %v9515_v10 = vcombine.low %v9507_v14, %v9514_v60  ;;  %15934 = vpow2.f32 %v12789_v40 }
 0xac9   :  { %15936 = vpow2.f32 %v12791_v36 }
 0xaca   :  { %14751 = vmatmul.mubr.msk.f32.gmra.mrb[88].mxu1 %vm319_vm8, %v9515_v10  ;;  %15938 = vpow2.f32 %v12793_v50 }
 0xacb   :  { %14753 = vmatprep.mubr.msk.f32.mxu1 %vm16138_vm0, %v16139_v1  ;;  %15940 = vpow2.f32 %v12795_v58 }
 0xacc   :  { %15942 = vpow2.f32 %v12797_v63 }
 0xacd   :  { %15944 = vpow2.f32 %v12799_v2 }
 0xace   :  { %14754 = vmatmul.mubr.msk.f32.gmra.mrb[90].mxu1 %vm319_vm8, %v9530_v53 }
 0xacf   :  { %14799 = vmatprep.mubr.msk.f32.mxu1 %vm16138_vm0, %v16139_v1 }
 0xad0   :  { %v15931_v16 = vpop.eup %15930 }
 0xad1   :  { %v10274_v32 = vmul.f32 %v15931_v16, %v10050_v15  ;;  %v15933_v56 = vpop.eup %15932 }
 0xad2   :  { %14800 = vmatmul.mubr.msk.f32.vlgmr.msra.gmra.mrb[92].mxu1 %vm319_vm8, %v17606_v26  ;;  %v10180_v46 = vadd.f32 1.0, %v15933_v56  ;;  %v15935_v41 = vpop.eup %15934 }
 0xad3   :  { %14802 = vmatprep.mubr.msk.f32.mxu1 %vm16138_vm0, %v16139_v1  ;;  %v10338_v13 = vcombine.high %v10274_v32, %v10274_v32  ;;  %v10345_v19 = vrot.slane %v10274_v32, %v16813_v62  ;;  %v15937_v0 = vpop.eup %15936  ;;  %v10182_v14 = vadd.f32 1.0, %v15935_v41  ;;  %v9668_v32 = vcombine.high %v17637_v4, %v17637_v4 }
 0xad4   :  { %15946 = vrcp.f32 %v10180_v46  ;;  %v10184_v60 = vadd.f32 1.0, %v15937_v0 }
 0xad5   :  { %v10352_v22 = vrot.slane %v10338_v13, %v16813_v62  ;;  %v10353_v27 = vcombine.high %v10345_v19, %v10345_v19  ;;  %v10361_v26 = vrot.slane %v10345_v19, %v16813_v62  ;;  %15948 = vrcp.f32 %v10182_v14 }
 0xad6   :  { %14803 = vmatmul.mubr.msk.f32.gmra.mrb[94].mxu1 %vm319_vm8, %v9515_v10  ;;  %v15939_v10 = vpop.eup %15938  ;;  %15950 = vrcp.f32 %v10184_v60 }
 0xad7   :  { %14805 = vmatprep.mubr.msk.f32.mxu1 %vm16138_vm0, %v16139_v1  ;;  %v10354_v29 = vcombine.high %v10352_v22, %v10352_v22  ;;  %v10375_v30 = vrot.slane %v10353_v27, %v16813_v62  ;;  %v10368_v37 = vrot.slane %v10352_v22, %v16813_v62  ;;  %v10186_v12 = vadd.f32 1.0, %v15939_v10 }
 0xad8   :  { %v9675_v22 = vrot.slane %v17637_v4, %v16813_v62 }
 0xad9   :  { %v10382_v24 = vrot.slane %v10354_v29, %v16813_v62  ;;  %v11357_v21 = vcombine.low %v10361_v26, %v10375_v30  ;;  %v12818_v8 = vcombine.high %v10361_v26, %v10375_v30  ;;  %15952 = vrcp.f32 %v10186_v12 }
 0xada   :  { %14806 = vmatmul.mubr.msk.f32.gmra.mrb[96].mxu1 %vm319_vm8, %v9530_v53  ;;  %v15941_v53 = vpop.eup %15940  ;;  %v9682_v30 = vrot.slane %v9668_v32, %v16813_v62 }
 0xadb   :  { %v11359_v20 = vcombine.low %v10368_v37, %v10382_v24  ;;  %v12819_v15 = vcombine.high %v10368_v37, %v10382_v24  ;;  %v11367_v1 = vrot.slane %v11357_v21, %v16813_v62  ;;  %v11374_v23 = vrot.slane %v12818_v8, %v16813_v62  ;;  %v15943_v16 = vpop.eup %15942 }
 0xadc   :  { %v15945_v13 = vpop.eup %15944  ;;  %v10188_v27 = vadd.f32 1.0, %v15941_v53  ;;  %v10190_v29 = vadd.f32 1.0, %v15943_v16  ;;  %v9683_v21 = vcombine.high %v9675_v22, %v9675_v22 }
 0xadd   :  { %v11381_v54 = vrot.slane %v11359_v20, %v16813_v62  ;;  %v11388_v59 = vrot.slane %v12819_v15, %v16813_v62  ;;  %v11389_v31 = vcombine.low %v11367_v1, %v11374_v23  ;;  %v10192_v26 = vadd.f32 1.0, %v15945_v13 }
 0xade   :  { %v15947_v19 = vpop.eup %15946  ;;  %15954 = vrcp.f32 %v10188_v27  ;;  %v9684_v20 = vcombine.high %v9682_v30, %v9682_v30  ;;  %v9691_v15 = vrot.slane %v9675_v22, %v16813_v62 }
 0xadf   :  { %v11390_v33 = vcombine.low %v11381_v54, %v11388_v59  ;;  %v11397_v34 = vrot.slane %v11389_v31, %v16813_v62  ;;  %v10276_v37 = vmul.f32 %v15947_v19, %v17693_v38  ;;  %v15949_v24 = vpop.eup %15948  ;;  %15956 = vrcp.f32 %v10190_v29 }
 0xae0   :  { %v15951_v8 = vpop.eup %15950  ;;  %15958 = vrcp.f32 %v10192_v26  ;;  %v10278_v1 = vmul.f32 %v15949_v24, %v17696_v57  ;;  %v9705_v54 = vrot.slane %v9683_v21, %v16813_v62  ;;  %v9698_v38 = vrot.slane %v9682_v30, %v16813_v62 }
 0xae1   :  { %v11404_v51 = vrot.slane %v11390_v33, %v16813_v62  ;;  %v10401_v23 = vcombine.high %v10276_v37, %v10276_v37  ;;  %v10408_v4 = vrot.slane %v10276_v37, %v16813_v62  ;;  %v10280_v59 = vmul.f32 %v15951_v8, %v17699_v39 }
 0xae2   :  { %v9712_v33 = vrot.slane %v9684_v20, %v16813_v62  ;;  %v10464_v44 = vcombine.high %v10278_v1, %v10278_v1  ;;  %v9715_v35 = vcombine.high %v9705_v54, %v9705_v54  ;;  %v17791_v3 = vrot.slane %v9691_v15, %v16830_v18 }
 0xae3   :  { %v11405_v55 = vcombine.low %v11397_v34, %v11404_v51  ;;  %v15953_v31 = vpop.eup %15952  ;;  %v9713_v34 = vcombine.high %v9691_v15, %v9691_v15  ;;  %v10415_v51 = vrot.slane %v10401_v23, %v16813_v62  ;;  %v10534_v42 = vrot.slane %v10280_v59, %v16813_v62 }
 0xae4   :  { %v10282_v57 = vmul.f32 %v15953_v31, %v17702_v52  ;;  %v9714_v39 = vcombine.high %v9698_v38, %v9698_v38  ;;  %v9716_v45 = vcombine.high %v9712_v33, %v9712_v33  ;;  %v17794_v49 = vrot.slane %v9705_v54, %v16830_v18 }
 0xae5   :  { %14764 = vmatprep.mubr.msk.f32.mxu0 %vm319_vm8, %v11405_v55  ;;  %v10416_v55 = vcombine.high %v10408_v4, %v10408_v4  ;;  %v17797_v40 = vrot.slane %v9713_v34, %v16830_v18  ;;  %v10417_v50 = vcombine.high %v10415_v51, %v10415_v51  ;;  %v10431_v56 = vrot.slane %v10415_v51, %v16813_v62 }
 0xae6   :  { %v10478_v58 = vrot.slane %v10464_v44, %v16813_v62  ;;  %v17803_v63 = vrot.slane %v9715_v35, %v16830_v18  ;;  %v17806_v2 = vrot.slane %v9698_v38, %v16830_v18  ;;  %v10542_v46 = vcombine.high %v10534_v42, %v10534_v42 }
 0xae7   :  { %v10438_v52 = vrot.slane %v10416_v55, %v16813_v62  ;;  %v10590_v41 = vcombine.high %v10282_v57, %v10282_v57  ;;  %v17810_v60 = vrot.slane %v10408_v4, %v16813_v62  ;;  %v10471_v10 = vrot.slane %v10278_v1, %v16813_v62 }
 0xae8   :  { %v15955_v47 = vpop.eup %15954  ;;  %v10597_v12 = vrot.slane %v10282_v57, %v16813_v62  ;;  %v17815_v53 = vrot.slane %v9712_v33, %v16830_v18  ;;  %v17818_v16 = vrot.slane %v9714_v39, %v16830_v18  ;;  %v10527_v13 = vcombine.high %v10280_v59, %v10280_v59 }
 0xae9   :  { %v15957_v36 = vpop.eup %15956  ;;  %v10284_v14 = vmul.f32 %v15955_v47, %v17705_v11  ;;  %v17822_v19 = vrot.slane %v10417_v50, %v16813_v62  ;;  %v10447_v11 = vcombine.high %v10431_v56, %v10431_v56  ;;  %v10448_v22 = vcombine.high %v10438_v52, %v10438_v52 }
 0xaea   :  { %v15959_v0 = vpop.eup %15958  ;;  %v10286_v32 = vmul.f32 %v15957_v36, %v17708_v25  ;;  %v10480_v27 = vcombine.high %v10478_v58, %v10478_v58  ;;  %v17825_v29 = vrot.slane %v9716_v45, %v16830_v18  ;;  %v10604_v26 = vrot.slane %v10590_v41, %v16813_v62 }
 0xaeb   :  { %v17828_v30 = vmul.f32 %v15959_v0, %v17711_v43  ;;  %v10564_v37 = vrot.slane %v10542_v46, %v16813_v62  ;;  %v10446_v25 = vcombine.high %v17810_v60, %v17810_v60  ;;  %v10479_v24 = vcombine.high %v10471_v10, %v10471_v10 }
 0xaec   :  { %v10605_v21 = vcombine.high %v10597_v12, %v10597_v12  ;;  %v10653_v8 = vcombine.high %v10284_v14, %v10284_v14  ;;  %v10541_v20 = vrot.slane %v10527_v13, %v16813_v62  ;;  %v10660_v15 = vrot.slane %v10284_v14, %v16813_v62 }
 0xaed   :  { %v10716_v1 = vcombine.high %v10286_v32, %v10286_v32  ;;  %v17837_v18 = vrot.slane %v10534_v42, %v16813_v62  ;;  %v10487_v43 = vrot.slane %v10471_v10, %v16813_v62  ;;  %v11408_v23 = vcombine.low %v10448_v22, %v10431_v56 }
 0xaee   :  { %v11409_v4 = vcombine.low %v17822_v19, %v10447_v11  ;;  %v17842_v54 = vrot.slane %v10480_v27, %v16813_v62  ;;  %v10606_v59 = vcombine.high %v10604_v26, %v10604_v26  ;;  %v10613_v31 = vrot.slane %v10597_v12, %v16813_v62 }
 0xaef   :  { %v17846_v38 = vrot.slane %v10286_v32, %v16813_v62  ;;  %v10574_v33 = vcombine.high %v10564_v37, %v10564_v37  ;;  %v10667_v34 = vrot.slane %v10653_v8, %v16813_v62  ;;  %v10494_v51 = vrot.slane %v10478_v58, %v16813_v62 }
 0xaf0   :  { %v10501_v55 = vrot.slane %v10479_v24, %v16813_v62  ;;  %v10627_v44 = vrot.slane %v10605_v21, %v16813_v62  ;;  %v10668_v35 = vcombine.high %v10660_v15, %v10660_v15  ;;  %v17853_v57 = vrot.slane %v10716_v1, %v16813_v62 }
 0xaf1   :  { %v10557_v42 = vrot.slane %v10541_v20, %v16813_v62  ;;  %v10572_v47 = vcombine.high %v17837_v18, %v17837_v18  ;;  %v11430_v39 = vrot.slane %v11408_v23, %v16813_v62  ;;  %v11437_v45 = vrot.slane %v11409_v4, %v16813_v62 }
 0xaf2   :  { %v11458_v36 = vcombine.low %v10494_v51, %v17842_v54  ;;  %v10543_v50 = vcombine.high %v10541_v20, %v10541_v20  ;;  %v10731_v56 = vcombine.high %v17846_v38, %v17846_v38  ;;  %v10779_v58 = vcombine.high %v17828_v30, %v17828_v30 }
 0xaf3   :  { %v11507_v46 = vcombine.low %v10574_v33, %v10557_v42  ;;  %v10634_v41 = vrot.slane %v10606_v59, %v16813_v62  ;;  %v12820_v0 = vcombine.high %v10487_v43, %v10501_v55  ;;  %v11555_v14 = vcombine.low %v10613_v31, %v10627_v44 }
 0xaf4   :  { %v12822_v10 = vcombine.high %v10613_v31, %v10627_v44  ;;  %v17867_v12 = vrot.slane %v10660_v15, %v16813_v62  ;;  %v17871_v32 = vrot.slane %v17828_v30, %v16813_v62  ;;  %v17873_v13 = vcombine.low %v10438_v52, %v10446_v25 }
 0xaf5   :  { %v11506_v11 = vcombine.low %v10564_v37, %v10572_v47  ;;  %v10620_v22 = vrot.slane %v10604_v26, %v16813_v62  ;;  %v17876_v27 = vcombine.low %v11430_v39, %v11437_v45  ;;  %v11486_v24 = vrot.slane %v11458_v36, %v16813_v62 }
 0xaf6   :  { %v17880_v21 = vrot.slane %v10543_v50, %v16813_v62  ;;  %v10573_v8 = vcombine.high %v10557_v42, %v10557_v42  ;;  %v11535_v20 = vrot.slane %v11507_v46, %v16813_v62  ;;  %v10690_v15 = vrot.slane %v10668_v35, %v16813_v62 }
 0xaf7   :  { %v11602_v1 = vcombine.low %v10620_v22, %v10634_v41  ;;  %v12823_v23 = vcombine.high %v10620_v22, %v10634_v41  ;;  %v11479_v52 = vrot.slane %v12820_v0, %v16813_v62  ;;  %v11577_v37 = vrot.slane %v11555_v14, %v16813_v62 }
 0xaf8   :  { %v11584_v26 = vrot.slane %v12822_v10, %v16813_v62  ;;  %v10698_v25 = vcombine.high %v17867_v12, %v17867_v12  ;;  %v11456_v4 = vcombine.low %v10487_v43, %v10501_v55  ;;  %v11528_v59 = vrot.slane %v11506_v11, %v16813_v62 }
 0xaf9   :  { %v10669_v31 = vcombine.high %v10667_v34, %v10667_v34  ;;  %v10683_v33 = vrot.slane %v10667_v34, %v16813_v62  ;;  %v11488_v35 = vcombine.low %v11479_v52, %v11486_v24  ;;  %v12821_v42 = vcombine.high %v10494_v51, %v17842_v54 }
 0xafa   :  { %v17895_v47 = vcombine.low %v17880_v21, %v10573_v8  ;;  %v17897_v39 = vcombine.low %v11528_v59, %v11535_v20  ;;  %v11612_v45 = vrot.slane %v11602_v1, %v16813_v62  ;;  %v11619_v43 = vrot.slane %v12823_v23, %v16813_v62 }
 0xafb   :  { %v10700_v55 = vcombine.high %v10690_v15, %v10690_v15  ;;  %v11586_v50 = vcombine.low %v11577_v37, %v11584_v26  ;;  %v17905_v46 = vcombine.low %v10690_v15, %v10698_v25  ;;  %v17908_v54 = vrot.slane %v11456_v4, %v16813_v62 }
 0xafc   :  { %v17911_v51 = vrot.slane %v10669_v31, %v16813_v62  ;;  %v10699_v41 = vcombine.high %v10683_v33, %v10683_v33  ;;  %v17914_v0 = vrot.slane %v10731_v56, %v16813_v62  ;;  %v17917_v14 = vrot.slane %v11488_v35, %v16813_v62 }
 0xafd   :  { %v17920_v10 = vrot.slane %v12821_v42, %v16813_v62  ;;  %v11634_v20 = vcombine.low %v11612_v45, %v11619_v43  ;;  %v17930_v56 = vrot.slane %v17846_v38, %v16813_v62  ;;  %v17932_v15 = vcombine.low %v10700_v55, %v10683_v33 }
 0xafe   :  { %v17936_v37 = vrot.slane %v11586_v50, %v16813_v62  ;;  %v17943_v4 = vcombine.low %v17911_v51, %v10699_v41  ;;  %v10732_v59 = vcombine.high %v17853_v57, %v17853_v57  ;;  %v17953_v42 = vrot.slane %v17853_v57, %v16813_v62 }
 0xaff   :  { %v17956_v43 = vrot.slane %v11634_v20, %v16813_v62  ;;  %v17962_v50 = vrot.slane %v17871_v32, %v16813_v62  ;;  %v10794_v41 = vcombine.high %v17871_v32, %v17871_v32  ;;  %v17977_v36 = vrot.slane %v10779_v58, %v16813_v62 }
 0xb00   :  { %v17971_v26 = vrot.slane %v10732_v59, %v16813_v62 }
 0xb01   :  { %v17986_v44 = vrot.slane %v10794_v41, %v16813_v62 }
 0xb9d   :  { %v9608_v24 = vpop.f32.mrb[88].mxu1 }
 0xb9e   :  { %v9769_v1 = vcombine.high %v9608_v24, %v9608_v24  ;;  %v9776_v23 = vrot.slane %v9608_v24, %v16813_v62  ;;  %v14752_v52 = vpop.f32.mrb[89].mxu1 }
 0xba0   :  { %v9783_v31 = vrot.slane %v9769_v1, %v16813_v62  ;;  %v9784_v33 = vcombine.high %v9776_v23, %v9776_v23  ;;  %v9792_v35 = vrot.slane %v9776_v23, %v16813_v62 }
 0xba1   :  { %v9613_v45 = vpop.f32.mrb[90].mxu1 }
 0xba2   :  { %v9785_v24 = vcombine.high %v9783_v31, %v9783_v31  ;;  %v9799_v1 = vrot.slane %v9783_v31, %v16813_v62  ;;  %v9806_v57 = vrot.slane %v9784_v33, %v16813_v62  ;;  %v9814_v23 = vcombine.high %v9792_v35, %v9792_v35  ;;  %v14755_v52 = vpop.f32.mrb[91].mxu1 }
 0xba3   :  { %v9975_v20 = vrot.slane %v9792_v35, %v16813_v62  ;;  %v9824_v8 = vrot.slane %v9613_v45, %v16813_v62  ;;  %v12852_v35 = vld [vmem:[%s18491_s11] ss:$0 sm:$0xff] }
 0xba4   :  { %v9813_v32 = vrot.slane %v9785_v24, %v16813_v62  ;;  %v9815_v31 = vcombine.high %v9799_v1, %v9799_v1  ;;  %v9816_v22 = vcombine.high %v9806_v57, %v9806_v57  ;;  %v9983_v33 = vcombine.low %v9806_v57, %v9814_v23 }
 0xba5   :  { %v9982_v45 = vrot.slane %v9975_v20, %v16813_v62  ;;  %v9825_v52 = vcombine.high %v9824_v8, %v9824_v8  ;;  %v9832_v59 = vrot.slane %v9824_v8, %v16813_v62  ;;  %v12525_v25 = vpop.f32.mrb[92].mxu1 }
 0xba6   :  { %v9984_v30 = vcombine.low %v9816_v22, %v9799_v1  ;;  %v9985_v58 = vcombine.low %v9813_v32, %v9815_v31  ;;  %v9993_v24 = vrot.slane %v9983_v33, %v16813_v62  ;;  %v9817_v11 = vcombine.high %v9813_v32, %v9813_v32  ;;  %v14801_v34 = vpop.f32.mrb[93].mxu1 }
 0xba7   :  { %v9839_v57 = vrot.slane %v9825_v52, %v16813_v62  ;;  %v12526_v23 = vadd.f32 %v12852_v35, %v12525_v25  ;;  %v17991_v38 = vadd.f32 %v9982_v45, %v17662_v9  ;;  %v17994_v20 = vadd.f32 %v9982_v45, %v17665_v7 }
 0xba8   :  { %v10000_v8 = vrot.slane %v9984_v30, %v16813_v62  ;;  %v9986_v55 = vcombine.low %v9817_v11, %v9832_v59  ;;  %v10007_v41 = vrot.slane %v9985_v58, %v16813_v62  ;;  %v17999_v22 = vadd.f32 %v9982_v45, %v17672_v5 }
 0xba9   :  { %v10038_v1 = vrot.slane %v9839_v57, %v16813_v62  ;;  %12539 = vst [vmem:[%s18505_s0] sm:$0xff] %v12526_v23  ;;  %v12530_v34 = vpop.f32.mrb[94].mxu1  ;;  %v12786_v9 = vmul.f32 -1.442695, %v17991_v38  ;;  %v12788_v7 = vmul.f32 -1.442695, %v17994_v20  ;;  %v18008_v25 = vadd.f32 %v9982_v45, %v17675_v6 }
 0xbaa   :  { %v10015_v11 = vcombine.low %v9993_v24, %v10000_v8  ;;  %v10014_v32 = vrot.slane %v9986_v55, %v16813_v62  ;;  %v12531_v31 = vadd.f32 %v12852_v35, %v12530_v34  ;;  %v14804_v5 = vpop.f32.mrb[95].mxu1  ;;  %v12790_v33 = vmul.f32 -1.442695, %v17999_v22 }
 0xbab   :  { %v18013_v52 = vrot.slane %v10038_v1, %v16813_v62  ;;  %15960 = vpow2.f32 %v12786_v9  ;;  %v12792_v59 = vmul.f32 -1.442695, %v18008_v25  ;;  %v18017_v30 = vadd.f32 %v9982_v45, %v17678_v61 }
 0xbac   :  { %v10023_v58 = vrot.slane %v10015_v11, %v16813_v62  ;;  %v10016_v6 = vcombine.low %v10007_v41, %v10014_v32  ;;  %12540 = vst [vmem:[%s18505_s0 + $0x8] sm:$0xff] %v12531_v31  ;;  %15962 = vpow2.f32 %v12788_v7  ;;  %v18024_v55 = vadd.f32 %v9982_v45, %v17681_v28 }
 0xbad   :  { %v12535_v24 = vpop.f32.mrb[96].mxu1  ;;  %15964 = vpow2.f32 %v12790_v33  ;;  %v12794_v57 = vmul.f32 -1.442695, %v18017_v30  ;;  %v18028_v23 = vadd.f32 %v9982_v45, %v17684_v48  ;;  %v18031_v61 = vadd.f32 %v9982_v45, %v17687_v17 }
 0xbae   :  { %v10030_v8 = vrot.slane %v10016_v6, %v16813_v62  ;;  %v12536_v41 = vadd.f32 %v12852_v35, %v12535_v24  ;;  %v14807_v1 = vpop.f32.mrb[97].mxu1  ;;  %15966 = vpow2.f32 %v12792_v59  ;;  %v12796_v34 = vmul.f32 -1.442695, %v18024_v55 }
 0xbaf   :  { %15968 = vpow2.f32 %v12794_v57  ;;  %v12798_v28 = vmul.f32 -1.442695, %v18028_v23  ;;  %v12800_v9 = vmul.f32 -1.442695, %v18031_v61  ;;  %v18039_v7 = vadd.f32 %v18013_v52, %v17791_v3 }
 0xbb0   :  { %v10031_v48 = vcombine.low %v10023_v58, %v10030_v8  ;;  %12541 = vst [vmem:[%s18505_s0 + $0x10] sm:$0x3] %v12536_v41  ;;  %15970 = vpow2.f32 %v12796_v34  ;;  %v18046_v17 = vadd.f32 %v18013_v52, %v17794_v49  ;;  %v18050_v35 = vadd.f32 %v18013_v52, %v17797_v40 }
 0xbb1   :  { %15972 = vpow2.f32 %v12798_v28  ;;  %v12802_v45 = vmul.f32 -1.442695, %v18039_v7  ;;  %v18055_v11 = vadd.f32 %v18013_v52, %v17803_v63  ;;  %v18059_v32 = vadd.f32 %v18013_v52, %v17806_v2 }
 0xbb2   :  { %18506 = vst [vmem:[#allocation11_spill] sm:$0xff] %v18046_v17  ;;  %15974 = vpow2.f32 %v12800_v9  ;;  %v18062_v31 = vadd.f32 %v10031_v48, %v17791_v3  ;;  %v18065_v5 = vadd.f32 %v10031_v48, %v17794_v49  ;;  %v18068_v33 = vadd.f32 %v10031_v48, %v17797_v40 }
 0xbb3   :  { %18507 = vst [vmem:[#allocation12_spill] sm:$0xff] %v18059_v32  ;;  %v12824_v59 = vcombine.high %v17930_v56, %v17914_v0  ;;  %15976 = vpow2.f32 %v12802_v45  ;;  %v12804_v58 = vmul.f32 -1.442695, %v18046_v17  ;;  %v18074_v6 = vadd.f32 %v10031_v48, %v17803_v63 }
 0xbb4   :  { %v11668_v24 = vrot.slane %v17943_v4, %v16813_v62  ;;  %v12801_v3 = vmul.f32 -1.442695, %v18062_v31  ;;  %v12803_v49 = vmul.f32 -1.442695, %v18065_v5  ;;  %v18081_v57 = vadd.f32 %v10031_v48, %v17806_v2 }
 0xbb5   :  { %v15961_v40 = vpop.eup %15960  ;;  %v11701_v8 = vcombine.low %v17953_v42, %v17971_v26  ;;  %v10824_v41 = vcombine.high %v17962_v50, %v17962_v50  ;;  %15978 = vpow2.f32 %v12804_v58  ;;  %v18088_v63 = vadd.f32 %v10031_v48, %v17815_v53 }
 0xbb6   :  { %v15963_v1 = vpop.eup %15962  ;;  %v10179_v4 = vadd.f32 1.0, %v15961_v40  ;;  %v10795_v34 = vcombine.high %v17977_v36, %v17977_v36  ;;  %v10826_v2 = vcombine.high %v17986_v44, %v17986_v44  ;;  %15980 = vpow2.f32 %v12801_v3 }
 0xbb7   :  { %18508 = vst [vmem:[#allocation13_spill] sm:$0xff] %v18088_v63  ;;  %v15965_v28 = vpop.eup %15964  ;;  %v10181_v9 = vadd.f32 1.0, %v15963_v1  ;;  %v10809_v45 = vrot.slane %v17977_v36, %v16813_v62  ;;  %15982 = vpow2.f32 %v12803_v49  ;;  %v18098_v58 = vadd.f32 %v18013_v52, %v17815_v53 }
 0xbb8   :  { %v15967_v63 = vpop.eup %15966  ;;  %15984 = vrcp.f32 %v10179_v4  ;;  %v10183_v40 = vadd.f32 1.0, %v15965_v28  ;;  %v18101_v32 = vadd.f32 %v10031_v48, %v17818_v16  ;;  %v18105_v17 = vadd.f32 %v18013_v52, %v17818_v16 }
 0xbb9   :  { %18509 = vst [vmem:[#allocation14_spill] sm:$0xff] %v18098_v58  ;;  %v15969_v3 = vpop.eup %15968  ;;  %15986 = vrcp.f32 %v10181_v9  ;;  %v10185_v1 = vadd.f32 1.0, %v15967_v63  ;;  %v12825_v36 = vcombine.high %v17953_v42, %v17971_v26  ;;  %v18110_v49 = vadd.f32 %v10031_v48, %v17825_v29 }
 0xbba   :  { %18510 = vst [vmem:[#allocation15_spill] sm:$0xff] %v18101_v32  ;;  %18511 = vst [vmem:[#allocation16_spill] sm:$0xff] %v18105_v17  ;;  %v15971_v53 = vpop.eup %15970  ;;  %15988 = vrcp.f32 %v10183_v40  ;;  %v10187_v4 = vadd.f32 1.0, %v15969_v3  ;;  %v18512_v28 = vrot.slane %v17932_v15, %v16813_v62  ;;  %v11750_v58 = vcombine.low %v10826_v2, %v10809_v45 }
 0xbbb   :  { %v15973_v16 = vpop.eup %15972  ;;  %15990 = vrcp.f32 %v10185_v1  ;;  %v10189_v17 = vadd.f32 1.0, %v15971_v53  ;;  %v11717_v63 = vrot.slane %v11701_v8, %v16813_v62  ;;  %v18120_v26 = vadd.f32 %v18013_v52, %v17825_v29 }
 0xbbc   :  { %v18115_v32 = vcombine.low %v18512_v28, %v11668_v24  ;;  %v15975_v42 = vpop.eup %15974  ;;  %15992 = vrcp.f32 %v10187_v4  ;;  %v10191_v48 = vadd.f32 1.0, %v15973_v16  ;;  %v18123_v9 = vrot.slane %v10795_v34, %v16813_v62 }
 0xbbd   :  { %v11749_v15 = vcombine.low %v17986_v44, %v10824_v41  ;;  %v15977_v24 = vpop.eup %15976  ;;  %15994 = vrcp.f32 %v10189_v17  ;;  %v10193_v2 = vadd.f32 1.0, %v15975_v42  ;;  %v10825_v40 = vcombine.high %v10809_v45, %v10809_v45 }
 0xbbe   :  { %v12805_v3 = vmul.f32 -1.442695, %v18068_v33  ;;  %15996 = vrcp.f32 %v10191_v48  ;;  %v11710_v8 = vrot.slane %v12824_v59, %v16813_v62  ;;  %v11766_v29 = vrot.slane %v11750_v58, %v16813_v62 }
 0xbbf   :  { %v10195_v52 = vadd.f32 1.0, %v15977_v24  ;;  %v15979_v1 = vpop.eup %15978  ;;  %v18513_v34 = vcombine.low %v17930_v56, %v17914_v0  ;;  %v11691_v44 = vrot.slane %v18115_v32, %v16813_v62  ;;  %v18138_v17 = vrot.slane %v12825_v36, %v16813_v62 }
 0xbc0   :  { %15998 = vrcp.f32 %v10193_v2  ;;  %v15981_v41 = vpop.eup %15980  ;;  %v11732_v45 = vcombine.low %v11710_v8, %v11717_v63  ;;  %v11759_v59 = vrot.slane %v11749_v15, %v16813_v62  ;;  %v10197_v58 = vadd.f32 1.0, %v15979_v1 }
 0xbc1   :  { %v18133_v53 = vrot.slane %v18513_v34, %v16813_v62  ;;  %16000 = vrcp.f32 %v10195_v52  ;;  %v15983_v4 = vpop.eup %15982  ;;  %v18142_v28 = vcombine.low %v18123_v9, %v10825_v40  ;;  %v10194_v0 = vadd.f32 1.0, %v15981_v41 }
 0xbc2   :  { %16002 = vpow2.f32 %v12805_v3  ;;  %v12806_v56 = vmul.f32 -1.442695, %v18050_v35  ;;  %v15985_v16 = vpop.eup %15984  ;;  %v18145_v42 = vcombine.low %v11759_v59, %v11766_v29  ;;  %v10196_v36 = vadd.f32 1.0, %v15983_v4 }
 0xbc3   :  { %16004 = vrcp.f32 %v10197_v58  ;;  %v12807_v48 = vmul.f32 -1.442695, %v18074_v6  ;;  %v15987_v63 = vpop.eup %15986  ;;  %v10275_v15 = vmul.f32 %v15985_v16, %v17991_v38  ;;  %v10827_v24 = vcombine.high %v18123_v9, %v18123_v9 }
 0xbc4   :  { %16006 = vrcp.f32 %v10194_v0  ;;  %v12808_v2 = vmul.f32 -1.442695, %v18055_v11  ;;  %v15989_v40 = vpop.eup %15988  ;;  %v10277_v3 = vmul.f32 %v15987_v63, %v17994_v20  ;;  %v18154_v8 = vrot.slane %v11732_v45, %v16813_v62 }
 0xbc5   :  { %16008 = vrcp.f32 %v10196_v36  ;;  %v12809_v29 = vmul.f32 -1.442695, %v18081_v57  ;;  %v15991_v52 = vpop.eup %15990  ;;  %v10393_v1 = vrot.slane %v10275_v15, %v16813_v62  ;;  %v10279_v38 = vmul.f32 %v15989_v40, %v17999_v22 }
 0xbc6   :  { %v11773_v34 = vrot.slane %v18142_v28, %v16813_v62  ;;  %16010 = vpow2.f32 %v12806_v56  ;;  %v15993_v41 = vpop.eup %15992  ;;  %v10456_v59 = vrot.slane %v10277_v3, %v16813_v62  ;;  %v10281_v20 = vmul.f32 %v15991_v52, %v18008_v25 }
 0xbc7   :  { %v11789_v45 = vrot.slane %v18145_v42, %v16813_v62  ;;  %16012 = vpow2.f32 %v12807_v48  ;;  %v15995_v58 = vpop.eup %15994  ;;  %v10400_v4 = vrot.slane %v10393_v1, %v16813_v62  ;;  %v10519_v0 = vrot.slane %v10279_v38, %v16813_v62 }
 0xbc8   :  { %v10283_v22 = vmul.f32 %v15993_v41, %v18017_v30  ;;  %16014 = vpow2.f32 %v12808_v2  ;;  %v15997_v16 = vpop.eup %15996  ;;  %v10463_v56 = vrot.slane %v10456_v59, %v16813_v62  ;;  %v10582_v36 = vrot.slane %v10281_v20, %v16813_v62 }
 0xbc9   :  { %v10285_v63 = vmul.f32 %v15995_v58, %v18024_v55  ;;  %16016 = vpow2.f32 %v12809_v29  ;;  %v11406_v15 = vcombine.low %v10400_v4, %v17810_v60  ;;  %v10526_v48 = vrot.slane %v10519_v0, %v16813_v62 }
 0xbca   :  { %v15999_v25 = vpop.eup %15998  ;;  %v10645_v40 = vrot.slane %v10283_v22, %v16813_v62  ;;  %v10287_v3 = vmul.f32 %v15997_v16, %v18028_v23  ;;  %v18514_v30 = vcombine.high %v17822_v19, %v17822_v19  ;;  %v10589_v1 = vrot.slane %v10582_v36, %v16813_v62 }
 0xbcb   :  { %v16001_v52 = vpop.eup %16000  ;;  %v10708_v38 = vrot.slane %v10285_v63, %v16813_v62  ;;  %v10289_v55 = vmul.f32 %v15999_v25, %v18031_v61  ;;  %v11416_v60 = vrot.slane %v11406_v15, %v16813_v62  ;;  %v11505_v41 = vcombine.low %v10526_v48, %v17837_v18 }
 0xbcc   :  { %v11455_v2 = vcombine.low %v18514_v30, %v10463_v56  ;;  %v18181_v29 = vpop.eup %16002  ;;  %v10652_v59 = vrot.slane %v10645_v40, %v16813_v62  ;;  %v10771_v23 = vrot.slane %v10287_v3, %v16813_v62  ;;  %v18515_v58 = vcombine.high %v17880_v21, %v17880_v21 }
 0xbcd   :  { %v18187_v20 = vpop.eup %16004  ;;  %v10715_v61 = vrot.slane %v10708_v38, %v16813_v62  ;;  %v10834_v0 = vrot.slane %v10289_v55, %v16813_v62  ;;  %v18516_v18 = vrot.slane %v17873_v13, %v16813_v62  ;;  %v11521_v56 = vrot.slane %v11505_v41, %v16813_v62 }
 0xbce   :  { %v11465_v19 = vrot.slane %v11455_v2, %v16813_v62  ;;  %v11554_v4 = vcombine.low %v18515_v58, %v10589_v1  ;;  %v16007_v22 = vpop.eup %16006  ;;  %v11604_v36 = vcombine.low %v10652_v59, %v17867_v12  ;;  %v10778_v63 = vrot.slane %v10771_v23, %v16813_v62 }
 0xbcf   :  { %v11438_v16 = vcombine.low %v11416_v60, %v18516_v18  ;;  %v16009_v25 = vpop.eup %16008  ;;  %v18517_v48 = vcombine.high %v17911_v51, %v17911_v51  ;;  %v10841_v3 = vrot.slane %v10834_v0, %v16813_v62  ;;  %v11536_v2 = vcombine.low %v17920_v10, %v11521_v56 }
 0xbd0   :  { %v11487_v15 = vcombine.low %v11465_v19, %v17908_v54  ;;  %v11570_v21 = vrot.slane %v11554_v4, %v16813_v62  ;;  %v18207_v30 = vpop.eup %16010  ;;  %v11626_v12 = vrot.slane %v11604_v36, %v16813_v62  ;;  %v11703_v1 = vcombine.low %v10778_v63, %v17962_v50 }
 0xbd1   :  { %v11653_v40 = vcombine.low %v18517_v48, %v10715_v61  ;;  %v11446_v13 = vrot.slane %v11438_v16, %v16813_v62  ;;  %v18213_v38 = vpop.eup %16012  ;;  %v18518_v51 = vrot.slane %v17895_v47, %v16813_v62  ;;  %v11752_v41 = vcombine.low %v10827_v24, %v10841_v3 }
 0xbd2   :  { %v11495_v54 = vrot.slane %v11487_v15, %v16813_v62  ;;  %v18223_v59 = vpop.eup %16014  ;;  %v18519_v10 = vrot.slane %v17876_v27, %v16813_v62  ;;  %v11544_v23 = vrot.slane %v11536_v2, %v16813_v62  ;;  %v18520_v19 = vrot.slane %v17905_v46, %v16813_v62 }
 0xbd3   :  { %v11585_v55 = vcombine.low %v18518_v51, %v11570_v21  ;;  %v11675_v60 = vrot.slane %v11653_v40, %v16813_v62  ;;  %v11731_v47 = vrot.slane %v11703_v1, %v16813_v62  ;;  %v18233_v4 = vpop.eup %16016  ;;  %v11780_v0 = vrot.slane %v11752_v41, %v16813_v62  ;;  %v18522_v1 = vld [vmem:[#allocation11_spill] sm:$0xff] }
 0xbd4   :  { %v11454_v50 = vcombine.low %v11446_v13, %v18519_v10  ;;  %v11635_v58 = vcombine.low %v11626_v12, %v18520_v19  ;;  %v11503_v61 = vcombine.low %v11495_v54, %v17917_v14  ;;  %v18521_v27 = vrot.slane %v17897_v39, %v16813_v62 }
 0xbd5   :  { %v11593_v9 = vrot.slane %v11585_v55, %v16813_v62  ;;  %v11684_v24 = vcombine.low %v11675_v60, %v18133_v53  ;;  %v11733_v16 = vcombine.low %v18138_v17, %v11731_v47  ;;  %v10290_v56 = vmul.f32 %v16007_v22, %v18062_v31 }
 0xbd6   :  { %14765 = vmatmul.mubr.msk.f32.vlgmr.msra.gmra.mrb[78].mxu0 %vm319_vm8, %v11454_v50  ;;  %v11552_v18 = vcombine.low %v11544_v23, %v18521_v27  ;;  %v11649_v46 = vrot.slane %v11635_v58, %v16813_v62  ;;  %v11782_v36 = vcombine.low %v11773_v34, %v11780_v0  ;;  %v10291_v63 = vmul.f32 %v16001_v52, %v18039_v7 }
 0xbd7   :  { %14767 = vmatprep.mubr.msk.f32.mxu0 %vm319_vm8, %v11503_v61  ;;  %v11601_v14 = vcombine.low %v11593_v9, %v17936_v37  ;;  %v11698_v53 = vrot.slane %v11684_v24, %v16813_v62  ;;  %v11747_v15 = vrot.slane %v11733_v16, %v16813_v62  ;;  %v10842_v21 = vcombine.high %v10290_v56, %v10290_v56 }
 0xbd8   :  { %v11650_v39 = vcombine.low %v17956_v43, %v11649_v46  ;;  %v10849_v17 = vrot.slane %v10290_v56, %v16813_v62  ;;  %v11796_v37 = vrot.slane %v11782_v36, %v16813_v62  ;;  %v10292_v22 = vmul.f32 %v16009_v25, %v18065_v5 }
 0xbd9   :  { %v11699_v31 = vcombine.low %v11691_v44, %v11698_v53  ;;  %v10897_v28 = vrot.slane %v10291_v63, %v16813_v62  ;;  %v11748_v7 = vcombine.low %v18154_v8, %v11747_v15  ;;  %v10856_v43 = vrot.slane %v10842_v21, %v16813_v62 }
 0xbda   :  { %14768 = vmatmul.mubr.msk.f32.gmra.mrb[80].mxu0 %vm319_vm8, %v11552_v18  ;;  %v10857_v34 = vcombine.high %v10849_v17, %v10849_v17  ;;  %v10865_v52 = vrot.slane %v10849_v17, %v16813_v62  ;;  %v11797_v32 = vcombine.low %v11789_v45, %v11796_v37  ;;  %v10905_v5 = vcombine.high %v10292_v22, %v10292_v22 }
 0xbdb   :  { %14770 = vmatprep.mubr.msk.f32.mxu0 %vm319_vm8, %v11601_v14  ;;  %v10904_v44 = vrot.slane %v10897_v28, %v16813_v62  ;;  %v10912_v25 = vrot.slane %v10292_v22, %v16813_v62  ;;  %v10858_v48 = vcombine.high %v10856_v43, %v10856_v43  ;;  %v10872_v40 = vrot.slane %v10856_v43, %v16813_v62 }
 0xbdc   :  { %v10879_v8 = vrot.slane %v10857_v34, %v16813_v62  ;;  %v10198_v3 = vadd.f32 1.0, %v18181_v29  ;;  %v10919_v13 = vrot.slane %v10905_v5, %v16813_v62  ;;  %v10293_v42 = vmul.f32 %v18187_v20, %v18522_v1  ;;  %v18523_v34 = vld [vmem:[#allocation12_spill] sm:$0xff] }
 0xbdd   :  { %v10920_v2 = vcombine.high %v10912_v25, %v10912_v25  ;;  %v10928_v12 = vrot.slane %v10912_v25, %v16813_v62  ;;  %v10886_v45 = vrot.slane %v10858_v48, %v16813_v62  ;;  %v10199_v21 = vadd.f32 1.0, %v18207_v30 }
 0xbde   :  { %14771 = vmatmul.mubr.msk.f32.gmra.mrb[82].mxu0 %vm319_vm8, %v11650_v39  ;;  %v11798_v54 = vcombine.low %v10865_v52, %v10879_v8  ;;  %v12826_v51 = vcombine.high %v10865_v52, %v10879_v8  ;;  %16018 = vrcp.f32 %v10198_v3  ;;  %v10921_v55 = vcombine.high %v10919_v13, %v10919_v13 }
 0xbdf   :  { %14773 = vmatprep.mubr.msk.f32.mxu0 %vm319_vm8, %v11699_v31  ;;  %v10935_v29 = vrot.slane %v10919_v13, %v16813_v62  ;;  %v10942_v60 = vrot.slane %v10920_v2, %v16813_v62  ;;  %v10950_v41 = vcombine.high %v10928_v12, %v10928_v12  ;;  %v11800_v10 = vcombine.low %v10872_v40, %v10886_v45  ;;  %v18526_v2 = vld [vmem:[#allocation15_spill] sm:$0xff] }
 0xbe0   :  { %v12827_v50 = vcombine.high %v10872_v40, %v10886_v45  ;;  %v11808_v23 = vrot.slane %v11798_v54, %v16813_v62  ;;  %v11815_v20 = vrot.slane %v12826_v51, %v16813_v62  ;;  %v10949_v19 = vrot.slane %v10921_v55, %v16813_v62  ;;  %v18525_v40 = vld [vmem:[#allocation14_spill] sm:$0xff] }
 0xbe1   :  { %v10951_v58 = vcombine.high %v10935_v29, %v10935_v29  ;;  %v10952_v47 = vcombine.high %v10942_v60, %v10942_v60  ;;  %v11847_v61 = vcombine.low %v10904_v44, %v10928_v12  ;;  %v11822_v9 = vrot.slane %v11800_v10, %v16813_v62 }
 0xbe2   :  { %14774 = vmatmul.mubr.msk.f32.gmra.mrb[84].mxu0 %vm319_vm8, %v11748_v7  ;;  %v11829_v24 = vrot.slane %v12827_v50, %v16813_v62  ;;  %v11830_v0 = vcombine.low %v11808_v23, %v11815_v20  ;;  %v11848_v27 = vcombine.low %v10942_v60, %v10950_v41  ;;  %v10953_v56 = vcombine.high %v10949_v19, %v10949_v19 }
 0xbe3   :  { %14776 = vmatprep.mubr.msk.f32.mxu0 %vm319_vm8, %v11797_v32  ;;  %v11849_v18 = vcombine.low %v10952_v47, %v10935_v29  ;;  %v11850_v46 = vcombine.low %v10949_v19, %v10951_v58  ;;  %v11857_v16 = vrot.slane %v11847_v61, %v16813_v62  ;;  %v10960_v63 = vrot.slane %v10293_v42, %v16813_v62  ;;  %v18527_v42 = vld [vmem:[#allocation16_spill] sm:$0xff] }
 0xbe4   :  { %v11831_v14 = vcombine.low %v11822_v9, %v11829_v24  ;;  %v11838_v53 = vrot.slane %v11830_v0, %v16813_v62  ;;  %v11864_v36 = vrot.slane %v11848_v27, %v16813_v62  ;;  %v10200_v17 = vadd.f32 1.0, %v18213_v38 }
 0xbe5   :  { %v11871_v39 = vrot.slane %v11849_v18, %v16813_v62  ;;  %v11878_v15 = vrot.slane %v11850_v46, %v16813_v62  ;;  %v10967_v22 = vrot.slane %v10960_v63, %v16813_v62  ;;  %v10201_v28 = vadd.f32 1.0, %v18223_v59  ;;  %v18524_v59 = vld [vmem:[#allocation13_spill] sm:$0xff] }
 0xbe6   :  { %v11845_v31 = vrot.slane %v11831_v14, %v16813_v62  ;;  %v11879_v37 = vcombine.low %v11857_v16, %v11864_v36  ;;  %16020 = vrcp.f32 %v10199_v21  ;;  %v10202_v43 = vadd.f32 1.0, %v18233_v4 }
 0xbe7   :  { %v11880_v7 = vcombine.low %v11871_v39, %v11878_v15  ;;  %v12810_v52 = vmul.f32 -1.442695, %v18523_v34  ;;  %v11896_v5 = vcombine.low %v10953_v56, %v10967_v22  ;;  %16022 = vrcp.f32 %v10200_v17 }
 0xbe8   :  { %v16019_v32 = vpop.eup %16018  ;;  %v11846_v44 = vcombine.low %v11838_v53, %v11845_v31  ;;  %v11887_v30 = vrot.slane %v11879_v37, %v16813_v62  ;;  %16024 = vrcp.f32 %v10201_v28  ;;  %v12811_v48 = vmul.f32 -1.442695, %v18524_v59 }
 0xbe9   :  { %v11894_v38 = vrot.slane %v11880_v7, %v16813_v62  ;;  %v10294_v25 = vmul.f32 %v16019_v32, %v18068_v33  ;;  %16026 = vrcp.f32 %v10202_v43  ;;  %v12812_v4 = vmul.f32 -1.442695, %v18525_v40 }
 0xbea   :  { %14777 = vmatmul.mubr.msk.f32.gmra.mrb[86].mxu0 %vm319_vm8, %v11846_v44  ;;  %16028 = vpow2.f32 %v12810_v52  ;;  %v12813_v12 = vmul.f32 -1.442695, %v18526_v2  ;;  %v12814_v45 = vmul.f32 -1.442695, %v18527_v42  ;;  %v12815_v54 = vmul.f32 -1.442695, %v18110_v49 }
 0xbeb   :  { %v11895_v8 = vcombine.low %v11887_v30, %v11894_v38  ;;  %v10968_v3 = vcombine.high %v10294_v25, %v10294_v25  ;;  %v10975_v13 = vrot.slane %v10294_v25, %v16813_v62  ;;  %16030 = vpow2.f32 %v12811_v48 }
 0xbec   :  { %v12816_v51 = vmul.f32 -1.442695, %v18120_v26  ;;  %16032 = vpow2.f32 %v12812_v4  ;;  %v11906_v10 = vrot.slane %v11896_v5, %v16813_v62 }
 0xbed   :  { %14779 = vmatprep.mubr.msk.f32.mxu0 %vm319_vm8, %v11895_v8  ;;  %v10982_v1 = vrot.slane %v10968_v3, %v16813_v62  ;;  %v10983_v33 = vcombine.high %v10975_v13, %v10975_v13  ;;  %v10991_v29 = vrot.slane %v10975_v13, %v16813_v62  ;;  %16034 = vpow2.f32 %v12813_v12 }
 0xbee   :  { %16036 = vpow2.f32 %v12814_v45 }
 0xbef   :  { %v10984_v55 = vcombine.high %v10982_v1, %v10982_v1  ;;  %v11005_v60 = vrot.slane %v10983_v33, %v16813_v62  ;;  %v10998_v41 = vrot.slane %v10982_v1, %v16813_v62  ;;  %16038 = vpow2.f32 %v12815_v54 }
 0xbf0   :  { %v16021_v50 = vpop.eup %16020  ;;  %16040 = vpow2.f32 %v12816_v51 }
 0xbf1   :  { %v11012_v23 = vrot.slane %v10984_v55, %v16813_v62  ;;  %v11897_v20 = vcombine.low %v10991_v29, %v11005_v60  ;;  %v12828_v19 = vcombine.high %v10991_v29, %v11005_v60  ;;  %v16023_v58 = vpop.eup %16022  ;;  %v10295_v47 = vmul.f32 %v16021_v50, %v18050_v35 }
 0xbf2   :  { %v16025_v61 = vpop.eup %16024  ;;  %v10296_v0 = vmul.f32 %v16023_v58, %v18074_v6 }
 0xbf3   :  { %v11899_v9 = vcombine.low %v10998_v41, %v11012_v23  ;;  %v11913_v24 = vrot.slane %v11897_v20, %v16813_v62  ;;  %v16027_v27 = vpop.eup %16026  ;;  %v11920_v18 = vrot.slane %v12828_v19, %v16813_v62  ;;  %v11023_v46 = vrot.slane %v10295_v47, %v16813_v62 }
 0xbf4   :  { %v12829_v16 = vcombine.high %v10998_v41, %v11012_v23  ;;  %v10297_v56 = vmul.f32 %v16025_v61, %v18055_v11  ;;  %v16029_v14 = vpop.eup %16028  ;;  %v11031_v36 = vcombine.high %v10296_v0, %v10296_v0  ;;  %v11038_v63 = vrot.slane %v10296_v0, %v16813_v62 }
 0xbf5   :  { %v11927_v53 = vrot.slane %v11899_v9, %v16813_v62  ;;  %v11928_v35 = vcombine.low %v11906_v10, %v11913_v24  ;;  %v11030_v39 = vrot.slane %v11023_v46, %v16813_v62  ;;  %v10298_v15 = vmul.f32 %v16027_v27, %v18081_v57  ;;  %v16031_v22 = vpop.eup %16030 }
 0xbf6   :  { %v11955_v6 = vrot.slane %v12829_v16, %v16813_v62  ;;  %v11086_v21 = vrot.slane %v10297_v56, %v16813_v62  ;;  %v11045_v11 = vrot.slane %v11031_v36, %v16813_v62  ;;  %v11046_v37 = vcombine.high %v11038_v63, %v11038_v63  ;;  %v16033_v32 = vpop.eup %16032 }
 0xbf7   :  { %v11929_v17 = vcombine.low %v11920_v18, %v11927_v53  ;;  %v11936_v31 = vrot.slane %v11928_v35, %v16813_v62  ;;  %v11054_v28 = vrot.slane %v11038_v63, %v16813_v62  ;;  %v11101_v43 = vrot.slane %v10298_v15, %v16813_v62  ;;  %v16035_v38 = vpop.eup %16034 }
 0xbf8   :  { %v11093_v7 = vrot.slane %v11086_v21, %v16813_v62  ;;  %v10203_v52 = vadd.f32 1.0, %v16029_v14  ;;  %v11061_v57 = vrot.slane %v11045_v11, %v16813_v62  ;;  %v11068_v5 = vrot.slane %v11046_v37, %v16813_v62  ;;  %v16037_v3 = vpop.eup %16036 }
 0xbf9   :  { %v11943_v44 = vrot.slane %v11929_v17, %v16813_v62  ;;  %v11047_v30 = vcombine.high %v11045_v11, %v11045_v11  ;;  %v11076_v25 = vcombine.high %v11054_v28, %v11054_v28  ;;  %v11946_v48 = vcombine.low %v11030_v39, %v11054_v28  ;;  %v16039_v45 = vpop.eup %16038 }
 0xbfa   :  { %v11109_v4 = vcombine.high %v11101_v43, %v11101_v43  ;;  %v11117_v8 = vrot.slane %v11101_v43, %v16813_v62  ;;  %v11078_v12 = vcombine.high %v11068_v5, %v11068_v5  ;;  %v11077_v33 = vcombine.high %v11061_v57, %v11061_v57  ;;  %v16041_v60 = vpop.eup %16040 }
 0xbfb   :  { %v11944_v13 = vcombine.low %v11936_v31, %v11943_v44  ;;  %v11075_v1 = vrot.slane %v11047_v30, %v16813_v62  ;;  %v11947_v54 = vcombine.low %v11068_v5, %v11076_v25  ;;  %v11962_v51 = vrot.slane %v11946_v48, %v16813_v62 }
 0xbfc   :  { %v11131_v55 = vrot.slane %v11109_v4, %v16813_v62  ;;  %v10204_v29 = vadd.f32 1.0, %v16031_v22  ;;  %v11948_v41 = vcombine.low %v11078_v12, %v11061_v57  ;;  %16042 = vrcp.f32 %v10203_v52 }
 0xbfd   :  { %14780 = vmatmul.mubr.msk.f32.gmra.mrb[88].mxu0 %vm319_vm8, %v11944_v13  ;;  %v11079_v10 = vcombine.high %v11075_v1, %v11075_v1  ;;  %v11994_v50 = vcombine.low %v11075_v1, %v11077_v33  ;;  %v11969_v23 = vrot.slane %v11947_v54, %v16813_v62  ;;  %v11977_v20 = vcombine.low %v11955_v6, %v11962_v51 }
 0xbfe   :  { %v11996_v19 = vcombine.low %v11117_v8, %v11131_v55  ;;  %v12830_v58 = vcombine.high %v11117_v8, %v11131_v55  ;;  %v11976_v47 = vrot.slane %v11948_v41, %v16813_v62  ;;  %16044 = vrcp.f32 %v10204_v29 }
 0xbff   :  { %v11995_v61 = vcombine.low %v11079_v10, %v11093_v7  ;;  %v12004_v9 = vrot.slane %v11994_v50, %v16813_v62  ;;  %v11985_v24 = vrot.slane %v11977_v20, %v16813_v62  ;;  %v11094_v18 = vcombine.high %v10298_v15, %v10298_v15 }
 0xc00   :  { %v12018_v0 = vrot.slane %v11996_v19, %v16813_v62  ;;  %v12025_v27 = vrot.slane %v12830_v58, %v16813_v62  ;;  %v11978_v46 = vcombine.low %v11969_v23, %v11976_v47  ;;  %v10205_v56 = vadd.f32 1.0, %v16033_v32 }
 0xc01   :  { %v12011_v16 = vrot.slane %v11995_v61, %v16813_v62  ;;  %v10206_v14 = vadd.f32 1.0, %v16035_v38  ;;  %v11108_v35 = vrot.slane %v11094_v18, %v16813_v62  ;;  %v10207_v36 = vadd.f32 1.0, %v16037_v3 }
 0xc02   :  { %v12027_v53 = vcombine.low %v12018_v0, %v12025_v27  ;;  %v11992_v63 = vrot.slane %v11978_v46, %v16813_v62  ;;  %16046 = vrcp.f32 %v10205_v56  ;;  %v10208_v6 = vadd.f32 1.0, %v16039_v45 }
 0xc03   :  { %v12026_v39 = vcombine.low %v12004_v9, %v12011_v16  ;;  %v11110_v21 = vcombine.high %v11108_v35, %v11108_v35  ;;  %16048 = vrcp.f32 %v10206_v14  ;;  %v11124_v11 = vrot.slane %v11108_v35, %v16813_v62 }
 0xc04   :  { %v11993_v17 = vcombine.low %v11985_v24, %v11992_v63  ;;  %v12041_v15 = vrot.slane %v12027_v53, %v16813_v62  ;;  %16050 = vrcp.f32 %v10207_v36  ;;  %v10209_v44 = vadd.f32 1.0, %v16041_v60 }
 0xc05   :  { %v12034_v31 = vrot.slane %v12026_v39, %v16813_v62  ;;  %v11138_v37 = vrot.slane %v11110_v21, %v16813_v62  ;;  %16052 = vrcp.f32 %v10208_v6 }
 0xc06   :  { %v16043_v22 = vpop.eup %16042  ;;  %14782 = vmatprep.mubr.msk.f32.mxu0 %vm319_vm8, %v11993_v17  ;;  %16054 = vrcp.f32 %v10209_v44 }
 0xc07   :  { %v12042_v28 = vcombine.low %v12034_v31, %v12041_v15  ;;  %v10299_v7 = vmul.f32 %v16043_v22, %v18523_v34  ;;  %v12043_v43 = vcombine.low %v11124_v11, %v11138_v37  ;;  %v12831_v52 = vcombine.high %v11124_v11, %v11138_v37 }
 0xc08   :  { %v16045_v32 = vpop.eup %16044 }
 0xc09   :  { %14783 = vmatmul.mubr.msk.f32.gmra.mrb[90].mxu0 %vm319_vm8, %v12042_v28  ;;  %v10300_v57 = vmul.f32 %v16045_v32, %v18524_v59  ;;  %v11149_v5 = vrot.slane %v10299_v7, %v16813_v62  ;;  %v12053_v30 = vrot.slane %v12043_v43, %v16813_v62  ;;  %v12060_v38 = vrot.slane %v12831_v52, %v16813_v62 }
 0xc0b   :  { %v11164_v25 = vrot.slane %v10300_v57, %v16813_v62  ;;  %v12075_v48 = vcombine.low %v12053_v30, %v12060_v38  ;;  %v11157_v4 = vcombine.high %v10300_v57, %v10300_v57  ;;  %v11156_v3 = vrot.slane %v11149_v5, %v16813_v62 }
 0xc0c   :  { %v16047_v8 = vpop.eup %16046 }
 0xc0d   :  { %v16049_v34 = vpop.eup %16048  ;;  %v11172_v13 = vcombine.high %v11164_v25, %v11164_v25  ;;  %v11180_v12 = vrot.slane %v11164_v25, %v16813_v62  ;;  %v10301_v59 = vmul.f32 %v16047_v8, %v18525_v40  ;;  %v12083_v33 = vrot.slane %v12075_v48, %v16813_v62 }
 0xc0e   :  { %v16051_v1 = vpop.eup %16050  ;;  %v10302_v45 = vmul.f32 %v16049_v34, %v18526_v2  ;;  %v11171_v54 = vrot.slane %v11157_v4, %v16813_v62 }
 0xc0f   :  { %v11194_v51 = vrot.slane %v11172_v13, %v16813_v62  ;;  %v11202_v55 = vcombine.high %v11180_v12, %v11180_v12  ;;  %v12045_v29 = vcombine.low %v11156_v3, %v11180_v12  ;;  %v11212_v60 = vrot.slane %v10301_v59, %v16813_v62  ;;  %v16053_v41 = vpop.eup %16052 }
 0xc10   :  { %v11173_v10 = vcombine.high %v11171_v54, %v11171_v54  ;;  %v11187_v50 = vrot.slane %v11171_v54, %v16813_v62  ;;  %v11227_v23 = vrot.slane %v10302_v45, %v16813_v62  ;;  %v10303_v40 = vmul.f32 %v16051_v1, %v18527_v42  ;;  %v16055_v39 = vpop.eup %16054 }
 0xc11   :  { %v12046_v20 = vcombine.low %v11194_v51, %v11202_v55  ;;  %v12067_v19 = vrot.slane %v12045_v29, %v16813_v62  ;;  %v11204_v2 = vcombine.high %v11194_v51, %v11194_v51  ;;  %v11219_v58 = vrot.slane %v11212_v60, %v16813_v62 }
 0xc12   :  { %v11201_v47 = vrot.slane %v11173_v10, %v16813_v62  ;;  %v11203_v61 = vcombine.high %v11187_v50, %v11187_v50  ;;  %v11235_v9 = vcombine.high %v11227_v23, %v11227_v23  ;;  %v11243_v24 = vrot.slane %v11227_v23, %v16813_v62 }
 0xc13   :  { %v12074_v0 = vrot.slane %v12046_v20, %v16813_v62  ;;  %v12092_v27 = vcombine.low %v11204_v2, %v11187_v50  ;;  %v10304_v18 = vmul.f32 %v16053_v41, %v18110_v49  ;;  %v11220_v46 = vcombine.high %v10302_v45, %v10302_v45 }
 0xc14   :  { %v11205_v16 = vcombine.high %v11201_v47, %v11201_v47  ;;  %v11257_v42 = vrot.slane %v11235_v9, %v16813_v62  ;;  %v12093_v56 = vcombine.low %v11201_v47, %v11203_v61  ;;  %v11275_v14 = vrot.slane %v10303_v40, %v16813_v62 }
 0xc15   :  { %v12076_v53 = vcombine.low %v12067_v19, %v12074_v0  ;;  %v12102_v35 = vrot.slane %v12092_v27, %v16813_v62  ;;  %v11234_v36 = vrot.slane %v11220_v46, %v16813_v62  ;;  %v11290_v63 = vrot.slane %v10304_v18, %v16813_v62 }
 0xc16   :  { %v12094_v6 = vcombine.low %v11205_v16, %v11219_v58  ;;  %v12095_v21 = vcombine.low %v11243_v24, %v11257_v42  ;;  %v12109_v17 = vrot.slane %v12093_v56, %v16813_v62  ;;  %v11282_v15 = vrot.slane %v11275_v14, %v16813_v62  ;;  %v12817_v14 = vld [vmem:[%s18528_s18] ss:$0 sm:$0xff] }
 0xc17   :  { %v12090_v49 = vrot.slane %v12076_v53, %v16813_v62  ;;  %v11236_v31 = vcombine.high %v11234_v36, %v11234_v36  ;;  %v11306_v11 = vrot.slane %v11290_v63, %v16813_v62  ;;  %v12832_v7 = vcombine.high %v11243_v24, %v11257_v42 }
 0xc18   :  { %v12116_v37 = vrot.slane %v12094_v6, %v16813_v62  ;;  %v12123_v22 = vrot.slane %v12095_v21, %v16813_v62  ;;  %v12124_v28 = vcombine.low %v12102_v35, %v12109_v17  ;;  %v11250_v52 = vrot.slane %v11234_v36, %v16813_v62 }
 0xc19   :  { %v12091_v43 = vcombine.low %v12083_v33, %v12090_v49  ;;  %v11264_v32 = vrot.slane %v11236_v31, %v16813_v62  ;;  %v12144_v44 = vcombine.low %v11282_v15, %v11306_v11  ;;  %v10305_v5 = vmul.f32 %v16055_v39, %v18120_v26 }
 0xc1a   :  { %v12125_v57 = vcombine.low %v12116_v37, %v12123_v22  ;;  %v11283_v30 = vcombine.high %v10304_v18, %v10304_v18  ;;  %v12132_v38 = vrot.slane %v12124_v28, %v16813_v62  ;;  %v11298_v4 = vcombine.high %v11290_v63, %v11290_v63 }
 0xc1b   :  { %14785 = vmatprep.mubr.msk.f32.mxu0 %vm319_vm8, %v12091_v43  ;;  %v12142_v25 = vcombine.low %v11250_v52, %v11264_v32  ;;  %v12833_v48 = vcombine.high %v11250_v52, %v11264_v32  ;;  %v12151_v34 = vrot.slane %v12832_v7, %v16813_v62  ;;  %v11328_v13 = vcombine.high %v11306_v11, %v11306_v11 }
 0xc1c   :  { %v12139_v8 = vrot.slane %v12125_v57, %v16813_v62  ;;  %v11297_v3 = vrot.slane %v11283_v30, %v16813_v62  ;;  %v12172_v26 = vrot.slane %v12144_v44, %v16813_v62  ;;  %v11320_v1 = vrot.slane %v11298_v4, %v16813_v62 }
 0xc1d   :  { %v12158_v12 = vrot.slane %v12142_v25, %v16813_v62  ;;  %v12165_v59 = vrot.slane %v12833_v48, %v16813_v62  ;;  %v11338_v51 = vrot.slane %v10305_v5, %v16813_v62 }
 0xc1e   :  { %v12140_v33 = vcombine.low %v12132_v38, %v12139_v8  ;;  %v11299_v45 = vcombine.high %v11297_v3, %v11297_v3  ;;  %v11313_v54 = vrot.slane %v11297_v3, %v16813_v62  ;;  %v11330_v60 = vcombine.high %v11320_v1, %v11320_v1 }
 0xc1f   :  { %v12173_v55 = vcombine.low %v12151_v34, %v12158_v12  ;;  %v12174_v29 = vcombine.low %v12165_v59, %v12172_v26  ;;  %v12190_v50 = vcombine.low %v11320_v1, %v11328_v13  ;;  %v11345_v2 = vrot.slane %v11338_v51, %v16813_v62 }
 0xc20   :  { %14786 = vmatmul.mubr.msk.f32.gmra.mrb[92].mxu0 %vm319_vm8, %v12140_v33  ;;  %v11327_v41 = vrot.slane %v11299_v45, %v16813_v62  ;;  %v11329_v10 = vcombine.high %v11313_v54, %v11313_v54  ;;  %v12191_v20 = vcombine.low %v11330_v60, %v11313_v54 }
 0xc21   :  { %v12181_v23 = vrot.slane %v12173_v55, %v16813_v62  ;;  %v12188_v40 = vrot.slane %v12174_v29, %v16813_v62  ;;  %v12200_v24 = vrot.slane %v12190_v50, %v16813_v62 }
 0xc22   :  { %v11331_v19 = vcombine.high %v11327_v41, %v11327_v41  ;;  %v12192_v58 = vcombine.low %v11327_v41, %v11329_v10  ;;  %v12207_v61 = vrot.slane %v12191_v20, %v16813_v62 }
 0xc23   :  { %v12189_v47 = vcombine.low %v12181_v23, %v12188_v40 }
 0xc24   :  { %v12193_v9 = vcombine.low %v11331_v19, %v11345_v2  ;;  %v12214_v0 = vrot.slane %v12192_v58, %v16813_v62  ;;  %v12222_v18 = vcombine.low %v12200_v24, %v12207_v61 }
 0xc25   :  { %14788 = vmatprep.mubr.msk.f32.mxu0 %vm319_vm8, %v12189_v47 }
 0xc26   :  { %v12221_v27 = vrot.slane %v12193_v9, %v16813_v62  ;;  %v12230_v16 = vrot.slane %v12222_v18, %v16813_v62 }
 0xc28   :  { %v12223_v46 = vcombine.low %v12214_v0, %v12221_v27 }
 0xc2a   :  { %v12237_v42 = vrot.slane %v12223_v46, %v16813_v62 }
 0xc2c   :  { %v12238_v56 = vcombine.low %v12230_v16, %v12237_v42 }
 0xc2e   :  { %14789 = vmatmul.mubr.msk.f32.gmra.mrb[94].mxu0 %vm319_vm8, %v12238_v56 }
 0xca9   :  { %v14766_v53 = vpop.f32.mrb[78].mxu0 }
 0xcaa   :  { %v12347_v35 = vadd.f32 %v14766_v53, %v12817_v14  ;;  %v12341_v36 = vpop.f32.mrb[79].mxu0 }
 0xcab   :  { %v12342_v63 = vadd.f32 %v12817_v14, %v12341_v36 }
 0xcac   :  { %12431 = vst [vmem:[%s18529_s30 + $0x8] sm:$0xff] %v12347_v35 }
 0xcad   :  { %12430 = vst [vmem:[%s18529_s30] sm:$0xff] %v12342_v63  ;;  %v14769_v62 = vpop.f32.mrb[80].mxu0 }
 0xcae   :  { %v12357_v39 = vadd.f32 %v14769_v62, %v12817_v14  ;;  %v12351_v6 = vpop.f32.mrb[81].mxu0 }
 0xcaf   :  { %v12352_v21 = vadd.f32 %v12817_v14, %v12351_v6 }
 0xcb0   :  { %12433 = vst [vmem:[%s18529_s30 + $0x18] sm:$0xff] %v12357_v39 }
 0xcb1   :  { %12432 = vst [vmem:[%s18529_s30 + $0x10] sm:$0xff] %v12352_v21  ;;  %v14772_v17 = vpop.f32.mrb[82].mxu0 }
 0xcb2   :  { %v12367_v49 = vadd.f32 %v14772_v17, %v12817_v14  ;;  %v12361_v31 = vpop.f32.mrb[83].mxu0 }
 0xcb3   :  { %v12362_v15 = vadd.f32 %v12817_v14, %v12361_v31 }
 0xcb4   :  { %12435 = vst [vmem:[%s18529_s30 + $0x28] sm:$0xff] %v12367_v49 }
 0xcb5   :  { %12434 = vst [vmem:[%s18529_s30 + $0x20] sm:$0xff] %v12362_v15  ;;  %v14775_v11 = vpop.f32.mrb[84].mxu0 }
 0xcb6   :  { %v12377_v37 = vadd.f32 %v14775_v11, %v12817_v14  ;;  %v12371_v22 = vpop.f32.mrb[85].mxu0 }
 0xcb7   :  { %v12372_v28 = vadd.f32 %v12817_v14, %v12371_v22 }
 0xcb8   :  { %12437 = vst [vmem:[%s18529_s30 + $0x38] sm:$0xff] %v12377_v37 }
 0xcb9   :  { %12436 = vst [vmem:[%s18529_s30 + $0x30] sm:$0xff] %v12372_v28 }
 0xcbd   :  { %v14778_v7 = vpop.f32.mrb[86].mxu0 }
 0xcbe   :  { %v12387_v43 = vadd.f32 %v14778_v7, %v12817_v14  ;;  %v12381_v52 = vpop.f32.mrb[87].mxu0 }
 0xcbf   :  { %v12382_v32 = vadd.f32 %v12817_v14, %v12381_v52 }
 0xcc0   :  { %12439 = vst [vmem:[%s18529_s30 + $0x48] sm:$0xff] %v12387_v43 }
 0xcc1   :  { %12438 = vst [vmem:[%s18529_s30 + $0x40] sm:$0xff] %v12382_v32 }
 0xcd0   :  { %v14781_v44 = vpop.f32.mrb[88].mxu0 }
 0xcd1   :  { %v12397_v57 = vadd.f32 %v14781_v44, %v12817_v14  ;;  %v12391_v5 = vpop.f32.mrb[89].mxu0 }
 0xcd2   :  { %v12392_v30 = vadd.f32 %v12817_v14, %v12391_v5 }
 0xcd3   :  { %12441 = vst [vmem:[%s18529_s30 + $0x58] sm:$0xff] %v12397_v57 }
 0xcd4   :  { %12440 = vst [vmem:[%s18529_s30 + $0x50] sm:$0xff] %v12392_v30 }
 0xcdc   :  { %v14784_v38 = vpop.f32.mrb[90].mxu0 }
 0xcdd   :  { %v12407_v25 = vadd.f32 %v14784_v38, %v12817_v14  ;;  %v12401_v48 = vpop.f32.mrb[91].mxu0 }
 0xcde   :  { %v12402_v4 = vadd.f32 %v12817_v14, %v12401_v48 }
 0xcdf   :  { %12443 = vst [vmem:[%s18529_s30 + $0x68] sm:$0xff] %v12407_v25 }
 0xce0   :  { %12442 = vst [vmem:[%s18529_s30 + $0x60] sm:$0xff] %v12402_v4 }
 0xcf3   :  { %v14787_v8 = vpop.f32.mrb[92].mxu0 }
 0xcf4   :  { %v12417_v34 = vadd.f32 %v14787_v8, %v12817_v14  ;;  %v12411_v3 = vpop.f32.mrb[93].mxu0 }
 0xcf5   :  { %v12412_v13 = vadd.f32 %v12817_v14, %v12411_v3 }
 0xcf6   :  { %12445 = vst [vmem:[%s18529_s30 + $0x78] sm:$0xff] %v12417_v34 }
 0xcf7   :  { %12444 = vst [vmem:[%s18529_s30 + $0x70] sm:$0xff] %v12412_v13 }
 0xd01   :  { %v14790_v12 = vpop.f32.mrb[94].mxu0 }
 0xd02   :  { %v12427_v59 = vadd.f32 %v14790_v12, %v12817_v14  ;;  %v12421_v26 = vpop.f32.mrb[95].mxu0 }
 0xd03   :  { %v12422_v1 = vadd.f32 %v12817_v14, %v12421_v26 }
 0xd04   :  { %12447 = vst [vmem:[%s18529_s30 + $0x88] sm:$0xff] %v12427_v59 }
 0xd05   :  { %12446 = vst [vmem:[%s18529_s30 + $0x80] sm:$0xff] %v12422_v1 }
 0xd06   :  { %12550 = vsyncpa [#allocation5], 1 }
 0xd07   :  { %12551 = vsyncpa [#allocation7], 1 }

</bundles_post_ra>
